<compile_context>
chip_gen: v7x
topology: tpu7x:2x2x1
jax: 0.10.0
libtpu: 0.0.40
codegen_flags: <defaults>
</compile_context>

<pallas_src>
import functools

import jax
import jax.numpy as jnp
from jax.experimental import pallas as pl
from jax.experimental.pallas import tpu as pltpu

# ---- hyper-parameters (nn.TransformerEncoderLayer defaults) -----------------
TEXT_VOCAB = 50
IMAGE_VOCAB = 128
N_EMBD = 256
N_HEAD = 4
N_LAYER = 4
MAX_LEN = 256
DIM_FF = 2048
HEAD_DIM = N_EMBD // N_HEAD
LN_EPS = 1e-5


def _layer_norm(x, gamma, beta):
    mu = jnp.mean(x, axis=-1, keepdims=True)
    xc = x - mu
    var = jnp.mean(xc * xc, axis=-1, keepdims=True)
    return xc * jax.lax.rsqrt(var + LN_EPS) * gamma + beta


# ---- fused encoder stack + lm_head kernel (grid axis = layer) ----------------
def encoder_lm_head_kernel(x_ref, wqkv_ref, bqkv_ref, wo_ref, bo_ref,
                           w1_ref, b1_ref, w2_ref, b2_ref,
                           g1_ref, be1_ref, g2_ref, be2_ref,
                           wh_ref, bh_ref,
                           x_out_ref, logits_ref, *, n_batch, n_seq):
    # n_batch = attention batch count  (= original S, positions)
    # n_seq   = attention sequence len (= original B; batch_first=False!)
    l = pl.program_id(0)

    @pl.when(l == 0)
    def _():
        # x_out_ref has a constant index_map over the layer axis, so it stays
        # VMEM-resident and doubles as the carried activation (no scratch).
        x_out_ref[...] = x_ref[...]

    x = x_out_ref[...]                                  # (T, E) f32, row = s*B + b
    T, E = x.shape
    H, D = N_HEAD, HEAD_DIM

    # ---- fused QKV projection: bf16 operands on the MXU, f32 accumulation ----
    qkv = jnp.dot(x.astype(jnp.bfloat16), wqkv_ref[0],
                  preferred_element_type=jnp.float32) + bqkv_ref[0]   # (T, 3E) f32
    # 1/sqrt(head_dim) is pre-folded into the q projection weights/bias.
    q3 = qkv[:, 0 * E:1 * E].reshape(n_batch, n_seq, E)
    k3 = qkv[:, 1 * E:2 * E].reshape(n_batch, n_seq, E)
    v3 = qkv[:, 2 * E:3 * E].reshape(n_batch, n_seq, E)

    # ---- multi-head attention, all heads at once (no per-head slices/concat).
    # A single batched einsum over heads needs a dot_general with two batch
    # dims (s, h), which Mosaic may not lower; instead the per-head reduction
    # over E is a tiny block-diagonal matmul (seg / seg_t) on the MXU.
    e_idx = jax.lax.broadcasted_iota(jnp.int32, (E, H), 0)
    h_idx = jax.lax.broadcasted_iota(jnp.int32, (E, H), 1)
    seg = ((e_idx >= h_idx * D) & (e_idx < (h_idx + 1) * D)).astype(jnp.float32)
    h_idx2 = jax.lax.broadcasted_iota(jnp.int32, (H, E), 0)
    e_idx2 = jax.lax.broadcasted_iota(jnp.int32, (H, E), 1)
    seg_t = ((e_idx2 >= h_idx2 * D) & (e_idx2 < (h_idx2 + 1) * D)).astype(jnp.float32)

    # scores[s, a, b, h] = sum_{d in head h} q[s,a,hd] * k[s,b,hd]
    prod = q3[:, :, None, :] * k3[:, None, :, :]                      # (S, A, B, E) f32
    scores = jnp.dot(prod.reshape(n_batch * n_seq * n_seq, E), seg,
                     preferred_element_type=jnp.float32)              # (S*A*B, H)
    scores = scores.reshape(n_batch, n_seq, n_seq, H)
    # numerically-stable softmax over the key axis (f32)
    scores = scores - jnp.max(scores, axis=2, keepdims=True)
    p = jnp.exp(scores)
    p = p / jnp.sum(p, axis=2, keepdims=True)
    # out[s, a, hd] = sum_b p[s,a,b,h] * v[s,b,hd]   (broadcast p over head lanes)
    p_full = jnp.dot(p.reshape(n_batch * n_seq * n_seq, H), seg_t,
                     preferred_element_type=jnp.float32)
    p_full = p_full.reshape(n_batch, n_seq, n_seq, E)
    attn = jnp.sum(p_full * v3[:, None, :, :], axis=2)                # (S, A, E)
    attn = attn.reshape(T, E)

    sa = jnp.dot(attn.astype(jnp.bfloat16), wo_ref[0],
                 preferred_element_type=jnp.float32) + bo_ref[0]
    # residual + LayerNorm1 (post-norm; dropout is identity in eval mode), f32
    h1 = _layer_norm(x + sa, g1_ref[0], be1_ref[0])

    # ---- feed-forward: Linear -> relu -> Linear (bf16 weights, f32 acc) ----
    ff = jnp.dot(h1.astype(jnp.bfloat16), w1_ref[0],
                 preferred_element_type=jnp.float32) + b1_ref[0]
    ff = jnp.maximum(ff, 0.0)
    ff = jnp.dot(ff.astype(jnp.bfloat16), w2_ref[0],
                 preferred_element_type=jnp.float32) + b2_ref[0]
    h2 = _layer_norm(h1 + ff, g2_ref[0], be2_ref[0])

    x_out_ref[...] = h2

    # ---- fused lm_head on the last layer step ----
    @pl.when(l == pl.num_programs(0) - 1)
    def _():
        logits_ref[...] = (jnp.dot(h2.astype(jnp.bfloat16), wh_ref[...],
                                   preferred_element_type=jnp.float32)
                           + bh_ref[...])


def encoder_lm_head(x_flat, p, *, n_batch, n_seq):
    T, E = x_flat.shape
    V = IMAGE_VOCAB
    wmap = lambda l: (l, 0, 0)    # per-layer stacked weights
    cmap = lambda l: (0, 0)       # layer-invariant blocks (VMEM-resident)

    grid_spec = pltpu.PrefetchScalarGridSpec(
        num_scalar_prefetch=0,
        grid=(N_LAYER,),
        in_specs=[
            pl.BlockSpec((T, E), cmap),                 # x (flat activations)
            pl.BlockSpec((1, E, 3 * E), wmap),          # wqkv   (bf16)
            pl.BlockSpec((1, 1, 3 * E), wmap),          # bqkv
            pl.BlockSpec((1, E, E), wmap),              # wo     (bf16)
            pl.BlockSpec((1, 1, E), wmap),              # bo
            pl.BlockSpec((1, E, DIM_FF), wmap),         # w1     (bf16)
            pl.BlockSpec((1, 1, DIM_FF), wmap),         # b1
            pl.BlockSpec((1, DIM_FF, E), wmap),         # w2     (bf16)
            pl.BlockSpec((1, 1, E), wmap),              # b2
            pl.BlockSpec((1, 1, E), wmap),              # ln1 gamma
            pl.BlockSpec((1, 1, E), wmap),              # ln1 beta
            pl.BlockSpec((1, 1, E), wmap),              # ln2 gamma
            pl.BlockSpec((1, 1, E), wmap),              # ln2 beta
            pl.BlockSpec((E, V), cmap),                 # w_head (bf16)
            pl.BlockSpec((1, V), cmap),                 # b_head
        ],
        out_specs=[
            pl.BlockSpec((T, E), cmap),                 # carried activation
            pl.BlockSpec((T, V), cmap),                 # logits (written on last step)
        ],
    )

    kernel = functools.partial(encoder_lm_head_kernel,
                               n_batch=n_batch, n_seq=n_seq)
    _, logits = pl.pallas_call(
        kernel,
        out_shape=(jax.ShapeDtypeStruct((T, E), jnp.float32),
                   jax.ShapeDtypeStruct((T, V), jnp.float32)),
        grid_spec=grid_spec,
        compiler_params=pltpu.CompilerParams(
            dimension_semantics=("arbitrary",),         # layer axis carries residual
            vmem_limit_bytes=32 * 1024 * 1024),
    )(x_flat,
      p['wqkv'], p['bqkv'], p['wo'], p['bo'],
      p['w1'], p['b1'], p['w2'], p['b2'],
      p['g1'], p['be1'], p['g2'], p['be2'],
      p['w_head'], p['b_head'])
    return logits


# ---- full forward (embedding gather is JAX glue) -----------------------------
def text_to_image_forward(tokens, p):
    B, S = tokens.shape
    # TODO(synk): nn.Embedding gather has no clean tiled-Pallas form at this
    # size; done with jnp.take in glue.
    x = jnp.take(p['text_emb'], tokens, axis=0) + p['pos_emb'][:, :S]   # (B, S, E)
    # PyTorch (batch_first=False) interprets (B, S, E) as (seq=B, batch=S, E).
    # Flatten to a lane-dense (S*B, E) slab with row = s*B + b for the kernel.
    x_flat = jnp.transpose(x, (1, 0, 2)).reshape(S * B, N_EMBD).astype(jnp.float32)
    logits_flat = encoder_lm_head(x_flat, p, n_batch=S, n_seq=B)        # (S*B, V)
    return logits_flat.reshape(S, B, IMAGE_VOCAB).transpose(1, 0, 2)    # (B, S, V)


# ---- deterministic synthetic parameters --------------------------------------
def init_params(key):
    ks = jax.random.split(key, 8)

    def nrm(k, shape, std=0.02):
        return jax.random.normal(k, shape, dtype=jnp.float32) * std

    # per-layer stacked weights, stored as (in, out) so the kernel does x @ W;
    # large matrices are bf16 in HBM (halves the per-layer DMA), biases/LN f32.
    scale = 1.0 / (HEAD_DIM ** 0.5)
    wqkv = nrm(ks[2], (N_LAYER, N_EMBD, 3 * N_EMBD))
    bqkv = jnp.zeros((N_LAYER, 1, 3 * N_EMBD), jnp.float32)
    # fold the 1/sqrt(head_dim) attention scale into the q projection
    wqkv = wqkv.at[:, :, :N_EMBD].multiply(scale)
    bqkv = bqkv.at[:, :, :N_EMBD].multiply(scale)

    p = {
        'text_emb': nrm(ks[0], (TEXT_VOCAB, N_EMBD), 1.0),
        'pos_emb':  nrm(ks[1], (1, MAX_LEN, N_EMBD), 1.0),
        'wqkv': wqkv.astype(jnp.bfloat16),
        'bqkv': bqkv,
        'wo':   nrm(ks[3], (N_LAYER, N_EMBD, N_EMBD)).astype(jnp.bfloat16),
        'bo':   jnp.zeros((N_LAYER, 1, N_EMBD), jnp.float32),
        'w1':   nrm(ks[4], (N_LAYER, N_EMBD, DIM_FF)).astype(jnp.bfloat16),
        'b1':   jnp.zeros((N_LAYER, 1, DIM_FF), jnp.float32),
        'w2':   nrm(ks[5], (N_LAYER, DIM_FF, N_EMBD)).astype(jnp.bfloat16),
        'b2':   jnp.zeros((N_LAYER, 1, N_EMBD), jnp.float32),
        'g1':   jnp.ones((N_LAYER, 1, N_EMBD), jnp.float32),
        'be1':  jnp.zeros((N_LAYER, 1, N_EMBD), jnp.float32),
        'g2':   jnp.ones((N_LAYER, 1, N_EMBD), jnp.float32),
        'be2':  jnp.zeros((N_LAYER, 1, N_EMBD), jnp.float32),
        'w_head': nrm(ks[6], (N_EMBD, IMAGE_VOCAB)).astype(jnp.bfloat16),
        'b_head': jnp.zeros((1, IMAGE_VOCAB), jnp.float32),
    }
    return p


if __name__ == "__main__":
    key = jax.random.PRNGKey(0)
    pkey, tkey = jax.random.split(key)
    params = init_params(pkey)

    B, S = 2, 8
    tokens = jax.random.randint(tkey, (B, S), 0, TEXT_VOCAB, dtype=jnp.int32)

    fwd = jax.jit(text_to_image_forward)
    logits = jax.block_until_ready(fwd(tokens, params))

    assert logits.shape == (B, S, IMAGE_VOCAB), logits.shape
    assert bool(jnp.all(jnp.isfinite(logits)))
    print("KERNEL_OK")
</pallas_src>

<mosaic_0001>
module attributes {stable_mosaic.version = 11 : i64} {
  func.func @encoder_lm_head_kernel(%arg0: i32, %arg1: memref<16x256xf32, #tpu.memory_space<vmem>>, %arg2: memref<1x256x768xbf16, #tpu.memory_space<vmem>>, %arg3: memref<1x1x768xf32, #tpu.memory_space<vmem>>, %arg4: memref<1x256x256xbf16, #tpu.memory_space<vmem>>, %arg5: memref<1x1x256xf32, #tpu.memory_space<vmem>>, %arg6: memref<1x256x2048xbf16, #tpu.memory_space<vmem>>, %arg7: memref<1x1x2048xf32, #tpu.memory_space<vmem>>, %arg8: memref<1x2048x256xbf16, #tpu.memory_space<vmem>>, %arg9: memref<1x1x256xf32, #tpu.memory_space<vmem>>, %arg10: memref<1x1x256xf32, #tpu.memory_space<vmem>>, %arg11: memref<1x1x256xf32, #tpu.memory_space<vmem>>, %arg12: memref<1x1x256xf32, #tpu.memory_space<vmem>>, %arg13: memref<1x1x256xf32, #tpu.memory_space<vmem>>, %arg14: memref<256x128xbf16, #tpu.memory_space<vmem>>, %arg15: memref<1x128xf32, #tpu.memory_space<vmem>>, %arg16: memref<16x256xf32, #tpu.memory_space<vmem>>, %arg17: memref<16x128xf32, #tpu.memory_space<vmem>>) attributes {dimension_semantics = [#tpu.dimension_semantics<arbitrary>], iteration_bounds = array<i64: 4>, scalar_prefetch = 0 : i64, scratch_operands = 0 : i64, tpu.core_type = #tpu.core_type<tc>, window_params = [{pipeline_mode = #tpu.pipeline_mode<synchronous>, transform_indices = @transform_0, window_bounds = array<i64: 16, 256>}, {transform_indices = @transform_1, window_bounds = array<i64: 1, 256, 768>}, {transform_indices = @transform_2, window_bounds = array<i64: 1, 1, 768>}, {transform_indices = @transform_3, window_bounds = array<i64: 1, 256, 256>}, {transform_indices = @transform_4, window_bounds = array<i64: 1, 1, 256>}, {transform_indices = @transform_5, window_bounds = array<i64: 1, 256, 2048>}, {transform_indices = @transform_6, window_bounds = array<i64: 1, 1, 2048>}, {transform_indices = @transform_7, window_bounds = array<i64: 1, 2048, 256>}, {transform_indices = @transform_8, window_bounds = array<i64: 1, 1, 256>}, {transform_indices = @transform_9, window_bounds = array<i64: 1, 1, 256>}, {transform_indices = @transform_10, window_bounds = array<i64: 1, 1, 256>}, {transform_indices = @transform_11, window_bounds = array<i64: 1, 1, 256>}, {transform_indices = @transform_12, window_bounds = array<i64: 1, 1, 256>}, {pipeline_mode = #tpu.pipeline_mode<synchronous>, transform_indices = @transform_13, window_bounds = array<i64: 256, 128>}, {pipeline_mode = #tpu.pipeline_mode<synchronous>, transform_indices = @transform_14, window_bounds = array<i64: 1, 128>}, {pipeline_mode = #tpu.pipeline_mode<synchronous>, transform_indices = @transform_15, window_bounds = array<i64: 16, 256>}, {pipeline_mode = #tpu.pipeline_mode<synchronous>, transform_indices = @transform_16, window_bounds = array<i64: 16, 128>}]} {
    %c0_i32 = arith.constant 0 : i32
    %0 = arith.cmpi eq, %arg0, %c0_i32 : i32
    %1 = arith.extui %0 : i1 to i32
    %c0_i32_0 = arith.constant 0 : i32
    %2 = arith.cmpi ne, %1, %c0_i32_0 : i32
    scf.if %2 {
      %c0_64 = arith.constant 0 : index
      %c0_65 = arith.constant 0 : index
      %149 = vector.load %arg1[%c0_64, %c0_65] : memref<16x256xf32, #tpu.memory_space<vmem>>, vector<16x256xf32>
      %c0_66 = arith.constant 0 : index
      %c0_67 = arith.constant 0 : index
      %150 = vector.load %arg16[%c0_66, %c0_67] : memref<16x256xf32, #tpu.memory_space<vmem>>, vector<16x256xf32>
      tpu.vector_store %arg16[%c0_66, %c0_67], %149 {strides = array<i32>} : memref<16x256xf32, #tpu.memory_space<vmem>>, vector<16x256xf32>,
    } else {
    }
    %c0 = arith.constant 0 : index
    %c0_1 = arith.constant 0 : index
    %3 = vector.load %arg16[%c0, %c0_1] : memref<16x256xf32, #tpu.memory_space<vmem>>, vector<16x256xf32>
    %4 = arith.truncf %3 : vector<16x256xf32> to vector<16x256xbf16>
    %c0_2 = arith.constant 0 : index
    %c0_3 = arith.constant 0 : index
    %c0_4 = arith.constant 0 : index
    %5 = vector.load %arg2[%c0_2, %c0_3, %c0_4] : memref<1x256x768xbf16, #tpu.memory_space<vmem>>, vector<1x256x768xbf16>
    %6 = vector.shape_cast %5 : vector<1x256x768xbf16> to vector<256x768xbf16>
    %cst = arith.constant dense<0.000000e+00> : vector<16x768xf32>
    %7 = tpu.matmul %4, %6, %cst {dimension_numbers = #tpu.dot_dimension_numbers<[1], [0], [0], [1], [0, 0, 1, 1], [], []>} : vector<16x256xbf16>, vector<256x768xbf16>, vector<16x768xf32> -> vector<16x768xf32>
    %c0_5 = arith.constant 0 : index
    %c0_6 = arith.constant 0 : index
    %c0_7 = arith.constant 0 : index
    %8 = vector.load %arg3[%c0_5, %c0_6, %c0_7] : memref<1x1x768xf32, #tpu.memory_space<vmem>>, vector<1x1x768xf32>
    %9 = vector.shape_cast %8 : vector<1x1x768xf32> to vector<1x768xf32>
    %10 = vector.broadcast %9 : vector<1x768xf32> to vector<16x768xf32>
    %11 = arith.addf %7, %10 : vector<16x768xf32>
    %12 = vector.extract_strided_slice %11 {offsets = [0, 0], sizes = [16, 256], strides = [1, 1]} : vector<16x768xf32> to vector<16x256xf32>
    %13 = vector.shape_cast %12 : vector<16x256xf32> to vector<8x2x256xf32>
    %14 = vector.extract_strided_slice %11 {offsets = [0, 256], sizes = [16, 256], strides = [1, 1]} : vector<16x768xf32> to vector<16x256xf32>
    %15 = vector.shape_cast %14 : vector<16x256xf32> to vector<8x2x256xf32>
    %16 = vector.extract_strided_slice %11 {offsets = [0, 512], sizes = [16, 256], strides = [1, 1]} : vector<16x768xf32> to vector<16x256xf32>
    %17 = vector.shape_cast %16 : vector<16x256xf32> to vector<8x2x256xf32>
    %18 = tpu.iota {dimensions = array<i32: 0>} : vector<256x4xi32>
    %19 = tpu.iota {dimensions = array<i32: 1>} : vector<256x4xi32>
    %c64_i32 = arith.constant 64 : i32
    %20 = vector.broadcast %c64_i32 : i32 to vector<256x4xi32>
    %21 = arith.muli %19, %20 : vector<256x4xi32>
    %22 = arith.cmpi sge, %18, %21 : vector<256x4xi32>
    %c1_i32 = arith.constant 1 : i32
    %23 = vector.broadcast %c1_i32 : i32 to vector<256x4xi32>
    %24 = arith.addi %19, %23 : vector<256x4xi32>
    %c64_i32_8 = arith.constant 64 : i32
    %25 = vector.broadcast %c64_i32_8 : i32 to vector<256x4xi32>
    %26 = arith.muli %24, %25 : vector<256x4xi32>
    %27 = arith.cmpi slt, %18, %26 : vector<256x4xi32>
    %28 = arith.andi %22, %27 : vector<256x4xi1>
    %29 = arith.extui %28 : vector<256x4xi1> to vector<256x4xi32>
    %30 = arith.sitofp %29 : vector<256x4xi32> to vector<256x4xf32>
    %31 = tpu.iota {dimensions = array<i32: 0>} : vector<4x256xi32>
    %32 = tpu.iota {dimensions = array<i32: 1>} : vector<4x256xi32>
    %c64_i32_9 = arith.constant 64 : i32
    %33 = vector.broadcast %c64_i32_9 : i32 to vector<4x256xi32>
    %34 = arith.muli %31, %33 : vector<4x256xi32>
    %35 = arith.cmpi sge, %32, %34 : vector<4x256xi32>
    %c1_i32_10 = arith.constant 1 : i32
    %36 = vector.broadcast %c1_i32_10 : i32 to vector<4x256xi32>
    %37 = arith.addi %31, %36 : vector<4x256xi32>
    %c64_i32_11 = arith.constant 64 : i32
    %38 = vector.broadcast %c64_i32_11 : i32 to vector<4x256xi32>
    %39 = arith.muli %37, %38 : vector<4x256xi32>
    %40 = arith.cmpi slt, %32, %39 : vector<4x256xi32>
    %41 = arith.andi %35, %40 : vector<4x256xi1>
    %42 = arith.extui %41 : vector<4x256xi1> to vector<4x256xi32>
    %43 = arith.sitofp %42 : vector<4x256xi32> to vector<4x256xf32>
    %44 = vector.shape_cast %13 : vector<8x2x256xf32> to vector<8x2x1x256xf32>
    %45 = vector.shape_cast %15 : vector<8x2x256xf32> to vector<8x1x2x256xf32>
    %46 = vector.broadcast %44 : vector<8x2x1x256xf32> to vector<8x2x2x256xf32>
    %47 = vector.broadcast %45 : vector<8x1x2x256xf32> to vector<8x2x2x256xf32>
    %48 = arith.mulf %46, %47 : vector<8x2x2x256xf32>
    %49 = vector.shape_cast %48 : vector<8x2x2x256xf32> to vector<32x256xf32>
    %cst_12 = arith.constant dense<0.000000e+00> : vector<32x4xf32>
    %50 = tpu.matmul %49, %30, %cst_12 {dimension_numbers = #tpu.dot_dimension_numbers<[1], [0], [0], [1], [0, 0, 1, 1], [], []>} : vector<32x256xf32>, vector<256x4xf32>, vector<32x4xf32> -> vector<32x4xf32>
    %51 = vector.shape_cast %50 : vector<32x4xf32> to vector<8x2x2x4xf32>
    %cst_13 = arith.constant dense<0xFF800000> : vector<8x2x4xf32>
    %52 = vector.multi_reduction <maximumf>, %51, %cst_13 [2] : vector<8x2x2x4xf32> to vector<8x2x4xf32>
    %53 = vector.shape_cast %52 : vector<8x2x4xf32> to vector<8x2x1x4xf32>
    %54 = vector.broadcast %53 : vector<8x2x1x4xf32> to vector<8x2x2x4xf32>
    %55 = arith.subf %51, %54 : vector<8x2x2x4xf32>
    %56 = math.exp %55 : vector<8x2x2x4xf32>
    %cst_14 = arith.constant dense<0.000000e+00> : vector<8x2x4xf32>
    %57 = vector.multi_reduction <add>, %56, %cst_14 [2] : vector<8x2x2x4xf32> to vector<8x2x4xf32>
    %58 = vector.shape_cast %57 : vector<8x2x4xf32> to vector<8x2x1x4xf32>
    %59 = vector.broadcast %58 : vector<8x2x1x4xf32> to vector<8x2x2x4xf32>
    %60 = arith.divf %56, %59 : vector<8x2x2x4xf32>
    %61 = vector.shape_cast %60 : vector<8x2x2x4xf32> to vector<32x4xf32>
    %cst_15 = arith.constant dense<0.000000e+00> : vector<32x256xf32>
    %62 = tpu.matmul %61, %43, %cst_15 {dimension_numbers = #tpu.dot_dimension_numbers<[1], [0], [0], [1], [0, 0, 1, 1], [], []>} : vector<32x4xf32>, vector<4x256xf32>, vector<32x256xf32> -> vector<32x256xf32>
    %63 = vector.shape_cast %62 : vector<32x256xf32> to vector<8x2x2x256xf32>
    %64 = vector.shape_cast %17 : vector<8x2x256xf32> to vector<8x1x2x256xf32>
    %65 = vector.broadcast %64 : vector<8x1x2x256xf32> to vector<8x2x2x256xf32>
    %66 = arith.mulf %63, %65 : vector<8x2x2x256xf32>
    %cst_16 = arith.constant dense<0.000000e+00> : vector<8x2x256xf32>
    %67 = vector.multi_reduction <add>, %66, %cst_16 [2] : vector<8x2x2x256xf32> to vector<8x2x256xf32>
    %68 = vector.shape_cast %67 : vector<8x2x256xf32> to vector<16x256xf32>
    %69 = arith.truncf %68 : vector<16x256xf32> to vector<16x256xbf16>
    %c0_17 = arith.constant 0 : index
    %c0_18 = arith.constant 0 : index
    %c0_19 = arith.constant 0 : index
    %70 = vector.load %arg4[%c0_17, %c0_18, %c0_19] : memref<1x256x256xbf16, #tpu.memory_space<vmem>>, vector<1x256x256xbf16>
    %71 = vector.shape_cast %70 : vector<1x256x256xbf16> to vector<256x256xbf16>
    %cst_20 = arith.constant dense<0.000000e+00> : vector<16x256xf32>
    %72 = tpu.matmul %69, %71, %cst_20 {dimension_numbers = #tpu.dot_dimension_numbers<[1], [0], [0], [1], [0, 0, 1, 1], [], []>} : vector<16x256xbf16>, vector<256x256xbf16>, vector<16x256xf32> -> vector<16x256xf32>
    %c0_21 = arith.constant 0 : index
    %c0_22 = arith.constant 0 : index
    %c0_23 = arith.constant 0 : index
    %73 = vector.load %arg5[%c0_21, %c0_22, %c0_23] : memref<1x1x256xf32, #tpu.memory_space<vmem>>, vector<1x1x256xf32>
    %74 = vector.shape_cast %73 : vector<1x1x256xf32> to vector<1x256xf32>
    %75 = vector.broadcast %74 : vector<1x256xf32> to vector<16x256xf32>
    %76 = arith.addf %72, %75 : vector<16x256xf32>
    %77 = arith.addf %3, %76 : vector<16x256xf32>
    %c0_24 = arith.constant 0 : index
    %c0_25 = arith.constant 0 : index
    %c0_26 = arith.constant 0 : index
    %78 = vector.load %arg10[%c0_24, %c0_25, %c0_26] : memref<1x1x256xf32, #tpu.memory_space<vmem>>, vector<1x1x256xf32>
    %79 = vector.shape_cast %78 : vector<1x1x256xf32> to vector<1x256xf32>
    %c0_27 = arith.constant 0 : index
    %c0_28 = arith.constant 0 : index
    %c0_29 = arith.constant 0 : index
    %80 = vector.load %arg11[%c0_27, %c0_28, %c0_29] : memref<1x1x256xf32, #tpu.memory_space<vmem>>, vector<1x1x256xf32>
    %81 = vector.shape_cast %80 : vector<1x1x256xf32> to vector<1x256xf32>
    %cst_30 = arith.constant dense<0.000000e+00> : vector<16xf32>
    %82 = vector.multi_reduction <add>, %77, %cst_30 [1] : vector<16x256xf32> to vector<16xf32>
    %83 = vector.shape_cast %82 : vector<16xf32> to vector<16x1xf32>
    %cst_31 = arith.constant 2.560000e+02 : f32
    %84 = vector.broadcast %cst_31 : f32 to vector<16x1xf32>
    %85 = arith.divf %83, %84 : vector<16x1xf32>
    %86 = vector.broadcast %85 : vector<16x1xf32> to vector<16x256xf32>
    %87 = arith.subf %77, %86 : vector<16x256xf32>
    %88 = arith.mulf %87, %87 : vector<16x256xf32>
    %cst_32 = arith.constant dense<0.000000e+00> : vector<16xf32>
    %89 = vector.multi_reduction <add>, %88, %cst_32 [1] : vector<16x256xf32> to vector<16xf32>
    %90 = vector.shape_cast %89 : vector<16xf32> to vector<16x1xf32>
    %cst_33 = arith.constant 2.560000e+02 : f32
    %91 = vector.broadcast %cst_33 : f32 to vector<16x1xf32>
    %92 = arith.divf %90, %91 : vector<16x1xf32>
    %cst_34 = arith.constant 9.99999974E-6 : f32
    %93 = vector.broadcast %cst_34 : f32 to vector<16x1xf32>
    %94 = arith.addf %92, %93 : vector<16x1xf32>
    %95 = math.rsqrt %94 : vector<16x1xf32>
    %96 = vector.broadcast %95 : vector<16x1xf32> to vector<16x256xf32>
    %97 = arith.mulf %87, %96 : vector<16x256xf32>
    %98 = vector.broadcast %79 : vector<1x256xf32> to vector<16x256xf32>
    %99 = arith.mulf %97, %98 : vector<16x256xf32>
    %100 = vector.broadcast %81 : vector<1x256xf32> to vector<16x256xf32>
    %101 = arith.addf %99, %100 : vector<16x256xf32>
    %102 = arith.truncf %101 : vector<16x256xf32> to vector<16x256xbf16>
    %c0_35 = arith.constant 0 : index
    %c0_36 = arith.constant 0 : index
    %c0_37 = arith.constant 0 : index
    %103 = vector.load %arg6[%c0_35, %c0_36, %c0_37] : memref<1x256x2048xbf16, #tpu.memory_space<vmem>>, vector<1x256x2048xbf16>
    %104 = vector.shape_cast %103 : vector<1x256x2048xbf16> to vector<256x2048xbf16>
    %cst_38 = arith.constant dense<0.000000e+00> : vector<16x2048xf32>
    %105 = tpu.matmul %102, %104, %cst_38 {dimension_numbers = #tpu.dot_dimension_numbers<[1], [0], [0], [1], [0, 0, 1, 1], [], []>} : vector<16x256xbf16>, vector<256x2048xbf16>, vector<16x2048xf32> -> vector<16x2048xf32>
    %c0_39 = arith.constant 0 : index
    %c0_40 = arith.constant 0 : index
    %c0_41 = arith.constant 0 : index
    %106 = vector.load %arg7[%c0_39, %c0_40, %c0_41] : memref<1x1x2048xf32, #tpu.memory_space<vmem>>, vector<1x1x2048xf32>
    %107 = vector.shape_cast %106 : vector<1x1x2048xf32> to vector<1x2048xf32>
    %108 = vector.broadcast %107 : vector<1x2048xf32> to vector<16x2048xf32>
    %109 = arith.addf %105, %108 : vector<16x2048xf32>
    %cst_42 = arith.constant 0.000000e+00 : f32
    %110 = vector.broadcast %cst_42 : f32 to vector<16x2048xf32>
    %111 = arith.maximumf %109, %110 : vector<16x2048xf32>
    %112 = arith.truncf %111 : vector<16x2048xf32> to vector<16x2048xbf16>
    %c0_43 = arith.constant 0 : index
    %c0_44 = arith.constant 0 : index
    %c0_45 = arith.constant 0 : index
    %113 = vector.load %arg8[%c0_43, %c0_44, %c0_45] : memref<1x2048x256xbf16, #tpu.memory_space<vmem>>, vector<1x2048x256xbf16>
    %114 = vector.shape_cast %113 : vector<1x2048x256xbf16> to vector<2048x256xbf16>
    %cst_46 = arith.constant dense<0.000000e+00> : vector<16x256xf32>
    %115 = tpu.matmul %112, %114, %cst_46 {dimension_numbers = #tpu.dot_dimension_numbers<[1], [0], [0], [1], [0, 0, 1, 1], [], []>} : vector<16x2048xbf16>, vector<2048x256xbf16>, vector<16x256xf32> -> vector<16x256xf32>
    %c0_47 = arith.constant 0 : index
    %c0_48 = arith.constant 0 : index
    %c0_49 = arith.constant 0 : index
    %116 = vector.load %arg9[%c0_47, %c0_48, %c0_49] : memref<1x1x256xf32, #tpu.memory_space<vmem>>, vector<1x1x256xf32>
    %117 = vector.shape_cast %116 : vector<1x1x256xf32> to vector<1x256xf32>
    %118 = vector.broadcast %117 : vector<1x256xf32> to vector<16x256xf32>
    %119 = arith.addf %115, %118 : vector<16x256xf32>
    %120 = arith.addf %101, %119 : vector<16x256xf32>
    %c0_50 = arith.constant 0 : index
    %c0_51 = arith.constant 0 : index
    %c0_52 = arith.constant 0 : index
    %121 = vector.load %arg12[%c0_50, %c0_51, %c0_52] : memref<1x1x256xf32, #tpu.memory_space<vmem>>, vector<1x1x256xf32>
    %122 = vector.shape_cast %121 : vector<1x1x256xf32> to vector<1x256xf32>
    %c0_53 = arith.constant 0 : index
    %c0_54 = arith.constant 0 : index
    %c0_55 = arith.constant 0 : index
    %123 = vector.load %arg13[%c0_53, %c0_54, %c0_55] : memref<1x1x256xf32, #tpu.memory_space<vmem>>, vector<1x1x256xf32>
    %124 = vector.shape_cast %123 : vector<1x1x256xf32> to vector<1x256xf32>
    %cst_56 = arith.constant dense<0.000000e+00> : vector<16xf32>
    %125 = vector.multi_reduction <add>, %120, %cst_56 [1] : vector<16x256xf32> to vector<16xf32>
    %126 = vector.shape_cast %125 : vector<16xf32> to vector<16x1xf32>
    %cst_57 = arith.constant 2.560000e+02 : f32
    %127 = vector.broadcast %cst_57 : f32 to vector<16x1xf32>
    %128 = arith.divf %126, %127 : vector<16x1xf32>
    %129 = vector.broadcast %128 : vector<16x1xf32> to vector<16x256xf32>
    %130 = arith.subf %120, %129 : vector<16x256xf32>
    %131 = arith.mulf %130, %130 : vector<16x256xf32>
    %cst_58 = arith.constant dense<0.000000e+00> : vector<16xf32>
    %132 = vector.multi_reduction <add>, %131, %cst_58 [1] : vector<16x256xf32> to vector<16xf32>
    %133 = vector.shape_cast %132 : vector<16xf32> to vector<16x1xf32>
    %cst_59 = arith.constant 2.560000e+02 : f32
    %134 = vector.broadcast %cst_59 : f32 to vector<16x1xf32>
    %135 = arith.divf %133, %134 : vector<16x1xf32>
    %cst_60 = arith.constant 9.99999974E-6 : f32
    %136 = vector.broadcast %cst_60 : f32 to vector<16x1xf32>
    %137 = arith.addf %135, %136 : vector<16x1xf32>
    %138 = math.rsqrt %137 : vector<16x1xf32>
    %139 = vector.broadcast %138 : vector<16x1xf32> to vector<16x256xf32>
    %140 = arith.mulf %130, %139 : vector<16x256xf32>
    %141 = vector.broadcast %122 : vector<1x256xf32> to vector<16x256xf32>
    %142 = arith.mulf %140, %141 : vector<16x256xf32>
    %143 = vector.broadcast %124 : vector<1x256xf32> to vector<16x256xf32>
    %144 = arith.addf %142, %143 : vector<16x256xf32>
    %c0_61 = arith.constant 0 : index
    %c0_62 = arith.constant 0 : index
    %145 = vector.load %arg16[%c0_61, %c0_62] : memref<16x256xf32, #tpu.memory_space<vmem>>, vector<16x256xf32>
    tpu.vector_store %arg16[%c0_61, %c0_62], %144 {strides = array<i32>} : memref<16x256xf32, #tpu.memory_space<vmem>>, vector<16x256xf32>,
    %c3_i32 = arith.constant 3 : i32
    %146 = arith.cmpi eq, %arg0, %c3_i32 : i32
    %147 = arith.extui %146 : i1 to i32
    %c0_i32_63 = arith.constant 0 : i32
    %148 = arith.cmpi ne, %147, %c0_i32_63 : i32
    scf.if %148 {
      %149 = arith.truncf %144 : vector<16x256xf32> to vector<16x256xbf16>
      %c0_64 = arith.constant 0 : index
      %c0_65 = arith.constant 0 : index
      %150 = vector.load %arg14[%c0_64, %c0_65] : memref<256x128xbf16, #tpu.memory_space<vmem>>, vector<256x128xbf16>
      %cst_66 = arith.constant dense<0.000000e+00> : vector<16x128xf32>
      %151 = tpu.matmul %149, %150, %cst_66 {dimension_numbers = #tpu.dot_dimension_numbers<[1], [0], [0], [1], [0, 0, 1, 1], [], []>} : vector<16x256xbf16>, vector<256x128xbf16>, vector<16x128xf32> -> vector<16x128xf32>
      %c0_67 = arith.constant 0 : index
      %c0_68 = arith.constant 0 : index
      %152 = vector.load %arg15[%c0_67, %c0_68] : memref<1x128xf32, #tpu.memory_space<vmem>>, vector<1x128xf32>
      %153 = vector.broadcast %152 : vector<1x128xf32> to vector<16x128xf32>
      %154 = arith.addf %151, %153 : vector<16x128xf32>
      %c0_69 = arith.constant 0 : index
      %c0_70 = arith.constant 0 : index
      %155 = vector.load %arg17[%c0_69, %c0_70] : memref<16x128xf32, #tpu.memory_space<vmem>>, vector<16x128xf32>
      tpu.vector_store %arg17[%c0_69, %c0_70], %154 {strides = array<i32>} : memref<16x128xf32, #tpu.memory_space<vmem>>, vector<16x128xf32>,
    } else {
    }
    return
  }
  func.func @transform_0(%arg0: i32) -> (i32, i32) {
    %c0_i32 = arith.constant 0 : i32
    %c0_i32_0 = arith.constant 0 : i32
    %c0_i32_1 = arith.constant 0 : i32
    return %c0_i32, %c0_i32_0 : i32, i32
  }
  func.func @transform_1(%arg0: i32) -> (i32, i32, i32) {
    %c0_i32 = arith.constant 0 : i32
    %c0_i32_0 = arith.constant 0 : i32
    %c0_i32_1 = arith.constant 0 : i32
    return %arg0, %c0_i32, %c0_i32_0 : i32, i32, i32
  }
  func.func @transform_2(%arg0: i32) -> (i32, i32, i32) {
    %c0_i32 = arith.constant 0 : i32
    %c0_i32_0 = arith.constant 0 : i32
    %c0_i32_1 = arith.constant 0 : i32
    return %arg0, %c0_i32, %c0_i32_0 : i32, i32, i32
  }
  func.func @transform_3(%arg0: i32) -> (i32, i32, i32) {
    %c0_i32 = arith.constant 0 : i32
    %c0_i32_0 = arith.constant 0 : i32
    %c0_i32_1 = arith.constant 0 : i32
    return %arg0, %c0_i32, %c0_i32_0 : i32, i32, i32
  }
  func.func @transform_4(%arg0: i32) -> (i32, i32, i32) {
    %c0_i32 = arith.constant 0 : i32
    %c0_i32_0 = arith.constant 0 : i32
    %c0_i32_1 = arith.constant 0 : i32
    return %arg0, %c0_i32, %c0_i32_0 : i32, i32, i32
  }
  func.func @transform_5(%arg0: i32) -> (i32, i32, i32) {
    %c0_i32 = arith.constant 0 : i32
    %c0_i32_0 = arith.constant 0 : i32
    %c0_i32_1 = arith.constant 0 : i32
    return %arg0, %c0_i32, %c0_i32_0 : i32, i32, i32
  }
  func.func @transform_6(%arg0: i32) -> (i32, i32, i32) {
    %c0_i32 = arith.constant 0 : i32
    %c0_i32_0 = arith.constant 0 : i32
    %c0_i32_1 = arith.constant 0 : i32
    return %arg0, %c0_i32, %c0_i32_0 : i32, i32, i32
  }
  func.func @transform_7(%arg0: i32) -> (i32, i32, i32) {
    %c0_i32 = arith.constant 0 : i32
    %c0_i32_0 = arith.constant 0 : i32
    %c0_i32_1 = arith.constant 0 : i32
    return %arg0, %c0_i32, %c0_i32_0 : i32, i32, i32
  }
  func.func @transform_8(%arg0: i32) -> (i32, i32, i32) {
    %c0_i32 = arith.constant 0 : i32
    %c0_i32_0 = arith.constant 0 : i32
    %c0_i32_1 = arith.constant 0 : i32
    return %arg0, %c0_i32, %c0_i32_0 : i32, i32, i32
  }
  func.func @transform_9(%arg0: i32) -> (i32, i32, i32) {
    %c0_i32 = arith.constant 0 : i32
    %c0_i32_0 = arith.constant 0 : i32
    %c0_i32_1 = arith.constant 0 : i32
    return %arg0, %c0_i32, %c0_i32_0 : i32, i32, i32
  }
  func.func @transform_10(%arg0: i32) -> (i32, i32, i32) {
    %c0_i32 = arith.constant 0 : i32
    %c0_i32_0 = arith.constant 0 : i32
    %c0_i32_1 = arith.constant 0 : i32
    return %arg0, %c0_i32, %c0_i32_0 : i32, i32, i32
  }
  func.func @transform_11(%arg0: i32) -> (i32, i32, i32) {
    %c0_i32 = arith.constant 0 : i32
    %c0_i32_0 = arith.constant 0 : i32
    %c0_i32_1 = arith.constant 0 : i32
    return %arg0, %c0_i32, %c0_i32_0 : i32, i32, i32
  }
  func.func @transform_12(%arg0: i32) -> (i32, i32, i32) {
    %c0_i32 = arith.constant 0 : i32
    %c0_i32_0 = arith.constant 0 : i32
    %c0_i32_1 = arith.constant 0 : i32
    return %arg0, %c0_i32, %c0_i32_0 : i32, i32, i32
  }
  func.func @transform_13(%arg0: i32) -> (i32, i32) {
    %c0_i32 = arith.constant 0 : i32
    %c0_i32_0 = arith.constant 0 : i32
    %c0_i32_1 = arith.constant 0 : i32
    return %c0_i32, %c0_i32_0 : i32, i32
  }
  func.func @transform_14(%arg0: i32) -> (i32, i32) {
    %c0_i32 = arith.constant 0 : i32
    %c0_i32_0 = arith.constant 0 : i32
    %c0_i32_1 = arith.constant 0 : i32
    return %c0_i32, %c0_i32_0 : i32, i32
  }
  func.func @transform_15(%arg0: i32) -> (i32, i32) {
    %c0_i32 = arith.constant 0 : i32
    %c0_i32_0 = arith.constant 0 : i32
    %c0_i32_1 = arith.constant 0 : i32
    return %c0_i32, %c0_i32_0 : i32, i32
  }
  func.func @transform_16(%arg0: i32) -> (i32, i32) {
    %c0_i32 = arith.constant 0 : i32
    %c0_i32_0 = arith.constant 0 : i32
    %c0_i32_1 = arith.constant 0 : i32
    return %c0_i32, %c0_i32_0 : i32, i32
  }
}

</mosaic_0001>

<bundles_post_ra>
// kernel: text_to_image_forward.1
= control target key start
LH: loop header
LB: loop body
LE: loop exit
PB: predicated region body
PF: predicated region fallthrough
CT: control target
= control target key end

     0   :  { %s13380_s0 = inlined_call_operand.vmem [shape: f32[16,256], index: 0, kind: input, shape index: {}]   ;;  %s13381_s1 = inlined_call_operand.hbm [shape: bf16[4,256,768], index: 1, kind: input, shape index: {}]   ;;  %s13382_s2 = inlined_call_operand.hbm [shape: f32[4,1,768], index: 2, kind: input, shape index: {}]   ;;  %s13383_s3 = inlined_call_operand.hbm [shape: bf16[4,256,256], index: 3, kind: input, shape index: {}]   ;;  %s13384_s4 = inlined_call_operand.hbm [shape: f32[4,1,256], index: 4, kind: input, shape index: {}]   ;;  %s13385_s5 = inlined_call_operand.hbm [shape: bf16[4,256,2048], index: 5, kind: input, shape index: {}]   ;;  %s13386_s6 = inlined_call_operand.hbm [shape: f32[4,1,2048], index: 6, kind: input, shape index: {}]   ;;  %s13387_s7 = inlined_call_operand.hbm [shape: bf16[4,2048,256], index: 7, kind: input, shape index: {}]   ;;  %s13388_s8 = inlined_call_operand.hbm [shape: f32[4,1,256], index: 8, kind: input, shape index: {}]   ;;  %s13389_s9 = inlined_call_operand.hbm [shape: f32[4,1,256], index: 9, kind: input, shape index: {}]   ;;  %s13390_s10 = inlined_call_operand.hbm [shape: f32[4,1,256], index: 10, kind: input, shape index: {}]   ;;  %s13391_s11 = inlined_call_operand.hbm [shape: f32[4,1,256], index: 11, kind: input, shape index: {}]   ;;  %s13392_s12 = inlined_call_operand.hbm [shape: f32[4,1,256], index: 12, kind: input, shape index: {}]   ;;  %s13393_s13 = inlined_call_operand.hbm [shape: bf16[256,128], index: 13, kind: input, shape index: {}]   ;;  %s13394_s14 = inlined_call_operand.hbm [shape: f32[1,128], index: 14, kind: input, shape index: {}]   ;;  %s13395_s15 = inlined_call_operand.hbm [shape: f32[16,256], index: 15, kind: output, shape index: {0}]   ;;  %s13396_s16 = inlined_call_operand.vmem [shape: f32[16,128], index: 16, kind: output, shape index: {1}]  }
   0x1   :  { %13431 = sst [smem:[#allocation43_spill]] %s13380_s0 }
   0x2   :  { %13432 = sst [smem:[#allocation44_spill]] %s13382_s2 }
   0x3   :  { %13433 = sst [smem:[#allocation45_spill]] %s13391_s11 }
   0x4   :  { %13434 = sst [smem:[#allocation46_spill]] %s13392_s12 }
   0x5   :  { %13435 = sst [smem:[#allocation47_spill]] %s13395_s15 }
   0x6   :  { %13436 = sst [smem:[#allocation48_spill]] %s13396_s16 }
   0x7   :  { %22 = vsyncpa [#allocation3], 0 }
   0x8   :  { %24 = vsyncpa [#allocation3 + $0x1], 0 }
   0x9   :  { %25 = vsyncpa [#allocation6], 0 }
   0xa   :  { %27 = vsyncpa [#allocation6 + $0x1], 0 }
   0xb   :  { %28 = vsyncpa [#allocation9], 0 }
   0xc   :  { %30 = vsyncpa [#allocation9 + $0x1], 0 }
   0xd   :  { %31 = vsyncpa [#allocation12], 0 }
   0xe   :  { %33 = vsyncpa [#allocation12 + $0x1], 0 }
   0xf   :  { %34 = vsyncpa [#allocation15], 0 }
  0x10   :  { %36 = vsyncpa [#allocation15 + $0x1], 0 }
  0x11   :  { %37 = vsyncpa [#allocation18], 0 }
  0x12   :  { %39 = vsyncpa [#allocation18 + $0x1], 0 }
  0x13   :  { %40 = vsyncpa [#allocation21], 0 }
  0x14   :  { %42 = vsyncpa [#allocation21 + $0x1], 0 }
  0x15   :  { %43 = vsyncpa [#allocation24], 0 }
  0x16   :  { %44 = vsyncpa [#allocation4], 0  ;;  %s11112_s21 = smov 0   ;;  %s11114_s22 = smov 0  }
  0x17   :  { %s11116_s23 = smov 0   ;;  %s11118_s24 = smov 0  }
  0x18 LB: > { %13437 = sst [smem:[#allocation36_spill]] %s10989_s22  ;;  %s11131_s25 = sadd.s32 4294967295, %s10997_s24   ;;  %s10997_s24 = sphi %s11118_s24, %s13508_s24   ;;  %s10993_s23 = sphi %s11116_s23, %s13511_s23   ;;  %s10989_s22 = sphi %s11114_s22, %s13510_s22   ;;  %s10985_s21 = sphi %s11112_s21, %s13509_s21  }
  0x19   : > { %13438 = sst [smem:[#allocation37_spill]] %s10993_s23  ;;  %s11134_s26 = sadd.s32 1, %s10997_s24  }
  0x1a   : > { %13439 = sst [smem:[#allocation38_spill]] %s11131_s25  ;;  %s75_s27 = ssub.s32 %s10997_s24, %s11134_s26 }
  0x1b   : > { %13440 = sst [smem:[#allocation39_spill]] %s11134_s26  ;;  %s78_s28 = sadd.s32 1, %s10993_s23 }
  0x1c   : > { %p76_p0 = scmp.eq.s32.totalorder %s75_s27, 0  ;;  %p85_p1 = scmp.ne.s32.totalorder %s10993_s23, %s10989_s22 }
  0x1d   : > { %p86_p2 = scmp.eq.s32.totalorder %s10997_s24, 0  ;;  %p91_p3 = scmp.ne.s32.totalorder %s10989_s22, %s10985_s21 }
  0x1e   : > { %s11144_s29 = scalar_select %p76_p0, %s10993_s23, %s78_s28  }
  0x1f   : > { %p11146_p4 = por %p86_p2, %p85_p1  ;;  %p13406_p5 = scmp.eq.s32.totalorder %s11131_s25, 0 }
  0x20   : > { %13441 = sst [smem:[#allocation40_spill]] %s11144_s29  ;;  %p8750_p6 = scmp.ge.s32.totalorder %s10997_s24, 1 }
  0x21   : > { %p472_p7 = scmp.lt.s32.totalorder %s10997_s24, 5  ;;  %p11155_p8 = por %p13406_p5, %p91_p3 }
  0x22   : > { %s10999_s18 = smov [#allocation22]   ;;  %p9762_p13 = scmp.lt.s32.totalorder %s10997_s24, 4 }
  0x23   : > { %s13443_s0 = scalar_select %p11155_p8, 1, 0 }
  0x24   : > { %p11160_p10 = pnand %p8750_p6, %p472_p7  ;;  %s487_s19 = sshll.u32 %s10999_s18, 4  ;;  %s488_s19 = int_to_ptr.vmem [resolvable:$true] %s487_s19 }
  0x25   : > { %13444 = sst [smem:[#allocation41_spill]] %s13443_s0  ;;  %s11174_s21 = sand.u32 1, %s10993_s23  }
  0x26   : > { %s13445_s17 = scalar_select %p11160_p10, 1, 0 }
  0x27   : > { %p9716_p11 = pneg %p11160_p10  ;;  %s11177_s27 = sand.u32 1, %s10997_s24  }
  0x28   : > { %13446 = sst [smem:[#allocation42_spill]] %s13445_s17  ;;  %p11181_p0 = pnand %p9762_p13, %p11146_p4 }
  0x29   : > { %p11168_p12 = pnand %p9716_p11, %p13406_p5  ;;  %s10485_s26 = scalar_lea.hbm %s13393_s13, 2048 }
  0x2a   : > { %s13448_s28 = scalar_select %p11181_p0, 1, 0 }
  0x2b   : > { %s13447_s20 = scalar_select %p11168_p12, 1, 0 }
  0x2c   : > { %p10486_p1 = scmp.ne.s32.totalorder %s13393_s13, %s10485_s26  ;;  %p13416_p2 = pneg %p11168_p12 }
  0x2d   : > { %p10492_p4 = scmp.lt.u32.totalorder %s10485_s26, %s13393_s13 }
  0x2e   : > { %p10488_p3 = pnand %p13416_p2, %p10486_p1 }
  0x30   : > { %p10489_p6 = pneg %p10488_p3 }
  0x32   : > { %p10494_p7 = pnand %p10492_p4, %p10489_p6 }
  0x34   : > { %10497 = shalt.err (!%p10494_p7)
}
  0x35   : > { %s10498_s25 = scalar_lea.vmem %s488_s19, 2048  ;;  %p10506_p5 = scmp.lt.s32.totalorder %s488_s19, %s488_s19 }
  0x36   : > { %p10499_p11 = scmp.ne.s32.totalorder %s488_s19, %s10498_s25  ;;  %p10507_p8 = scmp.lt.s32.totalorder %s10498_s25, %s10498_s25 }
  0x38   : > { %p10501_p13 = pnand %p10499_p11, %p13416_p2  ;;  %p10508_p10 = por %p10507_p8, %p10506_p5 }
  0x3a   : > { %p10502_p9 = pneg %p10501_p13 }
  0x3c   : > { %p10509_p0 = pnand %p10508_p10, %p10502_p9 }
  0x3e   : > { %10512 = shalt.err (!%p10509_p0)
}
  0x3f   : > { %s13419_s15 = smov 64   ;;  %s11001_s16 = smov 4  }
  0x40   : > { %9719 = dma.hbm_to_vmem [thread:$0]  (!%p11168_p12), %s13393_s13, 2048, %s488_s19, [#allocation21], %s13419_s15, %s13419_s15, %s11001_s16  }
  0x41   : > { %s9676_s25 = smul.u32 6, %s11174_s21  ;;  %s11212_s18 = sshll.u32 %s11174_s21, 1 }
  0x42   : > { %s9677_s29 = smul.u32 96, %s10997_s24  ;;  %s13449_s2 = sld [smem:[#allocation44_spill]] }
  0x43   : > { %s537_s17 = scalar_lea.vmem [#allocation5], %s9676_s25  ;;  %s11222_s11 = sshll.u32 %s10997_s24, 5 }
  0x44   : > { %s545_s12 = sshll.u32 %s537_s17, 4  ;;  %s13420_s19 = scalar_lea.sflag [#allocation6], %s11177_s27  ;;  %s11219_s12 = int_to_ptr.vmem [resolvable:$true] %s545_s12 }
  0x45   : > { %p13450_p8 = scmp.ne.s32.totalorder %s13448_s28, 0 }
  0x47   : > { %p11229_p9 = pneg %p13450_p8 }
  0x48   : > { %s11217_s22 = scalar_lea.hbm %s13449_s2, %s9677_s29  ;;  %s10518_s17 = scalar_lea.hbm %s13449_s2, 384 }
  0x49   : > { %s10513_s16 = scalar_lea.hbm %s11217_s22, 96  ;;  %p10519_p1 = scmp.lt.u32.totalorder %s11217_s22, %s13449_s2 }
  0x4a   : > { %p10514_p5 = scmp.ne.s32.totalorder %s11217_s22, %s10513_s16  ;;  %p10520_p3 = scmp.lt.u32.totalorder %s10518_s17, %s10513_s16 }
  0x4b   : > { %s13451_s23 = scalar_select %p11229_p9, 1, 0 }
  0x4c   : > { %p10516_p10 = pnand %p11229_p9, %p10514_p5  ;;  %p10521_p6 = por %p10520_p3, %p10519_p1 }
  0x4d   : > { %p10522_p4 = scmp.lt.u32.totalorder %s10513_s16, %s11217_s22 }
  0x4e   : > { %p10517_p0 = pneg %p10516_p10 }
  0x4f   : > { %p10523_p7 = por %p10522_p4, %p10521_p6 }
  0x51   : > { %p10524_p11 = pnand %p10523_p7, %p10517_p0 }
  0x53   : > { %10527 = shalt.err (!%p10524_p11)
}
  0x54   : > { %s10528_s30 = scalar_lea.vmem %s11219_s12, 96  ;;  %s11002_s0 = smov [#allocation5]  }
  0x55   : > { %p10529_p13 = scmp.ne.s32.totalorder %s11219_s12, %s10528_s30  ;;  %s10533_s26 = sshll.u32 %s11002_s0, 4  ;;  %s10534_s26 = int_to_ptr.vmem [resolvable:$false] %s10533_s26 }
  0x56   : > { %s10535_s25 = scalar_lea.vmem %s10534_s26, 192  ;;  %p10536_p2 = scmp.lt.s32.totalorder %s11219_s12, %s10534_s26 }
  0x57   : > { %p10531_p5 = pnand %p10529_p13, %p11229_p9  ;;  %p10537_p12 = scmp.lt.s32.totalorder %s10535_s25, %s10528_s30 }
  0x59   : > { %p10532_p10 = pneg %p10531_p5  ;;  %p10538_p1 = por %p10537_p12, %p10536_p2 }
  0x5b   : > { %p10539_p3 = pnand %p10538_p1, %p10532_p10 }
  0x5d   : > { %10542 = shalt.err (!%p10539_p3)
}
  0x5e   : > { %9729 = dma.hbm_to_vmem [thread:$0]  (!%p13450_p8), %s11217_s22, 96, %s11219_s12, %s13420_s19  }
  0x5f   : > { %s11258_s29 = scalar_lea.hbm %s13384_s4, %s11222_s11  ;;  %s577_s30 = scalar_lea.vmem [#allocation8], %s11212_s18 }
  0x60   : > { %s585_s0 = sshll.u32 %s577_s30, 4  ;;  %s10543_s25 = scalar_lea.hbm %s11258_s29, 32  ;;  %s586_s0 = int_to_ptr.vmem [resolvable:$true] %s585_s0 }
  0x61   : > { %p10544_p12 = scmp.ne.s32.totalorder %s11258_s29, %s10543_s25  ;;  %s10548_s22 = scalar_lea.hbm %s13384_s4, 128 }
  0x62   : > { %p10549_p6 = scmp.lt.u32.totalorder %s11258_s29, %s13384_s4  ;;  %p10550_p4 = scmp.lt.u32.totalorder %s10548_s22, %s10543_s25 }
  0x63   : > { %p10546_p2 = pnand %p10544_p12, %p11229_p9  ;;  %p10552_p11 = scmp.lt.u32.totalorder %s10543_s25, %s11258_s29 }
  0x64   : > { %p10551_p7 = por %p10550_p4, %p10549_p6 }
  0x65   : > { %p10547_p0 = pneg %p10546_p2 }
  0x66   : > { %p10553_p13 = por %p10552_p11, %p10551_p7 }
  0x68   : > { %p10554_p5 = pnand %p10553_p13, %p10547_p0 }
  0x6a   : > { %10557 = shalt.err (!%p10554_p5)
}
  0x6b   : > { %s10558_s30 = scalar_lea.vmem %s586_s0, 32  ;;  %s11003_s19 = smov [#allocation8]  }
  0x6c   : > { %p10559_p10 = scmp.ne.s32.totalorder %s586_s0, %s10558_s30  ;;  %s10563_s26 = sshll.u32 %s11003_s19, 4  ;;  %s10564_s26 = int_to_ptr.vmem [resolvable:$false] %s10563_s26 }
  0x6d   : > { %s10565_s15 = scalar_lea.vmem %s10564_s26, 64  ;;  %p10566_p12 = scmp.lt.s32.totalorder %s586_s0, %s10564_s26 }
  0x6e   : > { %p10561_p1 = pnand %p10559_p10, %p11229_p9  ;;  %p10567_p2 = scmp.lt.s32.totalorder %s10565_s15, %s10558_s30 }
  0x70   : > { %p10562_p3 = pneg %p10561_p1  ;;  %p10568_p8 = por %p10567_p2, %p10566_p12 }
  0x72   : > { %p10569_p4 = pnand %p10568_p8, %p10562_p3 }
  0x74   : > { %10572 = shalt.err (!%p10569_p4)
}
  0x75   : > { %p13452_p6 = scmp.ne.s32.totalorder %s13448_s28, 0  ;;  %s13453_s25 = scalar_lea.sflag [#allocation9], %s11177_s27 }
  0x76   : > { %s8765_s12 = sshll.u32 %s11174_s21, 4  ;;  %s9537_s22 = sshll.u32 %s10997_s24, 8 }
  0x77   : > { %9735 = dma.hbm_to_vmem [thread:$0]  (!%p13452_p6), %s11258_s29, 32, %s586_s0, %s13453_s25  }
  0x78   : > { %s11286_s26 = scalar_lea.hbm %s13386_s6, %s9537_s22  ;;  %s617_s17 = scalar_lea.vmem [#allocation11], %s8765_s12 }
  0x79   : > { %s625_s30 = sshll.u32 %s617_s17, 4  ;;  %s13422_s15 = scalar_lea.sflag [#allocation12], %s11177_s27  ;;  %s626_s30 = int_to_ptr.vmem [resolvable:$true] %s625_s30 }
  0x7a   : > { %s10573_s2 = scalar_lea.hbm %s11286_s26, 256  ;;  %s10578_s25 = scalar_lea.hbm %s13386_s6, 1024 }
  0x7b   : > { %p10574_p8 = scmp.ne.s32.totalorder %s11286_s26, %s10573_s2  ;;  %p10579_p11 = scmp.lt.u32.totalorder %s11286_s26, %s13386_s6 }
  0x7c   : > { %p10580_p13 = scmp.lt.u32.totalorder %s10578_s25, %s10573_s2  ;;  %p10582_p10 = scmp.lt.u32.totalorder %s10573_s2, %s11286_s26 }
  0x7d   : > { %p10576_p0 = pnand %p10574_p8, %p11229_p9 }
  0x7e   : > { %p10581_p5 = por %p10580_p13, %p10579_p11 }
  0x7f   : > { %p10577_p7 = pneg %p10576_p0 }
  0x80   : > { %p10583_p1 = por %p10582_p10, %p10581_p5 }
  0x82   : > { %p10584_p3 = pnand %p10583_p1, %p10577_p7 }
  0x84   : > { %10587 = shalt.err (!%p10584_p3)
}
  0x85   : > { %s10588_s12 = scalar_lea.vmem %s626_s30, 256  ;;  %s11004_s16 = smov [#allocation11]  }
  0x86   : > { %p10589_p12 = scmp.ne.s32.totalorder %s626_s30, %s10588_s12  ;;  %s10593_s17 = sshll.u32 %s11004_s16, 4  ;;  %s10594_s17 = int_to_ptr.vmem [resolvable:$false] %s10593_s17 }
  0x87   : > { %s10595_s29 = scalar_lea.vmem %s10594_s17, 512  ;;  %p10596_p8 = scmp.lt.s32.totalorder %s626_s30, %s10594_s17 }
  0x88   : > { %p10591_p2 = pnand %p10589_p12, %p11229_p9  ;;  %p10597_p0 = scmp.lt.s32.totalorder %s10595_s29, %s10588_s12 }
  0x8a   : > { %p10592_p4 = pneg %p10591_p2  ;;  %p10598_p6 = por %p10597_p0, %p10596_p8 }
  0x8c   : > { %p10599_p11 = pnand %p10598_p6, %p10592_p4 }
  0x8e   : > { %10602 = shalt.err (!%p10599_p11)
}
  0x8f   : > { %p13454_p13 = scmp.ne.s32.totalorder %s13448_s28, 0  ;;  %s11312_s25 = scalar_lea.hbm %s13388_s8, %s11222_s11 }
  0x90   : > { %s657_s19 = scalar_lea.vmem [#allocation14], %s11212_s18  ;;  %s13423_s12 = scalar_lea.sflag [#allocation15], %s11177_s27 }
  0x91   : > { %9741 = dma.hbm_to_vmem [thread:$0]  (!%p13454_p13), %s11286_s26, 256, %s626_s30, %s13422_s15  }
  0x92   : > { %s665_s22 = sshll.u32 %s657_s19, 4  ;;  %s10603_s16 = scalar_lea.hbm %s11312_s25, 32  ;;  %s666_s22 = int_to_ptr.vmem [resolvable:$true] %s665_s22 }
  0x93   : > { %p10604_p6 = scmp.ne.s32.totalorder %s11312_s25, %s10603_s16  ;;  %s10608_s30 = scalar_lea.hbm %s13388_s8, 128 }
  0x94   : > { %p10609_p10 = scmp.lt.u32.totalorder %s11312_s25, %s13388_s8  ;;  %p10610_p1 = scmp.lt.u32.totalorder %s10608_s30, %s10603_s16 }
  0x95   : > { %p10606_p7 = pnand %p10604_p6, %p11229_p9  ;;  %p10612_p12 = scmp.lt.u32.totalorder %s10603_s16, %s11312_s25 }
  0x96   : > { %p10611_p3 = por %p10610_p1, %p10609_p10 }
  0x97   : > { %p10607_p5 = pneg %p10606_p7 }
  0x98   : > { %p10613_p2 = por %p10612_p12, %p10611_p3 }
  0x9a   : > { %p10614_p4 = pnand %p10613_p2, %p10607_p5 }
  0x9c   : > { %10617 = shalt.err (!%p10614_p4)
}
  0x9d   : > { %s10618_s0 = scalar_lea.vmem %s666_s22, 32  ;;  %s11005_s19 = smov [#allocation14]  }
  0x9e   : > { %p10619_p8 = scmp.ne.s32.totalorder %s666_s22, %s10618_s0  ;;  %s10623_s15 = sshll.u32 %s11005_s19, 4  ;;  %s10624_s15 = int_to_ptr.vmem [resolvable:$false] %s10623_s15 }
  0x9f   : > { %s10625_s17 = scalar_lea.vmem %s10624_s15, 64  ;;  %p10626_p6 = scmp.lt.s32.totalorder %s666_s22, %s10624_s15 }
  0xa0   : > { %p10621_p0 = pnand %p10619_p8, %p11229_p9  ;;  %p10627_p7 = scmp.lt.s32.totalorder %s10625_s17, %s10618_s0 }
  0xa2   : > { %p10622_p11 = pneg %p10621_p0  ;;  %p10628_p13 = por %p10627_p7, %p10626_p6 }
  0xa4   : > { %p10629_p1 = pnand %p10628_p13, %p10622_p11 }
  0xa6   : > { %10632 = shalt.err (!%p10629_p1)
}
  0xa7   : > { %p13455_p10 = scmp.ne.s32.totalorder %s13448_s28, 0  ;;  %s11339_s30 = scalar_lea.hbm %s13390_s10, %s11222_s11 }
  0xa8   : > { %s695_s15 = scalar_lea.vmem [#allocation17], %s11212_s18  ;;  %s11006_s2 = smov [#allocation23]  }
  0xa9   : > { %9747 = dma.hbm_to_vmem [thread:$0]  (!%p13455_p10), %s11312_s25, 32, %s666_s22, %s13423_s12  }
  0xaa   : > { %s703_s29 = sshll.u32 %s695_s15, 4  ;;  %s11344_s0 = sshll.u32 %s11006_s2, 4  ;;  %s11342_s29 = int_to_ptr.vmem [resolvable:$true] %s703_s29  ;;  %s502_s0 = int_to_ptr.vmem [resolvable:$true] %s11344_s0 }
  0xab   : > { %s13427_s19 = scalar_lea.sflag [#allocation18], %s11177_s27  ;;  %s10633_s17 = scalar_lea.hbm %s11339_s30, 32 }
  0xac   : > { %p10634_p13 = scmp.ne.s32.totalorder %s11339_s30, %s10633_s17  ;;  %s10638_s16 = scalar_lea.hbm %s13390_s10, 128 }
  0xad   : > { %p10639_p12 = scmp.lt.u32.totalorder %s11339_s30, %s13390_s10  ;;  %p10640_p2 = scmp.lt.u32.totalorder %s10638_s16, %s10633_s17 }
  0xae   : > { %p10636_p5 = pnand %p10634_p13, %p11229_p9  ;;  %p10642_p8 = scmp.lt.u32.totalorder %s10633_s17, %s11339_s30 }
  0xaf   : > { %p10641_p4 = por %p10640_p2, %p10639_p12 }
  0xb0   : > { %p10637_p3 = pneg %p10636_p5 }
  0xb1   : > { %p10643_p0 = por %p10642_p8, %p10641_p4 }
  0xb3   : > { %p10644_p11 = pnand %p10643_p0, %p10637_p3 }
  0xb5   : > { %10647 = shalt.err (!%p10644_p11)
}
  0xb6   : > { %s10648_s15 = scalar_lea.vmem %s11342_s29, 32  ;;  %s11007_s2 = smov [#allocation17]  }
  0xb7   : > { %p10649_p6 = scmp.ne.s32.totalorder %s11342_s29, %s10648_s15  ;;  %s10653_s25 = sshll.u32 %s11007_s2, 4  ;;  %s10654_s25 = int_to_ptr.vmem [resolvable:$false] %s10653_s25 }
  0xb8   : > { %s10655_s12 = scalar_lea.vmem %s10654_s25, 64  ;;  %p10656_p13 = scmp.lt.s32.totalorder %s11342_s29, %s10654_s25 }
  0xb9   : > { %p10651_p7 = pnand %p10649_p6, %p11229_p9  ;;  %p10657_p5 = scmp.lt.s32.totalorder %s10655_s12, %s10648_s15 }
  0xbb   : > { %p10652_p1 = pneg %p10651_p7  ;;  %p10658_p12 = por %p10657_p5, %p10656_p13 }
  0xbd   : > { %p10659_p2 = pnand %p10658_p12, %p10652_p1 }
  0xbf   : > { %10662 = shalt.err (!%p10659_p2)
}
  0xc0   : > { %9753 = dma.hbm_to_vmem [thread:$0]  (!%p13455_p10), %s11339_s30, 32, %s11342_s29, %s13427_s19  }
  0xc1   : > { %s10663_s16 = scalar_lea.hbm %s13394_s14, 16  ;;  %p13456_p4 = scmp.ne.s32.totalorder %s13447_s20, 0 }
  0xc2   : > { %p10664_p3 = scmp.ne.s32.totalorder %s13394_s14, %s10663_s16  ;;  %p10670_p6 = scmp.lt.u32.totalorder %s10663_s16, %s13394_s14 }
  0xc3   : > { %p13457_p8 = pneg %p13456_p4 }
  0xc5   : > { %p10666_p0 = pnand %p10664_p3, %p13457_p8 }
  0xc7   : > { %p10667_p11 = pneg %p10666_p0 }
  0xc9   : > { %p10672_p7 = pnand %p10670_p6, %p10667_p11 }
  0xcb   : > { %10675 = shalt.err (!%p10672_p7)
}
  0xcc   : > { %s10676_s30 = scalar_lea.vmem %s502_s0, 16  ;;  %p13458_p13 = pmov %p13457_p8 }
  0xcd   : > { %p10677_p1 = scmp.ne.s32.totalorder %s502_s0, %s10676_s30  ;;  %s10683_s29 = scalar_lea.vmem %s502_s0, 32 }
  0xce   : > { %p10684_p2 = scmp.lt.s32.totalorder %s502_s0, %s502_s0  ;;  %p10685_p10 = scmp.lt.s32.totalorder %s10683_s29, %s10676_s30 }
  0xcf   : > { %p10679_p5 = pnand %p10677_p1, %p13458_p13 }
  0xd0   : > { %p10686_p9 = por %p10685_p10, %p10684_p2 }
  0xd1   : > { %p10680_p12 = pneg %p10679_p5 }
  0xd3   : > { %p10687_p3 = pnand %p10686_p9, %p10680_p12 }
  0xd5   : > { %10690 = shalt.err (!%p10687_p3)
}
  0xd6   : > { %9722 = dma.hbm_to_vmem [thread:$0]  (!%p13456_p4), %s13394_s14, 16, %s502_s0, [#allocation24]  }
  0xd7   : > { %s9674_s22 = smul.u32 768, %s11174_s21  ;;  %s8756_s26 = sshll.u32 %s11174_s21, 8 }
  0xd8   : > { %s9675_s16 = smul.u32 12288, %s10997_s24  ;;  %s513_s29 = scalar_lea.sflag [#allocation3], %s11174_s21 }
  0xd9   : > { %s516_s20 = scalar_lea.vmem [#allocation2], %s9674_s22  ;;  %p13459_p10 = scmp.ne.s32.totalorder %s13451_s23, 0 }
  0xda   : > { %s11397_s25 = scalar_lea.hbm %s13381_s1, %s9675_s16  ;;  %s523_s30 = sshll.u32 %s516_s20, 4  ;;  %s11399_s30 = int_to_ptr.vmem [resolvable:$true] %s523_s30 }
  0xdb   : > { %s10691_s12 = scalar_lea.hbm %s11397_s25, 12288  ;;  %s10696_s2 = scalar_lea.hbm %s13381_s1, 49152 }
  0xdc   : > { %p10692_p9 = scmp.ne.s32.totalorder %s11397_s25, %s10691_s12  ;;  %p10697_p0 = scmp.lt.u32.totalorder %s11397_s25, %s13381_s1 }
  0xdd   : > { %p10698_p11 = scmp.lt.u32.totalorder %s10696_s2, %s10691_s12  ;;  %p10700_p7 = scmp.lt.u32.totalorder %s10691_s12, %s11397_s25 }
  0xde   : > { %p10694_p4 = pnand %p10692_p9, %p13459_p10 }
  0xdf   : > { %p10699_p6 = por %p10698_p11, %p10697_p0 }
  0xe0   : > { %p10695_p8 = pneg %p10694_p4 }
  0xe1   : > { %p10701_p1 = por %p10700_p7, %p10699_p6 }
  0xe3   : > { %p10702_p13 = pnand %p10701_p1, %p10695_p8 }
  0xe5   : > { %10705 = shalt.err (!%p10702_p13)
}
  0xe6   : > { %s10706_s22 = scalar_lea.vmem %s11399_s30, 12288  ;;  %s11008_s20 = smov [#allocation2]  }
  0xe7   : > { %p10707_p5 = scmp.ne.s32.totalorder %s11399_s30, %s10706_s22  ;;  %s10711_s0 = sshll.u32 %s11008_s20, 4  ;;  %s10712_s0 = int_to_ptr.vmem [resolvable:$false] %s10711_s0 }
  0xe8   : > { %s10713_s17 = scalar_lea.vmem %s10712_s0, 24576  ;;  %p10714_p3 = scmp.lt.s32.totalorder %s11399_s30, %s10712_s0 }
  0xe9   : > { %p10709_p12 = pnand %p10707_p5, %p13459_p10  ;;  %p10715_p9 = scmp.lt.s32.totalorder %s10713_s17, %s10706_s22 }
  0xeb   : > { %p10710_p2 = pneg %p10709_p12  ;;  %p10716_p4 = por %p10715_p9, %p10714_p3 }
  0xed   : > { %p10717_p0 = pnand %p10716_p4, %p10710_p2 }
  0xef   : > { %10720 = shalt.err (!%p10717_p0)
}
  0xf0   : > { %s11009_s12 = smov 384   ;;  %s11010_s2 = smov 24  }
  0xf1   : > { %p13460_p8 = scmp.ne.s32.totalorder %s13448_s28, 0  ;;  %s9534_s16 = sshll.u32 %s10997_s24, 12 }
  0xf2   : > { %s556_s15 = scalar_lea.vmem [#allocation7], %s8756_s26  ;;  %s11431_s17 = scalar_lea.hbm %s13383_s3, %s9534_s16 }
  0xf3   : > { %9726 = dma.hbm_to_vmem [thread:$0]  (!%p13460_p8), %s11397_s25, 12288, %s11399_s30, %s513_s29, %s11009_s12, %s11009_s12, %s11010_s2  }
  0xf4   : > { %s563_s20 = sshll.u32 %s556_s15, 4  ;;  %s10721_s19 = scalar_lea.hbm %s11431_s17, 4096  ;;  %s11433_s20 = int_to_ptr.vmem [resolvable:$true] %s563_s20 }
  0xf5   : > { %p10722_p11 = scmp.ne.s32.totalorder %s11431_s17, %s10721_s19  ;;  %s10726_s26 = scalar_lea.hbm %s13383_s3, 16384 }
  0xf6   : > { %p10727_p1 = scmp.lt.u32.totalorder %s11431_s17, %s13383_s3  ;;  %p10728_p13 = scmp.lt.u32.totalorder %s10726_s26, %s10721_s19 }
  0xf7   : > { %p10724_p6 = pnand %p10722_p11, %p13459_p10  ;;  %p10730_p12 = scmp.lt.u32.totalorder %s10721_s19, %s11431_s17 }
  0xf8   : > { %p10729_p5 = por %p10728_p13, %p10727_p1 }
  0xf9   : > { %p10725_p7 = pneg %p10724_p6 }
  0xfa   : > { %p10731_p2 = por %p10730_p12, %p10729_p5 }
  0xfc   : > { %p10732_p3 = pnand %p10731_p2, %p10725_p7 }
  0xfe   : > { %10735 = shalt.err (!%p10732_p3)
}
  0xff   : > { %s10736_s2 = scalar_lea.vmem %s11433_s20, 4096  ;;  %s11011_s16 = smov [#allocation7]  }
 0x100   : > { %p10737_p9 = scmp.ne.s32.totalorder %s11433_s20, %s10736_s2  ;;  %s10741_s15 = sshll.u32 %s11011_s16, 4  ;;  %s10742_s15 = int_to_ptr.vmem [resolvable:$false] %s10741_s15 }
 0x101   : > { %s10743_s22 = scalar_lea.vmem %s10742_s15, 8192  ;;  %p10744_p11 = scmp.lt.s32.totalorder %s11433_s20, %s10742_s15 }
 0x102   : > { %p10739_p4 = pnand %p10737_p9, %p13459_p10  ;;  %p10745_p6 = scmp.lt.s32.totalorder %s10743_s22, %s10736_s2 }
 0x104   : > { %p10740_p0 = pneg %p10739_p4  ;;  %p10746_p1 = por %p10745_p6, %p10744_p11 }
 0x106   : > { %p10747_p13 = pnand %p10746_p1, %p10740_p0 }
 0x108   : > { %10750 = shalt.err (!%p10747_p13)
}
 0x109   : > { %s13428_s19 = smov 128   ;;  %s13429_s0 = smov 8  }
 0x10a   : > { %s13461_s25 = scalar_lea.sflag [#allocation6], %s11177_s27  ;;  %s8762_s30 = sshll.u32 %s11174_s21, 11 }
 0x10b   : > { %9732 = dma.hbm_to_vmem [thread:$0]  (!%p13460_p8), %s11431_s17, 4096, %s11433_s20, %s13461_s25, %s13428_s19, %s13428_s19, %s13429_s0  }
 0x10c   : > { %s9536_s26 = sshll.u32 %s10997_s24, 15  ;;  %s596_s16 = scalar_lea.vmem [#allocation10], %s8762_s30 }
 0x10d   : > { %s11468_s2 = scalar_lea.hbm %s13385_s5, %s9536_s26  ;;  %s603_s15 = sshll.u32 %s596_s16, 4  ;;  %s11472_s15 = int_to_ptr.vmem [resolvable:$true] %s603_s15 }
 0x10e   : > { %s10751_s22 = scalar_lea.hbm %s11468_s2, 32768  ;;  %s10756_s25 = scalar_lea.hbm %s13385_s5, 131072 }
 0x10f   : > { %p10752_p7 = scmp.ne.s32.totalorder %s11468_s2, %s10751_s22  ;;  %p10757_p2 = scmp.lt.u32.totalorder %s11468_s2, %s13385_s5 }
 0x110   : > { %p10758_p3 = scmp.lt.u32.totalorder %s10756_s25, %s10751_s22  ;;  %p10760_p4 = scmp.lt.u32.totalorder %s10751_s22, %s11468_s2 }
 0x111   : > { %p10754_p5 = pnand %p10752_p7, %p13459_p10 }
 0x112   : > { %p10759_p9 = por %p10758_p3, %p10757_p2 }
 0x113   : > { %p10755_p12 = pneg %p10754_p5 }
 0x114   : > { %p10761_p0 = por %p10760_p4, %p10759_p9 }
 0x116   : > { %p10762_p11 = pnand %p10761_p0, %p10755_p12 }
 0x118   : > { %10765 = shalt.err (!%p10762_p11)
}
 0x119   : > { %s10766_s16 = scalar_lea.vmem %s11472_s15, 32768  ;;  %s11014_s20 = smov [#allocation10]  }
 0x11a   : > { %p10767_p6 = scmp.ne.s32.totalorder %s11472_s15, %s10766_s16  ;;  %s10771_s17 = sshll.u32 %s11014_s20, 4  ;;  %s10772_s17 = int_to_ptr.vmem [resolvable:$false] %s10771_s17 }
 0x11b   : > { %s10773_s29 = scalar_lea.vmem %s10772_s17, 65536  ;;  %p10774_p7 = scmp.lt.s32.totalorder %s11472_s15, %s10772_s17 }
 0x11c   : > { %p10769_p1 = pnand %p10767_p6, %p13459_p10  ;;  %p10775_p5 = scmp.lt.s32.totalorder %s10773_s29, %s10766_s16 }
 0x11e   : > { %p10770_p13 = pneg %p10769_p1  ;;  %p10776_p2 = por %p10775_p5, %p10774_p7 }
 0x120   : > { %p10777_p3 = pnand %p10776_p2, %p10770_p13 }
 0x122   : > { %10780 = shalt.err (!%p10777_p3)
}
 0x123   : > { %s11015_s22 = smov 1024   ;;  %s13462_s25 = smov 64  }
 0x124   : > { %s13463_s12 = scalar_lea.sflag [#allocation9], %s11177_s27  ;;  %s11503_s16 = scalar_lea.hbm %s13387_s7, %s9536_s26 }
 0x125   : > { %9738 = dma.hbm_to_vmem [thread:$0]  (!%p13460_p8), %s11468_s2, 32768, %s11472_s15, %s13463_s12, %s11015_s22, %s11015_s22, %s13462_s25  }
 0x126   : > { %s636_s17 = scalar_lea.vmem [#allocation13], %s8762_s30  ;;  %s10781_s0 = scalar_lea.hbm %s11503_s16, 32768 }
 0x127   : > { %s643_s29 = sshll.u32 %s636_s17, 4  ;;  %p10782_p12 = scmp.ne.s32.totalorder %s11503_s16, %s10781_s0  ;;  %s11507_s29 = int_to_ptr.vmem [resolvable:$true] %s643_s29 }
 0x128   : > { %s10786_s19 = scalar_lea.hbm %s13387_s7, 131072  ;;  %p10787_p0 = scmp.lt.u32.totalorder %s11503_s16, %s13387_s7 }
 0x129   : > { %p10784_p9 = pnand %p10782_p12, %p13459_p10  ;;  %p10788_p11 = scmp.lt.u32.totalorder %s10786_s19, %s10781_s0 }
 0x12a   : > { %p10790_p1 = scmp.lt.u32.totalorder %s10781_s0, %s11503_s16 }
 0x12b   : > { %p10785_p4 = pneg %p10784_p9  ;;  %p10789_p6 = por %p10788_p11, %p10787_p0 }
 0x12d   : > { %p10791_p13 = por %p10790_p1, %p10789_p6 }
 0x12f   : > { %p10792_p7 = pnand %p10791_p13, %p10785_p4 }
 0x131   : > { %10795 = shalt.err (!%p10792_p7)
}
 0x132   : > { %s10796_s21 = scalar_lea.vmem %s11507_s29, 32768  ;;  %s11016_s30 = smov [#allocation13]  }
 0x133   : > { %p10797_p5 = scmp.ne.s32.totalorder %s11507_s29, %s10796_s21  ;;  %s10801_s22 = sshll.u32 %s11016_s30, 4  ;;  %s10802_s22 = int_to_ptr.vmem [resolvable:$false] %s10801_s22 }
 0x134   : > { %s10803_s25 = scalar_lea.vmem %s10802_s22, 65536  ;;  %p10804_p12 = scmp.lt.s32.totalorder %s11507_s29, %s10802_s22 }
 0x135   : > { %p10799_p2 = pnand %p10797_p5, %p13459_p10  ;;  %p10805_p9 = scmp.lt.s32.totalorder %s10803_s25, %s10796_s21 }
 0x137   : > { %p10800_p3 = pneg %p10799_p2  ;;  %p10806_p0 = por %p10805_p9, %p10804_p12 }
 0x139   : > { %p10807_p11 = pnand %p10806_p0, %p10800_p3 }
 0x13b   : > { %10810 = shalt.err (!%p10807_p11)
}
 0x13c   : > { %s13464_s0 = smov 8   ;;  %s13465_s12 = smov 128  }
 0x13d   : > { %s13466_s20 = scalar_lea.sflag [#allocation12], %s11177_s27  ;;  %s11539_s2 = scalar_lea.hbm %s13389_s9, %s11222_s11 }
 0x13e   : > { %9744 = dma.hbm_to_vmem [thread:$0]  (!%p13460_p8), %s11503_s16, 32768, %s11507_s29, %s13466_s20, %s13465_s12, %s13465_s12, %s13464_s0  }
 0x13f   : > { %s676_s19 = scalar_lea.vmem [#allocation16], %s11212_s18  ;;  %s10811_s15 = scalar_lea.hbm %s11539_s2, 32 }
 0x140   : > { %s684_s26 = sshll.u32 %s676_s19, 4  ;;  %p10812_p4 = scmp.ne.s32.totalorder %s11539_s2, %s10811_s15  ;;  %s685_s26 = int_to_ptr.vmem [resolvable:$true] %s684_s26 }
 0x141   : > { %s10816_s16 = scalar_lea.hbm %s13389_s9, 128  ;;  %p10817_p13 = scmp.lt.u32.totalorder %s11539_s2, %s13389_s9 }
 0x142   : > { %p10814_p6 = pnand %p10812_p4, %p13459_p10  ;;  %p10818_p7 = scmp.lt.u32.totalorder %s10816_s16, %s10811_s15 }
 0x143   : > { %p10820_p2 = scmp.lt.u32.totalorder %s10811_s15, %s11539_s2 }
 0x144   : > { %p10815_p1 = pneg %p10814_p6  ;;  %p10819_p5 = por %p10818_p7, %p10817_p13 }
 0x146   : > { %p10821_p3 = por %p10820_p2, %p10819_p5 }
 0x148   : > { %p10822_p12 = pnand %p10821_p3, %p10815_p1 }
 0x14a   : > { %10825 = shalt.err (!%p10822_p12)
}
 0x14b   : > { %s10826_s25 = scalar_lea.vmem %s685_s26, 32  ;;  %s11017_s0 = smov [#allocation16]  }
 0x14c   : > { %p10827_p9 = scmp.ne.s32.totalorder %s685_s26, %s10826_s25  ;;  %s10831_s12 = sshll.u32 %s11017_s0, 4  ;;  %s10832_s12 = int_to_ptr.vmem [resolvable:$false] %s10831_s12 }
 0x14d   : > { %s10833_s20 = scalar_lea.vmem %s10832_s12, 64  ;;  %p10834_p4 = scmp.lt.s32.totalorder %s685_s26, %s10832_s12 }
 0x14e   : > { %p10829_p0 = pnand %p10827_p9, %p13459_p10  ;;  %p10835_p6 = scmp.lt.s32.totalorder %s10833_s20, %s10826_s25 }
 0x150   : > { %p10830_p11 = pneg %p10829_p0  ;;  %p10836_p8 = por %p10835_p6, %p10834_p4 }
 0x152   : > { %p10837_p7 = pnand %p10836_p8, %p10830_p11 }
 0x154   : > { %10840 = shalt.err (!%p10837_p7)
}
 0x155   : > { %p13467_p13 = scmp.ne.s32.totalorder %s13448_s28, 0  ;;  %s13468_s17 = scalar_lea.sflag [#allocation15], %s11177_s27 }
 0x156   : > { %s13469_s15 = sld [smem:[#allocation45_spill]]  ;;  %s714_s30 = scalar_lea.vmem [#allocation19], %s11212_s18 }
 0x157   : > { %9750 = dma.hbm_to_vmem [thread:$0]  (!%p13467_p13), %s11539_s2, 32, %s685_s26, %s13468_s17  }
 0x158   : > { %s722_s16 = sshll.u32 %s714_s30, 4  ;;  %s723_s16 = int_to_ptr.vmem [resolvable:$true] %s722_s16 }
 0x15c   : > { %s11565_s21 = scalar_lea.hbm %s13469_s15, %s11222_s11  ;;  %s10846_s2 = scalar_lea.hbm %s13469_s15, 128 }
 0x15d   : > { %s10841_s29 = scalar_lea.hbm %s11565_s21, 32  ;;  %p10847_p2 = scmp.lt.u32.totalorder %s11565_s21, %s13469_s15 }
 0x15e   : > { %p10842_p8 = scmp.ne.s32.totalorder %s11565_s21, %s10841_s29  ;;  %p10848_p3 = scmp.lt.u32.totalorder %s10846_s2, %s10841_s29 }
 0x15f   : > { %p10850_p9 = scmp.lt.u32.totalorder %s10841_s29, %s11565_s21 }
 0x160   : > { %p10844_p1 = pnand %p10842_p8, %p13459_p10  ;;  %p10849_p12 = por %p10848_p3, %p10847_p2 }
 0x162   : > { %p10845_p5 = pneg %p10844_p1  ;;  %p10851_p0 = por %p10850_p9, %p10849_p12 }
 0x164   : > { %p10852_p11 = pnand %p10851_p0, %p10845_p5 }
 0x166   : > { %10855 = shalt.err (!%p10852_p11)
}
 0x167   : > { %s10856_s12 = scalar_lea.vmem %s723_s16, 32  ;;  %s11018_s20 = smov [#allocation19]  }
 0x168   : > { %p10857_p4 = scmp.ne.s32.totalorder %s723_s16, %s10856_s12  ;;  %s10861_s17 = sshll.u32 %s11018_s20, 4  ;;  %s10862_s17 = int_to_ptr.vmem [resolvable:$false] %s10861_s17 }
 0x169   : > { %s10863_s24 = scalar_lea.vmem %s10862_s17, 64  ;;  %p10864_p8 = scmp.lt.s32.totalorder %s723_s16, %s10862_s17 }
 0x16a   : > { %p10859_p6 = pnand %p10857_p4, %p13459_p10  ;;  %p10865_p1 = scmp.lt.s32.totalorder %s10863_s24, %s10856_s12 }
 0x16c   : > { %p10860_p7 = pneg %p10859_p6  ;;  %p10866_p13 = por %p10865_p1, %p10864_p8 }
 0x16e   : > { %p10867_p2 = pnand %p10866_p13, %p10860_p7 }
 0x170   : > { %10870 = shalt.err (!%p10867_p2)
}
 0x171   : > { %p13470_p3 = scmp.ne.s32.totalorder %s13448_s28, 0  ;;  %s13471_s19 = scalar_lea.sflag [#allocation18], %s11177_s27 }
 0x172   : > { %s13472_s22 = sld [smem:[#allocation46_spill]]  ;;  %s733_s26 = scalar_lea.vmem [#allocation20], %s11212_s18 }
 0x173   : > { %9756 = dma.hbm_to_vmem [thread:$0]  (!%p13470_p3), %s11565_s21, 32, %s723_s16, %s13471_s19  }
 0x174   : > { %s741_s0 = sshll.u32 %s733_s26, 4  ;;  %s730_s12 = scalar_lea.sflag [#allocation21], %s11177_s27  ;;  %s742_s0 = int_to_ptr.vmem [resolvable:$true] %s741_s0 }
 0x178   : > { %s13473_s25 = smov %s13472_s22  ;;  %s11591_s2 = scalar_lea.hbm %s13472_s22, %s11222_s11 }
 0x179   : > { %s10871_s20 = scalar_lea.hbm %s11591_s2, 32  ;;  %s10876_s16 = scalar_lea.hbm %s13473_s25, 128 }
 0x17a   : > { %p10872_p13 = scmp.ne.s32.totalorder %s11591_s2, %s10871_s20  ;;  %p10877_p9 = scmp.lt.u32.totalorder %s11591_s2, %s13473_s25 }
 0x17b   : > { %p10878_p0 = scmp.lt.u32.totalorder %s10876_s16, %s10871_s20  ;;  %p10880_p4 = scmp.lt.u32.totalorder %s10871_s20, %s11591_s2 }
 0x17c   : > { %p10874_p5 = pnand %p10872_p13, %p13459_p10 }
 0x17d   : > { %p10879_p11 = por %p10878_p0, %p10877_p9 }
 0x17e   : > { %p10875_p12 = pneg %p10874_p5 }
 0x17f   : > { %p10881_p6 = por %p10880_p4, %p10879_p11 }
 0x181   : > { %p10882_p7 = pnand %p10881_p6, %p10875_p12 }
 0x183   : > { %10885 = shalt.err (!%p10882_p7)
}
 0x184   : > { %s10886_s27 = scalar_lea.vmem %s742_s0, 32  ;;  %s11019_s18 = smov [#allocation20]  }
 0x185   : > { %p10887_p8 = scmp.ne.s32.totalorder %s742_s0, %s10886_s27  ;;  %s10891_s19 = sshll.u32 %s11019_s18, 4  ;;  %s10892_s19 = int_to_ptr.vmem [resolvable:$false] %s10891_s19 }
 0x186   : > { %s10893_s30 = scalar_lea.vmem %s10892_s19, 64  ;;  %p10894_p13 = scmp.lt.s32.totalorder %s742_s0, %s10892_s19 }
 0x187   : > { %p10889_p1 = pnand %p10887_p8, %p13459_p10  ;;  %p10895_p5 = scmp.lt.s32.totalorder %s10893_s30, %s10886_s27 }
 0x189   : > { %p10890_p2 = pneg %p10889_p1  ;;  %p10896_p3 = por %p10895_p5, %p10894_p13 }
 0x18b   : > { %p10897_p0 = pnand %p10896_p3, %p10890_p2 }
 0x18d   : > { %10900 = shalt.err (!%p10897_p0)
}
 0x18e   : > { %p13474_p9 = scmp.ne.s32.totalorder %s13448_s28, 0  ;;  %s13475_s29 = sld [smem:[#allocation42_spill]] }
 0x190   : > { %9759 = dma.hbm_to_vmem [thread:$0]  (!%p13474_p9), %s11591_s2, 32, %s742_s0, %s730_s12  }
 0x194   : > { %p13476_p12 = scmp.ne.s32.totalorder %s13475_s29, 0 }
 0x195   : > { %s13477_s22 = sld [smem:[#allocation36_spill]] (!%p13476_p12)  ;;  %s13478_s23 = sld [smem:[#allocation41_spill]] (!%p13476_p12) }
 0x196   : > { %750 = sbr.rel (%p13476_p12) target bundleno = 3436 (0xd6c), region = 80 }
 0x19b   : > { %s752_s26 = sand.u32 (!%p13476_p12), 1, %s13477_s22   ;;  %p13479_p10 = scmp.ne.s32.totalorder (!%p13476_p12), %s13478_s23, 0 }
 0x19c   : > { %s9678_s20 = smul.u32 (!%p13476_p12), 768, %s752_s26  ;;  %s753_s17 = scalar_lea.sflag (!%p13476_p12), [#allocation3], %s752_s26 }
 0x19e   : > { %s11615_s21 = scalar_lea.vmem [#allocation2], %s9678_s20 }
 0x19f   : > { %10944 = dma.done.wait (%p13479_p10), %s753_s17, 12288  }
 0x1a0   : > { %10946 = vsyncadd (%p13479_p10), %s753_s17, 4294955008  ;;  %s13480_s16 = sld [smem:[#allocation38_spill]]  ;;  %s9679_s2 = smul.u32 6, %s752_s26 }
 0x1a2   : > { %s11625_s12 = scalar_lea.vmem [#allocation5], %s9679_s2 }
 0x1a6   : > { %s11622_s28 = sand.u32 1, %s13480_s16  }
 0x1a7   : > { %s762_s0 = scalar_lea.sflag [#allocation6], %s11622_s28 }
 0x1a8   : > { %10948 = dma.done.wait (%p13479_p10), %s762_s0, 4192  }
 0x1a9   : > { %10950 = vsyncadd (%p13479_p10), %s762_s0, 4294963104  ;;  %s8787_s24 = sshll.u32 %s752_s26, 8  ;;  %s11631_s11 = sshll.u32 %s752_s26, 1 }
 0x1aa   : > { %s11633_s27 = scalar_lea.vmem [#allocation7], %s8787_s24  ;;  %s780_s18 = scalar_lea.sflag [#allocation9], %s11622_s28 }
 0x1ab   : > { %s783_s19 = scalar_lea.vmem [#allocation8], %s11631_s11 }
 0x1ac   : > { %10952 = dma.done.wait (%p13479_p10), %s780_s18, 32800  }
 0x1ad   : > { %10954 = vsyncadd (%p13479_p10), %s780_s18, 4294934496  ;;  %s8789_s30 = sshll.u32 %s752_s26, 11  ;;  %s8790_s29 = sshll.u32 %s752_s26, 4 }
 0x1ae   : > { %s11641_s22 = scalar_lea.vmem [#allocation10], %s8789_s30  ;;  %s798_s20 = scalar_lea.sflag [#allocation12], %s11622_s28 }
 0x1af   : > { %s11644_s17 = scalar_lea.vmem [#allocation11], %s8790_s29 }
 0x1b0   : > { %10956 = dma.done.wait (%p13479_p10), %s798_s20, 33024  }
 0x1b1   : > { %10958 = vsyncadd (%p13479_p10), %s798_s20, 4294934272  ;;  %s11650_s2 = scalar_lea.vmem [#allocation13], %s8789_s30  ;;  %s816_s0 = scalar_lea.sflag [#allocation15], %s11622_s28 }
 0x1b2   : > { %10960 = dma.done.wait (%p13479_p10), %s816_s0, 64  }
 0x1b3   : > { %10962 = vsyncadd (%p13479_p10), %s816_s0, 4294967232  ;;  %s834_s18 = scalar_lea.sflag [#allocation18], %s11622_s28 }
 0x1b4   : > { %10964 = dma.done.wait (%p13479_p10), %s834_s18, 64  }
 0x1b5   : > { %10966 = vsyncadd (%p13479_p10), %s834_s18, 4294967232  ;;  %s852_s20 = scalar_lea.sflag [#allocation21], %s11622_s28 }
 0x1b6   : > { %10968 = dma.done.wait (%p13479_p10), %s852_s20, 32  }
 0x1b7   : > { %10970 = vsyncadd (%p13479_p10), %s852_s20, 4294967264  ;;  %p13481_p3 = scmp.eq.s32.totalorder %s13480_s16, 0 }
 0x1b9   : > { %10972 = dma.done.wait (%p13481_p3), [#allocation21], 2048   ;;  %p13482_p11 = pmov %p13481_p3 }
 0x1ba   : > { %p13483_p4 = pmov %p13481_p3 }
 0x1bb   : > { %10974 = vsyncadd (%p13482_p11), [#allocation21], 4294965248 }
 0x1bc   : > { %10976 = dma.done.wait (%p13483_p4), [#allocation24], 16   ;;  %p13484_p6 = pmov %p13481_p3 }
 0x1bd   : > { %p13485_p7 = scmp.ne.s32.totalorder %s13480_s16, 0 }
 0x1be   : > { %10978 = vsyncadd (%p13484_p6), [#allocation24], 4294967280  ;;  %s13486_s18 = sld [smem:[#allocation43_spill]] (!%p13485_p7) }
 0x1bf   : > { %966 = sbr.rel (%p13485_p7) target bundleno = 455 (0x1c7), region = 140 }
 0x1c4   : > { %v967_v0 = vld [vmem:[%s13486_s18] sm:$0xff] (!%p13485_p7)  ;;  %v968_v1 = vld [vmem:[%s13486_s18 + $0x8] sm:$0xff] (!%p13485_p7)  ;;  %v969_v2 = vld [vmem:[%s13486_s18 + $0x10] sm:$0xff] (!%p13485_p7) }
 0x1c5   : > { %971 = vst [vmem:[#allocation25] sm:$0xff] (!%p13485_p7), %v967_v0  ;;  %972 = vst [vmem:[#allocation25 + $0x8] sm:$0xff] (!%p13485_p7), %v968_v1  ;;  %v970_v3 = vld [vmem:[%s13486_s18 + $0x18] sm:$0xff] (!%p13485_p7) }
 0x1c6   : > { %973 = vst [vmem:[#allocation25 + $0x10] sm:$0xff] %v969_v2  ;;  %974 = vst [vmem:[#allocation25 + $0x18] sm:$0xff] %v970_v3 }
 0x1c7 PF: > { %v9815_v4 = vld [vmem:[%s11615_s21 + $0x4] ss:$24 sps:$4 sm:$0xff]   ;;  %v9817_v5 = vld [vmem:[%s11615_s21] ss:$24 sps:$4 sm:$0xff]   ;;  %v9818_v6 = vld [vmem:[%s11615_s21 + $0x34] ss:$24 sps:$4 sm:$0xff]  }
 0x1c8   : > { %1589 = vmatprep.subr.bf16.mxu1 %v9815_v4  ;;  %v9820_v7 = vld [vmem:[%s11615_s21 + $0x30] ss:$24 sps:$4 sm:$0xff]   ;;  %v9821_v8 = vld [vmem:[%s11615_s21 + $0x64] ss:$24 sps:$4 sm:$0xff]   ;;  %v9823_v9 = vld [vmem:[%s11615_s21 + $0x60] ss:$24 sps:$4 sm:$0xff]  }
 0x1c9   : > { %1590 = vmatpush1.bf16.msra.mxu1 %v9817_v5  ;;  %v9824_v10 = vld [vmem:[%s11615_s21 + $0x94] ss:$24 sps:$4 sm:$0xff]   ;;  %v9826_v11 = vld [vmem:[%s11615_s21 + $0x90] ss:$24 sps:$4 sm:$0xff]   ;;  %v9827_v12 = vld [vmem:[%s11615_s21 + $0xc4] ss:$24 sps:$4 sm:$0xff]  }
 0x1ca   : > { %1591 = vmatprep.subr.bf16.mxu1 %v9818_v6  ;;  %v9829_v13 = vld [vmem:[%s11615_s21 + $0xc0] ss:$24 sps:$4 sm:$0xff]   ;;  %v9830_v14 = vld [vmem:[%s11615_s21 + $0xf4] ss:$24 sps:$4 sm:$0xff]   ;;  %v9832_v15 = vld [vmem:[%s11615_s21 + $0xf0] ss:$24 sps:$4 sm:$0xff]  }
 0x1cb   : > { %v9833_v16 = vld [vmem:[%s11615_s21 + $0x124] ss:$24 sps:$4 sm:$0xff]   ;;  %v9835_v20 = vld [vmem:[%s11615_s21 + $0x120] ss:$24 sps:$4 sm:$0xff]   ;;  %v9836_v21 = vld [vmem:[%s11615_s21 + $0x154] ss:$24 sps:$4 sm:$0xff]  }
 0x1cc   : > { %v9838_v22 = vld [vmem:[%s11615_s21 + $0x150] ss:$24 sps:$4 sm:$0xff]   ;;  %v9839_v23 = vld [vmem:[%s11615_s21 + $0x184] ss:$24 sps:$4 sm:$0xff]   ;;  %v9841_v24 = vld [vmem:[%s11615_s21 + $0x180] ss:$24 sps:$4 sm:$0xff]  }
 0x1cd   : > { %1592 = vmatpush1.bf16.msra.mxu1 %v9820_v7  ;;  %v976_v17 = vld [vmem:[#allocation25 + $0x8] sm:$0xff]  ;;  %v978_v18 = vld [vmem:[#allocation25 + $0x18] sm:$0xff]  ;;  %v975_v39 = vld [vmem:[#allocation25] sm:$0xff]  ;;  %s13499_s16 = scalar_lea.vmem [#allocation17], %s11631_s11 }
 0x1ce   : > { %1593 = vmatprep.subr.bf16.mxu1 %v9821_v8  ;;  %v11707_v19 = vpack.c.bf16 %v978_v18, %v976_v17  ;;  %v9842_v25 = vld [vmem:[%s11615_s21 + $0x1b4] ss:$24 sps:$4 sm:$0xff]   ;;  %v9844_v26 = vld [vmem:[%s11615_s21 + $0x1b0] ss:$24 sps:$4 sm:$0xff]   ;;  %v9845_v27 = vld [vmem:[%s11615_s21 + $0x1e4] ss:$24 sps:$4 sm:$0xff]  }
 0x1cf   : > { %v9847_v28 = vld [vmem:[%s11615_s21 + $0x1e0] ss:$24 sps:$4 sm:$0xff]   ;;  %v9848_v29 = vld [vmem:[%s11615_s21 + $0x214] ss:$24 sps:$4 sm:$0xff]   ;;  %v9850_v30 = vld [vmem:[%s11615_s21 + $0x210] ss:$24 sps:$4 sm:$0xff]  }
 0x1d0   : > { %1621 = vmatprep.mubr.bf16.mxu1 %v11707_v19  ;;  %v9851_v31 = vld [vmem:[%s11615_s21 + $0x244] ss:$24 sps:$4 sm:$0xff]   ;;  %v9853_v32 = vld [vmem:[%s11615_s21 + $0x240] ss:$24 sps:$4 sm:$0xff]   ;;  %v9854_v33 = vld [vmem:[%s11615_s21 + $0x274] ss:$24 sps:$4 sm:$0xff]  }
 0x1d1   : > { %1594 = vmatpush1.bf16.msra.mxu1 %v9823_v9  ;;  %v9856_v34 = vld [vmem:[%s11615_s21 + $0x270] ss:$24 sps:$4 sm:$0xff]   ;;  %v9857_v35 = vld [vmem:[%s11615_s21 + $0x2a4] ss:$24 sps:$4 sm:$0xff]   ;;  %v9859_v36 = vld [vmem:[%s11615_s21 + $0x2a0] ss:$24 sps:$4 sm:$0xff]  }
 0x1d2   : > { %1595 = vmatprep.subr.bf16.mxu1 %v9824_v10  ;;  %v9860_v37 = vld [vmem:[%s11615_s21 + $0x2d4] ss:$24 sps:$4 sm:$0xff]   ;;  %v9862_v38 = vld [vmem:[%s11615_s21 + $0x2d0] ss:$24 sps:$4 sm:$0xff]   ;;  %v1079_v10 = vlaneseq }
 0x1d3   : > { %v977_v40 = vld [vmem:[#allocation25 + $0x10] sm:$0xff]  ;;  %v9865_v41 = vld [vmem:[%s11615_s21 + $0xc] ss:$24 sps:$4 sm:$0xff]   ;;  %v9863_v42 = vld [vmem:[%s11615_s21 + $0x8] ss:$24 sps:$4 sm:$0xff]  }
 0x1d4   : > { %v11731_v43 = vpack.c.bf16 %v977_v40, %v975_v39  ;;  %v9868_v44 = vld [vmem:[%s11615_s21 + $0x3c] ss:$24 sps:$4 sm:$0xff]   ;;  %v9866_v45 = vld [vmem:[%s11615_s21 + $0x38] ss:$24 sps:$4 sm:$0xff]   ;;  %v9871_v46 = vld [vmem:[%s11615_s21 + $0x6c] ss:$24 sps:$4 sm:$0xff]  }
 0x1d5   : > { %1596 = vmatpush1.bf16.msra.mxu1 %v9826_v11  ;;  %v9869_v47 = vld [vmem:[%s11615_s21 + $0x68] ss:$24 sps:$4 sm:$0xff]   ;;  %v9874_v48 = vld [vmem:[%s11615_s21 + $0x9c] ss:$24 sps:$4 sm:$0xff]   ;;  %v9872_v49 = vld [vmem:[%s11615_s21 + $0x98] ss:$24 sps:$4 sm:$0xff]  }
 0x1d6   : > { %1597 = vmatprep.subr.bf16.mxu1 %v9827_v12  ;;  %v9877_v50 = vld [vmem:[%s11615_s21 + $0xcc] ss:$24 sps:$4 sm:$0xff]   ;;  %v9875_v51 = vld [vmem:[%s11615_s21 + $0xc8] ss:$24 sps:$4 sm:$0xff]   ;;  %v9880_v52 = vld [vmem:[%s11615_s21 + $0xfc] ss:$24 sps:$4 sm:$0xff]  }
 0x1d7   : > { %v9878_v53 = vld [vmem:[%s11615_s21 + $0xf8] ss:$24 sps:$4 sm:$0xff]   ;;  %v9883_v54 = vld [vmem:[%s11615_s21 + $0x12c] ss:$24 sps:$4 sm:$0xff]   ;;  %v9881_v55 = vld [vmem:[%s11615_s21 + $0x128] ss:$24 sps:$4 sm:$0xff]  }
 0x1d8   : > { %v9886_v56 = vld [vmem:[%s11615_s21 + $0x15c] ss:$24 sps:$4 sm:$0xff]   ;;  %v9884_v57 = vld [vmem:[%s11615_s21 + $0x158] ss:$24 sps:$4 sm:$0xff]   ;;  %v9889_v58 = vld [vmem:[%s11615_s21 + $0x18c] ss:$24 sps:$4 sm:$0xff]  }
 0x1d9   : > { %1598 = vmatpush1.bf16.msra.mxu1 %v9829_v13  ;;  %v9887_v59 = vld [vmem:[%s11615_s21 + $0x188] ss:$24 sps:$4 sm:$0xff]   ;;  %v9892_v60 = vld [vmem:[%s11615_s21 + $0x1bc] ss:$24 sps:$4 sm:$0xff]   ;;  %v9890_v61 = vld [vmem:[%s11615_s21 + $0x1b8] ss:$24 sps:$4 sm:$0xff]  }
 0x1da   : > { %1599 = vmatprep.subr.bf16.mxu1 %v9830_v14  ;;  %v9895_v62 = vld [vmem:[%s11615_s21 + $0x1ec] ss:$24 sps:$4 sm:$0xff]   ;;  %v9893_v63 = vld [vmem:[%s11615_s21 + $0x1e8] ss:$24 sps:$4 sm:$0xff]   ;;  %v9898_v0 = vld [vmem:[%s11615_s21 + $0x21c] ss:$24 sps:$4 sm:$0xff]  }
 0x1db   : > { %v9896_v1 = vld [vmem:[%s11615_s21 + $0x218] ss:$24 sps:$4 sm:$0xff]   ;;  %v9901_v2 = vld [vmem:[%s11615_s21 + $0x24c] ss:$24 sps:$4 sm:$0xff]   ;;  %v9899_v3 = vld [vmem:[%s11615_s21 + $0x248] ss:$24 sps:$4 sm:$0xff]  }
 0x1dc   : > { %v9904_v4 = vld [vmem:[%s11615_s21 + $0x27c] ss:$24 sps:$4 sm:$0xff]   ;;  %v9902_v5 = vld [vmem:[%s11615_s21 + $0x278] ss:$24 sps:$4 sm:$0xff]   ;;  %v9907_v6 = vld [vmem:[%s11615_s21 + $0x2ac] ss:$24 sps:$4 sm:$0xff]  }
 0x1dd   : > { %1600 = vmatpush1.bf16.msra.mxu1 %v9832_v15  ;;  %v9905_v7 = vld [vmem:[%s11615_s21 + $0x2a8] ss:$24 sps:$4 sm:$0xff]   ;;  %v9910_v8 = vld [vmem:[%s11615_s21 + $0x2dc] ss:$24 sps:$4 sm:$0xff]   ;;  %v9908_v9 = vld [vmem:[%s11615_s21 + $0x2d8] ss:$24 sps:$4 sm:$0xff]  }
 0x1de   : > { %1601 = vmatprep.subr.bf16.mxu1 %v9833_v16  ;;  %v11767_v11 = vshrl.u32 %v1079_v10, 7  ;;  %v11770_v13 = vand.u32 127, %v1079_v10 }
 0x1e0   : > { %v1735_v12 = vadd.s32 128, %v11767_v11  ;;  %v1736_v14 = vadd.s32 136, %v11767_v11  ;;  %v11774_v15 = vmul.u32 64, %v11770_v13  ;;  %v1786_v16 = vadd.s32 1, %v11770_v13 }
 0x1e1   : > { %1602 = vmatpush1.bf16.msra.mxu1 %v9835_v20  ;;  %v1720_v18 = vadd.s32 8, %v11767_v11  ;;  %v1738_v20 = vadd.s32 152, %v11767_v11  ;;  %v1730_v39 = vadd.s32 88, %v11767_v11  ;;  %v1747_v40 = vadd.s32 224, %v11767_v11 }
 0x1e2   : > { %1603 = vmatprep.subr.bf16.mxu1 %v9836_v21  ;;  %vm1770_vm0 = vcmp.ge.s32.totalorder %v1735_v12, %v11774_v15  ;;  %v11778_v17 = vmul.u32 64, %v1786_v16  ;;  %vm1771_vm1 = vcmp.ge.s32.totalorder %v1736_v14, %v11774_v15  ;;  %vm1754_vm5 = vcmp.ge.s32.totalorder %v11767_v11, %v11774_v15 }
 0x1e3   : > { %vm1755_vm8 = vcmp.ge.s32.totalorder %v1720_v18, %v11774_v15  ;;  %v11020_v21 = vmov 1.0|1.0   ;;  %vm1773_vm15 = vcmp.ge.s32.totalorder %v1738_v20, %v11774_v15 }
 0x1e4   : > { %vm1804_vm2 = vcmp.lt.s32.totalorder %v1735_v12, %v11778_v17  ;;  %vm1805_vm3 = vcmp.lt.s32.totalorder %v1736_v14, %v11778_v17  ;;  %vm1788_vm6 = vcmp.lt.s32.totalorder %v11767_v11, %v11778_v17  ;;  %vm1789_vm9 = vcmp.lt.s32.totalorder %v1720_v18, %v11778_v17 }
 0x1e5   : > { %1604 = vmatpush1.bf16.msra.mxu1 %v9838_v22  ;;  %vm1836_vm4 = vmand %vm1770_vm0, %vm1804_vm2  ;;  %vm1807_vm0 = vcmp.lt.s32.totalorder %v1738_v20, %v11778_v17  ;;  %v1721_v22 = vadd.s32 16, %v11767_v11 }
 0x1e6   : > { %1605 = vmatprep.subr.bf16.mxu1 %v9839_v23  ;;  %vm1837_vm7 = vmand %vm1771_vm1, %vm1805_vm3  ;;  %v1722_v23 = vadd.s32 24, %v11767_v11 }
 0x1e7   : > { %vm9610_vm10 = vmpackc.low %vm1837_vm7, %vm1836_vm4  ;;  %vm1790_vm7 = vcmp.lt.s32.totalorder %v1721_v22, %v11778_v17 }
 0x1e8   : > { %9611 = vmatprep.subr.msk.bf16.mxu0 %vm9610_vm10, %v11020_v21  ;;  %vm1820_vm11 = vmand %vm1754_vm5, %vm1788_vm6  ;;  %vm1756_vm5 = vcmp.ge.s32.totalorder %v1721_v22, %v11774_v15  ;;  %vm1757_vm6 = vcmp.ge.s32.totalorder %v1722_v23, %v11774_v15 }
 0x1e9   : > { %1606 = vmatpush1.bf16.msra.mxu1 %v9841_v24  ;;  %vm1821_vm14 = vmand %vm1755_vm8, %vm1789_vm9  ;;  %vm1791_vm8 = vcmp.lt.s32.totalorder %v1722_v23, %v11778_v17  ;;  %v1739_v24 = vadd.s32 160, %v11767_v11 }
 0x1ea   : > { %1607 = vmatprep.subr.bf16.mxu1 %v9842_v25  ;;  %vm9612_vm2 = vmpackc.low %vm1821_vm14, %vm1820_vm11  ;;  %v1740_v25 = vadd.s32 168, %v11767_v11 }
 0x1eb   : > { %9613 = vmatpush3.bf16.msk.msra.mxu0 %vm9612_vm2, %v11020_v21  ;;  %vm1839_vm3 = vmand %vm1773_vm15, %vm1807_vm0  ;;  %vm1808_vm14 = vcmp.lt.s32.totalorder %v1739_v24, %v11778_v17 }
 0x1ec   : > { %vm1822_vm9 = vmand %vm1756_vm5, %vm1790_vm7  ;;  %vm1809_vm15 = vcmp.lt.s32.totalorder %v1740_v25, %v11778_v17 }
 0x1ed   : > { %1608 = vmatpush1.bf16.msra.mxu1 %v9844_v26  ;;  %vm1823_vm10 = vmand %vm1757_vm6, %vm1791_vm8  ;;  %v1723_v26 = vadd.s32 32, %v11767_v11 }
 0x1ee   : > { %1609 = vmatprep.subr.bf16.mxu1 %v9845_v27  ;;  %vm9616_vm11 = vmpackc.low %vm1823_vm10, %vm1822_vm9  ;;  %v1724_v27 = vadd.s32 40, %v11767_v11 }
 0x1ef   : > { %vm1758_vm2 = vcmp.ge.s32.totalorder %v1723_v26, %v11774_v15 }
 0x1f0   : > { %vm1793_vm5 = vcmp.lt.s32.totalorder %v1724_v27, %v11778_v17 }
 0x1f1   : > { %1610 = vmatpush1.bf16.msra.mxu1 %v9847_v28  ;;  %v1741_v28 = vadd.s32 176, %v11767_v11 }
 0x1f2   : > { %1611 = vmatprep.subr.bf16.mxu1 %v9848_v29  ;;  %v1742_v29 = vadd.s32 184, %v11767_v11 }
 0x1f3   : > { %vm1776_vm8 = vcmp.ge.s32.totalorder %v1741_v28, %v11774_v15  ;;  %vm1810_vm9 = vcmp.lt.s32.totalorder %v1741_v28, %v11778_v17 }
 0x1f5   : > { %1612 = vmatpush1.bf16.msra.mxu1 %v9850_v30  ;;  %v1725_v30 = vadd.s32 48, %v11767_v11 }
 0x1f6   : > { %1613 = vmatprep.subr.bf16.mxu1 %v9851_v31  ;;  %v1726_v31 = vadd.s32 56, %v11767_v11 }
 0x1f9   : > { %1614 = vmatpush1.bf16.msra.mxu1 %v9853_v32  ;;  %v1743_v32 = vadd.s32 192, %v11767_v11 }
 0x1fa   : > { %1615 = vmatprep.subr.bf16.mxu1 %v9854_v33  ;;  %v1744_v33 = vadd.s32 200, %v11767_v11 }
 0x1fd   : > { %1616 = vmatpush1.bf16.msra.mxu1 %v9856_v34  ;;  %v1727_v34 = vadd.s32 64, %v11767_v11 }
 0x1fe   : > { %1617 = vmatprep.subr.bf16.mxu1 %v9857_v35  ;;  %v1728_v35 = vadd.s32 72, %v11767_v11 }
 0x201   : > { %1618 = vmatpush1.bf16.msra.mxu1 %v9859_v36  ;;  %v1745_v36 = vadd.s32 208, %v11767_v11 }
 0x202   : > { %1619 = vmatprep.subr.bf16.mxu1 %v9860_v37  ;;  %v1746_v37 = vadd.s32 216, %v11767_v11 }
 0x205   : > { %1620 = vmatpush1.bf16.msra.mxu1 %v9862_v38  ;;  %v1729_v38 = vadd.s32 80, %v11767_v11 }
 0x206   : > { %1632 = vmatprep.subr.bf16.mxu1 %v9865_v41  ;;  %v1748_v41 = vadd.s32 232, %v11767_v11 }
 0x208   : > { %1622 = vmatmul.mubr.bf16.vlgmr.msra.gmra.mrb[0].mxu1 %v11731_v43 }
 0x209   : > { %1633 = vmatpush1.bf16.msra.mxu1 %v9863_v42  ;;  %1664 = vmatprep.mubr.bf16.mxu1 %v11707_v19  ;;  %v1731_v42 = vadd.s32 96, %v11767_v11 }
 0x20a   : > { %1634 = vmatprep.subr.bf16.mxu1 %v9868_v44  ;;  %v1732_v44 = vadd.s32 104, %v11767_v11 }
 0x20d   : > { %1635 = vmatpush1.bf16.msra.mxu1 %v9866_v45  ;;  %v1749_v45 = vadd.s32 240, %v11767_v11 }
 0x20e   : > { %1636 = vmatprep.subr.bf16.mxu1 %v9871_v46  ;;  %v1750_v46 = vadd.s32 248, %v11767_v11 }
 0x211   : > { %1637 = vmatpush1.bf16.msra.mxu1 %v9869_v47  ;;  %v1733_v47 = vadd.s32 112, %v11767_v11 }
 0x212   : > { %1638 = vmatprep.subr.bf16.mxu1 %v9874_v48  ;;  %v1734_v48 = vadd.s32 120, %v11767_v11 }
 0x215   : > { %1639 = vmatpush1.bf16.msra.mxu1 %v9872_v49  ;;  %v9911_v49 = vld [vmem:[%s11615_s21 + $0x10] ss:$24 sps:$4 sm:$0xff]  }
 0x216   : > { %1640 = vmatprep.subr.bf16.mxu1 %v9877_v50  ;;  %v9913_v50 = vld [vmem:[%s11615_s21 + $0x14] ss:$24 sps:$4 sm:$0xff]  }
 0x219   : > { %1641 = vmatpush1.bf16.msra.mxu1 %v9875_v51  ;;  %v9916_v51 = vld [vmem:[%s11615_s21 + $0x44] ss:$24 sps:$4 sm:$0xff]  }
 0x21a   : > { %1642 = vmatprep.subr.bf16.mxu1 %v9880_v52  ;;  %v9914_v52 = vld [vmem:[%s11615_s21 + $0x40] ss:$24 sps:$4 sm:$0xff]  }
 0x21d   : > { %1643 = vmatpush1.bf16.msra.mxu1 %v9878_v53  ;;  %v11895_v53 = vsub.s32 0, %v11767_v11 }
 0x21e   : > { %1644 = vmatprep.subr.bf16.mxu1 %v9883_v54  ;;  %v1077_v54 = vld [vmem:[%s11625_s12] sm:$0x3f] }
 0x221   : > { %1645 = vmatpush1.bf16.msra.mxu1 %v9881_v55  ;;  %v11899_v55 = vsub.s32 1, %v11767_v11 }
 0x222   : > { %1646 = vmatprep.subr.bf16.mxu1 %v9886_v56  ;;  %v1082_v56 = vrot.slane %v1077_v54, %v11895_v53 }
 0x225   : > { %1647 = vmatpush1.bf16.msra.mxu1 %v9884_v57  ;;  %v1086_v57 = vrot.slane %v1077_v54, %v11899_v55 }
 0x226   : > { %1648 = vmatprep.subr.bf16.mxu1 %v9889_v58 }
 0x229   : > { %1649 = vmatpush1.bf16.msra.mxu1 %v9887_v59 }
 0x22a   : > { %1650 = vmatprep.subr.bf16.mxu1 %v9892_v60 }
 0x22d   : > { %1651 = vmatpush1.bf16.msra.mxu1 %v9890_v61 }
 0x22e   : > { %1652 = vmatprep.subr.bf16.mxu1 %v9895_v62 }
 0x231   : > { %1653 = vmatpush1.bf16.msra.mxu1 %v9893_v63 }
 0x232   : > { %1654 = vmatprep.subr.bf16.mxu1 %v9898_v0 }
 0x235   : > { %1655 = vmatpush1.bf16.msra.mxu1 %v9896_v1 }
 0x236   : > { %1656 = vmatprep.subr.bf16.mxu1 %v9901_v2 }
 0x239   : > { %1657 = vmatpush1.bf16.msra.mxu1 %v9899_v3 }
 0x23a   : > { %1658 = vmatprep.subr.bf16.mxu1 %v9904_v4 }
 0x23d   : > { %1659 = vmatpush1.bf16.msra.mxu1 %v9902_v5 }
 0x23e   : > { %1660 = vmatprep.subr.bf16.mxu1 %v9907_v6  ;;  %v11021_v6 = vmov 1966171168  }
 0x241   : > { %1661 = vmatpush1.bf16.msra.mxu1 %v9905_v7  ;;  %v1937_v7 = vunpack.c.l.s4 %v11021_v6 }
 0x242   : > { %1662 = vmatprep.subr.bf16.mxu1 %v9910_v8 }
 0x243   : > { %v1938_v8 = vunpack.c.0.s8 %v1937_v7 }
 0x245   : > { %1663 = vmatpush1.bf16.msra.mxu1 %v9908_v9  ;;  %v1941_v9 = vsub.s32 %v1938_v8, %v11767_v11 }
 0x246   : > { %1675 = vmatprep.subr.bf16.mxu1 %v9913_v50 }
 0x248   : > { %1665 = vmatmul.mubr.bf16.vlgmr.msra.gmra.mrb[4].mxu1 %v11731_v43 }
 0x249   : > { %1707 = vmatprep.mubr.bf16.mxu1 %v11707_v19  ;;  %v1737_v19 = vadd.s32 144, %v11767_v11  ;;  %1676 = vmatpush1.bf16.msra.mxu1 %v9911_v49 }
 0x24a   : > { %1677 = vmatprep.subr.bf16.mxu1 %v9916_v51 }
 0x24b   : > { %vm1772_vm12 = vcmp.ge.s32.totalorder %v1737_v19, %v11774_v15  ;;  %vm1806_vm13 = vcmp.lt.s32.totalorder %v1737_v19, %v11778_v17 }
 0x24c   : > { %vm1838_vm1 = vmand %vm1772_vm12, %vm1806_vm13  ;;  %vm1774_vm12 = vcmp.ge.s32.totalorder %v1739_v24, %v11774_v15  ;;  %vm1775_vm13 = vcmp.ge.s32.totalorder %v1740_v25, %v11774_v15  ;;  %v11912_v24 = vsub.s32 3, %v11767_v11 }
 0x24d   : > { %vm9614_vm4 = vmpackc.low %vm1839_vm3, %vm1838_vm1  ;;  %vm1792_vm1 = vcmp.lt.s32.totalorder %v1723_v26, %v11778_v17  ;;  %1678 = vmatpush1.bf16.msra.mxu1 %v9914_v52 }
 0x24e   : > { %9615 = vmatprep.subr.msk.bf16.mxu0 %vm9614_vm4, %v11020_v21  ;;  %vm1840_vm0 = vmand %vm1774_vm12, %vm1808_vm14  ;;  %vm1759_vm4 = vcmp.ge.s32.totalorder %v1724_v27, %v11774_v15  ;;  %vm1811_vm12 = vcmp.lt.s32.totalorder %v1742_v29, %v11778_v17 }
 0x24f   : > { %9617 = vmatpush3.bf16.msk.msra.mxu0 %vm9616_vm11, %v11020_v21  ;;  %vm1841_vm3 = vmand %vm1775_vm13, %vm1809_vm15  ;;  %vm1777_vm11 = vcmp.ge.s32.totalorder %v1742_v29, %v11774_v15  ;;  %vm1760_vm15 = vcmp.ge.s32.totalorder %v1725_v30, %v11774_v15 }
 0x250   : > { %vm9618_vm6 = vmpackc.low %vm1841_vm3, %vm1840_vm0  ;;  %vm1794_vm0 = vcmp.lt.s32.totalorder %v1725_v30, %v11778_v17  ;;  %vm1795_vm3 = vcmp.lt.s32.totalorder %v1726_v31, %v11778_v17 }
 0x251   : > { %9619 = vmatprep.subr.msk.bf16.mxu0 %vm9618_vm6, %v11020_v21  ;;  %vm1824_vm7 = vmand %vm1758_vm2, %vm1792_vm1  ;;  %vm1761_vm1 = vcmp.ge.s32.totalorder %v1726_v31, %v11774_v15  ;;  %vm1778_vm6 = vcmp.ge.s32.totalorder %v1743_v32, %v11774_v15 }
 0x252   : > { %vm1825_vm10 = vmand %vm1759_vm4, %vm1793_vm5 }
 0x253   : > { %vm9620_vm13 = vmpackc.low %vm1825_vm10, %vm1824_vm7  ;;  %vm1812_vm7 = vcmp.lt.s32.totalorder %v1743_v32, %v11778_v17  ;;  %vm1813_vm10 = vcmp.lt.s32.totalorder %v1744_v33, %v11778_v17 }
 0x254   : > { %9621 = vmatpush3.bf16.msk.msra.mxu0 %vm9620_vm13, %v11020_v21  ;;  %vm1842_vm14 = vmand %vm1776_vm8, %vm1810_vm9  ;;  %vm1779_vm9 = vcmp.ge.s32.totalorder %v1744_v33, %v11774_v15  ;;  %vm1762_vm13 = vcmp.ge.s32.totalorder %v1727_v34, %v11774_v15 }
 0x255   : > { %vm1843_vm2 = vmand %vm1777_vm11, %vm1811_vm12 }
 0x256   : > { %vm9622_vm4 = vmpackc.low %vm1843_vm2, %vm1842_vm14  ;;  %vm1796_vm14 = vcmp.lt.s32.totalorder %v1727_v34, %v11778_v17  ;;  %vm1797_vm2 = vcmp.lt.s32.totalorder %v1728_v35, %v11778_v17 }
 0x257   : > { %9623 = vmatprep.subr.msk.bf16.mxu0 %vm9622_vm4, %v11020_v21  ;;  %vm1826_vm5 = vmand %vm1760_vm15, %vm1794_vm0  ;;  %vm1763_vm0 = vcmp.ge.s32.totalorder %v1728_v35, %v11774_v15  ;;  %vm1780_vm4 = vcmp.ge.s32.totalorder %v1745_v36, %v11774_v15  ;;  %v1094_v35 = vrot.slane %v1077_v54, %v11912_v24 }
 0x258   : > { %vm1827_vm8 = vmand %vm1761_vm1, %vm1795_vm3 }
 0x259   : > { %vm9624_vm11 = vmpackc.low %vm1827_vm8, %vm1826_vm5  ;;  %vm1814_vm5 = vcmp.lt.s32.totalorder %v1745_v36, %v11778_v17  ;;  %vm1815_vm8 = vcmp.lt.s32.totalorder %v1746_v37, %v11778_v17 }
 0x25a   : > { %9625 = vmatpush3.bf16.msk.msra.mxu0 %vm9624_vm11, %v11020_v21  ;;  %vm1844_vm12 = vmand %vm1778_vm6, %vm1812_vm7  ;;  %vm1781_vm7 = vcmp.ge.s32.totalorder %v1746_v37, %v11774_v15  ;;  %vm1764_vm11 = vcmp.ge.s32.totalorder %v1729_v38, %v11774_v15 }
 0x25b   : > { %vm1845_vm15 = vmand %vm1779_vm9, %vm1813_vm10 }
 0x25c   : > { %vm9626_vm1 = vmpackc.low %vm1845_vm15, %vm1844_vm12  ;;  %vm1798_vm12 = vcmp.lt.s32.totalorder %v1729_v38, %v11778_v17  ;;  %vm1799_vm15 = vcmp.lt.s32.totalorder %v1730_v39, %v11778_v17 }
 0x25d   : > { %9627 = vmatprep.subr.msk.bf16.mxu0 %vm9626_vm1, %v11020_v21  ;;  %vm1828_vm3 = vmand %vm1762_vm13, %vm1796_vm14  ;;  %vm1765_vm14 = vcmp.ge.s32.totalorder %v1730_v39, %v11774_v15  ;;  %vm1782_vm1 = vcmp.ge.s32.totalorder %v1747_v40, %v11774_v15 }
 0x25e   : > { %vm1829_vm6 = vmand %vm1763_vm0, %vm1797_vm2 }
 0x25f   : > { %vm9628_vm9 = vmpackc.low %vm1829_vm6, %vm1828_vm3  ;;  %vm1816_vm3 = vcmp.lt.s32.totalorder %v1747_v40, %v11778_v17  ;;  %vm1817_vm6 = vcmp.lt.s32.totalorder %v1748_v41, %v11778_v17 }
 0x260   : > { %9629 = vmatpush3.bf16.msk.msra.mxu0 %vm9628_vm9, %v11020_v21  ;;  %vm1846_vm10 = vmand %vm1780_vm4, %vm1814_vm5  ;;  %vm1783_vm5 = vcmp.ge.s32.totalorder %v1748_v41, %v11774_v15  ;;  %vm1766_vm9 = vcmp.ge.s32.totalorder %v1731_v42, %v11774_v15 }
 0x261   : > { %vm1847_vm13 = vmand %vm1781_vm7, %vm1815_vm8 }
 0x262   : > { %vm9630_vm0 = vmpackc.low %vm1847_vm13, %vm1846_vm10  ;;  %vm1800_vm10 = vcmp.lt.s32.totalorder %v1731_v42, %v11778_v17  ;;  %vm1801_vm13 = vcmp.lt.s32.totalorder %v1732_v44, %v11778_v17 }
 0x263   : > { %9631 = vmatprep.subr.msk.bf16.mxu0 %vm9630_vm0, %v11020_v21  ;;  %vm1830_vm2 = vmand %vm1764_vm11, %vm1798_vm12  ;;  %vm1767_vm12 = vcmp.ge.s32.totalorder %v1732_v44, %v11774_v15  ;;  %vm1784_vm0 = vcmp.ge.s32.totalorder %v1749_v45, %v11774_v15 }
 0x264   : > { %vm1831_vm4 = vmand %vm1765_vm14, %vm1799_vm15 }
 0x265   : > { %vm9632_vm7 = vmpackc.low %vm1831_vm4, %vm1830_vm2  ;;  %vm1818_vm2 = vcmp.lt.s32.totalorder %v1749_v45, %v11778_v17  ;;  %vm1819_vm4 = vcmp.lt.s32.totalorder %v1750_v46, %v11778_v17 }
 0x266   : > { %9633 = vmatpush3.bf16.msk.msra.mxu0 %vm9632_vm7, %v11020_v21  ;;  %vm1848_vm8 = vmand %vm1782_vm1, %vm1816_vm3  ;;  %vm1785_vm3 = vcmp.ge.s32.totalorder %v1750_v46, %v11774_v15  ;;  %vm1768_vm7 = vcmp.ge.s32.totalorder %v1733_v47, %v11774_v15 }
 0x267   : > { %vm1849_vm11 = vmand %vm1783_vm5, %vm1817_vm6 }
 0x268   : > { %vm9634_vm14 = vmpackc.low %vm1849_vm11, %vm1848_vm8  ;;  %vm1802_vm8 = vcmp.lt.s32.totalorder %v1733_v47, %v11778_v17  ;;  %vm1803_vm11 = vcmp.lt.s32.totalorder %v1734_v48, %v11778_v17  ;;  %v11022_v17 = vmov 1983009808  }
 0x269   : > { %9635 = vmatprep.subr.msk.bf16.mxu0 %vm9634_vm14, %v11020_v21  ;;  %vm1832_vm15 = vmand %vm1766_vm9, %vm1800_vm10  ;;  %vm1769_vm10 = vcmp.ge.s32.totalorder %v1734_v48, %v11774_v15  ;;  %v2041_v18 = vunpack.c.l.s4 %v11022_v17 }
 0x26a   : > { %vm1833_vm1 = vmand %vm1767_vm12, %vm1801_vm13 }
 0x26b   : > { %vm9636_vm5 = vmpackc.low %vm1833_vm1, %vm1832_vm15  ;;  %v2042_v27 = vunpack.c.0.s8 %v2041_v18 }
 0x26c   : > { %9637 = vmatpush3.bf16.msk.msra.mxu0 %vm9636_vm5, %v11020_v21  ;;  %vm1850_vm6 = vmand %vm1784_vm0, %vm1818_vm2 }
 0x26d   : > { %vm1851_vm9 = vmand %vm1785_vm3, %vm1819_vm4  ;;  %v11943_v39 = vsub.s32 %v2042_v27, %v11767_v11  ;;  %vm3157_vm3 = vcmask 1043456  }
 0x26e   : > { %vm9638_vm12 = vmpackc.low %vm1851_vm9, %vm1850_vm6  ;;  %vm3589_vm9 = vcmask 1041408  }
 0x26f   : > { %9639 = vmatprep.subr.msk.bf16.mxu0 %vm9638_vm12, %v11020_v21  ;;  %vm1834_vm13 = vmand %vm1768_vm7, %vm1802_vm8  ;;  %vm2759_vm7 = vcmask 25600   ;;  %vm3148_vm8 = vcmask 31744   ;;  %vm3958_vm12 = vcmask 1043459  }
 0x270   : > { %vm1835_vm14 = vmand %vm1769_vm10, %vm1803_vm11  ;;  %vm3954_vm10 = vcmask 1041409   ;;  %vm3956_vm11 = vcmask 1042434  }
 0x271   : > { %vm9640_vm15 = vmpackc.low %vm1835_vm14, %vm1834_vm13  ;;  %vm3960_vm13 = vcmask 1044484   ;;  %vm3962_vm14 = vcmask 1045509  }
 0x272   : > { %9641 = vmatpush3.bf16.msk.msra.mxu0 %vm9640_vm15, %v11020_v21  ;;  %v11907_v21 = vsub.s32 2, %v11767_v11  ;;  %vm3964_vm15 = vcmask 1046534  }
 0x274   : > { %v1090_v31 = vrot.slane %v1077_v54, %v11907_v21 }
 0x2db   : > { %v1623_v58 = vpop.f32.mrb[0].mxu1 }
 0x2dc   : > { %v1624_v59 = vadd.f32 %v1623_v58, %v1082_v56  ;;  %v1625_v60 = vpop.f32.mrb[1].mxu1 }
 0x2dd   : > { %v1626_v61 = vadd.f32 %v1625_v60, %v1086_v57  ;;  %v1627_v62 = vpop.f32.mrb[2].mxu1 }
 0x2de   : > { %v1628_v63 = vadd.f32 %v1627_v62, %v1082_v56  ;;  %v1629_v0 = vpop.f32.mrb[3].mxu1 }
 0x2df   : > { %v1934_v1 = vcombine.low %v1624_v59, %v1626_v61  ;;  %v1935_v2 = vcombine.high %v1624_v59, %v1626_v61  ;;  %v1630_v3 = vadd.f32 %v1629_v0, %v1086_v57 }
 0x2e1   : > { %v1984_v4 = vcombine.low %v1628_v63, %v1630_v3  ;;  %v1985_v5 = vcombine.high %v1628_v63, %v1630_v3  ;;  %v1949_v10 = vrot.slane %v1935_v2, %v1941_v9  ;;  %v1942_v12 = vrot.slane %v1934_v1, %v1941_v9 }
 0x2e3   : > { %v1951_v14 = vcombine.high %v1949_v10, %v1949_v10  ;;  %v1992_v15 = vrot.slane %v1984_v4, %v1941_v9  ;;  %v1999_v16 = vrot.slane %v1985_v5, %v1941_v9  ;;  %v1950_v19 = vcombine.high %v1942_v12, %v1942_v12 }
 0x2e4   : > { %v11904_v20 = vrot.slane %v1949_v10, %v1941_v9  ;;  %v11914_v25 = vrot.slane %v1942_v12, %v1941_v9 }
 0x2e5   : > { %v11909_v22 = vrot.slane %v1951_v14, %v1941_v9  ;;  %v2000_v23 = vcombine.high %v1992_v15, %v1992_v15  ;;  %v2001_v26 = vcombine.high %v1999_v16, %v1999_v16  ;;  %v11916_v28 = vrot.slane %v1950_v19, %v1941_v9 }
 0x2e6   : > { %v11920_v29 = vcombine.high %v11904_v20, %v11904_v20  ;;  %v11922_v30 = vrot.slane %v1992_v15, %v1941_v9  ;;  %v11929_v33 = vrot.slane %v1999_v16, %v1941_v9  ;;  %v11936_v36 = vcombine.high %v11914_v25, %v11914_v25 }
 0x2e7   : > { %v11927_v32 = vcombine.high %v11909_v22, %v11909_v22  ;;  %v11931_v34 = vrot.slane %v2000_v23, %v1941_v9  ;;  %v2077_v37 = vrot.slane %v11914_v25, %v11895_v53  ;;  %v11940_v38 = vrot.slane %v2001_v26, %v1941_v9 }
 0x2e8   : > { %v11947_v40 = vcombine.high %v11916_v28, %v11916_v28  ;;  %v2081_v41 = vrot.slane %v11914_v25, %v11899_v55  ;;  %v2109_v42 = vrot.slane %v11904_v20, %v11895_v53  ;;  %v2113_v44 = vrot.slane %v11904_v20, %v11899_v55 }
 0x2e9   : > { %v2121_v45 = vrot.slane %v11909_v22, %v11899_v55  ;;  %v2125_v46 = vrot.slane %v11920_v29, %v11895_v53  ;;  %v11963_v48 = vcombine.high %v11922_v30, %v11922_v30  ;;  %v11969_v50 = vcombine.high %v11929_v33, %v11929_v33 }
 0x2ea   : > { %v11973_v51 = vcombine.high %v11931_v34, %v11931_v34  ;;  %v2117_v52 = vrot.slane %v11909_v22, %v11895_v53  ;;  %v11979_v54 = vcombine.high %v11940_v38, %v11940_v38  ;;  %v2141_v56 = vrot.slane %v11922_v30, %v11895_v53 }
 0x2eb   : > { %v2145_v57 = vrot.slane %v11922_v30, %v11899_v55  ;;  %v2133_v59 = vrot.slane %v11927_v32, %v11895_v53  ;;  %v2157_v1 = vrot.slane %v11963_v48, %v11895_v53  ;;  %v2189_v7 = vrot.slane %v11969_v50, %v11895_v53 }
 0x2ec   : > { %v2149_v17 = vrot.slane %v11931_v34, %v11895_v53  ;;  %v2165_v18 = vrot.slane %v11973_v51, %v11895_v53  ;;  %v2181_v19 = vrot.slane %v11940_v38, %v11895_v53  ;;  %v2197_v20 = vrot.slane %v11979_v54, %v11895_v53 }
 0x31b   : > { %v1666_v58 = vpop.f32.mrb[4].mxu1 }
 0x31c   : > { %v1667_v63 = vadd.f32 %v1666_v58, %v1090_v31  ;;  %v1668_v0 = vpop.f32.mrb[5].mxu1  ;;  %v2093_v58 = vrot.slane %v11936_v36, %v11895_v53 }
 0x31d   : > { %v1669_v4 = vadd.f32 %v1668_v0, %v1094_v35  ;;  %v1670_v5 = vpop.f32.mrb[6].mxu1 }
 0x31e   : > { %v1671_v9 = vadd.f32 %v1670_v5, %v1090_v31  ;;  %v1672_v10 = vpop.f32.mrb[7].mxu1  ;;  %v2085_v31 = vrot.slane %v11916_v28, %v11895_v53 }
 0x31f   : > { %v2038_v14 = vcombine.low %v1667_v63, %v1669_v4  ;;  %v2039_v15 = vcombine.high %v1667_v63, %v1669_v4  ;;  %v1673_v16 = vadd.f32 %v1672_v10, %v1094_v35  ;;  %v2089_v35 = vrot.slane %v11916_v28, %v11899_v55 }
 0x320   : > { %v2097_v63 = vrot.slane %v11936_v36, %v11899_v55  ;;  %v2105_v28 = vrot.slane %v11947_v40, %v11899_v55 }
 0x321   : > { %v2046_v22 = vrot.slane %v2038_v14, %v11943_v39  ;;  %v2053_v23 = vrot.slane %v2039_v15, %v11943_v39  ;;  %v2056_v26 = vcombine.low %v1671_v9, %v1673_v16  ;;  %v2057_v27 = vcombine.high %v1671_v9, %v1673_v16 }
 0x322   : > { %v2101_v15 = vrot.slane %v11947_v40, %v11895_v53 }
 0x323   : > { %v2054_v0 = vcombine.high %v2046_v22, %v2046_v22  ;;  %v2055_v4 = vcombine.high %v2053_v23, %v2053_v23  ;;  %v2240_v5 = vrot.slane %v2046_v22, %v11943_v39  ;;  %v2256_v10 = vrot.slane %v2053_v23, %v11943_v39 }
 0x324   : > { %v2064_v9 = vrot.slane %v2056_v26, %v11943_v39  ;;  %v2071_v14 = vrot.slane %v2057_v27, %v11943_v39 }
 0x325   : > { %v2241_v16 = vcombine.high %v2240_v5, %v2240_v5  ;;  %v2248_v12 = vrot.slane %v2054_v0, %v11943_v39  ;;  %v2257_v36 = vcombine.high %v2256_v10, %v2256_v10  ;;  %v2264_v8 = vrot.slane %v2055_v4, %v11943_v39 }
 0x326   : > { %v2322_v6 = vmul.f32 %v2256_v10, %v2109_v42  ;;  %v2324_v22 = vmul.f32 %v2256_v10, %v2117_v52  ;;  %v2072_v2 = vcombine.high %v2064_v9, %v2064_v9  ;;  %v2073_v23 = vcombine.high %v2071_v14, %v2071_v14 }
 0x327   : > { %v2265_v49 = vcombine.high %v2264_v8, %v2264_v8  ;;  %v2323_v26 = vmul.f32 %v2257_v36, %v2113_v44  ;;  %v2325_v47 = vmul.f32 %v2257_v36, %v2121_v45  ;;  %v2326_v27 = vmul.f32 %v2264_v8, %v2125_v46 }
 0x328   : > { %v2328_v3 = vmul.f32 %v2264_v8, %v2133_v59  ;;  %v2272_v62 = vrot.slane %v2064_v9, %v11943_v39  ;;  %v2280_v61 = vrot.slane %v2072_v2, %v11943_v39  ;;  %v2288_v40 = vrot.slane %v2071_v14, %v11943_v39 }
 0x329   : > { %v2296_v0 = vrot.slane %v2073_v23, %v11943_v39  ;;  %v2249_v60 = vcombine.high %v2248_v12, %v2248_v12  ;;  %v2314_v42 = vmul.f32 %v2240_v5, %v2077_v37  ;;  %v2315_v44 = vmul.f32 %v2241_v16, %v2081_v41 }
 0x32a   : > { %v2273_v45 = vcombine.high %v2272_v62, %v2272_v62  ;;  %v2281_v46 = vcombine.high %v2280_v61, %v2280_v61  ;;  %v2289_v52 = vcombine.high %v2288_v40, %v2288_v40  ;;  %v2330_v59 = vmul.f32 %v2272_v62, %v2141_v56 }
 0x32b   : > { %v2297_v2 = vcombine.high %v2296_v0, %v2296_v0  ;;  %v2332_v8 = vmul.f32 %v2272_v62, %v2149_v17  ;;  %v2334_v4 = vmul.f32 %v2280_v61, %v2157_v1  ;;  %v2336_v10 = vmul.f32 %v2280_v61, %v2165_v18 }
 0x32c   : > { %v2331_v9 = vmul.f32 %v2273_v45, %v2145_v57  ;;  %v13487_v37 = vrot.slane %v11931_v34, %v11899_v55  ;;  %v13488_v41 = vrot.slane %v11929_v33, %v11895_v53  ;;  %v13489_v36 = vrot.slane %v11929_v33, %v11899_v55 }
 0x32d   : > { %v12060_v23 = vmul.f32 %v2288_v40, %v2181_v19  ;;  %v13490_v61 = vrot.slane %v11940_v38, %v11899_v55  ;;  %v12067_v30 = vmul.f32 %v2296_v0, %v2189_v7  ;;  %v12069_v57 = vmul.f32 %v2296_v0, %v2197_v20 }
 0x32e   : > { %v2333_v25 = vmul.f32 %v2273_v45, %v13487_v37  ;;  %v2338_v14 = vmul.f32 %v2288_v40, %v13488_v41  ;;  %v2339_v56 = vmul.f32 %v2289_v52, %v13489_v36  ;;  %v2316_v34 = vmul.f32 %v2240_v5, %v2085_v31 }
 0x32f   : > { %v12065_v62 = vmul.f32 %v2289_v52, %v13490_v61  ;;  %v2317_v1 = vmul.f32 %v2241_v16, %v2089_v35  ;;  %v2318_v17 = vmul.f32 %v2248_v12, %v2093_v58  ;;  %v2319_v18 = vmul.f32 %v2249_v60, %v2097_v63 }
 0x330   : > { %v2320_v45 = vmul.f32 %v2248_v12, %v2101_v15  ;;  %v2321_v37 = vmul.f32 %v2249_v60, %v2105_v28  ;;  %v2378_v41 = vcombine.low %v2314_v42, %v2315_v44  ;;  %v13491_v33 = vrot.slane %v11920_v29, %v11899_v55 }
 0x331   : > { %v2386_v40 = vcombine.low %v2316_v34, %v2317_v1  ;;  %v2394_v36 = vcombine.low %v2318_v17, %v2319_v18  ;;  %v13492_v38 = vrot.slane %v11927_v32, %v11899_v55  ;;  %v2410_v52 = vcombine.low %v2322_v6, %v2323_v26 }
 0x332   : > { %v2327_v19 = vmul.f32 %v2265_v49, %v13491_v33  ;;  %v2385_v20 = vrot.slane %v2378_v41, %v11943_v39  ;;  %v2402_v31 = vcombine.low %v2320_v45, %v2321_v37  ;;  %v2418_v35 = vcombine.low %v2324_v22, %v2325_v47 }
 0x333   : > { %v2329_v7 = vmul.f32 %v2265_v49, %v13492_v38  ;;  %v2393_v12 = vrot.slane %v2386_v40, %v11943_v39  ;;  %v2401_v60 = vrot.slane %v2394_v36, %v11943_v39  ;;  %v2417_v63 = vrot.slane %v2410_v52, %v11943_v39 }
 0x334   : > { %v2426_v58 = vcombine.low %v2326_v27, %v2327_v19  ;;  %v2409_v5 = vrot.slane %v2402_v31, %v11943_v39  ;;  %v2425_v15 = vrot.slane %v2418_v35, %v11943_v39  ;;  %v13493_v49 = vrot.slane %v11963_v48, %v11899_v55 }
 0x335   : > { %v2434_v29 = vcombine.low %v2328_v3, %v2329_v7  ;;  %v2506_v28 = vcombine.low %v2385_v20, %v2393_v12  ;;  %v13494_v16 = vrot.slane %v11973_v51, %v11899_v55  ;;  %v2442_v26 = vcombine.low %v2330_v59, %v2331_v9  ;;  %v9919_v12 = vld [vmem:[%s11615_s21 + $0x74] ss:$24 sps:$4 sm:$0xff]  }
 0x336   : > { %v2433_v32 = vrot.slane %v2426_v58, %v11943_v39  ;;  %v2335_v6 = vmul.f32 %v2281_v46, %v13493_v49  ;;  %v2507_v27 = vcombine.low %v2401_v60, %v2409_v5  ;;  %v2524_v3 = vcombine.low %v2417_v63, %v2425_v15  ;;  %v9917_v60 = vld [vmem:[%s11615_s21 + $0x70] ss:$24 sps:$4 sm:$0xff]   ;;  %1679 = vmatprep.subr.bf16.mxu1 %v9919_v12  ;;  %v9922_v63 = vld [vmem:[%s11615_s21 + $0xa4] ss:$24 sps:$4 sm:$0xff]   ;;  %v9925_v5 = vld [vmem:[%s11615_s21 + $0xd4] ss:$24 sps:$4 sm:$0xff]  }
 0x337   : > { %v2441_v47 = vrot.slane %v2434_v29, %v11943_v39  ;;  %v2337_v22 = vmul.f32 %v2281_v46, %v13494_v16  ;;  %v2450_v0 = vcombine.low %v2332_v8, %v2333_v25  ;;  %v2514_v44 = vrot.slane %v2506_v28, %v11943_v39  ;;  %1680 = vmatpush1.bf16.msra.mxu1 %v9917_v60  ;;  %v9920_v29 = vld [vmem:[%s11615_s21 + $0xa0] ss:$24 sps:$4 sm:$0xff]   ;;  %v9923_v15 = vld [vmem:[%s11615_s21 + $0xd0] ss:$24 sps:$4 sm:$0xff]  }
 0x338   : > { %v2458_v42 = vcombine.low %v2334_v4, %v2335_v6  ;;  %v2449_v34 = vrot.slane %v2442_v26, %v11943_v39  ;;  %v2521_v48 = vrot.slane %v2507_v27, %v11943_v39  ;;  %v2532_v17 = vrot.slane %v2524_v3, %v11943_v39  ;;  %1681 = vmatprep.subr.bf16.mxu1 %v9922_v63  ;;  %v9926_v49 = vld [vmem:[%s11615_s21 + $0x100] ss:$24 sps:$4 sm:$0xff]   ;;  %v9931_v6 = vld [vmem:[%s11615_s21 + $0x134] ss:$24 sps:$4 sm:$0xff]   ;;  %v9929_v28 = vld [vmem:[%s11615_s21 + $0x130] ss:$24 sps:$4 sm:$0xff]  }
 0x339   : > { %v2525_v61 = vcombine.low %v2433_v32, %v2441_v47  ;;  %v2466_v1 = vcombine.low %v2336_v10, %v2337_v22  ;;  %v2457_v18 = vrot.slane %v2450_v0, %v11943_v39  ;;  %v13495_v8 = vrot.slane %v11969_v50, %v11899_v55  ;;  %v9928_v32 = vld [vmem:[%s11615_s21 + $0x104] ss:$24 sps:$4 sm:$0xff]   ;;  %v9932_v16 = vld [vmem:[%s11615_s21 + $0x160] ss:$24 sps:$4 sm:$0xff]   ;;  %v9937_v22 = vld [vmem:[%s11615_s21 + $0x194] ss:$24 sps:$4 sm:$0xff]  }
 0x33a   : > { %v2465_v51 = vrot.slane %v2458_v42, %v11943_v39  ;;  %v13496_v9 = vrot.slane %v11979_v54, %v11899_v55  ;;  %v2523_v25 = vcombine.high %v2514_v44, %v2521_v48  ;;  %v2522_v45 = vcombine.low %v2514_v44, %v2521_v48  ;;  %v9934_v47 = vld [vmem:[%s11615_s21 + $0x164] ss:$24 sps:$4 sm:$0xff]   ;;  %v9935_v26 = vld [vmem:[%s11615_s21 + $0x190] ss:$24 sps:$4 sm:$0xff]   ;;  %v9938_v3 = vld [vmem:[%s11615_s21 + $0x1c0] ss:$24 sps:$4 sm:$0xff]  }
 0x33b   : > { %v2539_v46 = vrot.slane %v2525_v61, %v11943_v39  ;;  %v2473_v59 = vrot.slane %v2466_v1, %v11943_v39  ;;  %v2343_v4 = vmul.f32 %v2297_v2, %v13495_v8  ;;  %v2542_v37 = vcombine.low %v2449_v34, %v2457_v18  ;;  %1682 = vmatpush1.bf16.msra.mxu1 %v9920_v29  ;;  %v9940_v27 = vld [vmem:[%s11615_s21 + $0x1c4] ss:$24 sps:$4 sm:$0xff]   ;;  %v9943_v0 = vld [vmem:[%s11615_s21 + $0x1f4] ss:$24 sps:$4 sm:$0xff]   ;;  %v9941_v42 = vld [vmem:[%s11615_s21 + $0x1f0] ss:$24 sps:$4 sm:$0xff]  }
 0x33c   : > { %v2345_v10 = vmul.f32 %v2297_v2, %v13496_v9  ;;  %v2474_v41 = vcombine.low %v2338_v14, %v2339_v56  ;;  %v2482_v36 = vcombine.low %v12060_v23, %v12065_v62  ;;  %2650 = vmatprep.mubr.f32.mxu0 %v2523_v25  ;;  %1683 = vmatprep.subr.bf16.mxu1 %v9925_v5  ;;  %v9946_v44 = vld [vmem:[%s11615_s21 + $0x224] ss:$24 sps:$4 sm:$0xff]   ;;  %v9944_v61 = vld [vmem:[%s11615_s21 + $0x220] ss:$24 sps:$4 sm:$0xff]   ;;  %v9949_v34 = vld [vmem:[%s11615_s21 + $0x254] ss:$24 sps:$4 sm:$0xff]  }
 0x33d   : > { %v2541_v33 = vcombine.high %v2532_v17, %v2539_v46  ;;  %v2540_v19 = vcombine.low %v2532_v17, %v2539_v46  ;;  %v2543_v40 = vcombine.low %v2465_v51, %v2473_v59  ;;  %v2490_v50 = vcombine.low %v12067_v30, %v2343_v4  ;;  %2651 = vmatmul.mubr.f32.vlgmr.msra.gmra.mrb[0].mxu0 %v2522_v45  ;;  %v9947_v1 = vld [vmem:[%s11615_s21 + $0x250] ss:$24 sps:$4 sm:$0xff]   ;;  %v9952_v48 = vld [vmem:[%s11615_s21 + $0x284] ss:$24 sps:$4 sm:$0xff]   ;;  %v9950_v17 = vld [vmem:[%s11615_s21 + $0x280] ss:$24 sps:$4 sm:$0xff]  }
 0x33e   : > { %v2481_v38 = vrot.slane %v2474_v41, %v11943_v39  ;;  %v2498_v7 = vcombine.low %v12069_v57, %v2345_v10  ;;  %v2550_v54 = vrot.slane %v2542_v37, %v11943_v39  ;;  %v2489_v14 = vrot.slane %v2482_v36, %v11943_v39  ;;  %v9955_v18 = vld [vmem:[%s11615_s21 + $0x2b4] ss:$24 sps:$4 sm:$0xff]   ;;  %v9953_v51 = vld [vmem:[%s11615_s21 + $0x2b0] ss:$24 sps:$4 sm:$0xff]   ;;  %v9958_v46 = vld [vmem:[%s11615_s21 + $0x2e4] ss:$24 sps:$4 sm:$0xff]  }
 0x33f   : > { %v2557_v2 = vrot.slane %v2543_v40, %v11943_v39  ;;  %2655 = vmatprep.mubr.f32.mxu0 %v2541_v33  ;;  %v2497_v56 = vrot.slane %v2490_v50, %v11943_v39  ;;  %1684 = vmatpush1.bf16.msra.mxu1 %v9923_v15  ;;  %v9956_v59 = vld [vmem:[%s11615_s21 + $0x2e0] ss:$24 sps:$4 sm:$0xff]   ;;  %v1916_v8 = vadd.s32 128, %v11770_v13  ;;  %v1917_v4 = vmul.u32 64, %v11767_v11  ;;  %s13498_s21 = scalar_lea.vmem [#allocation16], %s11631_s11 }
 0x340   : > { %v2505_v23 = vrot.slane %v2498_v7, %v11943_v39  ;;  %v2560_v30 = vcombine.low %v2481_v38, %v2489_v14  ;;  %1685 = vmatprep.subr.bf16.mxu1 %v9928_v32  ;;  %v1920_v9 = vadd.s32 1, %v11767_v11  ;;  %v11023_v25 = vmov 0.0  }
 0x341   : > { %v2559_v62 = vcombine.high %v2550_v54, %v2557_v2  ;;  %v2558_v52 = vcombine.low %v2550_v54, %v2557_v2  ;;  %2656 = vmatmul.mubr.f32.gmra.mrb[2].mxu0 %v2540_v19  ;;  %vm1919_vm0 = vcmp.ge.s32.totalorder %v1916_v8, %v1917_v4  ;;  %vm1918_vm2 = vcmp.ge.s32.totalorder %v11770_v13, %v1917_v4 }
 0x342   : > { %v2561_v57 = vcombine.low %v2497_v56, %v2505_v23  ;;  %v2568_v20 = vrot.slane %v2560_v30, %v11943_v39  ;;  %v1921_v10 = vmul.u32 64, %v1920_v9 }
 0x343   : > { %2660 = vmatprep.mubr.f32.mxu0 %v2559_v62  ;;  %1686 = vmatpush1.bf16.msra.mxu1 %v9926_v49 }
 0x344   : > { %v2575_v31 = vrot.slane %v2561_v57, %v11943_v39  ;;  %1687 = vmatprep.subr.bf16.mxu1 %v9931_v6  ;;  %vm1923_vm1 = vcmp.lt.s32.totalorder %v1916_v8, %v1921_v10  ;;  %vm1922_vm4 = vcmp.lt.s32.totalorder %v11770_v13, %v1921_v10 }
 0x345   : > { %2661 = vmatmul.mubr.f32.gmra.mrb[4].mxu0 %v2558_v52  ;;  %vm1925_vm5 = vmand %vm1919_vm0, %vm1923_vm1  ;;  %vm3966_vm0 = vcmask 1047559  }
 0x346   : > { %v2577_v35 = vcombine.high %v2568_v20, %v2575_v31  ;;  %v2576_v58 = vcombine.low %v2568_v20, %v2575_v31  ;;  %v8929_v45 = vsel %vm1925_vm5, 1.0, %v11023_v25  ;;  %vm1924_vm6 = vmand %vm1918_vm2, %vm1922_vm4 }
 0x347   : > { %1688 = vmatpush1.bf16.msra.mxu1 %v9929_v28  ;;  %v8928_v37 = vsel %vm1924_vm6, 1.0, %v11023_v25 }
 0x348   : > { %2665 = vmatprep.mubr.f32.mxu0 %v2577_v35  ;;  %1689 = vmatprep.subr.bf16.mxu1 %v9934_v47 }
 0x349   : > { %2666 = vmatmul.mubr.f32.gmra.mrb[6].mxu0 %v2576_v58 }
 0x34b   : > { %1690 = vmatpush1.bf16.msra.mxu1 %v9932_v16 }
 0x34c   : > { %1691 = vmatprep.subr.bf16.mxu1 %v9937_v22 }
 0x34f   : > { %1692 = vmatpush1.bf16.msra.mxu1 %v9935_v26 }
 0x350   : > { %1693 = vmatprep.subr.bf16.mxu1 %v9940_v27 }
 0x353   : > { %1694 = vmatpush1.bf16.msra.mxu1 %v9938_v3 }
 0x354   : > { %1695 = vmatprep.subr.bf16.mxu1 %v9943_v0 }
 0x357   : > { %1696 = vmatpush1.bf16.msra.mxu1 %v9941_v42 }
 0x358   : > { %1697 = vmatprep.subr.bf16.mxu1 %v9946_v44 }
 0x35b   : > { %1698 = vmatpush1.bf16.msra.mxu1 %v9944_v61 }
 0x35c   : > { %1699 = vmatprep.subr.bf16.mxu1 %v9949_v34 }
 0x35f   : > { %1700 = vmatpush1.bf16.msra.mxu1 %v9947_v1 }
 0x360   : > { %1701 = vmatprep.subr.bf16.mxu1 %v9952_v48 }
 0x363   : > { %1702 = vmatpush1.bf16.msra.mxu1 %v9950_v17 }
 0x364   : > { %1703 = vmatprep.subr.bf16.mxu1 %v9955_v18 }
 0x367   : > { %1704 = vmatpush1.bf16.msra.mxu1 %v9953_v51 }
 0x368   : > { %1705 = vmatprep.subr.bf16.mxu1 %v9958_v46 }
 0x36b   : > { %1706 = vmatpush1.bf16.msra.mxu1 %v9956_v59 }
 0x36c   : > { %8962 = vmatprep.subr.msk.mxu1 %vm3157_vm3, %v8929_v45 }
 0x36e   : > { %1708 = vmatmul.mubr.bf16.vlgmr.msra.gmra.mrb[8].mxu1 %v11731_v43  ;;  %v9961_v43 = vld [vmem:[%s11633_s27 + $0x4] ss:$8 sps:$4 sm:$0xff]  }
 0x36f   : > { %3228 = vmatprep.mubr.f32.mxu1 %v11023_v25  ;;  %8963 = vmatpush1.msk.msra.mxu1 %vm3157_vm3, %v8928_v37 }
 0x370   : > { %4153 = vmatprep.subr.bf16.mxu1 %v9961_v43 }
 0x410   : > { %v9576_v41 = vpop.f32.mrb[0].mxu0 }
 0x411   : > { %v9577_v33 = vpop.f32.mrb[1].mxu0 }
 0x412   : > { %v9578_v19 = vadd.f32 %v9577_v33, %v9576_v41 }
 0x414   : > { %v2675_v40 = vcombine.high %v9578_v19, %v9578_v19  ;;  %v12156_v36 = vrot.slane %v9578_v19, %v11943_v39  ;;  %v9579_v38 = vpop.f32.mrb[2].mxu0 }
 0x415   : > { %v9580_v13 = vpop.f32.mrb[3].mxu0 }
 0x416   : > { %v12159_v50 = vrot.slane %v2675_v40, %v11943_v39  ;;  %v12163_v7 = vcombine.high %v12156_v36, %v12156_v36  ;;  %v2760_v54 = vsel %vm2759_vm7, %v12156_v36, -inf  ;;  %v9581_v2 = vadd.f32 %v9580_v13, %v9579_v38 }
 0x417   : > { %v2761_v14 = vrot.slane %v2760_v54, 4 }
 0x418   : > { %v12169_v56 = vcombine.high %v12159_v50, %v12159_v50  ;;  %v2767_v23 = vsel %vm2759_vm7, %v12163_v7, -inf  ;;  %v2774_v62 = vsel %vm2759_vm7, %v12159_v50, -inf  ;;  %v2692_v52 = vcombine.high %v9581_v2, %v9581_v2  ;;  %v9582_v30 = vpop.f32.mrb[4].mxu0 }
 0x419   : > { %v2762_v57 = vmax.f32 %v2760_v54, %v2761_v14  ;;  %v2768_v20 = vrot.slane %v2767_v23, 4  ;;  %v2775_v31 = vrot.slane %v2774_v62, 4  ;;  %v12176_v35 = vrot.slane %v9581_v2, %v11943_v39  ;;  %v9583_v58 = vpop.f32.mrb[5].mxu0 }
 0x41a   : > { %v2781_v12 = vsel %vm2759_vm7, %v12169_v56, -inf  ;;  %v12181_v60 = vrot.slane %v2692_v52, %v11943_v39  ;;  %v12183_v63 = vadd.f32 %v9583_v58, %v9582_v30 }
 0x41b   : > { %v2763_v29 = vrot.slane %v2762_v57, 2  ;;  %v2769_v5 = vmax.f32 %v2767_v23, %v2768_v20  ;;  %v2776_v15 = vmax.f32 %v2774_v62, %v2775_v31  ;;  %v2782_v32 = vrot.slane %v2781_v12, 4 }
 0x41c   : > { %v12187_v49 = vcombine.high %v12176_v35, %v12176_v35  ;;  %v12191_v6 = vcombine.high %v12181_v60, %v12181_v60  ;;  %v2788_v28 = vsel %vm2759_vm7, %v12176_v35, -inf  ;;  %v2802_v47 = vsel %vm2759_vm7, %v12181_v60, -inf  ;;  %v12197_v16 = vpop.f32.mrb[6].mxu0 }
 0x41d   : > { %v2764_v22 = vmax.f32 %v2762_v57, %v2763_v29  ;;  %v2770_v26 = vrot.slane %v2769_v5, 2  ;;  %v2777_v27 = vrot.slane %v2776_v15, 2  ;;  %v2783_v3 = vmax.f32 %v2781_v12, %v2782_v32  ;;  %v12199_v0 = vpop.f32.mrb[7].mxu0 }
 0x41e   : > { %v2789_v42 = vrot.slane %v2788_v28, 4  ;;  %v2795_v44 = vsel %vm2759_vm7, %v12187_v49, -inf  ;;  %v2803_v61 = vrot.slane %v2802_v47, 4  ;;  %v2809_v34 = vsel %vm2759_vm7, %v12191_v6, -inf }
 0x41f   : > { %v2765_v1 = vrot.slane %v2764_v22, 1  ;;  %v2771_v48 = vmax.f32 %v2769_v5, %v2770_v26  ;;  %v2778_v17 = vmax.f32 %v2776_v15, %v2777_v27  ;;  %v2784_v18 = vrot.slane %v2783_v3, 2 }
 0x420   : > { %v2790_v51 = vmax.f32 %v2788_v28, %v2789_v42  ;;  %v2796_v46 = vrot.slane %v2795_v44, 4  ;;  %v2804_v59 = vmax.f32 %v2802_v47, %v2803_v61  ;;  %v2810_v8 = vrot.slane %v2809_v34, 4 }
 0x421   : > { %v2766_v4 = vmax.f32 %v2764_v22, %v2765_v1  ;;  %v2772_v9 = vrot.slane %v2771_v48, 1  ;;  %v2779_v10 = vrot.slane %v2778_v17, 1  ;;  %v2785_v45 = vmax.f32 %v2783_v3, %v2784_v18 }
 0x422   : > { %v2791_v37 = vrot.slane %v2790_v51, 2  ;;  %v2797_v43 = vmax.f32 %v2795_v44, %v2796_v46  ;;  %v2805_v41 = vrot.slane %v2804_v59, 2  ;;  %v2811_v33 = vmax.f32 %v2809_v34, %v2810_v8 }
 0x423   : > { %v2773_v19 = vmax.f32 %v2771_v48, %v2772_v9  ;;  %v2780_v40 = vmax.f32 %v2778_v17, %v2779_v10  ;;  %v2786_v38 = vrot.slane %v2785_v45, 1  ;;  %v2872_v13 = vsub.f32 %v12156_v36, %v2766_v4 }
 0x424   : > { %v2792_v54 = vmax.f32 %v2790_v51, %v2791_v37  ;;  %v2798_v2 = vrot.slane %v2797_v43, 2  ;;  %v2806_v14 = vmax.f32 %v2804_v59, %v2805_v41  ;;  %v2812_v23 = vrot.slane %v2811_v33, 2 }
 0x425   : > { %v2787_v62 = vmax.f32 %v2785_v45, %v2786_v38  ;;  %v2873_v52 = vsub.f32 %v12163_v7, %v2773_v19  ;;  %v2874_v30 = vsub.f32 %v12159_v50, %v2780_v40  ;;  %v2888_v57 = vmul.f32 1.442695, %v2872_v13 }
 0x426   : > { %v2793_v20 = vrot.slane %v2792_v54, 1  ;;  %v2799_v31 = vmax.f32 %v2797_v43, %v2798_v2  ;;  %v2807_v58 = vrot.slane %v2806_v14, 1  ;;  %v2813_v12 = vmax.f32 %v2811_v33, %v2812_v23 }
 0x427   : > { %v2875_v29 = vsub.f32 %v12169_v56, %v2787_v62  ;;  %10391 = vpow2.f32 %v2888_v57  ;;  %v2890_v5 = vmul.f32 1.442695, %v2873_v52  ;;  %v2892_v15 = vmul.f32 1.442695, %v2874_v30 }
 0x428   : > { %v2794_v36 = vmax.f32 %v2792_v54, %v2793_v20  ;;  %v2800_v32 = vrot.slane %v2799_v31, 1  ;;  %v2808_v28 = vmax.f32 %v2806_v14, %v2807_v58  ;;  %v2814_v47 = vrot.slane %v2813_v12, 1 }
 0x429   : > { %10393 = vpow2.f32 %v2890_v5  ;;  %v2894_v22 = vmul.f32 1.442695, %v2875_v29  ;;  %v2709_v7 = vcombine.high %v12183_v63, %v12183_v63  ;;  %v12213_v50 = vrot.slane %v12183_v63, %v11943_v39 }
 0x42a   : > { %10395 = vpow2.f32 %v2892_v15  ;;  %v2801_v26 = vmax.f32 %v2799_v31, %v2800_v32  ;;  %v2815_v27 = vmax.f32 %v2813_v12, %v2814_v47  ;;  %v2876_v56 = vsub.f32 %v12176_v35, %v2794_v36 }
 0x42b   : > { %10397 = vpow2.f32 %v2894_v22  ;;  %v2878_v3 = vsub.f32 %v12181_v60, %v2808_v28  ;;  %v12218_v42 = vrot.slane %v2709_v7, %v11943_v39  ;;  %v12222_v44 = vcombine.high %v12213_v50, %v12213_v50 }
 0x42c   : > { %v2877_v61 = vsub.f32 %v12187_v49, %v2801_v26  ;;  %v2879_v63 = vsub.f32 %v12191_v6, %v2815_v27  ;;  %v2896_v34 = vmul.f32 1.442695, %v2876_v56  ;;  %v2816_v1 = vsel %vm2759_vm7, %v12213_v50, -inf }
 0x42d   : > { %v2900_v48 = vmul.f32 1.442695, %v2878_v3  ;;  %v12230_v35 = vcombine.high %v12218_v42, %v12218_v42  ;;  %v2817_v60 = vrot.slane %v2816_v1, 4  ;;  %v2823_v17 = vsel %vm2759_vm7, %v12222_v44, -inf }
 0x42e   : > { %10399 = vpow2.f32 %v2896_v34  ;;  %v2898_v18 = vmul.f32 1.442695, %v2877_v61  ;;  %v2902_v51 = vmul.f32 1.442695, %v2879_v63  ;;  %v2824_v46 = vrot.slane %v2823_v17, 4 }
 0x42f   : > { %10401 = vpow2.f32 %v2900_v48  ;;  %v2818_v49 = vmax.f32 %v2816_v1, %v2817_v60  ;;  %v2830_v6 = vsel %vm2759_vm7, %v12218_v42, -inf  ;;  %v2837_v59 = vsel %vm2759_vm7, %v12230_v35, -inf }
 0x430   : > { %10403 = vpow2.f32 %v2898_v18  ;;  %v2825_v8 = vmax.f32 %v2823_v17, %v2824_v46  ;;  %v2831_v4 = vrot.slane %v2830_v6, 4  ;;  %v2838_v9 = vrot.slane %v2837_v59, 4 }
 0x431   : > { %v12238_v10 = vpop.eup %10391  ;;  %10405 = vpow2.f32 %v2902_v51  ;;  %v2819_v45 = vrot.slane %v2818_v49, 2  ;;  %v12242_v37 = vadd.f32 %v12199_v0, %v12197_v16 }
 0x432   : > { %v2920_v43 = vsel %vm2759_vm7, %v12238_v10, 0.0  ;;  %v2826_v41 = vrot.slane %v2825_v8, 2  ;;  %v2832_v33 = vmax.f32 %v2830_v6, %v2831_v4  ;;  %v2839_v19 = vmax.f32 %v2837_v59, %v2838_v9 }
 0x433   : > { %v12246_v40 = vpop.eup %10393  ;;  %v2921_v38 = vrot.slane %v2920_v43, 4  ;;  %v2820_v13 = vmax.f32 %v2818_v49, %v2819_v45  ;;  %v2726_v54 = vcombine.high %v12242_v37, %v12242_v37 }
 0x434   : > { %v12250_v2 = vpop.eup %10395  ;;  %v2927_v14 = vsel %vm2759_vm7, %v12246_v40, 0.0  ;;  %v2827_v16 = vmax.f32 %v2825_v8, %v2826_v41  ;;  %v2833_v0 = vrot.slane %v2832_v33, 2  ;;  %v2840_v23 = vrot.slane %v2839_v19, 2 }
 0x435   : > { %v12254_v62 = vpop.eup %10397  ;;  %v2922_v52 = vadd.f32 %v2921_v38, %v2920_v43  ;;  %v2928_v30 = vrot.slane %v2927_v14, 4  ;;  %v2934_v57 = vsel %vm2759_vm7, %v12250_v2, 0.0  ;;  %v2821_v20 = vrot.slane %v2820_v13, 1 }
 0x436   : > { %v2935_v31 = vrot.slane %v2934_v57, 4  ;;  %v2941_v58 = vsel %vm2759_vm7, %v12254_v62, 0.0  ;;  %v2828_v12 = vrot.slane %v2827_v16, 1  ;;  %v2834_v29 = vmax.f32 %v2832_v33, %v2833_v0 }
 0x437   : > { %v2923_v5 = vrot.slane %v2922_v52, 2  ;;  %v2929_v15 = vadd.f32 %v2928_v30, %v2927_v14  ;;  %v2942_v36 = vrot.slane %v2941_v58, 4  ;;  %v2822_v32 = vmax.f32 %v2820_v13, %v2821_v20 }
 0x438   : > { %v12260_v28 = vpop.eup %10399  ;;  %v2936_v47 = vadd.f32 %v2935_v31, %v2934_v57  ;;  %v2829_v22 = vmax.f32 %v2827_v16, %v2828_v12  ;;  %v2835_v7 = vrot.slane %v2834_v29, 1  ;;  %v2841_v26 = vmax.f32 %v2839_v19, %v2840_v23 }
 0x439   : > { %v12262_v27 = vpop.eup %10401  ;;  %v2924_v56 = vadd.f32 %v2923_v5, %v2922_v52  ;;  %v2930_v3 = vrot.slane %v2929_v15, 2  ;;  %v2943_v61 = vadd.f32 %v2942_v36, %v2941_v58  ;;  %v2948_v63 = vsel %vm2759_vm7, %v12260_v28, 0.0 }
 0x43a   : > { %v12266_v34 = vpop.eup %10403  ;;  %v2937_v1 = vrot.slane %v2936_v47, 2  ;;  %v2949_v48 = vrot.slane %v2948_v63, 4  ;;  %v2962_v60 = vsel %vm2759_vm7, %v12262_v27, 0.0  ;;  %v2836_v17 = vmax.f32 %v2834_v29, %v2835_v7 }
 0x43b   : > { %v12270_v18 = vpop.eup %10405  ;;  %v2925_v51 = vrot.slane %v2924_v56, 1  ;;  %v2931_v46 = vadd.f32 %v2930_v3, %v2929_v15  ;;  %v2944_v49 = vrot.slane %v2943_v61, 2  ;;  %v2955_v6 = vsel %vm2759_vm7, %v12266_v34, 0.0 }
 0x43c   : > { %v2938_v59 = vadd.f32 %v2937_v1, %v2936_v47  ;;  %v2950_v8 = vadd.f32 %v2949_v48, %v2948_v63  ;;  %v2956_v4 = vrot.slane %v2955_v6, 4  ;;  %v2963_v9 = vrot.slane %v2962_v60, 4 }
 0x43d   : > { %v2926_v45 = vadd.f32 %v2925_v51, %v2924_v56  ;;  %v2932_v43 = vrot.slane %v2931_v46, 1  ;;  %v2945_v41 = vadd.f32 %v2944_v49, %v2943_v61  ;;  %v2969_v33 = vsel %vm2759_vm7, %v12270_v18, 0.0 }
 0x43e   : > { %v2939_v19 = vrot.slane %v2938_v59, 1  ;;  %v2951_v38 = vrot.slane %v2950_v8, 2  ;;  %v2957_v13 = vadd.f32 %v2956_v4, %v2955_v6  ;;  %v2964_v14 = vadd.f32 %v2963_v9, %v2962_v60 }
 0x43f   : > { %v2933_v16 = vadd.f32 %v2932_v43, %v2931_v46  ;;  %v2946_v0 = vrot.slane %v2945_v41, 1  ;;  %10407 = vrcp.f32 %v2926_v45  ;;  %v2970_v23 = vrot.slane %v2969_v33, 4 }
 0x440   : > { %v2940_v52 = vadd.f32 %v2939_v19, %v2938_v59  ;;  %v2952_v30 = vadd.f32 %v2951_v38, %v2950_v8  ;;  %v2958_v57 = vrot.slane %v2957_v13, 2  ;;  %v2965_v20 = vrot.slane %v2964_v14, 2 }
 0x441   : > { %v2947_v31 = vadd.f32 %v2946_v0, %v2945_v41  ;;  %10409 = vrcp.f32 %v2933_v16  ;;  %v2971_v58 = vadd.f32 %v2970_v23, %v2969_v33  ;;  %v2842_v12 = vrot.slane %v2841_v26, 1 }
 0x442   : > { %10411 = vrcp.f32 %v2940_v52  ;;  %v2959_v29 = vadd.f32 %v2958_v57, %v2957_v13  ;;  %v2966_v5 = vadd.f32 %v2965_v20, %v2964_v14  ;;  %v12278_v15 = vrot.slane %v12242_v37, %v11943_v39 }
 0x443   : > { %10413 = vrcp.f32 %v2947_v31  ;;  %v2972_v36 = vrot.slane %v2971_v58, 2  ;;  %v2843_v47 = vmax.f32 %v2841_v26, %v2842_v12  ;;  %v2880_v7 = vsub.f32 %v12213_v50, %v2822_v32 }
 0x444   : > { %v2953_v56 = vrot.slane %v2952_v30, 1  ;;  %v2960_v3 = vrot.slane %v2959_v29, 1  ;;  %v2967_v61 = vrot.slane %v2966_v5, 1  ;;  %v2881_v63 = vsub.f32 %v12222_v44, %v2829_v22 }
 0x445   : > { %v2973_v1 = vadd.f32 %v2972_v36, %v2971_v58  ;;  %v2882_v48 = vsub.f32 %v12218_v42, %v2836_v17  ;;  %v2883_v60 = vsub.f32 %v12230_v35, %v2843_v47  ;;  %v2904_v51 = vmul.f32 1.442695, %v2880_v7 }
 0x446   : > { %v2906_v46 = vmul.f32 1.442695, %v2881_v63  ;;  %v12288_v49 = vrot.slane %v2726_v54, %v11943_v39  ;;  %v12292_v50 = vcombine.high %v12278_v15, %v12278_v15  ;;  %v2844_v44 = vsel %vm2759_vm7, %v12278_v15, -inf }
 0x447   : > { %10415 = vpow2.f32 %v2904_v51  ;;  %v2908_v32 = vmul.f32 1.442695, %v2882_v48  ;;  %v2910_v42 = vmul.f32 1.442695, %v2883_v60  ;;  %v2845_v22 = vrot.slane %v2844_v44, 4 }
 0x448   : > { %10417 = vpow2.f32 %v2906_v46  ;;  %v12298_v35 = vcombine.high %v12288_v49, %v12288_v49  ;;  %v2851_v37 = vsel %vm2759_vm7, %v12292_v50, -inf  ;;  %v2858_v54 = vsel %vm2759_vm7, %v12288_v49, -inf }
 0x449   : > { %v10408_v26 = vpop.eup %10407  ;;  %10419 = vpow2.f32 %v2908_v32  ;;  %v2846_v17 = vmax.f32 %v2844_v44, %v2845_v22  ;;  %v2852_v6 = vrot.slane %v2851_v37, 4  ;;  %v2859_v59 = vrot.slane %v2858_v54, 4 }
 0x44a   : > { %v2954_v8 = vadd.f32 %v2953_v56, %v2952_v30  ;;  %10421 = vpow2.f32 %v2910_v42  ;;  %v2865_v4 = vsel %vm2759_vm7, %v12298_v35, -inf  ;;  %v3033_v9 = vmul.f32 %v10408_v26, %v12238_v10 }
 0x44b   : > { %v10410_v45 = vpop.eup %10409  ;;  %v2847_v43 = vrot.slane %v2846_v17, 2  ;;  %v2853_v41 = vmax.f32 %v2851_v37, %v2852_v6  ;;  %v2860_v33 = vmax.f32 %v2858_v54, %v2859_v59  ;;  %v2866_v19 = vrot.slane %v2865_v4, 4 }
 0x44c   : > { %v10412_v38 = vpop.eup %10411  ;;  %v3035_v13 = vmul.f32 %v10410_v45, %v12246_v40  ;;  %v2961_v14 = vadd.f32 %v2960_v3, %v2959_v29  ;;  %v2968_v16 = vadd.f32 %v2967_v61, %v2966_v5  ;;  %v2974_v0 = vrot.slane %v2973_v1, 1 }
 0x44d   : > { %v10414_v23 = vpop.eup %10413  ;;  %v2848_v52 = vmax.f32 %v2846_v17, %v2847_v43  ;;  %v2854_v30 = vrot.slane %v2853_v41, 2  ;;  %v2861_v57 = vrot.slane %v2860_v33, 2  ;;  %v2867_v20 = vmax.f32 %v2865_v4, %v2866_v19 }
 0x44e   : > { %v3037_v31 = vmul.f32 %v10412_v38, %v12250_v2  ;;  %v3039_v10 = vmul.f32 %v10414_v23, %v12254_v62  ;;  %v3080_v58 = vcombine.low %v3033_v9, %v3035_v13  ;;  %10423 = vrcp.f32 %v2954_v8  ;;  %v9959_v23 = vld [vmem:[%s11633_s27] ss:$8 sps:$4 sm:$0xff]  }
 0x44f   : > { %v2849_v12 = vrot.slane %v2848_v52, 1  ;;  %v2855_v36 = vmax.f32 %v2853_v41, %v2854_v30  ;;  %v2862_v47 = vmax.f32 %v2860_v33, %v2861_v57  ;;  %v2868_v7 = vrot.slane %v2867_v20, 2  ;;  %v9964_v57 = vld [vmem:[%s11633_s27 + $0x14] ss:$8 sps:$4 sm:$0xff]  }
 0x450   : > { %v3081_v56 = vcombine.low %v3037_v31, %v3039_v10  ;;  %v2975_v40 = vadd.f32 %v2974_v0, %v2973_v1  ;;  %10425 = vrcp.f32 %v2961_v14  ;;  %v3088_v62 = vrot.slane %v3080_v58, %v11943_v39 }
 0x451   : > { %v12310_v29 = vpop.eup %10415  ;;  %v2850_v5 = vmax.f32 %v2848_v52, %v2849_v12  ;;  %v2856_v3 = vrot.slane %v2855_v36, 1  ;;  %v2863_v61 = vrot.slane %v2862_v47, 1  ;;  %v2869_v63 = vmax.f32 %v2867_v20, %v2868_v7  ;;  %v9962_v7 = vld [vmem:[%s11633_s27 + $0x10] ss:$8 sps:$4 sm:$0xff]  }
 0x452   : > { %v12312_v48 = vpop.eup %10417  ;;  %v2976_v2 = vsel %vm2759_vm7, %v12310_v29, 0.0  ;;  %v3095_v60 = vrot.slane %v3081_v56, %v11943_v39  ;;  %10427 = vrcp.f32 %v2968_v16 }
 0x453   : > { %v12318_v51 = vpop.eup %10419  ;;  %v2977_v1 = vrot.slane %v2976_v2, 4  ;;  %v2983_v46 = vsel %vm2759_vm7, %v12312_v48, 0.0  ;;  %v2857_v44 = vmax.f32 %v2855_v36, %v2856_v3  ;;  %v2864_v32 = vmax.f32 %v2862_v47, %v2863_v61  ;;  %v9967_v3 = vld [vmem:[%s11633_s27 + $0x24] ss:$8 sps:$4 sm:$0xff]  }
 0x454   : > { %v12322_v42 = vpop.eup %10421  ;;  %v2984_v22 = vrot.slane %v2983_v46, 4  ;;  %v2990_v37 = vsel %vm2759_vm7, %v12318_v51, 0.0  ;;  %v2870_v54 = vrot.slane %v2869_v63, 1  ;;  %v2884_v26 = vsub.f32 %v12278_v15, %v2850_v5 }
 0x455   : > { %v2978_v17 = vadd.f32 %v2977_v1, %v2976_v2  ;;  %v2991_v6 = vrot.slane %v2990_v37, 4  ;;  %v2997_v59 = vsel %vm2759_vm7, %v12322_v42, 0.0  ;;  %v2885_v8 = vsub.f32 %v12292_v50, %v2857_v44  ;;  %v9970_v1 = vld [vmem:[%s11633_s27 + $0x34] ss:$8 sps:$4 sm:$0xff]  }
 0x456   : > { %v2985_v4 = vadd.f32 %v2984_v22, %v2983_v46  ;;  %v2998_v9 = vrot.slane %v2997_v59, 4  ;;  %v2871_v45 = vmax.f32 %v2869_v63, %v2870_v54  ;;  %v2886_v43 = vsub.f32 %v12288_v49, %v2864_v32 }
 0x457   : > { %v2979_v41 = vrot.slane %v2978_v17, 2  ;;  %v2992_v33 = vadd.f32 %v2991_v6, %v2990_v37  ;;  %v2912_v19 = vmul.f32 1.442695, %v2884_v26  ;;  %v2914_v38 = vmul.f32 1.442695, %v2885_v8 }
 0x458   : > { %v10424_v13 = vpop.eup %10423  ;;  %v2986_v15 = vrot.slane %v2985_v4, 2  ;;  %v2999_v14 = vadd.f32 %v2998_v9, %v2997_v59  ;;  %v2887_v16 = vsub.f32 %v12298_v35, %v2871_v45  ;;  %v2916_v0 = vmul.f32 1.442695, %v2886_v43  ;;  %v9968_v37 = vld [vmem:[%s11633_s27 + $0x30] ss:$8 sps:$4 sm:$0xff]  }
 0x459   : > { %v2980_v52 = vadd.f32 %v2979_v41, %v2978_v17  ;;  %v2993_v30 = vrot.slane %v2992_v33, 2  ;;  %10429 = vpow2.f32 %v2912_v19  ;;  %v3096_v50 = vcombine.low %v3088_v62, %v3095_v60  ;;  %v9965_v60 = vld [vmem:[%s11633_s27 + $0x20] ss:$8 sps:$4 sm:$0xff]  }
 0x45a   : > { %v10426_v20 = vpop.eup %10425  ;;  %v2987_v31 = vadd.f32 %v2986_v15, %v2985_v4  ;;  %v3000_v49 = vrot.slane %v2999_v14, 2  ;;  %10431 = vpow2.f32 %v2914_v38  ;;  %v2918_v10 = vmul.f32 1.442695, %v2887_v16 }
 0x45b   : > { %v2981_v58 = vrot.slane %v2980_v52, 1  ;;  %v2994_v12 = vadd.f32 %v2993_v30, %v2992_v33  ;;  %10433 = vpow2.f32 %v2916_v0  ;;  %8964 = vmatmul.mubr.msk.f32.vlgmr.msra.gmra.mrb[12].mxu1 %vm3148_vm8, %v3096_v50  ;;  %v3043_v46 = vmul.f32 %v10426_v20, %v12266_v34 }
 0x45c   : > { %v10428_v35 = vpop.eup %10427  ;;  %v2988_v36 = vrot.slane %v2987_v31, 1  ;;  %v3001_v47 = vadd.f32 %v3000_v49, %v2999_v14  ;;  %10435 = vpow2.f32 %v2918_v10  ;;  %3234 = vmatprep.mubr.f32.mxu1 %v11023_v25  ;;  %4154 = vmatpush1.bf16.msra.mxu1 %v9959_v23  ;;  %v3041_v22 = vmul.f32 %v10424_v13, %v12260_v28 }
 0x45d   : > { %v2982_v56 = vadd.f32 %v2981_v58, %v2980_v52  ;;  %v2995_v5 = vrot.slane %v2994_v12, 1  ;;  %10437 = vrcp.f32 %v2975_v40  ;;  %4155 = vmatprep.subr.bf16.mxu1 %v9964_v57  ;;  %v3045_v33 = vmul.f32 %v10428_v35, %v12262_v27 }
 0x45e   : > { %v2989_v61 = vadd.f32 %v2988_v36, %v2987_v31  ;;  %v3002_v63 = vrot.slane %v3001_v47, 1  ;;  %v3097_v8 = vcombine.low %v3041_v22, %v3043_v46 }
 0x45f   : > { %v2996_v2 = vadd.f32 %v2995_v5, %v2994_v12  ;;  %10439 = vrcp.f32 %v2982_v56 }
 0x460   : > { %v3003_v62 = vadd.f32 %v3002_v63, %v3001_v47  ;;  %10441 = vrcp.f32 %v2989_v61  ;;  %4156 = vmatpush1.bf16.msra.mxu1 %v9962_v7  ;;  %v3105_v52 = vrot.slane %v3097_v8, %v11943_v39 }
 0x461   : > { %10443 = vrcp.f32 %v2996_v2  ;;  %4157 = vmatprep.subr.bf16.mxu1 %v9967_v3 }
 0x462   : > { %10445 = vrcp.f32 %v3003_v62 }
 0x463   : > { %v12341_v44 = vpop.eup %10429 }
 0x464   : > { %v12343_v40 = vpop.eup %10431  ;;  %v3004_v32 = vsel %vm2759_vm7, %v12341_v44, 0.0  ;;  %4158 = vmatpush1.bf16.msra.mxu1 %v9965_v60 }
 0x465   : > { %v12349_v54 = vpop.eup %10433  ;;  %v3005_v26 = vrot.slane %v3004_v32, 4  ;;  %v3011_v17 = vsel %vm2759_vm7, %v12343_v40, 0.0  ;;  %4159 = vmatprep.subr.bf16.mxu1 %v9970_v1 }
 0x466   : > { %v12353_v34 = vpop.eup %10435  ;;  %v3012_v6 = vrot.slane %v3011_v17, 4  ;;  %v3018_v59 = vsel %vm2759_vm7, %v12349_v54, 0.0 }
 0x467   : > { %v10438_v4 = vpop.eup %10437  ;;  %v3006_v9 = vadd.f32 %v3005_v26, %v3004_v32  ;;  %v3019_v45 = vrot.slane %v3018_v59, 4  ;;  %v3025_v28 = vsel %vm2759_vm7, %v12353_v34, 0.0 }
 0x468   : > { %v3013_v43 = vadd.f32 %v3012_v6, %v3011_v17  ;;  %v3026_v41 = vrot.slane %v3025_v28, 4  ;;  %v3047_v19 = vmul.f32 %v10438_v4, %v12270_v18  ;;  %4160 = vmatpush1.bf16.msra.mxu1 %v9968_v37 }
 0x469   : > { %v10440_v38 = vpop.eup %10439  ;;  %v3007_v13 = vrot.slane %v3006_v9, 2  ;;  %v3020_v15 = vadd.f32 %v3019_v45, %v3018_v59  ;;  %v12381_v45 = vsub.s32 4, %v11767_v11 }
 0x46a   : > { %v10442_v14 = vpop.eup %10441  ;;  %v3014_v16 = vrot.slane %v3013_v43, 2  ;;  %v3027_v0 = vadd.f32 %v3026_v41, %v3025_v28  ;;  %v3098_v23 = vcombine.low %v3045_v33, %v3047_v19  ;;  %v3049_v20 = vmul.f32 %v10440_v38, %v12310_v29  ;;  %v1709_v28 = vpop.f32.mrb[8].mxu1 }
 0x46b   : > { %v10444_v30 = vpop.eup %10443  ;;  %v3008_v50 = vadd.f32 %v3007_v13, %v3006_v9  ;;  %v3021_v57 = vrot.slane %v3020_v15, 2  ;;  %v3051_v31 = vmul.f32 %v10442_v14, %v12312_v48  ;;  %v1711_v41 = vpop.f32.mrb[9].mxu1 }
 0x46c   : > { %v10446_v27 = vpop.eup %10445  ;;  %v3015_v49 = vadd.f32 %v3014_v16, %v3013_v43  ;;  %v3028_v18 = vrot.slane %v3027_v0, 2  ;;  %v3112_v10 = vrot.slane %v3098_v23, %v11943_v39  ;;  %v3053_v58 = vmul.f32 %v10444_v30, %v12318_v51  ;;  %v1713_v19 = vpop.f32.mrb[10].mxu1  ;;  %v9973_v30 = vld [vmem:[%s11633_s27 + $0x44] ss:$8 sps:$4 sm:$0xff]  }
 0x46d   : > { %v3009_v12 = vrot.slane %v3008_v50, 1  ;;  %v3022_v35 = vadd.f32 %v3021_v57, %v3020_v15  ;;  %v3055_v36 = vmul.f32 %v10446_v27, %v12322_v42  ;;  %v3114_v47 = vcombine.low %v3049_v20, %v3051_v31  ;;  %v1715_v13 = vpop.f32.mrb[11].mxu1  ;;  %4161 = vmatprep.subr.bf16.mxu1 %v9973_v30  ;;  %v9974_v57 = vld [vmem:[%s11633_s27 + $0x50] ss:$8 sps:$4 sm:$0xff]   ;;  %v9979_v20 = vld [vmem:[%s11633_s27 + $0x64] ss:$8 sps:$4 sm:$0xff]  }
 0x46e   : > { %v3016_v7 = vrot.slane %v3015_v49, 1  ;;  %v3029_v56 = vadd.f32 %v3028_v18, %v3027_v0  ;;  %v3113_v5 = vcombine.low %v3105_v52, %v3112_v10  ;;  %v9971_v52 = vld [vmem:[%s11633_s27 + $0x40] ss:$8 sps:$4 sm:$0xff]   ;;  %v9982_v27 = vld [vmem:[%s11633_s27 + $0x74] ss:$8 sps:$4 sm:$0xff]  }
 0x46f   : > { %v3010_v3 = vadd.f32 %v3009_v12, %v3008_v50  ;;  %v3023_v61 = vrot.slane %v3022_v35, 1  ;;  %v3115_v29 = vcombine.low %v3053_v58, %v3055_v36  ;;  %v3122_v2 = vrot.slane %v3114_v47, %v11943_v39  ;;  %4162 = vmatpush1.bf16.msra.mxu1 %v9971_v52  ;;  %v9976_v50 = vld [vmem:[%s11633_s27 + $0x54] ss:$8 sps:$4 sm:$0xff]   ;;  %v9977_v31 = vld [vmem:[%s11633_s27 + $0x60] ss:$8 sps:$4 sm:$0xff]  }
 0x470   : > { %8965 = vmatmul.mubr.msk.f32.gmra.mrb[14].mxu1 %vm3148_vm8, %v3113_v5  ;;  %v3017_v48 = vadd.f32 %v3016_v7, %v3015_v49  ;;  %v3030_v63 = vrot.slane %v3029_v56, 1  ;;  %4163 = vmatprep.subr.bf16.mxu1 %v9976_v50  ;;  %v9980_v49 = vld [vmem:[%s11633_s27 + $0x70] ss:$8 sps:$4 sm:$0xff]   ;;  %v9985_v18 = vld [vmem:[%s11633_s27 + $0x84] ss:$8 sps:$4 sm:$0xff]  }
 0x471   : > { %3240 = vmatprep.mubr.f32.mxu1 %v11023_v25  ;;  %v3129_v51 = vrot.slane %v3115_v29, %v11943_v39  ;;  %v3024_v62 = vadd.f32 %v3023_v61, %v3022_v35  ;;  %10447 = vrcp.f32 %v3010_v3  ;;  %v9983_v10 = vld [vmem:[%s11633_s27 + $0x80] ss:$8 sps:$4 sm:$0xff]   ;;  %v9988_v58 = vld [vmem:[%s11633_s27 + $0x94] ss:$8 sps:$4 sm:$0xff]   ;;  %v9986_v12 = vld [vmem:[%s11633_s27 + $0x90] ss:$8 sps:$4 sm:$0xff]  }
 0x472   : > { %v3031_v42 = vadd.f32 %v3030_v63, %v3029_v56  ;;  %10449 = vrcp.f32 %v3017_v48  ;;  %v9991_v35 = vld [vmem:[%s11633_s27 + $0xa4] ss:$8 sps:$4 sm:$0xff]   ;;  %v9989_v36 = vld [vmem:[%s11633_s27 + $0xa0] ss:$8 sps:$4 sm:$0xff]   ;;  %v9994_v47 = vld [vmem:[%s11633_s27 + $0xb4] ss:$8 sps:$4 sm:$0xff]  }
 0x473   : > { %v3130_v60 = vcombine.low %v3122_v2, %v3129_v51  ;;  %10451 = vrcp.f32 %v3024_v62  ;;  %4164 = vmatpush1.bf16.msra.mxu1 %v9974_v57  ;;  %v9992_v7 = vld [vmem:[%s11633_s27 + $0xb0] ss:$8 sps:$4 sm:$0xff]   ;;  %v9997_v56 = vld [vmem:[%s11633_s27 + $0xc4] ss:$8 sps:$4 sm:$0xff]   ;;  %v9995_v5 = vld [vmem:[%s11633_s27 + $0xc0] ss:$8 sps:$4 sm:$0xff]  }
 0x474   : > { %10453 = vrcp.f32 %v3031_v42  ;;  %4165 = vmatprep.subr.bf16.mxu1 %v9979_v20  ;;  %v10000_v3 = vld [vmem:[%s11633_s27 + $0xd4] ss:$8 sps:$4 sm:$0xff]   ;;  %v9998_v61 = vld [vmem:[%s11633_s27 + $0xd0] ss:$8 sps:$4 sm:$0xff]   ;;  %v10003_v29 = vld [vmem:[%s11633_s27 + $0xe4] ss:$8 sps:$4 sm:$0xff]  }
 0x475   : > { %8966 = vmatmul.mubr.msk.f32.gmra.mrb[16].mxu1 %vm3148_vm8, %v3130_v60  ;;  %v10001_v48 = vld [vmem:[%s11633_s27 + $0xe0] ss:$8 sps:$4 sm:$0xff]   ;;  %v10006_v63 = vld [vmem:[%s11633_s27 + $0xf4] ss:$8 sps:$4 sm:$0xff]   ;;  %v10004_v2 = vld [vmem:[%s11633_s27 + $0xf0] ss:$8 sps:$4 sm:$0xff]  }
 0x476   : > { %3246 = vmatprep.mubr.f32.mxu1 %v11023_v25  ;;  %s13501_s27 = scalar_lea.vmem [#allocation19], %s11631_s11 }
 0x477   : > { %4166 = vmatpush1.bf16.msra.mxu1 %v9977_v31 }
 0x478   : > { %4167 = vmatprep.subr.bf16.mxu1 %v9982_v27 }
 0x47b   : > { %v10448_v1 = vpop.eup %10447  ;;  %4168 = vmatpush1.bf16.msra.mxu1 %v9980_v49 }
 0x47c   : > { %v10450_v46 = vpop.eup %10449  ;;  %v3057_v22 = vmul.f32 %v10448_v1, %v12341_v44  ;;  %v12384_v44 = vsub.s32 5, %v11767_v11  ;;  %4169 = vmatprep.subr.bf16.mxu1 %v9985_v18 }
 0x47d   : > { %v10452_v32 = vpop.eup %10451  ;;  %v3059_v37 = vmul.f32 %v10450_v46, %v12343_v40  ;;  %v10463_v40 = vld [vmem:[%s11625_s12] sm:$0x3f]  ;;  %s13500_s12 = scalar_lea.vmem [#allocation14], %s11631_s11 }
 0x47e   : > { %v10454_v26 = vpop.eup %10453  ;;  %v3061_v17 = vmul.f32 %v10452_v32, %v12349_v54  ;;  %v1098_v54 = vrot.slane %v10463_v40, %v12381_v45 }
 0x47f   : > { %v3063_v6 = vmul.f32 %v10454_v26, %v12353_v34  ;;  %v3131_v59 = vcombine.low %v3057_v22, %v3059_v37  ;;  %v1102_v34 = vrot.slane %v10463_v40, %v12384_v44  ;;  %4170 = vmatpush1.bf16.msra.mxu1 %v9983_v10 }
 0x480   : > { %v12389_v43 = vadd.f32 %v1709_v28, %v1098_v54  ;;  %v12393_v38 = vadd.f32 %v1713_v19, %v1098_v54  ;;  %4171 = vmatprep.subr.bf16.mxu1 %v9988_v58 }
 0x481   : > { %v3132_v8 = vcombine.low %v3061_v17, %v3063_v6  ;;  %v3139_v4 = vrot.slane %v3131_v59, %v11943_v39  ;;  %v12391_v33 = vadd.f32 %v1711_v41, %v1102_v34  ;;  %v12399_v16 = vadd.f32 %v1715_v13, %v1102_v34 }
 0x483   : > { %v3146_v9 = vrot.slane %v3132_v8, %v11943_v39  ;;  %v3353_v15 = vcombine.low %v12389_v43, %v12391_v33  ;;  %v3354_v14 = vcombine.high %v12389_v43, %v12391_v33  ;;  %v3371_v0 = vcombine.low %v12393_v38, %v12399_v16  ;;  %4172 = vmatpush1.bf16.msra.mxu1 %v9986_v12 }
 0x484   : > { %v3372_v23 = vcombine.high %v12393_v38, %v12399_v16  ;;  %4173 = vmatprep.subr.bf16.mxu1 %v9991_v35 }
 0x485   : > { %v3147_v25 = vcombine.low %v3139_v4, %v3146_v9  ;;  %v3361_v51 = vrot.slane %v3353_v15, %v11943_v39  ;;  %v12436_v59 = vrot.slane %v3354_v14, %v11943_v39  ;;  %v12442_v8 = vrot.slane %v3371_v0, %v11943_v39 }
 0x486   : > { %v12450_v54 = vrot.slane %v3372_v23, %v11943_v39 }
 0x487   : > { %8967 = vmatmul.mubr.msk.f32.gmra.mrb[18].mxu1 %vm3148_vm8, %v3147_v25  ;;  %v3369_v22 = vcombine.high %v3361_v51, %v3361_v51  ;;  %v12458_v13 = vcombine.high %v12436_v59, %v12436_v59  ;;  %v12462_v15 = vcombine.high %v12442_v8, %v12442_v8 }
 0x488   : > { %4174 = vmatpush1.bf16.msra.mxu1 %v9989_v36 }
 0x489   : > { %4175 = vmatprep.subr.bf16.mxu1 %v9994_v47 }
 0x48c   : > { %4176 = vmatpush1.bf16.msra.mxu1 %v9992_v7 }
 0x48d   : > { %4177 = vmatprep.subr.bf16.mxu1 %v9997_v56 }
 0x490   : > { %4178 = vmatpush1.bf16.msra.mxu1 %v9995_v5 }
 0x491   : > { %4179 = vmatprep.subr.bf16.mxu1 %v10000_v3 }
 0x494   : > { %4180 = vmatpush1.bf16.msra.mxu1 %v9998_v61 }
 0x495   : > { %4181 = vmatprep.subr.bf16.mxu1 %v10003_v29 }
 0x498   : > { %4182 = vmatpush1.bf16.msra.mxu1 %v10001_v48 }
 0x499   : > { %4183 = vmatprep.subr.bf16.mxu1 %v10006_v63 }
 0x49c   : > { %4184 = vmatpush1.bf16.msra.mxu1 %v10004_v2 }
 0x52e   : > { %v3230_v62 = vpop.f32.mrb[12].mxu1 }
 0x52f   : > { %v3232_v42 = vpop.f32.mrb[13].mxu1 }
 0x530   : > { %v3261_v60 = vcombine.low %v3230_v62, %v3232_v42  ;;  %v3262_v1 = vcombine.high %v3230_v62, %v3232_v42 }
 0x532   : > { %v3269_v46 = vrot.slane %v3261_v60, %v11943_v39  ;;  %v3276_v32 = vrot.slane %v3262_v1, %v11943_v39 }
 0x534   : > { %v3277_v37 = vcombine.high %v3269_v46, %v3269_v46  ;;  %v3278_v26 = vcombine.high %v3276_v32, %v3276_v32  ;;  %v3397_v17 = vmul.f32 %v3361_v51, %v3269_v46  ;;  %v3399_v6 = vmul.f32 %v3369_v22, %v3276_v32 }
 0x536   : > { %v3398_v4 = vmul.f32 %v3361_v51, %v3277_v37  ;;  %v3400_v9 = vmul.f32 %v3369_v22, %v3278_v26  ;;  %v3435_v25 = vrot.slane %v3397_v17, %v11943_v39  ;;  %v3451_v40 = vrot.slane %v3399_v6, %v11943_v39 }
 0x538   : > { %v3436_v34 = vcombine.high %v3435_v25, %v3435_v25  ;;  %v3443_v28 = vrot.slane %v3398_v4, %v11943_v39  ;;  %v3452_v43 = vcombine.high %v3451_v40, %v3451_v40  ;;  %v3459_v41 = vrot.slane %v3400_v9, %v11943_v39 }
 0x539   : > { %v3590_v33 = vsel %vm3589_vm9, %v3435_v25, 0.0  ;;  %v3618_v19 = vsel %vm3589_vm9, %v3451_v40, 0.0 }
 0x53a   : > { %v3444_v38 = vcombine.high %v3443_v28, %v3443_v28  ;;  %v3460_v14 = vcombine.high %v3459_v41, %v3459_v41  ;;  %v3591_v16 = vrot.slane %v3590_v33, 4  ;;  %v3597_v0 = vsel %vm3589_vm9, %v3436_v34, 0.0 }
 0x53b   : > { %v3598_v23 = vrot.slane %v3597_v0, 4  ;;  %v3604_v52 = vsel %vm3589_vm9, %v3443_v28, 0.0  ;;  %v3619_v30 = vrot.slane %v3618_v19, 4  ;;  %v3625_v50 = vsel %vm3589_vm9, %v3452_v43, 0.0 }
 0x53c   : > { %v3592_v57 = vadd.f32 %v3591_v16, %v3590_v33  ;;  %v3605_v20 = vrot.slane %v3604_v52, 4  ;;  %v3611_v31 = vsel %vm3589_vm9, %v3444_v38, 0.0  ;;  %v3626_v27 = vrot.slane %v3625_v50, 4 }
 0x53d   : > { %v3599_v49 = vadd.f32 %v3598_v23, %v3597_v0  ;;  %v3612_v18 = vrot.slane %v3611_v31, 4  ;;  %v3620_v10 = vadd.f32 %v3619_v30, %v3618_v19  ;;  %v3632_v58 = vsel %vm3589_vm9, %v3459_v41, 0.0 }
 0x53e   : > { %v3593_v12 = vrot.slane %v3592_v57, 2  ;;  %v3606_v35 = vadd.f32 %v3605_v20, %v3604_v52  ;;  %v3627_v36 = vadd.f32 %v3626_v27, %v3625_v50  ;;  %v3633_v47 = vrot.slane %v3632_v58, 4 }
 0x53f   : > { %v3600_v7 = vrot.slane %v3599_v49, 2  ;;  %v3613_v56 = vadd.f32 %v3612_v18, %v3611_v31  ;;  %v3621_v5 = vrot.slane %v3620_v10, 2  ;;  %v3639_v3 = vsel %vm3589_vm9, %v3460_v14, 0.0 }
 0x540   : > { %v3594_v61 = vadd.f32 %v3593_v12, %v3592_v57  ;;  %v3607_v29 = vrot.slane %v3606_v35, 2  ;;  %v3628_v48 = vrot.slane %v3627_v36, 2  ;;  %v3634_v63 = vadd.f32 %v3633_v47, %v3632_v58 }
 0x541   : > { %v3601_v2 = vadd.f32 %v3600_v7, %v3599_v49  ;;  %v3614_v51 = vrot.slane %v3613_v56, 2  ;;  %v3622_v62 = vadd.f32 %v3621_v5, %v3620_v10  ;;  %v3640_v42 = vrot.slane %v3639_v3, 4 }
 0x542   : > { %v3595_v60 = vrot.slane %v3594_v61, 1  ;;  %v3608_v1 = vadd.f32 %v3607_v29, %v3606_v35  ;;  %v3629_v46 = vadd.f32 %v3628_v48, %v3627_v36  ;;  %v3635_v32 = vrot.slane %v3634_v63, 2 }
 0x543   : > { %v3602_v22 = vrot.slane %v3601_v2, 1  ;;  %v3615_v37 = vadd.f32 %v3614_v51, %v3613_v56  ;;  %v3623_v26 = vrot.slane %v3622_v62, 1  ;;  %v3641_v17 = vadd.f32 %v3640_v42, %v3639_v3  ;;  %v3236_v6 = vpop.f32.mrb[14].mxu1 }
 0x544   : > { %v3596_v4 = vadd.f32 %v3595_v60, %v3594_v61  ;;  %v3609_v9 = vrot.slane %v3608_v1, 1  ;;  %v3630_v25 = vrot.slane %v3629_v46, 1  ;;  %v3636_v40 = vadd.f32 %v3635_v32, %v3634_v63  ;;  %v3238_v34 = vpop.f32.mrb[15].mxu1 }
 0x545   : > { %v3603_v28 = vadd.f32 %v3602_v22, %v3601_v2  ;;  %v3616_v43 = vrot.slane %v3615_v37, 1  ;;  %v3624_v41 = vadd.f32 %v3623_v26, %v3622_v62  ;;  %v3642_v33 = vrot.slane %v3641_v17, 2 }
 0x546   : > { %v3610_v19 = vadd.f32 %v3609_v9, %v3608_v1  ;;  %v3631_v38 = vadd.f32 %v3630_v25, %v3629_v46  ;;  %v3637_v14 = vrot.slane %v3636_v40, 1  ;;  %v3814_v16 = vpack.c.bf16 %v3596_v4, %v3596_v4 }
 0x547   : > { %v3617_v0 = vadd.f32 %v3616_v43, %v3615_v37  ;;  %v3643_v23 = vadd.f32 %v3642_v33, %v3641_v17  ;;  %v3815_v52 = vpack.c.bf16 %v3603_v28, %v3603_v28  ;;  %v3818_v30 = vpack.c.bf16 %v3624_v41, %v3624_v41 }
 0x548   : > { %v3638_v50 = vadd.f32 %v3637_v14, %v3636_v40  ;;  %v3816_v57 = vpack.c.bf16 %v3610_v19, %v3610_v19  ;;  %v3819_v20 = vpack.c.bf16 %v3631_v38, %v3631_v38  ;;  %v3242_v31 = vpop.f32.mrb[16].mxu1  ;;  %v12472_v27 = vcombine.high %v12450_v54, %v12450_v54 }
 0x549   : > { %v3644_v49 = vrot.slane %v3643_v23, 1  ;;  %v3817_v18 = vpack.c.bf16 %v3617_v0, %v3617_v0  ;;  %v3922_v10 = vunpack.c.l.b16 %v3814_v16  ;;  %v3923_v58 = vunpack.c.l.b16 %v3815_v52  ;;  %v3244_v12 = vpop.f32.mrb[17].mxu1 }
 0x54a   : > { %v3820_v35 = vpack.c.bf16 %v3638_v50, %v3638_v50  ;;  %v3924_v36 = vunpack.c.l.b16 %v3816_v57  ;;  %v3926_v47 = vunpack.c.l.b16 %v3818_v30  ;;  %v3279_v7 = vcombine.low %v3236_v6, %v3238_v34 }
 0x54b   : > { %v3925_v56 = vunpack.c.l.b16 %v3817_v18  ;;  %v12474_v5 = vunpack.c.l.b16 %v3819_v20  ;;  %v3280_v3 = vcombine.high %v3236_v6, %v3238_v34  ;;  %v3297_v61 = vcombine.low %v3242_v31, %v3244_v12 }
 0x54c   : > { %v12476_v29 = vadd.f32 %v3644_v49, %v3643_v23  ;;  %v3955_v48 = vsel %vm3954_vm10, %v3924_v36, %v3922_v10  ;;  %v3287_v63 = vrot.slane %v3279_v7, %v11943_v39  ;;  %v3298_v2 = vcombine.high %v3242_v31, %v3244_v12 }
 0x54d   : > { %v12480_v51 = vunpack.c.l.b16 %v3820_v35  ;;  %v12483_v62 = vsel %vm3956_vm11, %v3926_v47, %v3955_v48  ;;  %v3294_v42 = vrot.slane %v3280_v3, %v11943_v39  ;;  %v3305_v60 = vrot.slane %v3297_v61, %v11943_v39 }
 0x54e   : > { %v3295_v1 = vcombine.high %v3287_v63, %v3287_v63  ;;  %v3401_v46 = vmul.f32 %v12436_v59, %v3287_v63  ;;  %v3312_v32 = vrot.slane %v3298_v2, %v11943_v39  ;;  %v12490_v22 = vsel %vm3954_vm10, %v3925_v56, %v3923_v58 }
 0x54f   : > { %v3296_v37 = vcombine.high %v3294_v42, %v3294_v42  ;;  %v3403_v26 = vmul.f32 %v12458_v13, %v3294_v42  ;;  %v3313_v17 = vcombine.high %v3305_v60, %v3305_v60  ;;  %v3405_v6 = vmul.f32 %v12442_v8, %v3305_v60 }
 0x550   : > { %v3402_v4 = vmul.f32 %v12436_v59, %v3295_v1  ;;  %v3467_v9 = vrot.slane %v3401_v46, %v11943_v39  ;;  %v3314_v25 = vcombine.high %v3312_v32, %v3312_v32  ;;  %v3407_v40 = vmul.f32 %v12462_v15, %v3312_v32 }
 0x551   : > { %v3404_v34 = vmul.f32 %v12458_v13, %v3296_v37  ;;  %v3483_v28 = vrot.slane %v3403_v26, %v11943_v39  ;;  %v3406_v43 = vmul.f32 %v12442_v8, %v3313_v17  ;;  %v12501_v41 = vrot.slane %v3405_v6, %v11943_v39 }
 0x552   : > { %v3468_v33 = vcombine.high %v3467_v9, %v3467_v9  ;;  %v3475_v19 = vrot.slane %v3402_v4, %v11943_v39  ;;  %v3646_v38 = vsel %vm3589_vm9, %v3467_v9, 0.0  ;;  %v3408_v59 = vmul.f32 %v12462_v15, %v3314_v25 }
 0x553   : > { %v3484_v14 = vcombine.high %v3483_v28, %v3483_v28  ;;  %v3491_v16 = vrot.slane %v3404_v34, %v11943_v39  ;;  %v3647_v0 = vrot.slane %v3646_v38, 4  ;;  %v3674_v13 = vsel %vm3589_vm9, %v3483_v28, 0.0 }
 0x554   : > { %v3476_v23 = vcombine.high %v3475_v19, %v3475_v19  ;;  %v3653_v52 = vsel %vm3589_vm9, %v3468_v33, 0.0  ;;  %v3660_v8 = vsel %vm3589_vm9, %v3475_v19, 0.0  ;;  %v3675_v30 = vrot.slane %v3674_v13, 4 }
 0x555   : > { %v3492_v50 = vcombine.high %v3491_v16, %v3491_v16  ;;  %v3648_v57 = vadd.f32 %v3647_v0, %v3646_v38  ;;  %v3654_v20 = vrot.slane %v3653_v52, 4  ;;  %v3661_v31 = vrot.slane %v3660_v8, 4 }
 0x556   : > { %v3667_v49 = vsel %vm3589_vm9, %v3476_v23, 0.0  ;;  %v3676_v18 = vadd.f32 %v3675_v30, %v3674_v13  ;;  %v3681_v15 = vsel %vm3589_vm9, %v3484_v14, 0.0  ;;  %v3688_v10 = vsel %vm3589_vm9, %v3491_v16, 0.0 }
 0x557   : > { %v3649_v58 = vrot.slane %v3648_v57, 2  ;;  %v3655_v12 = vadd.f32 %v3654_v20, %v3653_v52  ;;  %v3662_v35 = vadd.f32 %v3661_v31, %v3660_v8  ;;  %v3668_v36 = vrot.slane %v3667_v49, 4 }
 0x558   : > { %v3677_v47 = vrot.slane %v3676_v18, 2  ;;  %v3682_v7 = vrot.slane %v3681_v15, 4  ;;  %v3689_v56 = vrot.slane %v3688_v10, 4  ;;  %v12514_v3 = vsel %vm3589_vm9, %v3492_v50, 0.0 }
 0x559   : > { %v3650_v61 = vadd.f32 %v3649_v58, %v3648_v57  ;;  %v3656_v48 = vrot.slane %v3655_v12, 2  ;;  %v3663_v63 = vrot.slane %v3662_v35, 2  ;;  %v3669_v2 = vadd.f32 %v3668_v36, %v3667_v49 }
 0x55a   : > { %v3678_v42 = vadd.f32 %v3677_v47, %v3676_v18  ;;  %v12516_v60 = vadd.f32 %v3682_v7, %v3681_v15  ;;  %v3690_v1 = vadd.f32 %v3689_v56, %v3688_v10  ;;  %v12518_v46 = vpop.f32.mrb[18].mxu1  ;;  %v3821_v32 = vpack.c.bf16 %v12476_v29, %v12476_v29 }
 0x55b   : > { %v3651_v37 = vrot.slane %v3650_v61, 1  ;;  %v3657_v26 = vadd.f32 %v3656_v48, %v3655_v12  ;;  %v3664_v17 = vadd.f32 %v3663_v63, %v3662_v35  ;;  %v3670_v6 = vrot.slane %v3669_v2, 2  ;;  %v12522_v4 = vpop.f32.mrb[19].mxu1 }
 0x55c   : > { %v3679_v9 = vrot.slane %v3678_v42, 1  ;;  %v3684_v25 = vrot.slane %v12516_v60, 2  ;;  %v3691_v34 = vrot.slane %v3690_v1, 2  ;;  %v3696_v28 = vrot.slane %v12514_v3, 4 }
 0x55d   : > { %v3652_v33 = vadd.f32 %v3651_v37, %v3650_v61  ;;  %v3658_v19 = vrot.slane %v3657_v26, 1  ;;  %v3665_v38 = vrot.slane %v3664_v17, 1  ;;  %v3500_v14 = vcombine.high %v12501_v41, %v12501_v41 }
 0x55e   : > { %v3680_v16 = vadd.f32 %v3679_v9, %v3678_v42  ;;  %v3692_v0 = vadd.f32 %v3691_v34, %v3690_v1  ;;  %v3507_v13 = vrot.slane %v3406_v43, %v11943_v39  ;;  %v3515_v23 = vrot.slane %v3407_v40, %v11943_v39 }
 0x55f   : > { %v3666_v52 = vadd.f32 %v3665_v38, %v3664_v17  ;;  %v12530_v8 = vadd.f32 %v3670_v6, %v3669_v2  ;;  %v3822_v30 = vpack.c.bf16 %v3652_v33, %v3652_v33  ;;  %v3523_v50 = vrot.slane %v3408_v59, %v11943_v39 }
 0x560   : > { %v12533_v57 = vadd.f32 %v3658_v19, %v3657_v26  ;;  %v3693_v20 = vrot.slane %v3692_v0, 1  ;;  %v3826_v31 = vpack.c.bf16 %v3680_v16, %v3680_v16  ;;  %v3508_v49 = vcombine.high %v3507_v13, %v3507_v13 }
 0x561   : > { %v3824_v18 = vpack.c.bf16 %v3666_v52, %v3666_v52  ;;  %v12535_v15 = vunpack.c.l.b16 %v3822_v30  ;;  %v3516_v10 = vcombine.high %v3515_v23, %v3515_v23  ;;  %v3702_v43 = vsel %vm3589_vm9, %v12501_v41, 0.0 }
 0x562   : > { %v12539_v58 = vadd.f32 %v3693_v20, %v3692_v0  ;;  %v3524_v40 = vcombine.high %v3523_v50, %v3523_v50  ;;  %v3703_v12 = vrot.slane %v3702_v43, 4  ;;  %v3709_v35 = vsel %vm3589_vm9, %v3500_v14, 0.0 }
 0x563   : > { %v12542_v36 = vunpack.c.l.b16 %v3826_v31  ;;  %v3710_v59 = vrot.slane %v3709_v35, 4  ;;  %v3716_v47 = vsel %vm3589_vm9, %v3507_v13, 0.0  ;;  %v3723_v7 = vsel %vm3589_vm9, %v3508_v49, 0.0 }
 0x564   : > { %v12546_v56 = vunpack.c.l.b16 %v3824_v18  ;;  %v3704_v61 = vadd.f32 %v3703_v12, %v3702_v43  ;;  %v3717_v48 = vrot.slane %v3716_v47, 4  ;;  %v3724_v63 = vrot.slane %v3723_v7, 4 }
 0x565   : > { %v3711_v2 = vadd.f32 %v3710_v59, %v3709_v35  ;;  %v3730_v41 = vsel %vm3589_vm9, %v3515_v23, 0.0  ;;  %v3737_v42 = vsel %vm3589_vm9, %v3516_v10, 0.0  ;;  %v3744_v1 = vsel %vm3589_vm9, %v3523_v50, 0.0 }
 0x566   : > { %v3705_v37 = vrot.slane %v3704_v61, 2  ;;  %v3718_v26 = vadd.f32 %v3717_v48, %v3716_v47  ;;  %v3725_v17 = vadd.f32 %v3724_v63, %v3723_v7  ;;  %v3731_v6 = vrot.slane %v3730_v41, 4 }
 0x567   : > { %v3712_v9 = vrot.slane %v3711_v2, 2  ;;  %v3738_v34 = vrot.slane %v3737_v42, 4  ;;  %v3745_v33 = vrot.slane %v3744_v1, 4  ;;  %v3751_v19 = vsel %vm3589_vm9, %v3524_v40, 0.0 }
 0x568   : > { %v3706_v38 = vadd.f32 %v3705_v37, %v3704_v61  ;;  %v3719_v14 = vrot.slane %v3718_v26, 2  ;;  %v3726_v16 = vrot.slane %v3725_v17, 2  ;;  %v3732_v0 = vadd.f32 %v3731_v6, %v3730_v41 }
 0x569   : > { %v3713_v13 = vadd.f32 %v3712_v9, %v3711_v2  ;;  %v3739_v52 = vadd.f32 %v3738_v34, %v3737_v42  ;;  %v3746_v23 = vadd.f32 %v3745_v33, %v3744_v1  ;;  %v3752_v30 = vrot.slane %v3751_v19, 4 }
 0x56a   : > { %v3707_v20 = vrot.slane %v3706_v38, 1  ;;  %v3720_v31 = vadd.f32 %v3719_v14, %v3718_v26  ;;  %v3727_v50 = vadd.f32 %v3726_v16, %v3725_v17  ;;  %v3733_v49 = vrot.slane %v3732_v0, 2 }
 0x56b   : > { %v3714_v18 = vrot.slane %v3713_v13, 1  ;;  %v3740_v10 = vrot.slane %v3739_v52, 2  ;;  %v3747_v43 = vrot.slane %v3746_v23, 2  ;;  %v3753_v12 = vadd.f32 %v3752_v30, %v3751_v19 }
 0x56c   : > { %v3708_v35 = vadd.f32 %v3707_v20, %v3706_v38  ;;  %v3721_v59 = vrot.slane %v3720_v31, 1  ;;  %v3728_v47 = vrot.slane %v3727_v50, 1  ;;  %v3734_v40 = vadd.f32 %v3733_v49, %v3732_v0 }
 0x56d   : > { %v3715_v7 = vadd.f32 %v3714_v18, %v3713_v13  ;;  %v3741_v61 = vadd.f32 %v3740_v10, %v3739_v52  ;;  %v3748_v48 = vadd.f32 %v3747_v43, %v3746_v23  ;;  %v3754_v63 = vrot.slane %v3753_v12, 2 }
 0x56e   : > { %v3722_v2 = vadd.f32 %v3721_v59, %v3720_v31  ;;  %v3729_v41 = vadd.f32 %v3728_v47, %v3727_v50  ;;  %v3735_v42 = vrot.slane %v3734_v40, 1  ;;  %v3830_v1 = vpack.c.bf16 %v3708_v35, %v3708_v35 }
 0x56f   : > { %v3742_v37 = vrot.slane %v3741_v61, 1  ;;  %v3749_v26 = vrot.slane %v3748_v48, 1  ;;  %v3755_v17 = vadd.f32 %v3754_v63, %v3753_v12  ;;  %v3831_v6 = vpack.c.bf16 %v3715_v7, %v3715_v7 }
 0x570   : > { %v3736_v34 = vadd.f32 %v3735_v42, %v3734_v40  ;;  %v3832_v33 = vpack.c.bf16 %v3722_v2, %v3722_v2  ;;  %v3833_v19 = vpack.c.bf16 %v3729_v41, %v3729_v41  ;;  %v3938_v0 = vunpack.c.l.b16 %v3830_v1 }
 0x571   : > { %v3743_v38 = vadd.f32 %v3742_v37, %v3741_v61  ;;  %v3750_v14 = vadd.f32 %v3749_v26, %v3748_v48  ;;  %v3756_v16 = vrot.slane %v3755_v17, 1  ;;  %v12554_v52 = vunpack.c.l.b16 %v3831_v6 }
 0x572   : > { %v3834_v13 = vpack.c.bf16 %v3736_v34, %v3736_v34  ;;  %v3940_v23 = vunpack.c.l.b16 %v3832_v33  ;;  %v3315_v30 = vcombine.low %v12518_v46, %v12522_v4  ;;  %v12558_v50 = vunpack.c.l.b16 %v3833_v19 }
 0x573   : > { %v3835_v20 = vpack.c.bf16 %v3743_v38, %v3743_v38  ;;  %v3836_v31 = vpack.c.bf16 %v3750_v14, %v3750_v14  ;;  %v3316_v49 = vcombine.high %v12518_v46, %v12522_v4  ;;  %v3672_v12 = vrot.slane %v12530_v8, 1 }
 0x574   : > { %v3942_v18 = vunpack.c.l.b16 %v3834_v13  ;;  %v3975_v10 = vsel %vm3954_vm10, %v3940_v23, %v3938_v0  ;;  %v3323_v43 = vrot.slane %v3315_v30, %v11943_v39  ;;  %v12565_v35 = vadd.f32 %v3756_v16, %v3755_v17 }
 0x575   : > { %v12567_v59 = vunpack.c.l.b16 %v3835_v20  ;;  %v3330_v47 = vrot.slane %v3316_v49, %v11943_v39  ;;  %v3685_v40 = vadd.f32 %v3684_v25, %v12516_v60  ;;  %v12578_v61 = vadd.f32 %v3672_v12, %v12530_v8 }
 0x576   : > { %v12574_v7 = vsel %vm3956_vm11, %v3942_v18, %v3975_v10  ;;  %v3331_v46 = vcombine.high %v3323_v43, %v3323_v43  ;;  %v3409_v4 = vmul.f32 %v12450_v54, %v3323_v43  ;;  %v3697_v41 = vadd.f32 %v3696_v28, %v12514_v3 }
 0x577   : > { %v3332_v48 = vcombine.high %v3330_v47, %v3330_v47  ;;  %v3411_v63 = vmul.f32 %v12472_v27, %v3330_v47  ;;  %v3686_v2 = vrot.slane %v3685_v40, 1  ;;  %v12584_v42 = vunpack.c.l.b16 %v3836_v31 }
 0x578   : > { %v3410_v60 = vmul.f32 %v12450_v54, %v3331_v46  ;;  %v3531_v25 = vrot.slane %v3409_v4, %v11943_v39  ;;  %v3823_v1 = vpack.c.bf16 %v12533_v57, %v12533_v57  ;;  %v3825_v17 = vpack.c.bf16 %v12578_v61, %v12578_v61 }
 0x579   : > { %v3412_v8 = vmul.f32 %v12472_v27, %v3332_v48  ;;  %v3547_v37 = vrot.slane %v3411_v63, %v11943_v39  ;;  %v12592_v26 = vadd.f32 %v3686_v2, %v3685_v40  ;;  %v3698_v54 = vrot.slane %v3697_v41, 2 }
 0x57a   : > { %v3532_v6 = vcombine.high %v3531_v25, %v3531_v25  ;;  %v3539_v3 = vrot.slane %v3410_v60, %v11943_v39  ;;  %v3758_v28 = vsel %vm3589_vm9, %v3531_v25, 0.0  ;;  %v3982_v29 = vsel %vm3954_vm10, %v12558_v50, %v12554_v52 }
 0x57b   : > { %v3548_v34 = vcombine.high %v3547_v37, %v3547_v37  ;;  %v3555_v33 = vrot.slane %v3412_v8, %v11943_v39  ;;  %v3759_v19 = vrot.slane %v3758_v28, 4  ;;  %v3786_v38 = vsel %vm3589_vm9, %v3547_v37, 0.0 }
 0x57c   : > { %v3540_v27 = vcombine.high %v3539_v3, %v3539_v3  ;;  %v3765_v14 = vsel %vm3589_vm9, %v3532_v6, 0.0  ;;  %v3772_v16 = vsel %vm3589_vm9, %v3539_v3, 0.0  ;;  %v3787_v0 = vrot.slane %v3786_v38, 4 }
 0x57d   : > { %v3556_v13 = vcombine.high %v3555_v33, %v3555_v33  ;;  %v3760_v23 = vadd.f32 %v3759_v19, %v3758_v28  ;;  %v3766_v30 = vrot.slane %v3765_v14, 4  ;;  %v3773_v20 = vrot.slane %v3772_v16, 4 }
 0x57e   : > { %v3779_v31 = vsel %vm3589_vm9, %v3540_v27, 0.0  ;;  %v3788_v49 = vadd.f32 %v3787_v0, %v3786_v38  ;;  %v3793_v18 = vsel %vm3589_vm9, %v3548_v34, 0.0  ;;  %v3800_v39 = vsel %vm3589_vm9, %v3555_v33, 0.0 }
 0x57f   : > { %v3761_v10 = vrot.slane %v3760_v23, 2  ;;  %v3767_v43 = vadd.f32 %v3766_v30, %v3765_v14  ;;  %v3774_v12 = vadd.f32 %v3773_v20, %v3772_v16  ;;  %v3780_v47 = vrot.slane %v3779_v31, 4 }
 0x580   : > { %v3789_v40 = vrot.slane %v3788_v49, 2  ;;  %v3794_v46 = vrot.slane %v3793_v18, 4  ;;  %v3801_v4 = vrot.slane %v3800_v39, 4  ;;  %v3807_v48 = vsel %vm3589_vm9, %v3556_v13, 0.0 }
 0x581   : > { %v3762_v63 = vadd.f32 %v3761_v10, %v3760_v23  ;;  %v3768_v2 = vrot.slane %v3767_v43, 2  ;;  %v3775_v60 = vrot.slane %v3774_v12, 2  ;;  %v3781_v25 = vadd.f32 %v3780_v47, %v3779_v31 }
 0x582   : > { %v3790_v8 = vadd.f32 %v3789_v40, %v3788_v49  ;;  %v3795_v37 = vadd.f32 %v3794_v46, %v3793_v18  ;;  %v3802_v6 = vadd.f32 %v3801_v4, %v3800_v39  ;;  %v3808_v3 = vrot.slane %v3807_v48, 4 }
 0x583   : > { %v3763_v28 = vrot.slane %v3762_v63, 1  ;;  %v3769_v34 = vadd.f32 %v3768_v2, %v3767_v43  ;;  %v3776_v33 = vadd.f32 %v3775_v60, %v3774_v12  ;;  %v3782_v19 = vrot.slane %v3781_v25, 2 }
 0x584   : > { %v3791_v38 = vrot.slane %v3790_v8, 1  ;;  %v3796_v27 = vrot.slane %v3795_v37, 2  ;;  %v3803_v14 = vrot.slane %v3802_v6, 2  ;;  %v3699_v16 = vadd.f32 %v3698_v54, %v3697_v41 }
 0x585   : > { %v3764_v0 = vadd.f32 %v3763_v28, %v3762_v63  ;;  %v3770_v30 = vrot.slane %v3769_v34, 1  ;;  %v3777_v20 = vrot.slane %v3776_v33, 1  ;;  %v3783_v13 = vadd.f32 %v3782_v19, %v3781_v25 }
 0x586   : > { %v3792_v23 = vadd.f32 %v3791_v38, %v3790_v8  ;;  %v3804_v10 = vadd.f32 %v3803_v14, %v3802_v6  ;;  %v3700_v9 = vrot.slane %v3699_v16, 1  ;;  %v3797_v31 = vadd.f32 %v3796_v27, %v3795_v37 }
 0x587   : > { %v3771_v49 = vadd.f32 %v3770_v30, %v3769_v34  ;;  %v3778_v18 = vadd.f32 %v3777_v20, %v3776_v33  ;;  %v3838_v39 = vpack.c.bf16 %v3764_v0, %v3764_v0  ;;  %v3784_v47 = vrot.slane %v3783_v13, 1 }
 0x588   : > { %v3805_v43 = vrot.slane %v3804_v10, 1  ;;  %v3842_v12 = vpack.c.bf16 %v3792_v23, %v3792_v23  ;;  %v3701_v40 = vadd.f32 %v3700_v9, %v3699_v16  ;;  %v3798_v46 = vrot.slane %v3797_v31, 1 }
 0x589   : > { %v3840_v41 = vpack.c.bf16 %v3778_v18, %v3778_v18  ;;  %v3785_v54 = vadd.f32 %v3784_v47, %v3783_v13  ;;  %v3809_v4 = vadd.f32 %v3808_v3, %v3807_v48  ;;  %v3837_v63 = vpack.c.bf16 %v12565_v35, %v12565_v35 }
 0x58a   : > { %v3806_v2 = vadd.f32 %v3805_v43, %v3804_v10  ;;  %v3946_v60 = vunpack.c.l.b16 %v3838_v39  ;;  %v3799_v25 = vadd.f32 %v3798_v46, %v3797_v31  ;;  %v3827_v8 = vpack.c.bf16 %v12592_v26, %v12592_v26 }
 0x58b   : > { %v3950_v37 = vunpack.c.l.b16 %v3842_v12  ;;  %v3810_v6 = vrot.slane %v3809_v4, 2  ;;  %v3829_v28 = vpack.c.bf16 %v3701_v40, %v3701_v40  ;;  %v3839_v9 = vpack.c.bf16 %v3771_v49, %v3771_v49 }
 0x58c   : > { %v3844_v34 = vpack.c.bf16 %v3806_v2, %v3806_v2  ;;  %v3948_v33 = vunpack.c.l.b16 %v3840_v41  ;;  %v3841_v19 = vpack.c.bf16 %v3785_v54, %v3785_v54  ;;  %v3843_v38 = vpack.c.bf16 %v3799_v25, %v3799_v25 }
 0x58d   : > { %v3811_v48 = vadd.f32 %v3810_v6, %v3809_v4  ;;  %v3929_v35 = vunpack.c.l.b16 %v3821_v32  ;;  %v3931_v3 = vunpack.c.l.b16 %v3823_v1  ;;  %v3933_v26 = vunpack.c.l.b16 %v3825_v17 }
 0x58e   : > { %v3935_v27 = vunpack.c.l.b16 %v3827_v8  ;;  %v3937_v14 = vunpack.c.l.b16 %v3829_v28  ;;  %v3945_v16 = vunpack.c.l.b16 %v3837_v63  ;;  %v3947_v0 = vunpack.c.l.b16 %v3839_v9  ;;  %v10464_v9 = vld [vmem:[#allocation25] sm:$0xff] }
 0x58f   : > { %v3812_v30 = vrot.slane %v3811_v48, 1  ;;  %v3949_v20 = vunpack.c.l.b16 %v3841_v19  ;;  %v3969_v13 = vsel %vm3956_vm11, %v12474_v5, %v12490_v22  ;;  %v3951_v32 = vunpack.c.l.b16 %v3843_v38  ;;  %v10465_v19 = vld [vmem:[#allocation25 + $0x8] sm:$0xff] }
 0x590   : > { %v3970_v57 = vsel %vm3958_vm12, %v3929_v35, %v3969_v13  ;;  %v3983_v61 = vsel %vm3956_vm11, %v12567_v59, %v3982_v29  ;;  %v13497_v1 = vpack.c.bf16 %v12539_v58, %v12539_v58  ;;  %v3959_v5 = vsel %vm3958_vm12, %v12480_v51, %v12483_v62  ;;  %v4279_v29 = vld [vmem:[%s11641_s22 + $0x60] sm:$0xff] }
 0x591   : > { %v3813_v23 = vadd.f32 %v3812_v30, %v3811_v48  ;;  %v3971_v10 = vsel %vm3960_vm13, %v3931_v3, %v3970_v57  ;;  %v3984_v31 = vsel %vm3958_vm12, %v3945_v16, %v3983_v61  ;;  %v3961_v50 = vsel %vm3960_vm13, %v12535_v15, %v3959_v5  ;;  %v10466_v48 = vld [vmem:[#allocation25 + $0x10] sm:$0xff]  ;;  %v10467_v3 = vld [vmem:[#allocation25 + $0x18] sm:$0xff] }
 0x592   : > { %v3936_v17 = vunpack.c.l.b16 %v13497_v1  ;;  %v3972_v22 = vsel %vm3962_vm14, %v3933_v26, %v3971_v10  ;;  %v3985_v52 = vsel %vm3960_vm13, %v3947_v0, %v3984_v31  ;;  %v3977_v58 = vsel %vm3958_vm12, %v12584_v42, %v12574_v7  ;;  %v4267_v16 = vld [vmem:[%s11641_s22] sm:$0xff] }
 0x593   : > { %v3845_v59 = vpack.c.bf16 %v3813_v23, %v3813_v23  ;;  %v3973_v49 = vsel %vm3964_vm15, %v3935_v27, %v3972_v22  ;;  %v3986_v18 = vsel %vm3962_vm14, %v3949_v20, %v3985_v52  ;;  %v3963_v39 = vsel %vm3962_vm14, %v12546_v56, %v3961_v50  ;;  %v4275_v0 = vld [vmem:[%s11641_s22 + $0x40] sm:$0xff] }
 0x594   : > { %v3974_v51 = vsel %vm3966_vm0, %v3937_v14, %v3973_v49  ;;  %v3987_v62 = vsel %vm3964_vm15, %v3951_v32, %v3986_v18  ;;  %v3965_v15 = vsel %vm3964_vm15, %v12542_v36, %v3963_v39  ;;  %v3978_v47 = vsel %vm3960_vm13, %v3946_v60, %v3977_v58  ;;  %v3878_v36 = vld [vmem:[%s783_s19] sm:$0x3]  ;;  %v4271_v30 = vld [vmem:[%s11641_s22 + $0x20] sm:$0xff]  ;;  %s13502_s19 = scalar_lea.vmem [#allocation20], %s11631_s11  ;;  %s13503_s11 = sld [smem:[#allocation38_spill]] }
 0x595   : > { %v3953_v43 = vunpack.c.l.b16 %v3845_v59  ;;  %v3952_v7 = vunpack.c.l.b16 %v3844_v34  ;;  %v3967_v42 = vsel %vm3966_vm0, %v3936_v17, %v3965_v15  ;;  %v3979_v12 = vsel %vm3962_vm14, %v3948_v33, %v3978_v47  ;;  %v4283_v32 = vld [vmem:[%s11641_s22 + $0x80] sm:$0xff] }
 0x596   : > { %v3980_v40 = vsel %vm3964_vm15, %v3950_v37, %v3979_v12  ;;  %v3883_v4 = vrot.slane %v3878_v36, %v11895_v53  ;;  %v3887_v63 = vrot.slane %v3878_v36, %v11899_v55  ;;  %v9000_v20 = vcombine.low %v4267_v16, %v4275_v0  ;;  %v4291_v57 = vld [vmem:[%s11641_s22 + $0xc0] sm:$0xff] }
 0x597   : > { %v3988_v56 = vsel %vm3966_vm0, %v3953_v43, %v3987_v62  ;;  %v3981_v46 = vsel %vm3966_vm0, %v3952_v7, %v3980_v40  ;;  %v9001_v13 = vcombine.high %v4267_v16, %v4275_v0  ;;  %v9008_v61 = vcombine.low %v4271_v30, %v4279_v29  ;;  %v4287_v23 = vld [vmem:[%s11641_s22 + $0xa0] sm:$0xff] }
 0x598   : > { %v3990_v41 = vpack.c.b16 %v3988_v56, %v3974_v51  ;;  %v3989_v54 = vpack.c.b16 %v3981_v46, %v3967_v42  ;;  %v9009_v1 = vcombine.high %v4271_v30, %v4279_v29  ;;  %v9017_v17 = vcombine.high %v4283_v32, %v4291_v57  ;;  %v4295_v10 = vld [vmem:[%s11641_s22 + $0xe0] sm:$0xff] }
 0x599   : > { %v4299_v31 = vld [vmem:[%s11641_s22 + $0x100] sm:$0xff]  ;;  %5887 = vmatprep.subr.bf16.mxu1 %v9001_v13  ;;  %v9025_v5 = vcombine.high %v4287_v23, %v4295_v10  ;;  %v9016_v58 = vcombine.low %v4283_v32, %v4291_v57  ;;  %v9024_v59 = vcombine.low %v4287_v23, %v4295_v10 }
 0x59a   : > { %4185 = vmatprep.mubr.bf16.mxu1 %v3990_v41  ;;  %v4307_v22 = vld [vmem:[%s11641_s22 + $0x140] sm:$0xff]  ;;  %6059 = vmatprep.subr.bf16.mxu0 %v9009_v1  ;;  %p9512_p8 = scmp.ne.s32.totalorder %s13503_s11, 3 }
 0x59b   : > { %4186 = vmatmul.mubr.bf16.vlgmr.msra.gmra.mrb[20].mxu1 %v3989_v54  ;;  %v4303_v52 = vld [vmem:[%s11641_s22 + $0x120] sm:$0xff]  ;;  %6060 = vmatpush1.bf16.msra.mxu0 %v9008_v61  ;;  %v9033_v49 = vcombine.high %v4299_v31, %v4307_v22  ;;  %v9032_v47 = vcombine.low %v4299_v31, %v4307_v22 }
 0x59c   : > { %v4311_v50 = vld [vmem:[%s11641_s22 + $0x160] sm:$0xff]  ;;  %5888 = vmatpush1.bf16.msra.mxu1 %v9000_v20  ;;  %6061 = vmatprep.subr.bf16.mxu0 %v9025_v5 }
 0x59d   : > { %5889 = vmatprep.subr.bf16.mxu1 %v9017_v17  ;;  %v9041_v18 = vcombine.high %v4303_v52, %v4311_v50  ;;  %v4315_v39 = vld [vmem:[%s11641_s22 + $0x180] sm:$0xff]  ;;  %v9040_v43 = vcombine.low %v4303_v52, %v4311_v50 }
 0x59e   : > { %v4323_v51 = vld [vmem:[%s11641_s22 + $0x1c0] sm:$0xff] }
 0x59f   : > { %v4319_v62 = vld [vmem:[%s11641_s22 + $0x1a0] sm:$0xff]  ;;  %6062 = vmatpush1.bf16.msra.mxu0 %v9024_v59  ;;  %v9049_v7 = vcombine.high %v4315_v39, %v4323_v51  ;;  %v9048_v41 = vcombine.low %v4315_v39, %v4323_v51 }
 0x5a0   : > { %v4327_v15 = vld [vmem:[%s11641_s22 + $0x1e0] sm:$0xff]  ;;  %5890 = vmatpush1.bf16.msra.mxu1 %v9016_v58  ;;  %6063 = vmatprep.subr.bf16.mxu0 %v9041_v18 }
 0x5a1   : > { %5891 = vmatprep.subr.bf16.mxu1 %v9033_v49  ;;  %v9057_v42 = vcombine.high %v4319_v62, %v4327_v15  ;;  %v4331_v12 = vld [vmem:[%s11641_s22 + $0x200] sm:$0xff]  ;;  %v9056_v54 = vcombine.low %v4319_v62, %v4327_v15 }
 0x5a2   : > { %v4339_v40 = vld [vmem:[%s11641_s22 + $0x240] sm:$0xff] }
 0x5a3   : > { %v4335_v56 = vld [vmem:[%s11641_s22 + $0x220] sm:$0xff]  ;;  %6064 = vmatpush1.bf16.msra.mxu0 %v9040_v43  ;;  %v9065_v36 = vcombine.high %v4331_v12, %v4339_v40 }
 0x5a4   : > { %v4343_v46 = vld [vmem:[%s11641_s22 + $0x260] sm:$0xff]  ;;  %5892 = vmatpush1.bf16.msra.mxu1 %v9032_v47  ;;  %6065 = vmatprep.subr.bf16.mxu0 %v9057_v42 }
 0x5a5   : > { %5893 = vmatprep.subr.bf16.mxu1 %v9049_v7  ;;  %v4379_v0 = vld [vmem:[%s11641_s22 + $0x380] sm:$0xff] }
 0x5a6   : > { %v4387_v30 = vld [vmem:[%s11641_s22 + $0x3c0] sm:$0xff] }
 0x5a7   : > { %6066 = vmatpush1.bf16.msra.mxu0 %v9056_v54  ;;  %v4383_v20 = vld [vmem:[%s11641_s22 + $0x3a0] sm:$0xff]  ;;  %v9113_v57 = vcombine.high %v4379_v0, %v4387_v30  ;;  %v9112_v31 = vcombine.low %v4379_v0, %v4387_v30 }
 0x5a8   : > { %5894 = vmatpush1.bf16.msra.mxu1 %v9048_v41  ;;  %v4391_v13 = vld [vmem:[%s11641_s22 + $0x3e0] sm:$0xff] }
 0x5a9   : > { %5895 = vmatprep.subr.bf16.mxu1 %v9065_v36  ;;  %v9121_v61 = vcombine.high %v4383_v20, %v4391_v13  ;;  %v4395_v1 = vld [vmem:[%s11641_s22 + $0x400] sm:$0xff]  ;;  %v9120_v5 = vcombine.low %v4383_v20, %v4391_v13 }
 0x5aa   : > { %v4403_v17 = vld [vmem:[%s11641_s22 + $0x440] sm:$0xff] }
 0x5ab   : > { %v4399_v23 = vld [vmem:[%s11641_s22 + $0x420] sm:$0xff]  ;;  %v9129_v22 = vcombine.high %v4395_v1, %v4403_v17  ;;  %v9128_v18 = vcombine.low %v4395_v1, %v4403_v17 }
 0x5ac   : > { %v4407_v10 = vld [vmem:[%s11641_s22 + $0x460] sm:$0xff] }
 0x5ad   : > { %v9137_v52 = vcombine.high %v4399_v23, %v4407_v10  ;;  %v4411_v50 = vld [vmem:[%s11641_s22 + $0x480] sm:$0xff]  ;;  %v9136_v39 = vcombine.low %v4399_v23, %v4407_v10 }
 0x5ae   : > { %v4419_v58 = vld [vmem:[%s11641_s22 + $0x4c0] sm:$0xff] }
 0x5af   : > { %v4415_v59 = vld [vmem:[%s11641_s22 + $0x4a0] sm:$0xff]  ;;  %v9145_v51 = vcombine.high %v4411_v50, %v4419_v58  ;;  %v9144_v15 = vcombine.low %v4411_v50, %v4419_v58 }
 0x5b0   : > { %v4423_v49 = vld [vmem:[%s11641_s22 + $0x4e0] sm:$0xff] }
 0x5b1   : > { %v9153_v62 = vcombine.high %v4415_v59, %v4423_v49  ;;  %v9152_v47 = vcombine.low %v4415_v59, %v4423_v49  ;;  %v4467_v0 = vld [vmem:[%s11641_s22 + $0x640] sm:$0xff] }
 0x5b2   : > { %v4463_v30 = vld [vmem:[%s11641_s22 + $0x620] sm:$0xff] }
 0x5b3   : > { %v4471_v13 = vld [vmem:[%s11641_s22 + $0x660] sm:$0xff] }
 0x5b4   : > { %v4483_v1 = vld [vmem:[%s11641_s22 + $0x6c0] sm:$0xff] }
 0x5b5   : > { %v4479_v17 = vld [vmem:[%s11641_s22 + $0x6a0] sm:$0xff] }
 0x5b6   : > { %v4487_v10 = vld [vmem:[%s11641_s22 + $0x6e0] sm:$0xff] }
 0x5b7   : > { %v4499_v50 = vld [vmem:[%s11641_s22 + $0x740] sm:$0xff] }
 0x5b8   : > { %v4495_v58 = vld [vmem:[%s11641_s22 + $0x720] sm:$0xff] }
 0x66e   : > { %v4187_v2 = vpop.f32.mrb[20].mxu1 }
 0x66f   : > { %v4188_v60 = vadd.f32 %v4187_v2, %v3883_v4  ;;  %v4189_v25 = vpop.f32.mrb[21].mxu1  ;;  %v4355_v2 = vld [vmem:[%s11641_s22 + $0x2c0] sm:$0xff] }
 0x670   : > { %v4190_v8 = vadd.f32 %v4189_v25, %v3887_v63  ;;  %v4191_v6 = vpop.f32.mrb[22].mxu1  ;;  %v4359_v25 = vld [vmem:[%s11641_s22 + $0x2e0] sm:$0xff] }
 0x671   : > { %v4192_v37 = vadd.f32 %v4191_v6, %v3883_v4  ;;  %v4193_v28 = vpop.f32.mrb[23].mxu1  ;;  %v12661_v34 = vadd.f32 %v10464_v9, %v4188_v60  ;;  %v9073_v4 = vcombine.high %v4335_v56, %v4343_v46  ;;  %v4351_v60 = vld [vmem:[%s11641_s22 + $0x2a0] sm:$0xff]  ;;  %v9072_v6 = vcombine.low %v4335_v56, %v4343_v46 }
 0x672   : > { %v4194_v33 = vadd.f32 %v4193_v28, %v3887_v63  ;;  %v12663_v38 = vadd.f32 %v10465_v19, %v4190_v8  ;;  %v4347_v63 = vld [vmem:[%s11641_s22 + $0x280] sm:$0xff]  ;;  %v9064_v8 = vcombine.low %v4331_v12, %v4339_v40  ;;  %v9089_v28 = vcombine.high %v4351_v60, %v4359_v25 }
 0x673   : > { %v12665_v35 = vadd.f32 %v10466_v48, %v4192_v37  ;;  %v9081_v37 = vcombine.high %v4347_v63, %v4355_v2  ;;  %6067 = vmatprep.subr.bf16.mxu0 %v9073_v4  ;;  %v4363_v9 = vld [vmem:[%s11641_s22 + $0x300] sm:$0xff] }
 0x674   : > { %v12667_v26 = vadd.f32 %v10467_v3, %v4194_v33  ;;  %v4202_v27 = vadd.f32 %v12663_v38, %v12661_v34  ;;  %v4371_v33 = vld [vmem:[%s11641_s22 + $0x340] sm:$0xff]  ;;  %5896 = vmatpush1.bf16.msra.mxu1 %v9064_v8  ;;  %v9080_v3 = vcombine.low %v4347_v63, %v4355_v2  ;;  %6068 = vmatpush1.bf16.msra.mxu0 %v9072_v6 }
 0x675   : > { %v4367_v19 = vld [vmem:[%s11641_s22 + $0x320] sm:$0xff]  ;;  %5897 = vmatprep.subr.bf16.mxu1 %v9081_v37  ;;  %6069 = vmatprep.subr.bf16.mxu0 %v9089_v28  ;;  %v9096_v29 = vcombine.low %v4363_v9, %v4371_v33 }
 0x676   : > { %4203 = vadd.xlane.f32.xlu0 %v4202_v27  ;;  %v4205_v14 = vadd.f32 %v12667_v26, %v12665_v35  ;;  %v4375_v48 = vld [vmem:[%s11641_s22 + $0x360] sm:$0xff]  ;;  %v9088_v27 = vcombine.low %v4351_v60, %v4359_v25 }
 0x677   : > { %v9105_v16 = vcombine.high %v4367_v19, %v4375_v48  ;;  %v9104_v32 = vcombine.low %v4367_v19, %v4375_v48  ;;  %v4427_v2 = vld [vmem:[%s11641_s22 + $0x500] sm:$0xff] }
 0x678   : > { %5898 = vmatpush1.bf16.msra.mxu1 %v9080_v3  ;;  %6070 = vmatpush1.bf16.msra.mxu0 %v9088_v27  ;;  %v4431_v60 = vld [vmem:[%s11641_s22 + $0x520] sm:$0xff] }
 0x679   : > { %6071 = vmatprep.subr.bf16.mxu0 %v9105_v16  ;;  %v4443_v28 = vld [vmem:[%s11641_s22 + $0x580] sm:$0xff] }
 0x67a   : > { %4206 = vadd.xlane.f32.xlu0 %v4205_v14  ;;  %v9097_v14 = vcombine.high %v4363_v9, %v4371_v33  ;;  %v4451_v9 = vld [vmem:[%s11641_s22 + $0x5c0] sm:$0xff] }
 0x67b   : > { %v4447_v33 = vld [vmem:[%s11641_s22 + $0x5a0] sm:$0xff]  ;;  %v9177_v19 = vcombine.high %v4443_v28, %v4451_v9  ;;  %v9176_v3 = vcombine.low %v4443_v28, %v4451_v9 }
 0x67c   : > { %5899 = vmatprep.subr.bf16.mxu1 %v9097_v14  ;;  %6072 = vmatpush1.bf16.msra.mxu0 %v9104_v32  ;;  %v4455_v48 = vld [vmem:[%s11641_s22 + $0x5e0] sm:$0xff]  ;;  %v9200_v32 = vcombine.low %v4463_v30, %v4471_v13 }
 0x67d   : > { %5900 = vmatpush1.bf16.msra.mxu1 %v9096_v29  ;;  %6073 = vmatprep.subr.bf16.mxu0 %v9121_v61  ;;  %v9184_v27 = vcombine.low %v4447_v33, %v4455_v48  ;;  %v9185_v14 = vcombine.high %v4447_v33, %v4455_v48  ;;  %v4459_v16 = vld [vmem:[%s11641_s22 + $0x600] sm:$0xff] }
 0x67e   : > { %5901 = vmatprep.subr.bf16.mxu1 %v9113_v57  ;;  %v9193_v20 = vcombine.high %v4459_v16, %v4467_v0  ;;  %v9192_v29 = vcombine.low %v4459_v16, %v4467_v0  ;;  %v9201_v57 = vcombine.high %v4463_v30, %v4471_v13  ;;  %v4475_v61 = vld [vmem:[%s11641_s22 + $0x680] sm:$0xff] }
 0x67f   : > { %v9209_v23 = vcombine.high %v4475_v61, %v4483_v1  ;;  %v4200_v9 = vld [vmem:[%s13498_s21] sm:$0x3] }
 0x680   : > { %6074 = vmatpush1.bf16.msra.mxu0 %v9120_v5  ;;  %v9216_v5 = vcombine.low %v4479_v17, %v4487_v10  ;;  %v4239_v48 = vrot.slane %v4200_v9, %v11895_v53 }
 0x681   : > { %5902 = vmatpush1.bf16.msra.mxu1 %v9112_v31  ;;  %6075 = vmatprep.subr.bf16.mxu0 %v9137_v52  ;;  %v9208_v31 = vcombine.low %v4475_v61, %v4483_v1  ;;  %v4491_v52 = vld [vmem:[%s11641_s22 + $0x700] sm:$0xff] }
 0x682   : > { %5903 = vmatprep.subr.bf16.mxu1 %v9129_v22  ;;  %v9217_v22 = vcombine.high %v4479_v17, %v4487_v10  ;;  %v9224_v59 = vcombine.low %v4491_v52, %v4499_v50  ;;  %v9225_v49 = vcombine.high %v4491_v52, %v4499_v50  ;;  %v4292_v10 = vld [vmem:[%s11641_s22 + $0xc8] sm:$0xff] }
 0x684   : > { %6076 = vmatpush1.bf16.msra.mxu0 %v9136_v39  ;;  %v4507_v39 = vld [vmem:[%s11641_s22 + $0x780] sm:$0xff] }
 0x685   : > { %5904 = vmatpush1.bf16.msra.mxu1 %v9128_v18  ;;  %6077 = vmatprep.subr.bf16.mxu0 %v9153_v62  ;;  %v4503_v18 = vld [vmem:[%s11641_s22 + $0x760] sm:$0xff] }
 0x686   : > { %5905 = vmatprep.subr.bf16.mxu1 %v9145_v51  ;;  %v4515_v51 = vld [vmem:[%s11641_s22 + $0x7c0] sm:$0xff]  ;;  %v9232_v62 = vcombine.low %v4495_v58, %v4503_v18 }
 0x688   : > { %6078 = vmatpush1.bf16.msra.mxu0 %v9152_v47  ;;  %v9241_v47 = vcombine.high %v4507_v39, %v4515_v51 }
 0x689   : > { %5906 = vmatpush1.bf16.msra.mxu1 %v9144_v15  ;;  %v9233_v15 = vcombine.high %v4495_v58, %v4503_v18  ;;  %v4308_v58 = vld [vmem:[%s11641_s22 + $0x148] sm:$0xff] }
 0x703   : > { %v4204_v43 = vpop.xlane.xlu0 %4203 }
 0x704   : > { %v4209_v7 = vmul.f32 0.00390625, %v4204_v43  ;;  %v4511_v43 = vld [vmem:[%s11641_s22 + $0x7a0] sm:$0xff] }
 0x706   : > { %v12714_v42 = vsub.f32 %v12661_v34, %v4209_v7  ;;  %v12717_v12 = vsub.f32 %v12663_v38, %v4209_v7  ;;  %v4519_v7 = vld [vmem:[%s11641_s22 + $0x7e0] sm:$0xff] }
 0x707   : > { %v4207_v40 = vpop.xlane.xlu0 %4206 }
 0x708   : > { %v4210_v56 = vmul.f32 0.00390625, %v4207_v40  ;;  %v4215_v46 = vmul.f32 %v12714_v42, %v12714_v42  ;;  %v4216_v41 = vmul.f32 %v12717_v12, %v12717_v12  ;;  %v9249_v40 = vcombine.high %v4511_v43, %v4519_v7 }
 0x70a   : > { %v12724_v54 = vsub.f32 %v12665_v35, %v4210_v56  ;;  %v12727_v36 = vsub.f32 %v12667_v26, %v4210_v56  ;;  %v4219_v34 = vadd.f32 %v4216_v41, %v4215_v46  ;;  %v4435_v35 = vld [vmem:[%s11641_s22 + $0x540] sm:$0xff]  ;;  %v12758_v56 = vld [vmem:[%s11641_s22 + $0x8] sm:$0xff]  ;;  %v4273_v41 = vld [vmem:[%s11641_s22 + $0x30] sm:$0xff] }
 0x70b   : > { %v9161_v25 = vcombine.high %v4427_v2, %v4435_v35  ;;  %v4439_v26 = vld [vmem:[%s11641_s22 + $0x560] sm:$0xff]  ;;  %v9160_v8 = vcombine.low %v4427_v2, %v4435_v35  ;;  %v4276_v46 = vld [vmem:[%s11641_s22 + $0x48] sm:$0xff] }
 0x70c   : > { %4220 = vadd.xlane.f32.xlu1 %v4219_v34  ;;  %v4217_v38 = vmul.f32 %v12724_v54, %v12724_v54  ;;  %v4218_v4 = vmul.f32 %v12727_v36, %v12727_v36  ;;  %v9168_v6 = vcombine.low %v4431_v60, %v4439_v26  ;;  %v9169_v37 = vcombine.high %v4431_v60, %v4439_v26 }
 0x70d   : > { %5907 = vmatprep.subr.bf16.mxu1 %v9161_v25  ;;  %v9240_v34 = vcombine.low %v4507_v39, %v4515_v51  ;;  %v9003_v2 = vcombine.high %v12758_v56, %v4276_v46 }
 0x70e   : > { %v4222_v63 = vadd.f32 %v4218_v4, %v4217_v38  ;;  %6079 = vmatprep.subr.bf16.mxu0 %v9169_v37  ;;  %5908 = vmatpush1.bf16.msra.mxu1 %v9160_v8  ;;  %v9002_v38 = vcombine.low %v12758_v56, %v4276_v46  ;;  %v4281_v4 = vld [vmem:[%s11641_s22 + $0x70] sm:$0xff] }
 0x70f   : > { %6080 = vmatpush1.bf16.msra.mxu0 %v9168_v6  ;;  %5909 = vmatprep.subr.bf16.mxu1 %v9177_v19  ;;  %v9012_v35 = vcombine.low %v4273_v41, %v4281_v4  ;;  %v9013_v60 = vcombine.high %v4273_v41, %v4281_v4  ;;  %v4201_v19 = vld [vmem:[%s13499_s16] sm:$0x3]  ;;  %v4337_v4 = vld [vmem:[%s11641_s22 + $0x230] sm:$0xff] }
 0x710   : > { %4223 = vadd.xlane.f32.xlu1 %v4222_v63  ;;  %6081 = vmatprep.subr.bf16.mxu0 %v9185_v14  ;;  %v9248_v63 = vcombine.low %v4511_v43, %v4519_v7  ;;  %v4254_v0 = vrot.slane %v4201_v19, %v11895_v53  ;;  %v4258_v30 = vrot.slane %v4201_v19, %v11899_v55  ;;  %v4321_v43 = vld [vmem:[%s11641_s22 + $0x1b0] sm:$0xff] }
 0x711   : > { %v4329_v7 = vld [vmem:[%s11641_s22 + $0x1f0] sm:$0xff] }
 0x712   : > { %5910 = vmatpush1.bf16.msra.mxu1 %v9176_v3  ;;  %v4243_v3 = vrot.slane %v4200_v9, %v11899_v55  ;;  %v9061_v41 = vcombine.high %v4321_v43, %v4329_v7 }
 0x713   : > { %6082 = vmatpush1.bf16.msra.mxu0 %v9184_v27  ;;  %5911 = vmatprep.subr.bf16.mxu1 %v9193_v20 }
 0x714   : > { %6083 = vmatprep.subr.bf16.mxu0 %v9201_v57 }
 0x716   : > { %5912 = vmatpush1.bf16.msra.mxu1 %v9192_v29 }
 0x717   : > { %6084 = vmatpush1.bf16.msra.mxu0 %v9200_v32  ;;  %5913 = vmatprep.subr.bf16.mxu1 %v9209_v23  ;;  %v4284_v23 = vld [vmem:[%s11641_s22 + $0x88] sm:$0xff] }
 0x718   : > { %6085 = vmatprep.subr.bf16.mxu0 %v9217_v22  ;;  %v4300_v22 = vld [vmem:[%s11641_s22 + $0x108] sm:$0xff]  ;;  %v9019_v52 = vcombine.high %v4284_v23, %v4292_v10  ;;  %v9018_v18 = vcombine.low %v4284_v23, %v4292_v10 }
 0x719   : > { %v9035_v51 = vcombine.high %v4300_v22, %v4308_v58 }
 0x71a   : > { %5914 = vmatpush1.bf16.msra.mxu1 %v9208_v31  ;;  %v4289_v31 = vld [vmem:[%s11641_s22 + $0xb0] sm:$0xff] }
 0x71b   : > { %6086 = vmatpush1.bf16.msra.mxu0 %v9216_v5  ;;  %5915 = vmatprep.subr.bf16.mxu1 %v9225_v49  ;;  %v4297_v5 = vld [vmem:[%s11641_s22 + $0xf0] sm:$0xff] }
 0x71c   : > { %6087 = vmatprep.subr.bf16.mxu0 %v9233_v15  ;;  %v9029_v50 = vcombine.high %v4289_v31, %v4297_v5  ;;  %v4313_v49 = vld [vmem:[%s11641_s22 + $0x170] sm:$0xff]  ;;  %v9028_v39 = vcombine.low %v4289_v31, %v4297_v5  ;;  %v4316_v15 = vld [vmem:[%s11641_s22 + $0x188] sm:$0xff] }
 0x71d   : > { %v4396_v5 = vld [vmem:[%s11641_s22 + $0x408] sm:$0xff] }
 0x71e   : > { %5916 = vmatpush1.bf16.msra.mxu1 %v9224_v59  ;;  %v4305_v59 = vld [vmem:[%s11641_s22 + $0x130] sm:$0xff] }
 0x71f   : > { %6088 = vmatpush1.bf16.msra.mxu0 %v9232_v62  ;;  %5917 = vmatprep.subr.bf16.mxu1 %v9241_v47  ;;  %v9045_v62 = vcombine.high %v4305_v59, %v4313_v49  ;;  %v4324_v47 = vld [vmem:[%s11641_s22 + $0x1c8] sm:$0xff]  ;;  %v9044_v56 = vcombine.low %v4305_v59, %v4313_v49 }
 0x720   : > { %6089 = vmatprep.subr.bf16.mxu0 %v9249_v40  ;;  %v9034_v40 = vcombine.low %v4300_v22, %v4308_v58  ;;  %v9051_v46 = vcombine.high %v4316_v15, %v4324_v47  ;;  %v4404_v22 = vld [vmem:[%s11641_s22 + $0x448] sm:$0xff] }
 0x721   : > { %v9131_v49 = vcombine.high %v4396_v5, %v4404_v22 }
 0x722   : > { %5918 = vmatpush1.bf16.msra.mxu1 %v9240_v34  ;;  %v4332_v34 = vld [vmem:[%s11641_s22 + $0x208] sm:$0xff] }
 0x723   : > { %6090 = vmatpush1.bf16.msra.mxu0 %v9248_v63  ;;  %5930 = vmatprep.subr.bf16.mxu1 %v9003_v2  ;;  %v4345_v63 = vld [vmem:[%s11641_s22 + $0x270] sm:$0xff]  ;;  %v9050_v2 = vcombine.low %v4316_v15, %v4324_v47  ;;  %v9130_v47 = vcombine.low %v4396_v5, %v4404_v22 }
 0x724   : > { %6145 = vmatprep.subr.bf16.mxu0 %v9013_v60  ;;  %v9076_v9 = vcombine.low %v4337_v4, %v4345_v63  ;;  %v4425_v15 = vld [vmem:[%s11641_s22 + $0x4f0] sm:$0xff] }
 0x725   : > { %v4505_v5 = vld [vmem:[%s11641_s22 + $0x770] sm:$0xff] }
 0x799   : > { %v4221_v25 = vpop.xlane.xlu1 %4220 }
 0x79a   : > { %v4225_v26 = vmul.f32 0.00390625, %v4221_v25  ;;  %v9077_v25 = vcombine.high %v4337_v4, %v4345_v63 }
 0x79c   : > { %v4227_v8 = vadd.f32 1e-05, %v4225_v26  ;;  %v4348_v26 = vld [vmem:[%s11641_s22 + $0x288] sm:$0xff] }
 0x79d   : > { %v4224_v6 = vpop.xlane.xlu1 %4223 }
 0x79e   : > { %10455 = vrsqrt.f32 %v4227_v8  ;;  %v4226_v37 = vmul.f32 0.00390625, %v4224_v6  ;;  %v4356_v8 = vld [vmem:[%s11641_s22 + $0x2c8] sm:$0xff]  ;;  %v4353_v6 = vld [vmem:[%s11641_s22 + $0x2b0] sm:$0xff] }
 0x7a0   : > { %v4228_v28 = vadd.f32 1e-05, %v4226_v37  ;;  %v4361_v37 = vld [vmem:[%s11641_s22 + $0x2f0] sm:$0xff] }
 0x7a1   : > { %v9093_v19 = vcombine.high %v4353_v6, %v4361_v37 }
 0x7a2   : > { %10457 = vrsqrt.f32 %v4228_v28 }
 0x7a8   : > { %v10456_v33 = vpop.eup %10455 }
 0x7a9   : > { %v4231_v27 = vmul.f32 %v10456_v33, %v12714_v42  ;;  %v4232_v14 = vmul.f32 %v10456_v33, %v12717_v12  ;;  %v9083_v33 = vcombine.high %v4348_v26, %v4356_v8 }
 0x7ab   : > { %v4246_v20 = vmul.f32 %v4239_v48, %v4231_v27  ;;  %v4247_v13 = vmul.f32 %v4243_v3, %v4232_v14  ;;  %v4369_v27 = vld [vmem:[%s11641_s22 + $0x330] sm:$0xff] }
 0x7ac   : > { %v10458_v16 = vpop.eup %10457  ;;  %v4377_v14 = vld [vmem:[%s11641_s22 + $0x370] sm:$0xff] }
 0x7ad   : > { %v4233_v29 = vmul.f32 %v10458_v16, %v12724_v54  ;;  %v4234_v32 = vmul.f32 %v10458_v16, %v12727_v36  ;;  %v12777_v42 = vadd.f32 %v4254_v0, %v4246_v20  ;;  %v12779_v12 = vadd.f32 %v4258_v30, %v4247_v13  ;;  %v4380_v13 = vld [vmem:[%s11641_s22 + $0x388] sm:$0xff] }
 0x7ae   : > { %v9082_v16 = vcombine.low %v4348_v26, %v4356_v8  ;;  %v9109_v20 = vcombine.high %v4369_v27, %v4377_v14  ;;  %v9108_v23 = vcombine.low %v4369_v27, %v4377_v14  ;;  %v4457_v26 = vld [vmem:[%s11641_s22 + $0x5f0] sm:$0xff] }
 0x7af   : > { %v4248_v57 = vmul.f32 %v4239_v48, %v4233_v29  ;;  %v4249_v61 = vmul.f32 %v4243_v3, %v4234_v32  ;;  %v4364_v48 = vld [vmem:[%s11641_s22 + $0x308] sm:$0xff]  ;;  %v4385_v32 = vld [vmem:[%s11641_s22 + $0x3b0] sm:$0xff] }
 0x7b0   : > { %v4372_v3 = vld [vmem:[%s11641_s22 + $0x348] sm:$0xff] }
 0x7b1   : > { %v12781_v1 = vadd.f32 %v4254_v0, %v4248_v57  ;;  %v12783_v17 = vadd.f32 %v4258_v30, %v4249_v61  ;;  %v9092_v0 = vcombine.low %v4353_v6, %v4361_v37  ;;  %v9099_v30 = vcombine.high %v4364_v48, %v4372_v3  ;;  %v4388_v29 = vld [vmem:[%s11641_s22 + $0x3c8] sm:$0xff]  ;;  %v4393_v57 = vld [vmem:[%s11641_s22 + $0x3f0] sm:$0xff] }
 0x7b2   : > { %v9098_v61 = vcombine.low %v4364_v48, %v4372_v3  ;;  %v9115_v10 = vcombine.high %v4380_v13, %v4388_v29  ;;  %v9125_v31 = vcombine.high %v4385_v32, %v4393_v57  ;;  %v9114_v58 = vcombine.low %v4380_v13, %v4388_v29  ;;  %v4473_v48 = vld [vmem:[%s11641_s22 + $0x670] sm:$0xff] }
 0x7b3   : > { %v12791_v54 = vpack.c.bf16 %v12781_v1, %v12777_v42  ;;  %v12795_v36 = vpack.c.bf16 %v12783_v17, %v12779_v12  ;;  %v9124_v59 = vcombine.low %v4385_v32, %v4393_v57  ;;  %v4489_v13 = vld [vmem:[%s11641_s22 + $0x6f0] sm:$0xff] }
 0x7b5   : > { %5919 = vmatprep.mubr.bf16.mxu1 %v12795_v36  ;;  %6091 = vmatprep.mubr.bf16.mxu0 %v12795_v36 }
 0x7b6   : > { %5920 = vmatmul.mubr.bf16.vlgmr.msra.gmra.mrb[24].mxu1 %v12791_v54  ;;  %6092 = vmatmul.mubr.bf16.vlgmr.msra.gmra.mrb[8].mxu0 %v12791_v54 }
 0x7b7   : > { %5931 = vmatpush1.bf16.msra.mxu1 %v9002_v38  ;;  %6146 = vmatpush1.bf16.msra.mxu0 %v9012_v35  ;;  %v4340_v38 = vld [vmem:[%s11641_s22 + $0x248] sm:$0xff]  ;;  %v9060_v35 = vcombine.low %v4321_v43, %v4329_v7 }
 0x7b8   : > { %5962 = vmatprep.mubr.bf16.mxu1 %v12795_v36  ;;  %6177 = vmatprep.mubr.bf16.mxu0 %v12795_v36  ;;  %v9067_v60 = vcombine.high %v4332_v34, %v4340_v38  ;;  %v9066_v28 = vcombine.low %v4332_v34, %v4340_v38  ;;  %v4441_v34 = vld [vmem:[%s11641_s22 + $0x570] sm:$0xff] }
 0x7b9   : > { %5932 = vmatprep.subr.bf16.mxu1 %v9019_v52  ;;  %6147 = vmatprep.subr.bf16.mxu0 %v9029_v50  ;;  %v4401_v52 = vld [vmem:[%s11641_s22 + $0x430] sm:$0xff] }
 0x7ba   : > { %v4409_v50 = vld [vmem:[%s11641_s22 + $0x470] sm:$0xff] }
 0x7bb   : > { %5933 = vmatpush1.bf16.msra.mxu1 %v9018_v18  ;;  %6148 = vmatpush1.bf16.msra.mxu0 %v9028_v39  ;;  %v9141_v18 = vcombine.high %v4401_v52, %v4409_v50  ;;  %v4412_v39 = vld [vmem:[%s11641_s22 + $0x488] sm:$0xff]  ;;  %v9140_v43 = vcombine.low %v4401_v52, %v4409_v50 }
 0x7bc   : > { %5934 = vmatprep.subr.bf16.mxu1 %v9035_v51  ;;  %6149 = vmatprep.subr.bf16.mxu0 %v9045_v62  ;;  %v4420_v51 = vld [vmem:[%s11641_s22 + $0x4c8] sm:$0xff]  ;;  %v4417_v62 = vld [vmem:[%s11641_s22 + $0x4b0] sm:$0xff] }
 0x7bd   : > { %v9147_v7 = vcombine.high %v4412_v39, %v4420_v51  ;;  %v9146_v38 = vcombine.low %v4412_v39, %v4420_v51  ;;  %v9156_v4 = vcombine.low %v4417_v62, %v4425_v15  ;;  %v4521_v39 = vld [vmem:[%s11641_s22 + $0x7f0] sm:$0xff] }
 0x7bf   : > { %5935 = vmatpush1.bf16.msra.mxu1 %v9034_v40  ;;  %6150 = vmatpush1.bf16.msra.mxu0 %v9044_v56  ;;  %v9157_v40 = vcombine.high %v4417_v62, %v4425_v15  ;;  %v4428_v56 = vld [vmem:[%s11641_s22 + $0x508] sm:$0xff] }
 0x7c0   : > { %5936 = vmatprep.subr.bf16.mxu1 %v9051_v46  ;;  %6151 = vmatprep.subr.bf16.mxu0 %v9061_v41  ;;  %v4436_v46 = vld [vmem:[%s11641_s22 + $0x548] sm:$0xff]  ;;  %v4433_v41 = vld [vmem:[%s11641_s22 + $0x530] sm:$0xff] }
 0x7c1   : > { %v9163_v63 = vcombine.high %v4428_v56, %v4436_v46  ;;  %v9162_v8 = vcombine.low %v4428_v56, %v4436_v46  ;;  %v9172_v6 = vcombine.low %v4433_v41, %v4441_v34 }
 0x7c3   : > { %5937 = vmatpush1.bf16.msra.mxu1 %v9050_v2  ;;  %6152 = vmatpush1.bf16.msra.mxu0 %v9060_v35  ;;  %v9173_v2 = vcombine.high %v4433_v41, %v4441_v34  ;;  %v4444_v35 = vld [vmem:[%s11641_s22 + $0x588] sm:$0xff]  ;;  %v4285_v34 = vld [vmem:[%s11641_s22 + $0x90] sm:$0xff] }
 0x7c4   : > { %5938 = vmatprep.subr.bf16.mxu1 %v9067_v60  ;;  %6153 = vmatprep.subr.bf16.mxu0 %v9077_v25  ;;  %v4452_v60 = vld [vmem:[%s11641_s22 + $0x5c8] sm:$0xff]  ;;  %v4449_v25 = vld [vmem:[%s11641_s22 + $0x5b0] sm:$0xff] }
 0x7c5   : > { %v9179_v37 = vcombine.high %v4444_v35, %v4452_v60  ;;  %v9178_v3 = vcombine.low %v4444_v35, %v4452_v60  ;;  %v9188_v27 = vcombine.low %v4449_v25, %v4457_v26  ;;  %v10009_v41 = vld [vmem:[%s11650_s2 + $0x4] ss:$8 sps:$4 sm:$0xff]   ;;  %v4301_v35 = vld [vmem:[%s11641_s22 + $0x110] sm:$0xff] }
 0x7c6   : > { %v4309_v60 = vld [vmem:[%s11641_s22 + $0x150] sm:$0xff] }
 0x7c7   : > { %5939 = vmatpush1.bf16.msra.mxu1 %v9066_v28  ;;  %6154 = vmatpush1.bf16.msra.mxu0 %v9076_v9  ;;  %v9189_v28 = vcombine.high %v4449_v25, %v4457_v26  ;;  %v4460_v9 = vld [vmem:[%s11641_s22 + $0x608] sm:$0xff]  ;;  %v10012_v25 = vld [vmem:[%s11650_s2 + $0x14] ss:$8 sps:$4 sm:$0xff]  }
 0x7c8   : > { %5940 = vmatprep.subr.bf16.mxu1 %v9083_v33  ;;  %6155 = vmatprep.subr.bf16.mxu0 %v9093_v19  ;;  %v4468_v33 = vld [vmem:[%s11641_s22 + $0x648] sm:$0xff]  ;;  %v4465_v19 = vld [vmem:[%s11641_s22 + $0x630] sm:$0xff] }
 0x7c9   : > { %v9195_v14 = vcombine.high %v4460_v9, %v4468_v33  ;;  %v9194_v29 = vcombine.low %v4460_v9, %v4468_v33  ;;  %v9204_v32 = vcombine.low %v4465_v19, %v4473_v48  ;;  %v10015_v9 = vld [vmem:[%s11650_s2 + $0x24] ss:$8 sps:$4 sm:$0xff]   ;;  %v9036_v33 = vcombine.low %v4301_v35, %v4309_v60 }
 0x7cb   : > { %5941 = vmatpush1.bf16.msra.mxu1 %v9082_v16  ;;  %6156 = vmatpush1.bf16.msra.mxu0 %v9092_v0  ;;  %v9205_v16 = vcombine.high %v4465_v19, %v4473_v48  ;;  %v4476_v0 = vld [vmem:[%s11641_s22 + $0x688] sm:$0xff] }
 0x7cc   : > { %5942 = vmatprep.subr.bf16.mxu1 %v9099_v30  ;;  %6157 = vmatprep.subr.bf16.mxu0 %v9109_v20  ;;  %v4484_v30 = vld [vmem:[%s11641_s22 + $0x6c8] sm:$0xff]  ;;  %v4481_v20 = vld [vmem:[%s11641_s22 + $0x6b0] sm:$0xff] }
 0x7cd   : > { %v9211_v57 = vcombine.high %v4476_v0, %v4484_v30  ;;  %v9210_v22 = vcombine.low %v4476_v0, %v4484_v30  ;;  %v9220_v52 = vcombine.low %v4481_v20, %v4489_v13  ;;  %v10013_v48 = vld [vmem:[%s11650_s2 + $0x20] ss:$8 sps:$4 sm:$0xff]   ;;  %v10016_v30 = vld [vmem:[%s11650_s2 + $0x30] ss:$8 sps:$4 sm:$0xff]  }
 0x7cf   : > { %5943 = vmatpush1.bf16.msra.mxu1 %v9098_v61  ;;  %6158 = vmatpush1.bf16.msra.mxu0 %v9108_v23  ;;  %v9221_v61 = vcombine.high %v4481_v20, %v4489_v13  ;;  %v4492_v23 = vld [vmem:[%s11641_s22 + $0x708] sm:$0xff]  ;;  %v4349_v20 = vld [vmem:[%s11641_s22 + $0x290] sm:$0xff] }
 0x7d0   : > { %5944 = vmatprep.subr.bf16.mxu1 %v9115_v10  ;;  %6159 = vmatprep.subr.bf16.mxu0 %v9125_v31  ;;  %v4500_v10 = vld [vmem:[%s11641_s22 + $0x748] sm:$0xff]  ;;  %v4497_v31 = vld [vmem:[%s11641_s22 + $0x730] sm:$0xff] }
 0x7d1   : > { %v9227_v50 = vcombine.high %v4492_v23, %v4500_v10  ;;  %v9226_v51 = vcombine.low %v4492_v23, %v4500_v10  ;;  %v9236_v62 = vcombine.low %v4497_v31, %v4505_v5  ;;  %v4357_v13 = vld [vmem:[%s11641_s22 + $0x2d0] sm:$0xff] }
 0x7d2   : > { %v4365_v23 = vld [vmem:[%s11641_s22 + $0x310] sm:$0xff] }
 0x7d3   : > { %5945 = vmatpush1.bf16.msra.mxu1 %v9114_v58  ;;  %6160 = vmatpush1.bf16.msra.mxu0 %v9124_v59  ;;  %v9237_v58 = vcombine.high %v4497_v31, %v4505_v5  ;;  %v4508_v59 = vld [vmem:[%s11641_s22 + $0x788] sm:$0xff]  ;;  %v4373_v10 = vld [vmem:[%s11641_s22 + $0x350] sm:$0xff]  ;;  %v9084_v5 = vcombine.low %v4349_v20, %v4357_v13 }
 0x7d4   : > { %5946 = vmatprep.subr.bf16.mxu1 %v9131_v49  ;;  %6161 = vmatprep.subr.bf16.mxu0 %v9141_v18  ;;  %v4516_v49 = vld [vmem:[%s11641_s22 + $0x7c8] sm:$0xff]  ;;  %v4513_v18 = vld [vmem:[%s11641_s22 + $0x7b0] sm:$0xff] }
 0x7d5   : > { %v9243_v15 = vcombine.high %v4508_v59, %v4516_v49  ;;  %v9252_v56 = vcombine.low %v4513_v18, %v4521_v39  ;;  %v10024_v31 = vld [vmem:[%s11650_s2 + $0x54] ss:$8 sps:$4 sm:$0xff]  }
 0x7d7   : > { %5947 = vmatpush1.bf16.msra.mxu1 %v9130_v47  ;;  %6162 = vmatpush1.bf16.msra.mxu0 %v9140_v43  ;;  %v9253_v47 = vcombine.high %v4513_v18, %v4521_v39  ;;  %v4269_v43 = vld [vmem:[%s11641_s22 + $0x10] sm:$0xff]  ;;  %v10025_v39 = vld [vmem:[%s11650_s2 + $0x60] ss:$8 sps:$4 sm:$0xff]  }
 0x7d8   : > { %5948 = vmatprep.subr.bf16.mxu1 %v9147_v7  ;;  %6163 = vmatprep.subr.bf16.mxu0 %v9157_v40  ;;  %v4277_v7 = vld [vmem:[%s11641_s22 + $0x50] sm:$0xff]  ;;  %v9242_v40 = vcombine.low %v4508_v59, %v4516_v49  ;;  %v10027_v59 = vld [vmem:[%s11650_s2 + $0x64] ss:$8 sps:$4 sm:$0xff]   ;;  %v9100_v49 = vcombine.low %v4365_v23, %v4373_v10 }
 0x7d9   : > { %v9005_v46 = vcombine.high %v4269_v43, %v4277_v7 }
 0x7db   : > { %5949 = vmatpush1.bf16.msra.mxu1 %v9146_v38  ;;  %6164 = vmatpush1.bf16.msra.mxu0 %v9156_v4  ;;  %v4293_v38 = vld [vmem:[%s11641_s22 + $0xd0] sm:$0xff]  ;;  %v9004_v4 = vcombine.low %v4269_v43, %v4277_v7 }
 0x7dc   : > { %5950 = vmatprep.subr.bf16.mxu1 %v9163_v63  ;;  %6165 = vmatprep.subr.bf16.mxu0 %v9173_v2  ;;  %v9021_v63 = vcombine.high %v4285_v34, %v4293_v38  ;;  %v10007_v2 = vld [vmem:[%s11650_s2] ss:$8 sps:$4 sm:$0xff]   ;;  %v9020_v26 = vcombine.low %v4285_v34, %v4293_v38  ;;  %v10028_v7 = vld [vmem:[%s11650_s2 + $0x70] ss:$8 sps:$4 sm:$0xff]  }
 0x7dd   : > { %v10031_v38 = vld [vmem:[%s11650_s2 + $0x80] ss:$8 sps:$4 sm:$0xff]  }
 0x7df   : > { %5951 = vmatpush1.bf16.msra.mxu1 %v9162_v8  ;;  %6166 = vmatpush1.bf16.msra.mxu0 %v9172_v6  ;;  %v9037_v8 = vcombine.high %v4301_v35, %v4309_v60  ;;  %v10010_v6 = vld [vmem:[%s11650_s2 + $0x10] ss:$8 sps:$4 sm:$0xff]  }
 0x7e0   : > { %5952 = vmatprep.subr.bf16.mxu1 %v9179_v37  ;;  %6167 = vmatprep.subr.bf16.mxu0 %v9189_v28  ;;  %v4317_v37 = vld [vmem:[%s11641_s22 + $0x190] sm:$0xff] }
 0x7e1   : > { %v4325_v28 = vld [vmem:[%s11641_s22 + $0x1d0] sm:$0xff] }
 0x7e2   : > { %v9053_v19 = vcombine.high %v4317_v37, %v4325_v28 }
 0x7e3   : > { %5953 = vmatpush1.bf16.msra.mxu1 %v9178_v3  ;;  %6168 = vmatpush1.bf16.msra.mxu0 %v9188_v27  ;;  %v4333_v3 = vld [vmem:[%s11641_s22 + $0x210] sm:$0xff] }
 0x7e4   : > { %5954 = vmatprep.subr.bf16.mxu1 %v9195_v14  ;;  %6169 = vmatprep.subr.bf16.mxu0 %v9205_v16  ;;  %v4341_v27 = vld [vmem:[%s11641_s22 + $0x250] sm:$0xff]  ;;  %v9052_v16 = vcombine.low %v4317_v37, %v4325_v28 }
 0x7e5   : > { %v10018_v14 = vld [vmem:[%s11650_s2 + $0x34] ss:$8 sps:$4 sm:$0xff]   ;;  %v9069_v0 = vcombine.high %v4333_v3, %v4341_v27 }
 0x7e7   : > { %5955 = vmatpush1.bf16.msra.mxu1 %v9194_v29  ;;  %6170 = vmatpush1.bf16.msra.mxu0 %v9204_v32  ;;  %v10021_v29 = vld [vmem:[%s11650_s2 + $0x44] ss:$8 sps:$4 sm:$0xff]   ;;  %v9068_v32 = vcombine.low %v4333_v3, %v4341_v27 }
 0x7e8   : > { %5956 = vmatprep.subr.bf16.mxu1 %v9211_v57  ;;  %6171 = vmatprep.subr.bf16.mxu0 %v9221_v61  ;;  %v9085_v57 = vcombine.high %v4349_v20, %v4357_v13  ;;  %v10019_v61 = vld [vmem:[%s11650_s2 + $0x40] ss:$8 sps:$4 sm:$0xff]  }
 0x7eb   : > { %5957 = vmatpush1.bf16.msra.mxu1 %v9210_v22  ;;  %6172 = vmatpush1.bf16.msra.mxu0 %v9220_v52  ;;  %v9101_v22 = vcombine.high %v4365_v23, %v4373_v10  ;;  %v10022_v52 = vld [vmem:[%s11650_s2 + $0x50] ss:$8 sps:$4 sm:$0xff]  }
 0x7ec   : > { %5958 = vmatprep.subr.bf16.mxu1 %v9227_v50  ;;  %6173 = vmatprep.subr.bf16.mxu0 %v9237_v58  ;;  %v4381_v50 = vld [vmem:[%s11641_s22 + $0x390] sm:$0xff] }
 0x7ed   : > { %v4389_v58 = vld [vmem:[%s11641_s22 + $0x3d0] sm:$0xff] }
 0x7ee   : > { %v9117_v18 = vcombine.high %v4381_v50, %v4389_v58 }
 0x7ef   : > { %5959 = vmatpush1.bf16.msra.mxu1 %v9226_v51  ;;  %6174 = vmatpush1.bf16.msra.mxu0 %v9236_v62  ;;  %v4397_v51 = vld [vmem:[%s11641_s22 + $0x410] sm:$0xff] }
 0x7f0   : > { %5960 = vmatprep.subr.bf16.mxu1 %v9243_v15  ;;  %6175 = vmatprep.subr.bf16.mxu0 %v9253_v47  ;;  %v4405_v62 = vld [vmem:[%s11641_s22 + $0x450] sm:$0xff]  ;;  %v9116_v47 = vcombine.low %v4381_v50, %v4389_v58 }
 0x7f1   : > { %v10030_v15 = vld [vmem:[%s11650_s2 + $0x74] ss:$8 sps:$4 sm:$0xff]   ;;  %v9133_v43 = vcombine.high %v4397_v51, %v4405_v62 }
 0x7f3   : > { %5961 = vmatpush1.bf16.msra.mxu1 %v9242_v40  ;;  %6176 = vmatpush1.bf16.msra.mxu0 %v9252_v56  ;;  %v4413_v40 = vld [vmem:[%s11641_s22 + $0x490] sm:$0xff] }
 0x7f4   : > { %5973 = vmatprep.subr.bf16.mxu1 %v9005_v46  ;;  %7827 = vmatprep.subr.bf16.mxu0 %v10009_v41  ;;  %v4421_v56 = vld [vmem:[%s11641_s22 + $0x4d0] sm:$0xff]  ;;  %v10033_v46 = vld [vmem:[%s11650_s2 + $0x84] ss:$8 sps:$4 sm:$0xff]   ;;  %v9132_v41 = vcombine.low %v4397_v51, %v4405_v62 }
 0x7f5   : > { %v9149_v34 = vcombine.high %v4413_v40, %v4421_v56  ;;  %v9148_v35 = vcombine.low %v4413_v40, %v4421_v56 }
 0x7f6   : > { %5963 = vmatmul.mubr.bf16.vlgmr.msra.gmra.mrb[28].mxu1 %v12791_v54  ;;  %6178 = vmatmul.mubr.bf16.vlgmr.msra.gmra.mrb[12].mxu0 %v12791_v54 }
 0x7f7   : > { %5974 = vmatpush1.bf16.msra.mxu1 %v9004_v4  ;;  %6005 = vmatprep.mubr.bf16.mxu1 %v12795_v36  ;;  %v4429_v4 = vld [vmem:[%s11641_s22 + $0x510] sm:$0xff] }
 0x7f8   : > { %5975 = vmatprep.subr.bf16.mxu1 %v9021_v63  ;;  %7828 = vmatpush1.bf16.msra.mxu0 %v10007_v2  ;;  %v4437_v63 = vld [vmem:[%s11641_s22 + $0x550] sm:$0xff] }
 0x7f9   : > { %7829 = vmatprep.subr.bf16.mxu0 %v10012_v25  ;;  %v10036_v2 = vld [vmem:[%s11650_s2 + $0x94] ss:$8 sps:$4 sm:$0xff]   ;;  %v9165_v60 = vcombine.high %v4429_v4, %v4437_v63  ;;  %v10034_v25 = vld [vmem:[%s11650_s2 + $0x90] ss:$8 sps:$4 sm:$0xff]   ;;  %v9164_v37 = vcombine.low %v4429_v4, %v4437_v63 }
 0x7fa   : > { %v4318_v4 = vld [vmem:[%s11641_s22 + $0x198] sm:$0xff] }
 0x7fb   : > { %5976 = vmatpush1.bf16.msra.mxu1 %v9020_v26  ;;  %v4445_v26 = vld [vmem:[%s11641_s22 + $0x590] sm:$0xff]  ;;  %v4326_v63 = vld [vmem:[%s11641_s22 + $0x1d8] sm:$0xff] }
 0x7fc   : > { %5977 = vmatprep.subr.bf16.mxu1 %v9037_v8  ;;  %7830 = vmatpush1.bf16.msra.mxu0 %v10010_v6  ;;  %v4453_v8 = vld [vmem:[%s11641_s22 + $0x5d0] sm:$0xff]  ;;  %v10039_v6 = vld [vmem:[%s11650_s2 + $0xa4] ss:$8 sps:$4 sm:$0xff]  }
 0x7fd   : > { %7831 = vmatprep.subr.bf16.mxu0 %v10015_v9  ;;  %v9181_v28 = vcombine.high %v4445_v26, %v4453_v8  ;;  %v10037_v9 = vld [vmem:[%s11650_s2 + $0xa0] ss:$8 sps:$4 sm:$0xff]   ;;  %v9180_v3 = vcombine.low %v4445_v26, %v4453_v8  ;;  %v9054_v26 = vcombine.low %v4318_v4, %v4326_v63 }
 0x7ff   : > { %5978 = vmatpush1.bf16.msra.mxu1 %v9036_v33  ;;  %v4461_v33 = vld [vmem:[%s11641_s22 + $0x610] sm:$0xff] }
 0x800   : > { %5979 = vmatprep.subr.bf16.mxu1 %v9053_v19  ;;  %7832 = vmatpush1.bf16.msra.mxu0 %v10013_v48  ;;  %v4469_v19 = vld [vmem:[%s11641_s22 + $0x650] sm:$0xff] }
 0x801   : > { %7833 = vmatprep.subr.bf16.mxu0 %v10018_v14  ;;  %v10042_v48 = vld [vmem:[%s11650_s2 + $0xb4] ss:$8 sps:$4 sm:$0xff]   ;;  %v9197_v27 = vcombine.high %v4461_v33, %v4469_v19  ;;  %v10040_v14 = vld [vmem:[%s11650_s2 + $0xb0] ss:$8 sps:$4 sm:$0xff]   ;;  %v9196_v20 = vcombine.low %v4461_v33, %v4469_v19 }
 0x802   : > { %v4366_v33 = vld [vmem:[%s11641_s22 + $0x318] sm:$0xff] }
 0x803   : > { %5980 = vmatpush1.bf16.msra.mxu1 %v9052_v16  ;;  %v4477_v16 = vld [vmem:[%s11641_s22 + $0x690] sm:$0xff]  ;;  %v4374_v19 = vld [vmem:[%s11641_s22 + $0x358] sm:$0xff] }
 0x804   : > { %5981 = vmatprep.subr.bf16.mxu1 %v9069_v0  ;;  %7834 = vmatpush1.bf16.msra.mxu0 %v10016_v30  ;;  %v4485_v0 = vld [vmem:[%s11641_s22 + $0x6d0] sm:$0xff]  ;;  %v10045_v30 = vld [vmem:[%s11650_s2 + $0xc4] ss:$8 sps:$4 sm:$0xff]  }
 0x805   : > { %7835 = vmatprep.subr.bf16.mxu0 %v10021_v29  ;;  %v9213_v13 = vcombine.high %v4477_v16, %v4485_v0  ;;  %v10043_v29 = vld [vmem:[%s11650_s2 + $0xc0] ss:$8 sps:$4 sm:$0xff]   ;;  %v9212_v23 = vcombine.low %v4477_v16, %v4485_v0  ;;  %v9102_v16 = vcombine.low %v4366_v33, %v4374_v19 }
 0x807   : > { %5982 = vmatpush1.bf16.msra.mxu1 %v9068_v32  ;;  %v4493_v32 = vld [vmem:[%s11641_s22 + $0x710] sm:$0xff] }
 0x808   : > { %5983 = vmatprep.subr.bf16.mxu1 %v9085_v57  ;;  %7836 = vmatpush1.bf16.msra.mxu0 %v10019_v61  ;;  %v4501_v57 = vld [vmem:[%s11641_s22 + $0x750] sm:$0xff] }
 0x809   : > { %7837 = vmatprep.subr.bf16.mxu0 %v10024_v31  ;;  %v10048_v61 = vld [vmem:[%s11650_s2 + $0xd4] ss:$8 sps:$4 sm:$0xff]   ;;  %v9229_v10 = vcombine.high %v4493_v32, %v4501_v57  ;;  %v10046_v31 = vld [vmem:[%s11650_s2 + $0xd0] ss:$8 sps:$4 sm:$0xff]   ;;  %v9228_v50 = vcombine.low %v4493_v32, %v4501_v57 }
 0x80a   : > { %v4414_v32 = vld [vmem:[%s11641_s22 + $0x498] sm:$0xff] }
 0x80b   : > { %5984 = vmatpush1.bf16.msra.mxu1 %v9084_v5  ;;  %v4509_v5 = vld [vmem:[%s11641_s22 + $0x790] sm:$0xff]  ;;  %v4422_v57 = vld [vmem:[%s11641_s22 + $0x4d8] sm:$0xff] }
 0x80c   : > { %5985 = vmatprep.subr.bf16.mxu1 %v9101_v22  ;;  %7838 = vmatpush1.bf16.msra.mxu0 %v10022_v52  ;;  %v4517_v22 = vld [vmem:[%s11641_s22 + $0x7d0] sm:$0xff]  ;;  %v10051_v52 = vld [vmem:[%s11650_s2 + $0xe4] ss:$8 sps:$4 sm:$0xff]  }
 0x80d   : > { %7839 = vmatprep.subr.bf16.mxu0 %v10027_v59  ;;  %v9245_v58 = vcombine.high %v4509_v5, %v4517_v22  ;;  %v10049_v59 = vld [vmem:[%s11650_s2 + $0xe0] ss:$8 sps:$4 sm:$0xff]   ;;  %v9244_v51 = vcombine.low %v4509_v5, %v4517_v22  ;;  %v9150_v5 = vcombine.low %v4414_v32, %v4422_v57 }
 0x80f   : > { %5986 = vmatpush1.bf16.msra.mxu1 %v9100_v49  ;;  %v4270_v49 = vld [vmem:[%s11641_s22 + $0x18] sm:$0xff] }
 0x810   : > { %5987 = vmatprep.subr.bf16.mxu1 %v9117_v18  ;;  %7840 = vmatpush1.bf16.msra.mxu0 %v10025_v39  ;;  %v4278_v18 = vld [vmem:[%s11641_s22 + $0x58] sm:$0xff] }
 0x811   : > { %7841 = vmatprep.subr.bf16.mxu0 %v10030_v15  ;;  %v10054_v39 = vld [vmem:[%s11650_s2 + $0xf4] ss:$8 sps:$4 sm:$0xff]   ;;  %v9007_v62 = vcombine.high %v4270_v49, %v4278_v18  ;;  %v10052_v15 = vld [vmem:[%s11650_s2 + $0xf0] ss:$8 sps:$4 sm:$0xff]   ;;  %v9006_v40 = vcombine.low %v4270_v49, %v4278_v18 }
 0x812   : > { %v4462_v49 = vld [vmem:[%s11641_s22 + $0x618] sm:$0xff] }
 0x813   : > { %5988 = vmatpush1.bf16.msra.mxu1 %v9116_v47  ;;  %v4286_v47 = vld [vmem:[%s11641_s22 + $0x98] sm:$0xff] }
 0x814   : > { %5989 = vmatprep.subr.bf16.mxu1 %v9133_v43  ;;  %7842 = vmatpush1.bf16.msra.mxu0 %v10028_v7  ;;  %v4294_v43 = vld [vmem:[%s11641_s22 + $0xd8] sm:$0xff]  ;;  %v10057_v7 = vld [vmem:[%s11650_s2 + $0x104] ss:$8 sps:$4 sm:$0xff]  }
 0x815   : > { %7843 = vmatprep.subr.bf16.mxu0 %v10033_v46  ;;  %v9023_v56 = vcombine.high %v4286_v47, %v4294_v43  ;;  %v4302_v46 = vld [vmem:[%s11641_s22 + $0x118] sm:$0xff] }
 0x816   : > { %v4470_v18 = vld [vmem:[%s11641_s22 + $0x658] sm:$0xff] }
 0x817   : > { %5990 = vmatpush1.bf16.msra.mxu1 %v9132_v41  ;;  %v4310_v41 = vld [vmem:[%s11641_s22 + $0x158] sm:$0xff] }
 0x818   : > { %5991 = vmatprep.subr.bf16.mxu1 %v9149_v34  ;;  %7844 = vmatpush1.bf16.msra.mxu0 %v10031_v38  ;;  %v9022_v34 = vcombine.low %v4286_v47, %v4294_v43  ;;  %v9039_v38 = vcombine.high %v4302_v46, %v4310_v41  ;;  %v9198_v47 = vcombine.low %v4462_v49, %v4470_v18 }
 0x819   : > { %7845 = vmatprep.subr.bf16.mxu0 %v10036_v2  ;;  %v9038_v2 = vcombine.low %v4302_v46, %v4310_v41  ;;  %v4510_v41 = vld [vmem:[%s11641_s22 + $0x798] sm:$0xff] }
 0x81b   : > { %5992 = vmatpush1.bf16.msra.mxu1 %v9148_v35  ;;  %v9055_v35 = vcombine.high %v4318_v4, %v4326_v63  ;;  %v4272_v63 = vld [vmem:[%s11641_s22 + $0x28] sm:$0xff] }
 0x81c   : > { %5993 = vmatprep.subr.bf16.mxu1 %v9165_v60  ;;  %7846 = vmatpush1.bf16.msra.mxu0 %v10034_v25  ;;  %v4334_v60 = vld [vmem:[%s11641_s22 + $0x218] sm:$0xff] }
 0x81d   : > { %7847 = vmatprep.subr.bf16.mxu0 %v10039_v6  ;;  %v4342_v25 = vld [vmem:[%s11641_s22 + $0x258] sm:$0xff] }
 0x81e   : > { %v9071_v8 = vcombine.high %v4334_v60, %v4342_v25  ;;  %v4350_v6 = vld [vmem:[%s11641_s22 + $0x298] sm:$0xff] }
 0x81f   : > { %5994 = vmatpush1.bf16.msra.mxu1 %v9164_v37  ;;  %v4358_v37 = vld [vmem:[%s11641_s22 + $0x2d8] sm:$0xff] }
 0x820   : > { %5995 = vmatprep.subr.bf16.mxu1 %v9181_v28  ;;  %7848 = vmatpush1.bf16.msra.mxu0 %v10037_v9  ;;  %v9070_v28 = vcombine.low %v4334_v60, %v4342_v25  ;;  %v9087_v9 = vcombine.high %v4350_v6, %v4358_v37  ;;  %v4288_v25 = vld [vmem:[%s11641_s22 + $0xa8] sm:$0xff] }
 0x821   : > { %7849 = vmatprep.subr.bf16.mxu0 %v10042_v48  ;;  %v9086_v48 = vcombine.low %v4350_v6, %v4358_v37  ;;  %v4304_v37 = vld [vmem:[%s11641_s22 + $0x128] sm:$0xff] }
 0x823   : > { %5996 = vmatpush1.bf16.msra.mxu1 %v9180_v3  ;;  %v9103_v3 = vcombine.high %v4366_v33, %v4374_v19  ;;  %v4320_v19 = vld [vmem:[%s11641_s22 + $0x1a8] sm:$0xff] }
 0x824   : > { %5997 = vmatprep.subr.bf16.mxu1 %v9197_v27  ;;  %7850 = vmatpush1.bf16.msra.mxu0 %v10040_v14  ;;  %v4382_v27 = vld [vmem:[%s11641_s22 + $0x398] sm:$0xff] }
 0x825   : > { %7851 = vmatprep.subr.bf16.mxu0 %v10045_v30  ;;  %v4390_v14 = vld [vmem:[%s11641_s22 + $0x3d8] sm:$0xff] }
 0x826   : > { %v9119_v0 = vcombine.high %v4382_v27, %v4390_v14  ;;  %v4398_v30 = vld [vmem:[%s11641_s22 + $0x418] sm:$0xff] }
 0x827   : > { %5998 = vmatpush1.bf16.msra.mxu1 %v9196_v20  ;;  %v4406_v20 = vld [vmem:[%s11641_s22 + $0x458] sm:$0xff] }
 0x828   : > { %5999 = vmatprep.subr.bf16.mxu1 %v9213_v13  ;;  %7852 = vmatpush1.bf16.msra.mxu0 %v10043_v29  ;;  %v9118_v13 = vcombine.low %v4382_v27, %v4390_v14  ;;  %v9135_v29 = vcombine.high %v4398_v30, %v4406_v20  ;;  %v4336_v14 = vld [vmem:[%s11641_s22 + $0x228] sm:$0xff] }
 0x829   : > { %7853 = vmatprep.subr.bf16.mxu0 %v10048_v61  ;;  %v9134_v61 = vcombine.low %v4398_v30, %v4406_v20  ;;  %v4352_v20 = vld [vmem:[%s11641_s22 + $0x2a8] sm:$0xff] }
 0x82b   : > { %6000 = vmatpush1.bf16.msra.mxu1 %v9212_v23  ;;  %v9151_v23 = vcombine.high %v4414_v32, %v4422_v57  ;;  %v12976_v32 = vld [vmem:[%s11644_s17] sm:$0xff]  ;;  %v12979_v57 = vld [vmem:[%s11644_s17 + $0x8] sm:$0xff] }
 0x82c   : > { %6001 = vmatprep.subr.bf16.mxu1 %v9229_v10  ;;  %7854 = vmatpush1.bf16.msra.mxu0 %v10046_v31  ;;  %v4430_v10 = vld [vmem:[%s11641_s22 + $0x518] sm:$0xff] }
 0x82d   : > { %7855 = vmatprep.subr.bf16.mxu0 %v10051_v52  ;;  %v4438_v31 = vld [vmem:[%s11641_s22 + $0x558] sm:$0xff] }
 0x82e   : > { %v9167_v22 = vcombine.high %v4430_v10, %v4438_v31  ;;  %v4446_v52 = vld [vmem:[%s11641_s22 + $0x598] sm:$0xff] }
 0x82f   : > { %6002 = vmatpush1.bf16.msra.mxu1 %v9228_v50  ;;  %v4454_v50 = vld [vmem:[%s11641_s22 + $0x5d8] sm:$0xff] }
 0x830   : > { %6003 = vmatprep.subr.bf16.mxu1 %v9245_v58  ;;  %7856 = vmatpush1.bf16.msra.mxu0 %v10049_v59  ;;  %v9166_v58 = vcombine.low %v4430_v10, %v4438_v31  ;;  %v9183_v59 = vcombine.high %v4446_v52, %v4454_v50  ;;  %v4376_v10 = vld [vmem:[%s11641_s22 + $0x368] sm:$0xff]  ;;  %v4530_v31 = vrot.slane %v12976_v32, %v11895_v53 }
 0x831   : > { %7857 = vmatprep.subr.bf16.mxu0 %v10054_v39  ;;  %v9182_v39 = vcombine.low %v4446_v52, %v4454_v50  ;;  %v4534_v52 = vrot.slane %v12976_v32, %v11899_v55  ;;  %v4566_v50 = vrot.slane %v12979_v57, %v11899_v55 }
 0x833   : > { %6004 = vmatpush1.bf16.msra.mxu1 %v9244_v51  ;;  %v9199_v51 = vcombine.high %v4462_v49, %v4470_v18  ;;  %v4384_v18 = vld [vmem:[%s11641_s22 + $0x3a8] sm:$0xff] }
 0x834   : > { %6016 = vmatprep.subr.bf16.mxu1 %v9007_v62  ;;  %7858 = vmatpush1.bf16.msra.mxu0 %v10052_v15  ;;  %v4478_v62 = vld [vmem:[%s11641_s22 + $0x698] sm:$0xff] }
 0x835   : > { %7870 = vmatprep.subr.bf16.mxu0 %v10057_v7  ;;  %v4486_v15 = vld [vmem:[%s11641_s22 + $0x6d8] sm:$0xff] }
 0x836   : > { %6006 = vmatmul.mubr.bf16.vlgmr.msra.gmra.mrb[32].mxu1 %v12791_v54  ;;  %v9215_v43 = vcombine.high %v4478_v62, %v4486_v15  ;;  %v4494_v7 = vld [vmem:[%s11641_s22 + $0x718] sm:$0xff] }
 0x837   : > { %6017 = vmatpush1.bf16.msra.mxu1 %v9006_v40  ;;  %6048 = vmatprep.mubr.bf16.mxu1 %v12795_v36  ;;  %v4502_v40 = vld [vmem:[%s11641_s22 + $0x758] sm:$0xff] }
 0x838   : > { %6018 = vmatprep.subr.bf16.mxu1 %v9023_v56  ;;  %v9214_v56 = vcombine.low %v4478_v62, %v4486_v15  ;;  %v9231_v46 = vcombine.high %v4494_v7, %v4502_v40 }
 0x83b   : > { %6019 = vmatpush1.bf16.msra.mxu1 %v9022_v34  ;;  %v4518_v34 = vld [vmem:[%s11641_s22 + $0x7d8] sm:$0xff] }
 0x83c   : > { %6020 = vmatprep.subr.bf16.mxu1 %v9039_v38  ;;  %v9230_v38 = vcombine.low %v4494_v7, %v4502_v40  ;;  %v9247_v4 = vcombine.high %v4510_v41, %v4518_v34 }
 0x83f   : > { %6021 = vmatpush1.bf16.msra.mxu1 %v9038_v2  ;;  %v4280_v2 = vld [vmem:[%s11641_s22 + $0x68] sm:$0xff] }
 0x840   : > { %6022 = vmatprep.subr.bf16.mxu1 %v9055_v35  ;;  %v9246_v35 = vcombine.low %v4510_v41, %v4518_v34  ;;  %v9011_v60 = vcombine.high %v4272_v63, %v4280_v2 }
 0x843   : > { %6023 = vmatpush1.bf16.msra.mxu1 %v9054_v26  ;;  %v4296_v26 = vld [vmem:[%s11641_s22 + $0xe8] sm:$0xff] }
 0x844   : > { %6024 = vmatprep.subr.bf16.mxu1 %v9071_v8  ;;  %v9010_v8 = vcombine.low %v4272_v63, %v4280_v2  ;;  %v9027_v6 = vcombine.high %v4288_v25, %v4296_v26 }
 0x847   : > { %6025 = vmatpush1.bf16.msra.mxu1 %v9070_v28  ;;  %v4312_v28 = vld [vmem:[%s11641_s22 + $0x168] sm:$0xff] }
 0x848   : > { %6026 = vmatprep.subr.bf16.mxu1 %v9087_v9  ;;  %v9026_v9 = vcombine.low %v4288_v25, %v4296_v26  ;;  %v9043_v33 = vcombine.high %v4304_v37, %v4312_v28  ;;  %v4400_v25 = vld [vmem:[%s11641_s22 + $0x428] sm:$0xff] }
 0x849   : > { %v4408_v26 = vld [vmem:[%s11641_s22 + $0x468] sm:$0xff] }
 0x84b   : > { %6027 = vmatpush1.bf16.msra.mxu1 %v9086_v48  ;;  %v4328_v48 = vld [vmem:[%s11641_s22 + $0x1e8] sm:$0xff] }
 0x84c   : > { %6028 = vmatprep.subr.bf16.mxu1 %v9103_v3  ;;  %v9042_v3 = vcombine.low %v4304_v37, %v4312_v28  ;;  %v9059_v27 = vcombine.high %v4320_v19, %v4328_v48 }
 0x84f   : > { %6029 = vmatpush1.bf16.msra.mxu1 %v9102_v16  ;;  %v4344_v16 = vld [vmem:[%s11641_s22 + $0x268] sm:$0xff] }
 0x850   : > { %6030 = vmatprep.subr.bf16.mxu1 %v9119_v0  ;;  %v9058_v0 = vcombine.low %v4320_v19, %v4328_v48  ;;  %v9075_v30 = vcombine.high %v4336_v14, %v4344_v16 }
 0x853   : > { %6031 = vmatpush1.bf16.msra.mxu1 %v9118_v13  ;;  %v4360_v13 = vld [vmem:[%s11641_s22 + $0x2e8] sm:$0xff] }
 0x854   : > { %6032 = vmatprep.subr.bf16.mxu1 %v9135_v29  ;;  %v9074_v29 = vcombine.low %v4336_v14, %v4344_v16  ;;  %v9139_v14 = vcombine.high %v4400_v25, %v4408_v26 }
 0x857   : > { %6033 = vmatpush1.bf16.msra.mxu1 %v9134_v61  ;;  %v9091_v61 = vcombine.high %v4352_v20, %v4360_v13 }
 0x858   : > { %6034 = vmatprep.subr.bf16.mxu1 %v9151_v23  ;;  %v4368_v23 = vld [vmem:[%s11641_s22 + $0x328] sm:$0xff] }
 0x85b   : > { %6035 = vmatpush1.bf16.msra.mxu1 %v9150_v5  ;;  %v4562_v5 = vrot.slane %v12979_v57, %v11895_v53 }
 0x85c   : > { %6036 = vmatprep.subr.bf16.mxu1 %v9167_v22  ;;  %v9090_v22 = vcombine.low %v4352_v20, %v4360_v13  ;;  %v4416_v20 = vld [vmem:[%s11641_s22 + $0x4a8] sm:$0xff] }
 0x85d   : > { %v4424_v13 = vld [vmem:[%s11641_s22 + $0x4e8] sm:$0xff] }
 0x85f   : > { %6037 = vmatpush1.bf16.msra.mxu1 %v9166_v58  ;;  %v9107_v58 = vcombine.high %v4368_v23, %v4376_v10 }
 0x860   : > { %6038 = vmatprep.subr.bf16.mxu1 %v9183_v59 }
 0x863   : > { %6039 = vmatpush1.bf16.msra.mxu1 %v9182_v39  ;;  %v4392_v39 = vld [vmem:[%s11641_s22 + $0x3e8] sm:$0xff] }
 0x864   : > { %6040 = vmatprep.subr.bf16.mxu1 %v9199_v51  ;;  %v9123_v63 = vcombine.high %v4384_v18, %v4392_v39 }
 0x867   : > { %6041 = vmatpush1.bf16.msra.mxu1 %v9198_v47 }
 0x868   : > { %6042 = vmatprep.subr.bf16.mxu1 %v9215_v43 }
 0x86b   : > { %6043 = vmatpush1.bf16.msra.mxu1 %v9214_v56 }
 0x86c   : > { %6044 = vmatprep.subr.bf16.mxu1 %v9231_v46  ;;  %v9106_v46 = vcombine.low %v4368_v23, %v4376_v10  ;;  %v9155_v23 = vcombine.high %v4416_v20, %v4424_v13  ;;  %v10058_v10 = vld [vmem:[%s11650_s2 + $0x110] ss:$8 sps:$4 sm:$0xff]  }
 0x86f   : > { %6045 = vmatpush1.bf16.msra.mxu1 %v9230_v38 }
 0x870   : > { %6046 = vmatprep.subr.bf16.mxu1 %v9247_v4 }
 0x873   : > { %6047 = vmatpush1.bf16.msra.mxu1 %v9246_v35 }
 0x874   : > { %6102 = vmatprep.subr.bf16.mxu1 %v9011_v60  ;;  %v9122_v60 = vcombine.low %v4384_v18, %v4392_v39  ;;  %v10066_v18 = vld [vmem:[%s11650_s2 + $0x134] ss:$8 sps:$4 sm:$0xff]  }
 0x876   : > { %6049 = vmatmul.mubr.bf16.vlgmr.msra.gmra.mrb[36].mxu1 %v12791_v54 }
 0x877   : > { %6103 = vmatpush1.bf16.msra.mxu1 %v9010_v8  ;;  %6134 = vmatprep.mubr.bf16.mxu1 %v12795_v36 }
 0x878   : > { %6104 = vmatprep.subr.bf16.mxu1 %v9027_v6 }
 0x87b   : > { %6105 = vmatpush1.bf16.msra.mxu1 %v9026_v9 }
 0x87c   : > { %6106 = vmatprep.subr.bf16.mxu1 %v9043_v33 }
 0x87f   : > { %6107 = vmatpush1.bf16.msra.mxu1 %v9042_v3 }
 0x880   : > { %6108 = vmatprep.subr.bf16.mxu1 %v9059_v27 }
 0x883   : > { %6109 = vmatpush1.bf16.msra.mxu1 %v9058_v0 }
 0x884   : > { %6110 = vmatprep.subr.bf16.mxu1 %v9075_v30  ;;  %v10055_v30 = vld [vmem:[%s11650_s2 + $0x100] ss:$8 sps:$4 sm:$0xff]  }
 0x887   : > { %6111 = vmatpush1.bf16.msra.mxu1 %v9074_v29  ;;  %v10060_v29 = vld [vmem:[%s11650_s2 + $0x114] ss:$8 sps:$4 sm:$0xff]  }
 0x888   : > { %6112 = vmatprep.subr.bf16.mxu1 %v9091_v61  ;;  %v9138_v61 = vcombine.low %v4400_v25, %v4408_v26 }
 0x889   : > { %v5921_v59 = vpop.f32.mrb[24].mxu1  ;;  %v6093_v49 = vpop.f32.mrb[8].mxu0 }
 0x88a   : > { %v5922_v51 = vadd.f32 %v5921_v59, %v4530_v31  ;;  %v6094_v62 = vadd.f32 %v6093_v49, %v4562_v5  ;;  %v5923_v15 = vpop.f32.mrb[25].mxu1  ;;  %v6095_v47 = vpop.f32.mrb[9].mxu0  ;;  %v4448_v59 = vld [vmem:[%s11641_s22 + $0x5a8] sm:$0xff] }
 0x88b   : > { %v5924_v43 = vadd.f32 %v5923_v15, %v4534_v52  ;;  %v6096_v7 = vadd.f32 %v6095_v47, %v4566_v50  ;;  %6113 = vmatpush1.bf16.msra.mxu1 %v9090_v22  ;;  %v5925_v40 = vpop.f32.mrb[26].mxu1  ;;  %v6097_v56 = vpop.f32.mrb[10].mxu0  ;;  %v10063_v22 = vld [vmem:[%s11650_s2 + $0x124] ss:$8 sps:$4 sm:$0xff]  }
 0x88c   : > { %v5926_v41 = vadd.f32 %v5925_v40, %v4530_v31  ;;  %v6098_v34 = vadd.f32 %v6097_v56, %v4562_v5  ;;  %v5927_v38 = vpop.f32.mrb[27].mxu1  ;;  %v6099_v4 = vpop.f32.mrb[11].mxu0  ;;  %6114 = vmatprep.subr.bf16.mxu1 %v9107_v58  ;;  %v6231_v8 = vmax.f32 %v5922_v51, 0.0  ;;  %v6239_v6 = vmax.f32 %v6094_v62, 0.0  ;;  %v4432_v31 = vld [vmem:[%s11641_s22 + $0x528] sm:$0xff] }
 0x88d   : > { %v5928_v2 = vadd.f32 %v5927_v38, %v4534_v52  ;;  %v6100_v35 = vadd.f32 %v6099_v4, %v4566_v50  ;;  %v6232_v9 = vmax.f32 %v5924_v43, 0.0  ;;  %v6240_v33 = vmax.f32 %v6096_v7, 0.0  ;;  %v4440_v5 = vld [vmem:[%s11641_s22 + $0x568] sm:$0xff]  ;;  %v10064_v62 = vld [vmem:[%s11650_s2 + $0x130] ss:$8 sps:$4 sm:$0xff]  }
 0x88e   : > { %v6247_v37 = vmax.f32 %v5926_v41, 0.0  ;;  %v6255_v28 = vmax.f32 %v6098_v34, 0.0  ;;  %v9154_v52 = vcombine.low %v4416_v20, %v4424_v13  ;;  %v9171_v50 = vcombine.high %v4432_v31, %v4440_v5  ;;  %v10061_v58 = vld [vmem:[%s11650_s2 + $0x120] ss:$8 sps:$4 sm:$0xff]   ;;  %v10069_v43 = vld [vmem:[%s11650_s2 + $0x144] ss:$8 sps:$4 sm:$0xff]  }
 0x88f   : > { %v6248_v19 = vmax.f32 %v5928_v2, 0.0  ;;  %v6256_v48 = vmax.f32 %v6100_v35, 0.0  ;;  %6115 = vmatpush1.bf16.msra.mxu1 %v9106_v46  ;;  %v4456_v49 = vld [vmem:[%s11641_s22 + $0x5e8] sm:$0xff]  ;;  %v9170_v39 = vcombine.low %v4432_v31, %v4440_v5  ;;  %v10072_v34 = vld [vmem:[%s11650_s2 + $0x154] ss:$8 sps:$4 sm:$0xff]  }
 0x890   : > { %v6263_v3 = vpack.c.bf16 %v6247_v37, %v6231_v8  ;;  %v12995_v27 = vpack.c.bf16 %v6255_v28, %v6239_v6  ;;  %6116 = vmatprep.subr.bf16.mxu1 %v9123_v63  ;;  %v9187_v51 = vcombine.high %v4448_v59, %v4456_v49  ;;  %v4464_v15 = vld [vmem:[%s11641_s22 + $0x628] sm:$0xff]  ;;  %v9186_v7 = vcombine.low %v4448_v59, %v4456_v49  ;;  %v10070_v63 = vld [vmem:[%s11650_s2 + $0x150] ss:$8 sps:$4 sm:$0xff]   ;;  %v10078_v28 = vld [vmem:[%s11650_s2 + $0x174] ss:$8 sps:$4 sm:$0xff]  }
 0x891   : > { %v6264_v16 = vpack.c.bf16 %v6248_v19, %v6232_v9  ;;  %v12997_v0 = vpack.c.bf16 %v6256_v48, %v6240_v33  ;;  %v4472_v47 = vld [vmem:[%s11641_s22 + $0x668] sm:$0xff]  ;;  %v10076_v19 = vld [vmem:[%s11650_s2 + $0x170] ss:$8 sps:$4 sm:$0xff]  }
 0x892   : > { %v9203_v40 = vcombine.high %v4464_v15, %v4472_v47  ;;  %v10067_v56 = vld [vmem:[%s11650_s2 + $0x140] ss:$8 sps:$4 sm:$0xff]   ;;  %v9202_v38 = vcombine.low %v4464_v15, %v4472_v47  ;;  %v4274_v48 = vld [vmem:[%s11641_s22 + $0x38] sm:$0xff] }
 0x893   : > { %6117 = vmatpush1.bf16.msra.mxu1 %v9122_v60  ;;  %7859 = vmatprep.mubr.bf16.mxu0 %v6264_v16  ;;  %v4480_v46 = vld [vmem:[%s11641_s22 + $0x6a8] sm:$0xff]  ;;  %v4290_v13 = vld [vmem:[%s11641_s22 + $0xb8] sm:$0xff] }
 0x894   : > { %7860 = vmatmul.mubr.bf16.vlgmr.msra.gmra.mrb[16].mxu0 %v6263_v3  ;;  %6118 = vmatprep.subr.bf16.mxu1 %v9139_v14  ;;  %v4488_v41 = vld [vmem:[%s11641_s22 + $0x6e8] sm:$0xff]  ;;  %v4282_v3 = vld [vmem:[%s11641_s22 + $0x78] sm:$0xff] }
 0x895   : > { %7871 = vmatpush1.bf16.msra.mxu0 %v10055_v30  ;;  %v9219_v4 = vcombine.high %v4480_v46, %v4488_v41  ;;  %v4496_v2 = vld [vmem:[%s11641_s22 + $0x728] sm:$0xff]  ;;  %v9218_v25 = vcombine.low %v4480_v46, %v4488_v41  ;;  %v9015_v30 = vcombine.high %v4274_v48, %v4282_v3  ;;  %v10082_v31 = vld [vmem:[%s11650_s2 + $0x190] ss:$8 sps:$4 sm:$0xff]  }
 0x896   : > { %7872 = vmatprep.subr.bf16.mxu0 %v10060_v29  ;;  %v4504_v35 = vld [vmem:[%s11641_s22 + $0x768] sm:$0xff]  ;;  %v4298_v29 = vld [vmem:[%s11641_s22 + $0xf8] sm:$0xff] }
 0x897   : > { %6119 = vmatpush1.bf16.msra.mxu1 %v9138_v61  ;;  %v10075_v60 = vld [vmem:[%s11650_s2 + $0x164] ss:$8 sps:$4 sm:$0xff]   ;;  %v9235_v26 = vcombine.high %v4496_v2, %v4504_v35  ;;  %v10073_v8 = vld [vmem:[%s11650_s2 + $0x160] ss:$8 sps:$4 sm:$0xff]   ;;  %v9234_v9 = vcombine.low %v4496_v2, %v4504_v35  ;;  %v10084_v61 = vld [vmem:[%s11650_s2 + $0x194] ss:$8 sps:$4 sm:$0xff]  }
 0x898   : > { %6120 = vmatprep.subr.bf16.mxu1 %v9155_v23  ;;  %v4512_v6 = vld [vmem:[%s11641_s22 + $0x7a8] sm:$0xff]  ;;  %v9014_v23 = vcombine.low %v4274_v48, %v4282_v3  ;;  %v4306_v5 = vld [vmem:[%s11641_s22 + $0x138] sm:$0xff] }
 0x899   : > { %7873 = vmatpush1.bf16.msra.mxu0 %v10058_v10  ;;  %v4520_v37 = vld [vmem:[%s11641_s22 + $0x7e8] sm:$0xff]  ;;  %v9031_v10 = vcombine.high %v4290_v13, %v4298_v29  ;;  %v4322_v49 = vld [vmem:[%s11641_s22 + $0x1b8] sm:$0xff] }
 0x89a   : > { %7874 = vmatprep.subr.bf16.mxu0 %v10063_v22  ;;  %v9251_v33 = vcombine.high %v4512_v6, %v4520_v37  ;;  %v10081_v14 = vld [vmem:[%s11650_s2 + $0x184] ss:$8 sps:$4 sm:$0xff]   ;;  %v9250_v16 = vcombine.low %v4512_v6, %v4520_v37  ;;  %v10079_v20 = vld [vmem:[%s11650_s2 + $0x180] ss:$8 sps:$4 sm:$0xff]   ;;  %v4314_v22 = vld [vmem:[%s11641_s22 + $0x178] sm:$0xff]  ;;  %v4582_v6 = vrot.slane %v12979_v57, %v12384_v44 }
 0x89b   : > { %6121 = vmatpush1.bf16.msra.mxu1 %v9154_v52  ;;  %v10087_v52 = vld [vmem:[%s11650_s2 + $0x1a4] ss:$8 sps:$4 sm:$0xff]   ;;  %v10085_v59 = vld [vmem:[%s11650_s2 + $0x1a0] ss:$8 sps:$4 sm:$0xff]   ;;  %v4338_v15 = vld [vmem:[%s11641_s22 + $0x238] sm:$0xff] }
 0x89c   : > { %6122 = vmatprep.subr.bf16.mxu1 %v9171_v50  ;;  %v9030_v50 = vcombine.low %v4290_v13, %v4298_v29  ;;  %v4346_v47 = vld [vmem:[%s11641_s22 + $0x278] sm:$0xff] }
 0x89d   : > { %7875 = vmatpush1.bf16.msra.mxu0 %v10061_v58  ;;  %v9047_v58 = vcombine.high %v4306_v5, %v4314_v22  ;;  %v4354_v46 = vld [vmem:[%s11641_s22 + $0x2b8] sm:$0xff] }
 0x89e   : > { %7876 = vmatprep.subr.bf16.mxu0 %v10066_v18  ;;  %v4330_v18 = vld [vmem:[%s11641_s22 + $0x1f8] sm:$0xff] }
 0x89f   : > { %6123 = vmatpush1.bf16.msra.mxu1 %v9170_v39  ;;  %v10090_v39 = vld [vmem:[%s11650_s2 + $0x1b4] ss:$8 sps:$4 sm:$0xff]  }
 0x8a0   : > { %6124 = vmatprep.subr.bf16.mxu1 %v9187_v51  ;;  %v9046_v51 = vcombine.low %v4306_v5, %v4314_v22  ;;  %v4362_v41 = vld [vmem:[%s11641_s22 + $0x2f8] sm:$0xff] }
 0x8a1   : > { %7877 = vmatpush1.bf16.msra.mxu0 %v10064_v62  ;;  %v9063_v62 = vcombine.high %v4322_v49, %v4330_v18  ;;  %v4370_v2 = vld [vmem:[%s11641_s22 + $0x338] sm:$0xff]  ;;  %v9094_v37 = vcombine.low %v4354_v46, %v4362_v41 }
 0x8a2   : > { %7878 = vmatprep.subr.bf16.mxu0 %v10069_v43  ;;  %v10093_v43 = vld [vmem:[%s11650_s2 + $0x1c4] ss:$8 sps:$4 sm:$0xff]   ;;  %v4378_v35 = vld [vmem:[%s11641_s22 + $0x378] sm:$0xff] }
 0x8a3   : > { %6125 = vmatpush1.bf16.msra.mxu1 %v9186_v7  ;;  %v9062_v7 = vcombine.low %v4322_v49, %v4330_v18  ;;  %v4386_v48 = vld [vmem:[%s11641_s22 + $0x3b8] sm:$0xff] }
 0x8a4   : > { %6126 = vmatprep.subr.bf16.mxu1 %v9203_v40  ;;  %v9079_v40 = vcombine.high %v4338_v15, %v4346_v47  ;;  %v4394_v3 = vld [vmem:[%s11641_s22 + $0x3f8] sm:$0xff] }
 0x8a5   : > { %7879 = vmatpush1.bf16.msra.mxu0 %v10067_v56  ;;  %v10091_v56 = vld [vmem:[%s11650_s2 + $0x1c0] ss:$8 sps:$4 sm:$0xff]   ;;  %v10102_v13 = vld [vmem:[%s11650_s2 + $0x1f4] ss:$8 sps:$4 sm:$0xff]   ;;  %v10100_v49 = vld [vmem:[%s11650_s2 + $0x1f0] ss:$8 sps:$4 sm:$0xff]   ;;  %v9126_v18 = vcombine.low %v4386_v48, %v4394_v3 }
 0x8a6   : > { %7880 = vmatprep.subr.bf16.mxu0 %v10072_v34  ;;  %v10096_v34 = vld [vmem:[%s11650_s2 + $0x1d4] ss:$8 sps:$4 sm:$0xff]  }
 0x8a7   : > { %6127 = vmatpush1.bf16.msra.mxu1 %v9202_v38  ;;  %v9078_v38 = vcombine.low %v4338_v15, %v4346_v47 }
 0x8a8   : > { %6128 = vmatprep.subr.bf16.mxu1 %v9219_v4  ;;  %v9095_v4 = vcombine.high %v4354_v46, %v4362_v41 }
 0x8a9   : > { %7881 = vmatpush1.bf16.msra.mxu0 %v10070_v63  ;;  %v10094_v63 = vld [vmem:[%s11650_s2 + $0x1d0] ss:$8 sps:$4 sm:$0xff]  }
 0x8aa   : > { %7882 = vmatprep.subr.bf16.mxu0 %v10075_v60  ;;  %v4538_v60 = vrot.slane %v12976_v32, %v11907_v21 }
 0x8ab   : > { %6129 = vmatpush1.bf16.msra.mxu1 %v9218_v25  ;;  %v4578_v25 = vrot.slane %v12979_v57, %v12381_v45 }
 0x8ac   : > { %6130 = vmatprep.subr.bf16.mxu1 %v9235_v26  ;;  %v10099_v26 = vld [vmem:[%s11650_s2 + $0x1e4] ss:$8 sps:$4 sm:$0xff]  }
 0x8ad   : > { %7883 = vmatpush1.bf16.msra.mxu0 %v10073_v8  ;;  %v4542_v8 = vrot.slane %v12976_v32, %v11912_v24 }
 0x8ae   : > { %7884 = vmatprep.subr.bf16.mxu0 %v10078_v28  ;;  %v9111_v28 = vcombine.high %v4370_v2, %v4378_v35 }
 0x8af   : > { %6131 = vmatpush1.bf16.msra.mxu1 %v9234_v9 }
 0x8b0   : > { %6132 = vmatprep.subr.bf16.mxu1 %v9251_v33 }
 0x8b1   : > { %7885 = vmatpush1.bf16.msra.mxu0 %v10076_v19  ;;  %v10097_v19 = vld [vmem:[%s11650_s2 + $0x1e0] ss:$8 sps:$4 sm:$0xff]  }
 0x8b2   : > { %7886 = vmatprep.subr.bf16.mxu0 %v10081_v14 }
 0x8b3   : > { %6133 = vmatpush1.bf16.msra.mxu1 %v9250_v16 }
 0x8b4   : > { %6188 = vmatprep.subr.bf16.mxu1 %v9015_v30 }
 0x8b5   : > { %7887 = vmatpush1.bf16.msra.mxu0 %v10079_v20 }
 0x8b6   : > { %6135 = vmatmul.mubr.bf16.vlgmr.msra.gmra.mrb[40].mxu1 %v12791_v54  ;;  %7888 = vmatprep.subr.bf16.mxu0 %v10084_v61 }
 0x8b7   : > { %6189 = vmatpush1.bf16.msra.mxu1 %v9014_v23  ;;  %6220 = vmatprep.mubr.bf16.mxu1 %v12795_v36  ;;  %v10088_v36 = vld [vmem:[%s11650_s2 + $0x1b0] ss:$8 sps:$4 sm:$0xff]  }
 0x8b8   : > { %6190 = vmatprep.subr.bf16.mxu1 %v9031_v10  ;;  %v9110_v10 = vcombine.low %v4370_v2, %v4378_v35  ;;  %v10103_v2 = vld [vmem:[%s11650_s2 + $0x200] ss:$8 sps:$4 sm:$0xff]   ;;  %v4418_v35 = vld [vmem:[%s11641_s22 + $0x4b8] sm:$0xff] }
 0x8b9   : > { %7889 = vmatpush1.bf16.msra.mxu0 %v10082_v31 }
 0x8ba   : > { %7890 = vmatprep.subr.bf16.mxu0 %v10087_v52 }
 0x8bb   : > { %6191 = vmatpush1.bf16.msra.mxu1 %v9030_v50  ;;  %v9127_v50 = vcombine.high %v4386_v48, %v4394_v3  ;;  %v10109_v48 = vld [vmem:[%s11650_s2 + $0x220] ss:$8 sps:$4 sm:$0xff]   ;;  %v4450_v3 = vld [vmem:[%s11641_s22 + $0x5b8] sm:$0xff] }
 0x8bc   : > { %6192 = vmatprep.subr.bf16.mxu1 %v9047_v58 }
 0x8bd   : > { %7891 = vmatpush1.bf16.msra.mxu0 %v10085_v59 }
 0x8be   : > { %7892 = vmatprep.subr.bf16.mxu0 %v10090_v39  ;;  %v4402_v39 = vld [vmem:[%s11641_s22 + $0x438] sm:$0xff] }
 0x8bf   : > { %6193 = vmatpush1.bf16.msra.mxu1 %v9046_v51  ;;  %v4410_v51 = vld [vmem:[%s11641_s22 + $0x478] sm:$0xff] }
 0x8c0   : > { %6194 = vmatprep.subr.bf16.mxu1 %v9063_v62 }
 0x8c1   : > { %7893 = vmatpush1.bf16.msra.mxu0 %v10088_v36 }
 0x8c2   : > { %7894 = vmatprep.subr.bf16.mxu0 %v10093_v43  ;;  %v10105_v43 = vld [vmem:[%s11650_s2 + $0x204] ss:$8 sps:$4 sm:$0xff]  }
 0x8c3   : > { %6195 = vmatpush1.bf16.msra.mxu1 %v9062_v7 }
 0x8c4   : > { %6196 = vmatprep.subr.bf16.mxu1 %v9079_v40 }
 0x8c5   : > { %7895 = vmatpush1.bf16.msra.mxu0 %v10091_v56 }
 0x8c6   : > { %7896 = vmatprep.subr.bf16.mxu0 %v10096_v34 }
 0x8c7   : > { %6197 = vmatpush1.bf16.msra.mxu1 %v9078_v38  ;;  %v9143_v38 = vcombine.high %v4402_v39, %v4410_v51 }
 0x8c8   : > { %6198 = vmatprep.subr.bf16.mxu1 %v9095_v4 }
 0x8c9   : > { %v5964_v9 = vpop.f32.mrb[28].mxu1  ;;  %v6179_v33 = vpop.f32.mrb[12].mxu0  ;;  %7897 = vmatpush1.bf16.msra.mxu0 %v10094_v63 }
 0x8ca   : > { %v5965_v14 = vadd.f32 %v5964_v9, %v4538_v60  ;;  %v6180_v16 = vadd.f32 %v6179_v33, %v4578_v25  ;;  %v5966_v30 = vpop.f32.mrb[29].mxu1  ;;  %v6181_v20 = vpop.f32.mrb[13].mxu0  ;;  %7898 = vmatprep.subr.bf16.mxu0 %v10099_v26  ;;  %v9142_v26 = vcombine.low %v4402_v39, %v4410_v51  ;;  %v10111_v9 = vld [vmem:[%s11650_s2 + $0x224] ss:$8 sps:$4 sm:$0xff]  }
 0x8cb   : > { %v5967_v29 = vadd.f32 %v5966_v30, %v4542_v8  ;;  %v6182_v61 = vadd.f32 %v6181_v20, %v4582_v6  ;;  %v5968_v57 = vpop.f32.mrb[30].mxu1  ;;  %v6183_v23 = vpop.f32.mrb[14].mxu0  ;;  %6199 = vmatpush1.bf16.msra.mxu1 %v9094_v37  ;;  %v4434_v37 = vld [vmem:[%s11641_s22 + $0x538] sm:$0xff]  ;;  %v10123_v39 = vld [vmem:[%s11650_s2 + $0x264] ss:$8 sps:$4 sm:$0xff]  }
 0x8cc   : > { %v5969_v31 = vadd.f32 %v5968_v57, %v4538_v60  ;;  %v6184_v5 = vadd.f32 %v6183_v23, %v4578_v25  ;;  %v5970_v22 = vpop.f32.mrb[31].mxu1  ;;  %v6185_v52 = vpop.f32.mrb[15].mxu0  ;;  %6200 = vmatprep.subr.bf16.mxu1 %v9111_v28  ;;  %v6233_v62 = vmax.f32 %v5965_v14, 0.0  ;;  %v6243_v36 = vmax.f32 %v6180_v16, 0.0  ;;  %v4426_v60 = vld [vmem:[%s11641_s22 + $0x4f8] sm:$0xff] }
 0x8cd   : > { %v5971_v58 = vadd.f32 %v5970_v22, %v4542_v8  ;;  %v6186_v59 = vadd.f32 %v6185_v52, %v4582_v6  ;;  %7899 = vmatpush1.bf16.msra.mxu0 %v10097_v19  ;;  %v6234_v7 = vmax.f32 %v5967_v29, 0.0  ;;  %v6244_v40 = vmax.f32 %v6182_v61, 0.0  ;;  %v10108_v25 = vld [vmem:[%s11650_s2 + $0x214] ss:$8 sps:$4 sm:$0xff]   ;;  %v10106_v6 = vld [vmem:[%s11650_s2 + $0x210] ss:$8 sps:$4 sm:$0xff]  }
 0x8ce   : > { %v6249_v15 = vmax.f32 %v5969_v31, 0.0  ;;  %v6259_v47 = vmax.f32 %v6184_v5, 0.0  ;;  %7900 = vmatprep.subr.bf16.mxu0 %v10102_v13  ;;  %v9159_v8 = vcombine.high %v4418_v35, %v4426_v60  ;;  %v4442_v28 = vld [vmem:[%s11641_s22 + $0x578] sm:$0xff]  ;;  %v9158_v33 = vcombine.low %v4418_v35, %v4426_v60  ;;  %v10117_v57 = vld [vmem:[%s11650_s2 + $0x244] ss:$8 sps:$4 sm:$0xff]  }
 0x8cf   : > { %v6250_v56 = vmax.f32 %v5971_v58, 0.0  ;;  %v6260_v46 = vmax.f32 %v6186_v59, 0.0  ;;  %6201 = vmatpush1.bf16.msra.mxu1 %v9110_v10  ;;  %v9175_v19 = vcombine.high %v4434_v37, %v4442_v28  ;;  %v4458_v14 = vld [vmem:[%s11641_s22 + $0x5f8] sm:$0xff]  ;;  %v9174_v30 = vcombine.low %v4434_v37, %v4442_v28  ;;  %v10115_v31 = vld [vmem:[%s11650_s2 + $0x240] ss:$8 sps:$4 sm:$0xff]  }
 0x8d0   : > { %v6265_v41 = vpack.c.bf16 %v6249_v15, %v6233_v62  ;;  %v13073_v34 = vpack.c.bf16 %v6259_v47, %v6243_v36  ;;  %6202 = vmatprep.subr.bf16.mxu1 %v9127_v50  ;;  %v10114_v16 = vld [vmem:[%s11650_s2 + $0x234] ss:$8 sps:$4 sm:$0xff]   ;;  %v9191_v20 = vcombine.high %v4450_v3, %v4458_v14  ;;  %v10112_v13 = vld [vmem:[%s11650_s2 + $0x230] ss:$8 sps:$4 sm:$0xff]   ;;  %v9190_v23 = vcombine.low %v4450_v3, %v4458_v14  ;;  %v10121_v36 = vld [vmem:[%s11650_s2 + $0x260] ss:$8 sps:$4 sm:$0xff]  }
 0x8d1   : > { %v6266_v4 = vpack.c.bf16 %v6250_v56, %v6234_v7  ;;  %v13075_v63 = vpack.c.bf16 %v6260_v46, %v6244_v40  ;;  %7901 = vmatpush1.bf16.msra.mxu0 %v10100_v49  ;;  %v4466_v29 = vld [vmem:[%s11641_s22 + $0x638] sm:$0xff]  ;;  %v10129_v46 = vld [vmem:[%s11650_s2 + $0x284] ss:$8 sps:$4 sm:$0xff]   ;;  %v10133_v60 = vld [vmem:[%s11650_s2 + $0x2a0] ss:$8 sps:$4 sm:$0xff]   ;;  %v4546_v28 = vrot.slane %v12976_v32, %v12381_v45 }
 0x8d2   : > { %7913 = vmatprep.subr.bf16.mxu0 %v10105_v43  ;;  %v4474_v61 = vld [vmem:[%s11641_s22 + $0x678] sm:$0xff]  ;;  %v10135_v35 = vld [vmem:[%s11650_s2 + $0x2a4] ss:$8 sps:$4 sm:$0xff]  }
 0x8d3   : > { %6203 = vmatpush1.bf16.msra.mxu1 %v9126_v18  ;;  %7902 = vmatprep.mubr.bf16.mxu0 %v6266_v4  ;;  %v9207_v10 = vcombine.high %v4466_v29, %v4474_v61  ;;  %v4482_v5 = vld [vmem:[%s11641_s22 + $0x6b8] sm:$0xff]  ;;  %v9206_v50 = vcombine.low %v4466_v29, %v4474_v61 }
 0x8d4   : > { %7903 = vmatmul.mubr.bf16.vlgmr.msra.gmra.mrb[16].mxu0 %v6265_v41  ;;  %6204 = vmatprep.subr.bf16.mxu1 %v9143_v38  ;;  %v4490_v22 = vld [vmem:[%s11641_s22 + $0x6f8] sm:$0xff]  ;;  %v10127_v38 = vld [vmem:[%s11650_s2 + $0x280] ss:$8 sps:$4 sm:$0xff]  }
 0x8d5   : > { %7914 = vmatpush1.bf16.msra.mxu0 %v10103_v2  ;;  %v10120_v52 = vld [vmem:[%s11650_s2 + $0x254] ss:$8 sps:$4 sm:$0xff]   ;;  %v9223_v58 = vcombine.high %v4482_v5, %v4490_v22  ;;  %v10118_v59 = vld [vmem:[%s11650_s2 + $0x250] ss:$8 sps:$4 sm:$0xff]   ;;  %v9222_v51 = vcombine.low %v4482_v5, %v4490_v22 }
 0x8d6   : > { %7915 = vmatprep.subr.bf16.mxu0 %v10108_v25  ;;  %v4498_v49 = vld [vmem:[%s11641_s22 + $0x738] sm:$0xff] }
 0x8d7   : > { %6205 = vmatpush1.bf16.msra.mxu1 %v9142_v26  ;;  %v4506_v18 = vld [vmem:[%s11641_s22 + $0x778] sm:$0xff] }
 0x8d8   : > { %6206 = vmatprep.subr.bf16.mxu1 %v9159_v8  ;;  %v9239_v62 = vcombine.high %v4498_v49, %v4506_v18  ;;  %v4514_v15 = vld [vmem:[%s11641_s22 + $0x7b8] sm:$0xff]  ;;  %v9238_v7 = vcombine.low %v4498_v49, %v4506_v18  ;;  %v10141_v8 = vld [vmem:[%s11650_s2 + $0x2c4] ss:$8 sps:$4 sm:$0xff]   ;;  %v10157_v49 = vld [vmem:[%s11650_s2 + $0x320] ss:$8 sps:$4 sm:$0xff]  }
 0x8d9   : > { %7916 = vmatpush1.bf16.msra.mxu0 %v10106_v6  ;;  %v4522_v47 = vld [vmem:[%s11641_s22 + $0x7f8] sm:$0xff]  ;;  %v10139_v6 = vld [vmem:[%s11650_s2 + $0x2c0] ss:$8 sps:$4 sm:$0xff]  }
 0x8da   : > { %7917 = vmatprep.subr.bf16.mxu0 %v10111_v9  ;;  %v10126_v43 = vld [vmem:[%s11650_s2 + $0x274] ss:$8 sps:$4 sm:$0xff]   ;;  %v9255_v40 = vcombine.high %v4514_v15, %v4522_v47  ;;  %v10124_v56 = vld [vmem:[%s11650_s2 + $0x270] ss:$8 sps:$4 sm:$0xff]   ;;  %v9254_v41 = vcombine.low %v4514_v15, %v4522_v47  ;;  %v10147_v9 = vld [vmem:[%s11650_s2 + $0x2e4] ss:$8 sps:$4 sm:$0xff]  }
 0x8db   : > { %6207 = vmatpush1.bf16.msra.mxu1 %v9158_v33  ;;  %v10132_v4 = vld [vmem:[%s11650_s2 + $0x294] ss:$8 sps:$4 sm:$0xff]   ;;  %v10130_v2 = vld [vmem:[%s11650_s2 + $0x290] ss:$8 sps:$4 sm:$0xff]   ;;  %v4550_v33 = vrot.slane %v12976_v32, %v12384_v44  ;;  %v10171_v47 = vld [vmem:[%s11650_s2 + $0x364] ss:$8 sps:$4 sm:$0xff]  }
 0x8dc   : > { %6208 = vmatprep.subr.bf16.mxu1 %v9175_v19  ;;  %v10138_v25 = vld [vmem:[%s11650_s2 + $0x2b4] ss:$8 sps:$4 sm:$0xff]   ;;  %v10136_v26 = vld [vmem:[%s11650_s2 + $0x2b0] ss:$8 sps:$4 sm:$0xff]  }
 0x8dd   : > { %7918 = vmatpush1.bf16.msra.mxu0 %v10109_v48  ;;  %v10144_v37 = vld [vmem:[%s11650_s2 + $0x2d4] ss:$8 sps:$4 sm:$0xff]   ;;  %v10145_v48 = vld [vmem:[%s11650_s2 + $0x2e0] ss:$8 sps:$4 sm:$0xff]   ;;  %v10148_v61 = vld [vmem:[%s11650_s2 + $0x2f0] ss:$8 sps:$4 sm:$0xff]  }
 0x8de   : > { %7919 = vmatprep.subr.bf16.mxu0 %v10114_v16  ;;  %v10150_v16 = vld [vmem:[%s11650_s2 + $0x2f4] ss:$8 sps:$4 sm:$0xff]   ;;  %v10166_v15 = vld [vmem:[%s11650_s2 + $0x350] ss:$8 sps:$4 sm:$0xff]  }
 0x8df   : > { %6209 = vmatpush1.bf16.msra.mxu1 %v9174_v30  ;;  %v10162_v18 = vld [vmem:[%s11650_s2 + $0x334] ss:$8 sps:$4 sm:$0xff]  }
 0x8e0   : > { %6210 = vmatprep.subr.bf16.mxu1 %v9191_v20 }
 0x8e1   : > { %7920 = vmatpush1.bf16.msra.mxu0 %v10112_v13 }
 0x8e2   : > { %7921 = vmatprep.subr.bf16.mxu0 %v10117_v57 }
 0x8e3   : > { %6211 = vmatpush1.bf16.msra.mxu1 %v9190_v23  ;;  %v10153_v23 = vld [vmem:[%s11650_s2 + $0x304] ss:$8 sps:$4 sm:$0xff]  }
 0x8e4   : > { %6212 = vmatprep.subr.bf16.mxu1 %v9207_v10 }
 0x8e5   : > { %7922 = vmatpush1.bf16.msra.mxu0 %v10115_v31 }
 0x8e6   : > { %7923 = vmatprep.subr.bf16.mxu0 %v10120_v52  ;;  %v10151_v52 = vld [vmem:[%s11650_s2 + $0x300] ss:$8 sps:$4 sm:$0xff]  }
 0x8e7   : > { %6213 = vmatpush1.bf16.msra.mxu1 %v9206_v50  ;;  %v10156_v50 = vld [vmem:[%s11650_s2 + $0x314] ss:$8 sps:$4 sm:$0xff]  }
 0x8e8   : > { %6214 = vmatprep.subr.bf16.mxu1 %v9223_v58  ;;  %v10154_v58 = vld [vmem:[%s11650_s2 + $0x310] ss:$8 sps:$4 sm:$0xff]  }
 0x8e9   : > { %7924 = vmatpush1.bf16.msra.mxu0 %v10118_v59  ;;  %v10159_v59 = vld [vmem:[%s11650_s2 + $0x324] ss:$8 sps:$4 sm:$0xff]  }
 0x8ea   : > { %7925 = vmatprep.subr.bf16.mxu0 %v10123_v39  ;;  %v10160_v39 = vld [vmem:[%s11650_s2 + $0x330] ss:$8 sps:$4 sm:$0xff]  }
 0x8eb   : > { %6215 = vmatpush1.bf16.msra.mxu1 %v9222_v51  ;;  %v10165_v51 = vld [vmem:[%s11650_s2 + $0x344] ss:$8 sps:$4 sm:$0xff]  }
 0x8ec   : > { %6216 = vmatprep.subr.bf16.mxu1 %v9239_v62  ;;  %v10163_v62 = vld [vmem:[%s11650_s2 + $0x340] ss:$8 sps:$4 sm:$0xff]  }
 0x8ed   : > { %7926 = vmatpush1.bf16.msra.mxu0 %v10121_v36  ;;  %v10168_v36 = vld [vmem:[%s11650_s2 + $0x354] ss:$8 sps:$4 sm:$0xff]  }
 0x8ee   : > { %7927 = vmatprep.subr.bf16.mxu0 %v10126_v43  ;;  %v10169_v43 = vld [vmem:[%s11650_s2 + $0x360] ss:$8 sps:$4 sm:$0xff]  }
 0x8ef   : > { %6217 = vmatpush1.bf16.msra.mxu1 %v9238_v7  ;;  %v10174_v7 = vld [vmem:[%s11650_s2 + $0x374] ss:$8 sps:$4 sm:$0xff]  }
 0x8f0   : > { %6218 = vmatprep.subr.bf16.mxu1 %v9255_v40  ;;  %v10172_v40 = vld [vmem:[%s11650_s2 + $0x370] ss:$8 sps:$4 sm:$0xff]  }
 0x8f1   : > { %7928 = vmatpush1.bf16.msra.mxu0 %v10124_v56  ;;  %v10177_v56 = vld [vmem:[%s11650_s2 + $0x384] ss:$8 sps:$4 sm:$0xff]  }
 0x8f2   : > { %7929 = vmatprep.subr.bf16.mxu0 %v10129_v46  ;;  %v10175_v46 = vld [vmem:[%s11650_s2 + $0x380] ss:$8 sps:$4 sm:$0xff]  }
 0x8f3   : > { %6219 = vmatpush1.bf16.msra.mxu1 %v9254_v41  ;;  %v10180_v41 = vld [vmem:[%s11650_s2 + $0x394] ss:$8 sps:$4 sm:$0xff]  }
 0x8f5   : > { %7930 = vmatpush1.bf16.msra.mxu0 %v10127_v38  ;;  %v10178_v38 = vld [vmem:[%s11650_s2 + $0x390] ss:$8 sps:$4 sm:$0xff]  }
 0x8f6   : > { %6221 = vmatmul.mubr.bf16.vlgmr.msra.gmra.mrb[44].mxu1 %v12791_v54  ;;  %7931 = vmatprep.subr.bf16.mxu0 %v10132_v4  ;;  %v10142_v54 = vld [vmem:[%s11650_s2 + $0x2d0] ss:$8 sps:$4 sm:$0xff]   ;;  %v10183_v4 = vld [vmem:[%s11650_s2 + $0x3a4] ss:$8 sps:$4 sm:$0xff]  }
 0x8f9   : > { %7932 = vmatpush1.bf16.msra.mxu0 %v10130_v2  ;;  %v10181_v2 = vld [vmem:[%s11650_s2 + $0x3a0] ss:$8 sps:$4 sm:$0xff]  }
 0x8fa   : > { %7933 = vmatprep.subr.bf16.mxu0 %v10135_v35  ;;  %v10186_v35 = vld [vmem:[%s11650_s2 + $0x3b4] ss:$8 sps:$4 sm:$0xff]  }
 0x8fd   : > { %7934 = vmatpush1.bf16.msra.mxu0 %v10133_v60  ;;  %v10184_v60 = vld [vmem:[%s11650_s2 + $0x3b0] ss:$8 sps:$4 sm:$0xff]  }
 0x8fe   : > { %7935 = vmatprep.subr.bf16.mxu0 %v10138_v25  ;;  %v10189_v25 = vld [vmem:[%s11650_s2 + $0x3c4] ss:$8 sps:$4 sm:$0xff]  }
 0x901   : > { %7936 = vmatpush1.bf16.msra.mxu0 %v10136_v26  ;;  %v10187_v26 = vld [vmem:[%s11650_s2 + $0x3c0] ss:$8 sps:$4 sm:$0xff]  }
 0x902   : > { %7937 = vmatprep.subr.bf16.mxu0 %v10141_v8  ;;  %v10192_v8 = vld [vmem:[%s11650_s2 + $0x3d4] ss:$8 sps:$4 sm:$0xff]  }
 0x905   : > { %7938 = vmatpush1.bf16.msra.mxu0 %v10139_v6  ;;  %v4553_v6 = vsub.s32 6, %v11767_v11 }
 0x906   : > { %7939 = vmatprep.subr.bf16.mxu0 %v10144_v37  ;;  %v4557_v37 = vsub.s32 7, %v11767_v11 }
 0x909   : > { %v6007_v19 = vpop.f32.mrb[32].mxu1  ;;  %7940 = vmatpush1.bf16.msra.mxu0 %v10142_v54  ;;  %v10190_v54 = vld [vmem:[%s11650_s2 + $0x3d0] ss:$8 sps:$4 sm:$0xff]  }
 0x90a   : > { %v6008_v3 = vadd.f32 %v6007_v19, %v4546_v28  ;;  %v6009_v14 = vpop.f32.mrb[33].mxu1  ;;  %7941 = vmatprep.subr.bf16.mxu0 %v10147_v9  ;;  %v10195_v9 = vld [vmem:[%s11650_s2 + $0x3e4] ss:$8 sps:$4 sm:$0xff]  }
 0x90b   : > { %v6010_v30 = vadd.f32 %v6009_v14, %v4550_v33  ;;  %v6011_v20 = vpop.f32.mrb[34].mxu1 }
 0x90c   : > { %v6012_v13 = vadd.f32 %v6011_v20, %v4546_v28  ;;  %v6013_v29 = vpop.f32.mrb[35].mxu1  ;;  %v6235_v57 = vmax.f32 %v6008_v3, 0.0  ;;  %v4554_v28 = vrot.slane %v12976_v32, %v4553_v6 }
 0x90d   : > { %v6014_v45 = vadd.f32 %v6013_v29, %v4550_v33  ;;  %7942 = vmatpush1.bf16.msra.mxu0 %v10145_v48  ;;  %v6236_v10 = vmax.f32 %v6010_v30, 0.0  ;;  %v4558_v33 = vrot.slane %v12976_v32, %v4557_v37  ;;  %v10193_v48 = vld [vmem:[%s11650_s2 + $0x3e0] ss:$8 sps:$4 sm:$0xff]  }
 0x90e   : > { %v6251_v44 = vmax.f32 %v6012_v13, 0.0  ;;  %7943 = vmatprep.subr.bf16.mxu0 %v10150_v16  ;;  %v10198_v16 = vld [vmem:[%s11650_s2 + $0x3f4] ss:$8 sps:$4 sm:$0xff]  }
 0x90f   : > { %v6252_v31 = vmax.f32 %v6014_v45, 0.0 }
 0x910   : > { %v6267_v5 = vpack.c.bf16 %v6251_v44, %v6235_v57  ;;  %v10201_v44 = vld [vmem:[%s11650_s2 + $0x404] ss:$8 sps:$4 sm:$0xff]  }
 0x911   : > { %v6268_v22 = vpack.c.bf16 %v6252_v31, %v6236_v10  ;;  %7944 = vmatpush1.bf16.msra.mxu0 %v10148_v61  ;;  %v10196_v61 = vld [vmem:[%s11650_s2 + $0x3f0] ss:$8 sps:$4 sm:$0xff]  }
 0x912   : > { %7956 = vmatprep.subr.bf16.mxu0 %v10153_v23 }
 0x913   : > { %7945 = vmatprep.mubr.bf16.mxu0 %v6268_v22  ;;  %v10199_v22 = vld [vmem:[%s11650_s2 + $0x400] ss:$8 sps:$4 sm:$0xff]  }
 0x914   : > { %7946 = vmatmul.mubr.bf16.vlgmr.msra.gmra.mrb[16].mxu0 %v6267_v5 }
 0x915   : > { %7957 = vmatpush1.bf16.msra.mxu0 %v10151_v52  ;;  %v10204_v52 = vld [vmem:[%s11650_s2 + $0x414] ss:$8 sps:$4 sm:$0xff]  }
 0x916   : > { %7958 = vmatprep.subr.bf16.mxu0 %v10156_v50  ;;  %v10202_v50 = vld [vmem:[%s11650_s2 + $0x410] ss:$8 sps:$4 sm:$0xff]  }
 0x919   : > { %7959 = vmatpush1.bf16.msra.mxu0 %v10154_v58  ;;  %v10207_v58 = vld [vmem:[%s11650_s2 + $0x424] ss:$8 sps:$4 sm:$0xff]  }
 0x91a   : > { %7960 = vmatprep.subr.bf16.mxu0 %v10159_v59  ;;  %v10205_v59 = vld [vmem:[%s11650_s2 + $0x420] ss:$8 sps:$4 sm:$0xff]  }
 0x91d   : > { %7961 = vmatpush1.bf16.msra.mxu0 %v10157_v49  ;;  %v10210_v49 = vld [vmem:[%s11650_s2 + $0x434] ss:$8 sps:$4 sm:$0xff]  }
 0x91e   : > { %7962 = vmatprep.subr.bf16.mxu0 %v10162_v18  ;;  %v10208_v18 = vld [vmem:[%s11650_s2 + $0x430] ss:$8 sps:$4 sm:$0xff]  }
 0x921   : > { %7963 = vmatpush1.bf16.msra.mxu0 %v10160_v39  ;;  %v10213_v39 = vld [vmem:[%s11650_s2 + $0x444] ss:$8 sps:$4 sm:$0xff]  }
 0x922   : > { %7964 = vmatprep.subr.bf16.mxu0 %v10165_v51  ;;  %v10211_v51 = vld [vmem:[%s11650_s2 + $0x440] ss:$8 sps:$4 sm:$0xff]  }
 0x925   : > { %7965 = vmatpush1.bf16.msra.mxu0 %v10163_v62  ;;  %v10214_v62 = vld [vmem:[%s11650_s2 + $0x450] ss:$8 sps:$4 sm:$0xff]  }
 0x926   : > { %7966 = vmatprep.subr.bf16.mxu0 %v10168_v36  ;;  %v10219_v36 = vld [vmem:[%s11650_s2 + $0x464] ss:$8 sps:$4 sm:$0xff]  }
 0x929   : > { %7967 = vmatpush1.bf16.msra.mxu0 %v10166_v15  ;;  %v10217_v15 = vld [vmem:[%s11650_s2 + $0x460] ss:$8 sps:$4 sm:$0xff]  }
 0x92a   : > { %7968 = vmatprep.subr.bf16.mxu0 %v10171_v47  ;;  %v10222_v47 = vld [vmem:[%s11650_s2 + $0x474] ss:$8 sps:$4 sm:$0xff]  }
 0x92d   : > { %7969 = vmatpush1.bf16.msra.mxu0 %v10169_v43  ;;  %v10220_v43 = vld [vmem:[%s11650_s2 + $0x470] ss:$8 sps:$4 sm:$0xff]  }
 0x92e   : > { %7970 = vmatprep.subr.bf16.mxu0 %v10174_v7  ;;  %v10225_v7 = vld [vmem:[%s11650_s2 + $0x484] ss:$8 sps:$4 sm:$0xff]  }
 0x931   : > { %7971 = vmatpush1.bf16.msra.mxu0 %v10172_v40  ;;  %v10223_v40 = vld [vmem:[%s11650_s2 + $0x480] ss:$8 sps:$4 sm:$0xff]  }
 0x932   : > { %7972 = vmatprep.subr.bf16.mxu0 %v10177_v56  ;;  %v10228_v56 = vld [vmem:[%s11650_s2 + $0x494] ss:$8 sps:$4 sm:$0xff]  }
 0x935   : > { %7973 = vmatpush1.bf16.msra.mxu0 %v10175_v46  ;;  %v10226_v46 = vld [vmem:[%s11650_s2 + $0x490] ss:$8 sps:$4 sm:$0xff]  }
 0x936   : > { %7974 = vmatprep.subr.bf16.mxu0 %v10180_v41  ;;  %v10231_v41 = vld [vmem:[%s11650_s2 + $0x4a4] ss:$8 sps:$4 sm:$0xff]  }
 0x939   : > { %7975 = vmatpush1.bf16.msra.mxu0 %v10178_v38  ;;  %v10229_v38 = vld [vmem:[%s11650_s2 + $0x4a0] ss:$8 sps:$4 sm:$0xff]  }
 0x93a   : > { %7976 = vmatprep.subr.bf16.mxu0 %v10183_v4  ;;  %v10234_v4 = vld [vmem:[%s11650_s2 + $0x4b4] ss:$8 sps:$4 sm:$0xff]  }
 0x93d   : > { %7977 = vmatpush1.bf16.msra.mxu0 %v10181_v2  ;;  %v10232_v2 = vld [vmem:[%s11650_s2 + $0x4b0] ss:$8 sps:$4 sm:$0xff]  }
 0x93e   : > { %7978 = vmatprep.subr.bf16.mxu0 %v10186_v35  ;;  %v10237_v35 = vld [vmem:[%s11650_s2 + $0x4c4] ss:$8 sps:$4 sm:$0xff]  }
 0x941   : > { %7979 = vmatpush1.bf16.msra.mxu0 %v10184_v60  ;;  %v10235_v60 = vld [vmem:[%s11650_s2 + $0x4c0] ss:$8 sps:$4 sm:$0xff]  }
 0x942   : > { %7980 = vmatprep.subr.bf16.mxu0 %v10189_v25  ;;  %v10240_v25 = vld [vmem:[%s11650_s2 + $0x4d4] ss:$8 sps:$4 sm:$0xff]  }
 0x945   : > { %7981 = vmatpush1.bf16.msra.mxu0 %v10187_v26  ;;  %v10238_v26 = vld [vmem:[%s11650_s2 + $0x4d0] ss:$8 sps:$4 sm:$0xff]  }
 0x946   : > { %7982 = vmatprep.subr.bf16.mxu0 %v10192_v8  ;;  %v13197_v8 = vld [vmem:[%s11644_s17 + $0x8] sm:$0xff] }
 0x949   : > { %v6050_v19 = vpop.f32.mrb[36].mxu1  ;;  %7983 = vmatpush1.bf16.msra.mxu0 %v10190_v54  ;;  %v4570_v54 = vrot.slane %v13197_v8, %v11907_v21 }
 0x94a   : > { %v6051_v3 = vadd.f32 %v6050_v19, %v4554_v28  ;;  %v6052_v14 = vpop.f32.mrb[37].mxu1  ;;  %7984 = vmatprep.subr.bf16.mxu0 %v10195_v9  ;;  %v4574_v9 = vrot.slane %v13197_v8, %v11912_v24  ;;  %v10241_v19 = vld [vmem:[%s11650_s2 + $0x4e0] ss:$8 sps:$4 sm:$0xff]  }
 0x94b   : > { %v6053_v30 = vadd.f32 %v6052_v14, %v4558_v33  ;;  %v6054_v20 = vpop.f32.mrb[38].mxu1  ;;  %v10246_v14 = vld [vmem:[%s11650_s2 + $0x4f4] ss:$8 sps:$4 sm:$0xff]  }
 0x94c   : > { %v6055_v13 = vadd.f32 %v6054_v20, %v4554_v28  ;;  %v6056_v29 = vpop.f32.mrb[39].mxu1  ;;  %v6237_v57 = vmax.f32 %v6051_v3, 0.0  ;;  %v10243_v28 = vld [vmem:[%s11650_s2 + $0x4e4] ss:$8 sps:$4 sm:$0xff]  }
 0x94d   : > { %v6057_v45 = vadd.f32 %v6056_v29, %v4558_v33  ;;  %7985 = vmatpush1.bf16.msra.mxu0 %v10193_v48  ;;  %v6238_v23 = vmax.f32 %v6053_v30, 0.0  ;;  %v10244_v29 = vld [vmem:[%s11650_s2 + $0x4f0] ss:$8 sps:$4 sm:$0xff]  }
 0x94e   : > { %v6253_v32 = vmax.f32 %v6055_v13, 0.0  ;;  %7986 = vmatprep.subr.bf16.mxu0 %v10198_v16 }
 0x94f   : > { %v6254_v10 = vmax.f32 %v6057_v45, 0.0 }
 0x950   : > { %v6269_v31 = vpack.c.bf16 %v6253_v32, %v6237_v57 }
 0x951   : > { %v6270_v5 = vpack.c.bf16 %v6254_v10, %v6238_v23  ;;  %7987 = vmatpush1.bf16.msra.mxu0 %v10196_v61  ;;  %v10249_v61 = vld [vmem:[%s11650_s2 + $0x504] ss:$8 sps:$4 sm:$0xff]   ;;  %v10247_v10 = vld [vmem:[%s11650_s2 + $0x500] ss:$8 sps:$4 sm:$0xff]  }
 0x952   : > { %7999 = vmatprep.subr.bf16.mxu0 %v10201_v44 }
 0x953   : > { %7988 = vmatprep.mubr.bf16.mxu0 %v6270_v5  ;;  %v10250_v5 = vld [vmem:[%s11650_s2 + $0x510] ss:$8 sps:$4 sm:$0xff]  }
 0x954   : > { %7989 = vmatmul.mubr.bf16.vlgmr.msra.gmra.mrb[16].mxu0 %v6269_v31  ;;  %v10252_v31 = vld [vmem:[%s11650_s2 + $0x514] ss:$8 sps:$4 sm:$0xff]  }
 0x955   : > { %8000 = vmatpush1.bf16.msra.mxu0 %v10199_v22  ;;  %8031 = vmatprep.mubr.bf16.mxu0 %v12997_v0  ;;  %v10216_v0 = vld [vmem:[%s11650_s2 + $0x454] ss:$8 sps:$4 sm:$0xff]   ;;  %v10255_v22 = vld [vmem:[%s11650_s2 + $0x524] ss:$8 sps:$4 sm:$0xff]  }
 0x956   : > { %8001 = vmatprep.subr.bf16.mxu0 %v10204_v52  ;;  %v10253_v52 = vld [vmem:[%s11650_s2 + $0x520] ss:$8 sps:$4 sm:$0xff]  }
 0x959   : > { %8002 = vmatpush1.bf16.msra.mxu0 %v10202_v50  ;;  %v10258_v50 = vld [vmem:[%s11650_s2 + $0x534] ss:$8 sps:$4 sm:$0xff]  }
 0x95a   : > { %8003 = vmatprep.subr.bf16.mxu0 %v10207_v58  ;;  %v10256_v58 = vld [vmem:[%s11650_s2 + $0x530] ss:$8 sps:$4 sm:$0xff]  }
 0x95d   : > { %8004 = vmatpush1.bf16.msra.mxu0 %v10205_v59  ;;  %v10261_v59 = vld [vmem:[%s11650_s2 + $0x544] ss:$8 sps:$4 sm:$0xff]  }
 0x95e   : > { %8005 = vmatprep.subr.bf16.mxu0 %v10210_v49  ;;  %v10264_v49 = vld [vmem:[%s11650_s2 + $0x554] ss:$8 sps:$4 sm:$0xff]  }
 0x961   : > { %8006 = vmatpush1.bf16.msra.mxu0 %v10208_v18  ;;  %v10262_v18 = vld [vmem:[%s11650_s2 + $0x550] ss:$8 sps:$4 sm:$0xff]  }
 0x962   : > { %8007 = vmatprep.subr.bf16.mxu0 %v10213_v39  ;;  %v10267_v39 = vld [vmem:[%s11650_s2 + $0x564] ss:$8 sps:$4 sm:$0xff]  }
 0x965   : > { %8008 = vmatpush1.bf16.msra.mxu0 %v10211_v51  ;;  %v10265_v51 = vld [vmem:[%s11650_s2 + $0x560] ss:$8 sps:$4 sm:$0xff]  }
 0x966   : > { %8009 = vmatprep.subr.bf16.mxu0 %v10216_v0  ;;  %v10270_v0 = vld [vmem:[%s11650_s2 + $0x574] ss:$8 sps:$4 sm:$0xff]  }
 0x969   : > { %8010 = vmatpush1.bf16.msra.mxu0 %v10214_v62  ;;  %v10268_v62 = vld [vmem:[%s11650_s2 + $0x570] ss:$8 sps:$4 sm:$0xff]  }
 0x96a   : > { %8011 = vmatprep.subr.bf16.mxu0 %v10219_v36  ;;  %v10273_v36 = vld [vmem:[%s11650_s2 + $0x584] ss:$8 sps:$4 sm:$0xff]  }
 0x96d   : > { %8012 = vmatpush1.bf16.msra.mxu0 %v10217_v15  ;;  %v10271_v15 = vld [vmem:[%s11650_s2 + $0x580] ss:$8 sps:$4 sm:$0xff]  }
 0x96e   : > { %8013 = vmatprep.subr.bf16.mxu0 %v10222_v47  ;;  %v10276_v47 = vld [vmem:[%s11650_s2 + $0x594] ss:$8 sps:$4 sm:$0xff]  }
 0x971   : > { %8014 = vmatpush1.bf16.msra.mxu0 %v10220_v43  ;;  %v10274_v43 = vld [vmem:[%s11650_s2 + $0x590] ss:$8 sps:$4 sm:$0xff]  }
 0x972   : > { %8015 = vmatprep.subr.bf16.mxu0 %v10225_v7  ;;  %v10279_v7 = vld [vmem:[%s11650_s2 + $0x5a4] ss:$8 sps:$4 sm:$0xff]  }
 0x975   : > { %8016 = vmatpush1.bf16.msra.mxu0 %v10223_v40  ;;  %v10277_v40 = vld [vmem:[%s11650_s2 + $0x5a0] ss:$8 sps:$4 sm:$0xff]  }
 0x976   : > { %8017 = vmatprep.subr.bf16.mxu0 %v10228_v56  ;;  %v10282_v56 = vld [vmem:[%s11650_s2 + $0x5b4] ss:$8 sps:$4 sm:$0xff]  }
 0x979   : > { %8018 = vmatpush1.bf16.msra.mxu0 %v10226_v46  ;;  %v10280_v46 = vld [vmem:[%s11650_s2 + $0x5b0] ss:$8 sps:$4 sm:$0xff]  }
 0x97a   : > { %8019 = vmatprep.subr.bf16.mxu0 %v10231_v41  ;;  %v10285_v41 = vld [vmem:[%s11650_s2 + $0x5c4] ss:$8 sps:$4 sm:$0xff]  }
 0x97d   : > { %8020 = vmatpush1.bf16.msra.mxu0 %v10229_v38  ;;  %v10283_v38 = vld [vmem:[%s11650_s2 + $0x5c0] ss:$8 sps:$4 sm:$0xff]  }
 0x97e   : > { %8021 = vmatprep.subr.bf16.mxu0 %v10234_v4  ;;  %v10288_v4 = vld [vmem:[%s11650_s2 + $0x5d4] ss:$8 sps:$4 sm:$0xff]  }
 0x981   : > { %8022 = vmatpush1.bf16.msra.mxu0 %v10232_v2  ;;  %v10286_v2 = vld [vmem:[%s11650_s2 + $0x5d0] ss:$8 sps:$4 sm:$0xff]  }
 0x982   : > { %8023 = vmatprep.subr.bf16.mxu0 %v10237_v35  ;;  %v4586_v35 = vrot.slane %v13197_v8, %v4553_v6 }
 0x985   : > { %8024 = vmatpush1.bf16.msra.mxu0 %v10235_v60  ;;  %v10291_v60 = vld [vmem:[%s11650_s2 + $0x5e4] ss:$8 sps:$4 sm:$0xff]  }
 0x986   : > { %8025 = vmatprep.subr.bf16.mxu0 %v10240_v25  ;;  %v4590_v25 = vrot.slane %v13197_v8, %v4557_v37  ;;  %v10297_v8 = vld [vmem:[%s11650_s2 + $0x604] ss:$8 sps:$4 sm:$0xff]  }
 0x989   : > { %v6136_v33 = vpop.f32.mrb[40].mxu1  ;;  %8026 = vmatpush1.bf16.msra.mxu0 %v10238_v26 }
 0x98a   : > { %v6137_v48 = vadd.f32 %v6136_v33, %v4570_v54  ;;  %v6138_v3 = vpop.f32.mrb[41].mxu1  ;;  %8027 = vmatprep.subr.bf16.mxu0 %v10243_v28  ;;  %v10294_v33 = vld [vmem:[%s11650_s2 + $0x5f4] ss:$8 sps:$4 sm:$0xff]  }
 0x98b   : > { %v6139_v16 = vadd.f32 %v6138_v3, %v4574_v9  ;;  %v6140_v30 = vpop.f32.mrb[42].mxu1 }
 0x98c   : > { %v6141_v20 = vadd.f32 %v6140_v30, %v4570_v54  ;;  %v6142_v13 = vpop.f32.mrb[43].mxu1  ;;  %v6241_v45 = vmax.f32 %v6137_v48, 0.0  ;;  %v10289_v54 = vld [vmem:[%s11650_s2 + $0x5e0] ss:$8 sps:$4 sm:$0xff]  }
 0x98d   : > { %v6143_v21 = vadd.f32 %v6142_v13, %v4574_v9  ;;  %8028 = vmatpush1.bf16.msra.mxu0 %v10241_v19  ;;  %v6242_v57 = vmax.f32 %v6139_v16, 0.0  ;;  %v10292_v16 = vld [vmem:[%s11650_s2 + $0x5f0] ss:$8 sps:$4 sm:$0xff]  }
 0x98e   : > { %v6257_v24 = vmax.f32 %v6141_v20, 0.0  ;;  %8029 = vmatprep.subr.bf16.mxu0 %v10246_v14 }
 0x98f   : > { %v6258_v32 = vmax.f32 %v6143_v21, 0.0 }
 0x990   : > { %v13208_v44 = vpack.c.bf16 %v6257_v24, %v6241_v45  ;;  %v10300_v45 = vld [vmem:[%s11650_s2 + $0x614] ss:$8 sps:$4 sm:$0xff]   ;;  %v10298_v24 = vld [vmem:[%s11650_s2 + $0x610] ss:$8 sps:$4 sm:$0xff]  }
 0x991   : > { %v6274_v23 = vpack.c.bf16 %v6258_v32, %v6242_v57  ;;  %8030 = vmatpush1.bf16.msra.mxu0 %v10244_v29  ;;  %v10295_v29 = vld [vmem:[%s11650_s2 + $0x600] ss:$8 sps:$4 sm:$0xff]   ;;  %v10306_v32 = vld [vmem:[%s11650_s2 + $0x634] ss:$8 sps:$4 sm:$0xff]  }
 0x992   : > { %8042 = vmatprep.subr.bf16.mxu0 %v10249_v61  ;;  %v10303_v61 = vld [vmem:[%s11650_s2 + $0x624] ss:$8 sps:$4 sm:$0xff]   ;;  %v10301_v57 = vld [vmem:[%s11650_s2 + $0x620] ss:$8 sps:$4 sm:$0xff]  }
 0x994   : > { %8032 = vmatmul.mubr.bf16.vlgmr.msra.gmra.mrb[16].mxu0 %v12995_v27  ;;  %v10259_v27 = vld [vmem:[%s11650_s2 + $0x540] ss:$8 sps:$4 sm:$0xff]  }
 0x995   : > { %8043 = vmatpush1.bf16.msra.mxu0 %v10247_v10  ;;  %8074 = vmatprep.mubr.bf16.mxu0 %v6274_v23  ;;  %v10304_v23 = vld [vmem:[%s11650_s2 + $0x630] ss:$8 sps:$4 sm:$0xff]   ;;  %v10307_v10 = vld [vmem:[%s11650_s2 + $0x640] ss:$8 sps:$4 sm:$0xff]  }
 0x996   : > { %8044 = vmatprep.subr.bf16.mxu0 %v10252_v31  ;;  %v10310_v31 = vld [vmem:[%s11650_s2 + $0x650] ss:$8 sps:$4 sm:$0xff]  }
 0x999   : > { %8045 = vmatpush1.bf16.msra.mxu0 %v10250_v5  ;;  %v10315_v5 = vld [vmem:[%s11650_s2 + $0x664] ss:$8 sps:$4 sm:$0xff]  }
 0x99a   : > { %8046 = vmatprep.subr.bf16.mxu0 %v10255_v22  ;;  %v10313_v22 = vld [vmem:[%s11650_s2 + $0x660] ss:$8 sps:$4 sm:$0xff]  }
 0x99d   : > { %8047 = vmatpush1.bf16.msra.mxu0 %v10253_v52  ;;  %v10318_v52 = vld [vmem:[%s11650_s2 + $0x674] ss:$8 sps:$4 sm:$0xff]  }
 0x99e   : > { %8048 = vmatprep.subr.bf16.mxu0 %v10258_v50  ;;  %v10316_v50 = vld [vmem:[%s11650_s2 + $0x670] ss:$8 sps:$4 sm:$0xff]  }
 0x9a1   : > { %8049 = vmatpush1.bf16.msra.mxu0 %v10256_v58  ;;  %v10321_v58 = vld [vmem:[%s11650_s2 + $0x684] ss:$8 sps:$4 sm:$0xff]  }
 0x9a2   : > { %8050 = vmatprep.subr.bf16.mxu0 %v10261_v59  ;;  %v10319_v59 = vld [vmem:[%s11650_s2 + $0x680] ss:$8 sps:$4 sm:$0xff]  }
 0x9a5   : > { %8051 = vmatpush1.bf16.msra.mxu0 %v10259_v27  ;;  %v10324_v27 = vld [vmem:[%s11650_s2 + $0x694] ss:$8 sps:$4 sm:$0xff]  }
 0x9a6   : > { %8052 = vmatprep.subr.bf16.mxu0 %v10264_v49  ;;  %v10322_v49 = vld [vmem:[%s11650_s2 + $0x690] ss:$8 sps:$4 sm:$0xff]  }
 0x9a9   : > { %8053 = vmatpush1.bf16.msra.mxu0 %v10262_v18  ;;  %v10327_v18 = vld [vmem:[%s11650_s2 + $0x6a4] ss:$8 sps:$4 sm:$0xff]  }
 0x9aa   : > { %8054 = vmatprep.subr.bf16.mxu0 %v10267_v39  ;;  %v10325_v39 = vld [vmem:[%s11650_s2 + $0x6a0] ss:$8 sps:$4 sm:$0xff]  }
 0x9ad   : > { %8055 = vmatpush1.bf16.msra.mxu0 %v10265_v51  ;;  %v10330_v51 = vld [vmem:[%s11650_s2 + $0x6b4] ss:$8 sps:$4 sm:$0xff]  }
 0x9ae   : > { %8056 = vmatprep.subr.bf16.mxu0 %v10270_v0  ;;  %v10328_v0 = vld [vmem:[%s11650_s2 + $0x6b0] ss:$8 sps:$4 sm:$0xff]  }
 0x9b1   : > { %8057 = vmatpush1.bf16.msra.mxu0 %v10268_v62  ;;  %v10333_v62 = vld [vmem:[%s11650_s2 + $0x6c4] ss:$8 sps:$4 sm:$0xff]  }
 0x9b2   : > { %8058 = vmatprep.subr.bf16.mxu0 %v10273_v36  ;;  %v10331_v36 = vld [vmem:[%s11650_s2 + $0x6c0] ss:$8 sps:$4 sm:$0xff]  }
 0x9b5   : > { %8059 = vmatpush1.bf16.msra.mxu0 %v10271_v15  ;;  %v10336_v15 = vld [vmem:[%s11650_s2 + $0x6d4] ss:$8 sps:$4 sm:$0xff]  }
 0x9b6   : > { %8060 = vmatprep.subr.bf16.mxu0 %v10276_v47  ;;  %v10334_v47 = vld [vmem:[%s11650_s2 + $0x6d0] ss:$8 sps:$4 sm:$0xff]  }
 0x9b9   : > { %8061 = vmatpush1.bf16.msra.mxu0 %v10274_v43  ;;  %v10339_v43 = vld [vmem:[%s11650_s2 + $0x6e4] ss:$8 sps:$4 sm:$0xff]  }
 0x9ba   : > { %8062 = vmatprep.subr.bf16.mxu0 %v10279_v7  ;;  %v10337_v7 = vld [vmem:[%s11650_s2 + $0x6e0] ss:$8 sps:$4 sm:$0xff]  }
 0x9bd   : > { %8063 = vmatpush1.bf16.msra.mxu0 %v10277_v40  ;;  %v10342_v40 = vld [vmem:[%s11650_s2 + $0x6f4] ss:$8 sps:$4 sm:$0xff]  }
 0x9be   : > { %8064 = vmatprep.subr.bf16.mxu0 %v10282_v56  ;;  %v10340_v56 = vld [vmem:[%s11650_s2 + $0x6f0] ss:$8 sps:$4 sm:$0xff]  }
 0x9c1   : > { %8065 = vmatpush1.bf16.msra.mxu0 %v10280_v46  ;;  %v10345_v46 = vld [vmem:[%s11650_s2 + $0x704] ss:$8 sps:$4 sm:$0xff]  }
 0x9c2   : > { %8066 = vmatprep.subr.bf16.mxu0 %v10285_v41  ;;  %v10343_v41 = vld [vmem:[%s11650_s2 + $0x700] ss:$8 sps:$4 sm:$0xff]  }
 0x9c5   : > { %8067 = vmatpush1.bf16.msra.mxu0 %v10283_v38  ;;  %v10348_v38 = vld [vmem:[%s11650_s2 + $0x714] ss:$8 sps:$4 sm:$0xff]  }
 0x9c6   : > { %8068 = vmatprep.subr.bf16.mxu0 %v10288_v4  ;;  %v10346_v4 = vld [vmem:[%s11650_s2 + $0x710] ss:$8 sps:$4 sm:$0xff]  }
 0x9c9   : > { %v6222_v26 = vpop.f32.mrb[44].mxu1  ;;  %8069 = vmatpush1.bf16.msra.mxu0 %v10286_v2  ;;  %v10351_v2 = vld [vmem:[%s11650_s2 + $0x724] ss:$8 sps:$4 sm:$0xff]  }
 0x9ca   : > { %v6223_v28 = vadd.f32 %v6222_v26, %v4586_v35  ;;  %v6224_v9 = vpop.f32.mrb[45].mxu1  ;;  %8070 = vmatprep.subr.bf16.mxu0 %v10291_v60  ;;  %v10354_v60 = vld [vmem:[%s11650_s2 + $0x734] ss:$8 sps:$4 sm:$0xff]   ;;  %v10355_v26 = vld [vmem:[%s11650_s2 + $0x740] ss:$8 sps:$4 sm:$0xff]  }
 0x9cb   : > { %v6225_v19 = vadd.f32 %v6224_v9, %v4590_v25  ;;  %v6226_v48 = vpop.f32.mrb[46].mxu1  ;;  %v10363_v9 = vld [vmem:[%s11650_s2 + $0x764] ss:$8 sps:$4 sm:$0xff]  }
 0x9cc   : > { %v6227_v3 = vadd.f32 %v6226_v48, %v4586_v35  ;;  %v6228_v6 = vpop.f32.mrb[47].mxu1  ;;  %v6245_v11 = vmax.f32 %v6223_v28, 0.0  ;;  %v10349_v35 = vld [vmem:[%s11650_s2 + $0x720] ss:$8 sps:$4 sm:$0xff]   ;;  %v10358_v28 = vld [vmem:[%s11650_s2 + $0x750] ss:$8 sps:$4 sm:$0xff]  }
 0x9cd   : > { %v6229_v14 = vadd.f32 %v6228_v6, %v4590_v25  ;;  %8071 = vmatpush1.bf16.msra.mxu0 %v10289_v54  ;;  %v6246_v30 = vmax.f32 %v6225_v19, 0.0  ;;  %v10352_v25 = vld [vmem:[%s11650_s2 + $0x730] ss:$8 sps:$4 sm:$0xff]   ;;  %v10360_v54 = vld [vmem:[%s11650_s2 + $0x754] ss:$8 sps:$4 sm:$0xff]  }
 0x9ce   : > { %v6261_v37 = vmax.f32 %v6227_v3, 0.0  ;;  %8072 = vmatprep.subr.bf16.mxu0 %v10294_v33  ;;  %v10361_v33 = vld [vmem:[%s11650_s2 + $0x760] ss:$8 sps:$4 sm:$0xff]   ;;  %v10366_v19 = vld [vmem:[%s11650_s2 + $0x774] ss:$8 sps:$4 sm:$0xff]  }
 0x9cf   : > { %v6262_v20 = vmax.f32 %v6229_v14, 0.0  ;;  %v10364_v48 = vld [vmem:[%s11650_s2 + $0x770] ss:$8 sps:$4 sm:$0xff]   ;;  %v10369_v3 = vld [vmem:[%s11650_s2 + $0x784] ss:$8 sps:$4 sm:$0xff]  }
 0x9d0   : > { %v13249_v13 = vpack.c.bf16 %v6261_v37, %v6245_v11  ;;  %v10367_v6 = vld [vmem:[%s11650_s2 + $0x780] ss:$8 sps:$4 sm:$0xff]   ;;  %v10372_v14 = vld [vmem:[%s11650_s2 + $0x794] ss:$8 sps:$4 sm:$0xff]   ;;  %v10375_v11 = vld [vmem:[%s11650_s2 + $0x7a4] ss:$8 sps:$4 sm:$0xff]  }
 0x9d1   : > { %v13251_v21 = vpack.c.bf16 %v6262_v20, %v6246_v30  ;;  %8073 = vmatpush1.bf16.msra.mxu0 %v10292_v16  ;;  %v10370_v16 = vld [vmem:[%s11650_s2 + $0x790] ss:$8 sps:$4 sm:$0xff]   ;;  %v10373_v37 = vld [vmem:[%s11650_s2 + $0x7a0] ss:$8 sps:$4 sm:$0xff]   ;;  %v10381_v20 = vld [vmem:[%s11650_s2 + $0x7c4] ss:$8 sps:$4 sm:$0xff]  }
 0x9d2   : > { %8085 = vmatprep.subr.bf16.mxu0 %v10297_v8  ;;  %v10378_v8 = vld [vmem:[%s11650_s2 + $0x7b4] ss:$8 sps:$4 sm:$0xff]   ;;  %v10376_v30 = vld [vmem:[%s11650_s2 + $0x7b0] ss:$8 sps:$4 sm:$0xff]  }
 0x9d4   : > { %8075 = vmatmul.mubr.bf16.vlgmr.msra.gmra.mrb[16].mxu0 %v13208_v44  ;;  %v10309_v44 = vld [vmem:[%s11650_s2 + $0x644] ss:$8 sps:$4 sm:$0xff]  }
 0x9d5   : > { %8086 = vmatpush1.bf16.msra.mxu0 %v10295_v29  ;;  %8117 = vmatprep.mubr.bf16.mxu0 %v13075_v63  ;;  %v10312_v63 = vld [vmem:[%s11650_s2 + $0x654] ss:$8 sps:$4 sm:$0xff]  }
 0x9d6   : > { %8087 = vmatprep.subr.bf16.mxu0 %v10300_v45  ;;  %v10384_v29 = vld [vmem:[%s11650_s2 + $0x7d4] ss:$8 sps:$4 sm:$0xff]   ;;  %v10382_v45 = vld [vmem:[%s11650_s2 + $0x7d0] ss:$8 sps:$4 sm:$0xff]  }
 0x9d9   : > { %8088 = vmatpush1.bf16.msra.mxu0 %v10298_v24  ;;  %v10387_v24 = vld [vmem:[%s11650_s2 + $0x7e4] ss:$8 sps:$4 sm:$0xff]  }
 0x9da   : > { %8089 = vmatprep.subr.bf16.mxu0 %v10303_v61  ;;  %v10385_v61 = vld [vmem:[%s11650_s2 + $0x7e0] ss:$8 sps:$4 sm:$0xff]  }
 0x9dd   : > { %8090 = vmatpush1.bf16.msra.mxu0 %v10301_v57  ;;  %v10390_v57 = vld [vmem:[%s11650_s2 + $0x7f4] ss:$8 sps:$4 sm:$0xff]  }
 0x9de   : > { %8091 = vmatprep.subr.bf16.mxu0 %v10306_v32  ;;  %v10388_v32 = vld [vmem:[%s11650_s2 + $0x7f0] ss:$8 sps:$4 sm:$0xff]  }
 0x9e1   : > { %8092 = vmatpush1.bf16.msra.mxu0 %v10304_v23  ;;  %v6535_v23 = vld [vmem:[%s13500_s12] sm:$0x3] }
 0x9e2   : > { %8093 = vmatprep.subr.bf16.mxu0 %v10309_v44  ;;  %v6540_v44 = vrot.slane %v6535_v23, %v11895_v53 }
 0x9e5   : > { %8094 = vmatpush1.bf16.msra.mxu0 %v10307_v10  ;;  %v6544_v10 = vrot.slane %v6535_v23, %v11899_v55  ;;  %v10475_v23 = vld [vmem:[#allocation22 + $0x58] sm:$0xff] (!%p9512_p8)  }
 0x9e6   : > { %8095 = vmatprep.subr.bf16.mxu0 %v10312_v63 }
 0x9e9   : > { %8096 = vmatpush1.bf16.msra.mxu0 %v10310_v31 }
 0x9ea   : > { %8097 = vmatprep.subr.bf16.mxu0 %v10315_v5 }
 0x9ed   : > { %8098 = vmatpush1.bf16.msra.mxu0 %v10313_v22 }
 0x9ee   : > { %8099 = vmatprep.subr.bf16.mxu0 %v10318_v52 }
 0x9f1   : > { %8100 = vmatpush1.bf16.msra.mxu0 %v10316_v50 }
 0x9f2   : > { %8101 = vmatprep.subr.bf16.mxu0 %v10321_v58 }
 0x9f5   : > { %8102 = vmatpush1.bf16.msra.mxu0 %v10319_v59 }
 0x9f6   : > { %8103 = vmatprep.subr.bf16.mxu0 %v10324_v27 }
 0x9f9   : > { %8104 = vmatpush1.bf16.msra.mxu0 %v10322_v49 }
 0x9fa   : > { %8105 = vmatprep.subr.bf16.mxu0 %v10327_v18 }
 0x9fd   : > { %8106 = vmatpush1.bf16.msra.mxu0 %v10325_v39 }
 0x9fe   : > { %8107 = vmatprep.subr.bf16.mxu0 %v10330_v51 }
 0xa01   : > { %8108 = vmatpush1.bf16.msra.mxu0 %v10328_v0 }
 0xa02   : > { %8109 = vmatprep.subr.bf16.mxu0 %v10333_v62 }
 0xa05   : > { %8110 = vmatpush1.bf16.msra.mxu0 %v10331_v36 }
 0xa06   : > { %8111 = vmatprep.subr.bf16.mxu0 %v10336_v15 }
 0xa09   : > { %8112 = vmatpush1.bf16.msra.mxu0 %v10334_v47 }
 0xa0a   : > { %8113 = vmatprep.subr.bf16.mxu0 %v10339_v43 }
 0xa0d   : > { %8114 = vmatpush1.bf16.msra.mxu0 %v10337_v7 }
 0xa0e   : > { %8115 = vmatprep.subr.bf16.mxu0 %v10342_v40 }
 0xa11   : > { %8116 = vmatpush1.bf16.msra.mxu0 %v10340_v56 }
 0xa12   : > { %8128 = vmatprep.subr.bf16.mxu0 %v10345_v46 }
 0xa14   : > { %8118 = vmatmul.mubr.bf16.vlgmr.msra.gmra.mrb[16].mxu0 %v13073_v34  ;;  %v10357_v34 = vld [vmem:[%s11650_s2 + $0x744] ss:$8 sps:$4 sm:$0xff]  }
 0xa15   : > { %8129 = vmatpush1.bf16.msra.mxu0 %v10343_v41  ;;  %8160 = vmatprep.mubr.bf16.mxu0 %v13251_v21  ;;  %v10379_v21 = vld [vmem:[%s11650_s2 + $0x7c0] ss:$8 sps:$4 sm:$0xff]   ;;  %s13504_s2 = sld [smem:[#allocation48_spill]] (!%p9512_p8) }
 0xa16   : > { %8130 = vmatprep.subr.bf16.mxu0 %v10348_v38 }
 0xa19   : > { %8131 = vmatpush1.bf16.msra.mxu0 %v10346_v4 }
 0xa1a   : > { %8132 = vmatprep.subr.bf16.mxu0 %v10351_v2 }
 0xa1d   : > { %8133 = vmatpush1.bf16.msra.mxu0 %v10349_v35 }
 0xa1e   : > { %8134 = vmatprep.subr.bf16.mxu0 %v10354_v60 }
 0xa21   : > { %8135 = vmatpush1.bf16.msra.mxu0 %v10352_v25  ;;  %v8175_v25 = vld [vmem:[%s13501_s27] sm:$0x3] }
 0xa22   : > { %8136 = vmatprep.subr.bf16.mxu0 %v10357_v34  ;;  %v8176_v34 = vld [vmem:[%s13502_s19] sm:$0x3] }
 0xa25   : > { %8137 = vmatpush1.bf16.msra.mxu0 %v10355_v26  ;;  %v8213_v26 = vrot.slane %v8175_v25, %v11895_v53 }
 0xa26   : > { %8138 = vmatprep.subr.bf16.mxu0 %v10360_v54  ;;  %v8217_v54 = vrot.slane %v8175_v25, %v11899_v55 }
 0xa29   : > { %8139 = vmatpush1.bf16.msra.mxu0 %v10358_v28 }
 0xa2a   : > { %8140 = vmatprep.subr.bf16.mxu0 %v10363_v9  ;;  %v8228_v9 = vrot.slane %v8176_v34, %v11895_v53  ;;  %v10469_v53 = vld [vmem:[#allocation22 + $0x40] sm:$0xff] (!%p9512_p8)  }
 0xa2d   : > { %8141 = vmatpush1.bf16.msra.mxu0 %v10361_v33  ;;  %v8232_v33 = vrot.slane %v8176_v34, %v11899_v55 }
 0xa2e   : > { %8142 = vmatprep.subr.bf16.mxu0 %v10366_v19 }
 0xa31   : > { %8143 = vmatpush1.bf16.msra.mxu0 %v10364_v48 }
 0xa32   : > { %8144 = vmatprep.subr.bf16.mxu0 %v10369_v3 }
 0xa35   : > { %8145 = vmatpush1.bf16.msra.mxu0 %v10367_v6 }
 0xa36   : > { %8146 = vmatprep.subr.bf16.mxu0 %v10372_v14 }
 0xa39   : > { %8147 = vmatpush1.bf16.msra.mxu0 %v10370_v16 }
 0xa3a   : > { %8148 = vmatprep.subr.bf16.mxu0 %v10375_v11 }
 0xa3d   : > { %8149 = vmatpush1.bf16.msra.mxu0 %v10373_v37 }
 0xa3e   : > { %8150 = vmatprep.subr.bf16.mxu0 %v10378_v8 }
 0xa41   : > { %8151 = vmatpush1.bf16.msra.mxu0 %v10376_v30 }
 0xa42   : > { %8152 = vmatprep.subr.bf16.mxu0 %v10381_v20 }
 0xa45   : > { %8153 = vmatpush1.bf16.msra.mxu0 %v10379_v21 }
 0xa46   : > { %8154 = vmatprep.subr.bf16.mxu0 %v10384_v29 }
 0xa49   : > { %8155 = vmatpush1.bf16.msra.mxu0 %v10382_v45  ;;  %v10470_v45 = vld [vmem:[#allocation22] sm:$0xff] (!%p9512_p8)  }
 0xa4a   : > { %8156 = vmatprep.subr.bf16.mxu0 %v10387_v24  ;;  %v10471_v24 = vld [vmem:[#allocation22 + $0x48] sm:$0xff] (!%p9512_p8)  }
 0xa4d   : > { %8157 = vmatpush1.bf16.msra.mxu0 %v10385_v61  ;;  %v10472_v61 = vld [vmem:[#allocation22 + $0x8] sm:$0xff] (!%p9512_p8)  }
 0xa4e   : > { %8158 = vmatprep.subr.bf16.mxu0 %v10390_v57  ;;  %v10473_v57 = vld [vmem:[#allocation22 + $0x50] sm:$0xff] (!%p9512_p8)  }
 0xa51   : > { %8159 = vmatpush1.bf16.msra.mxu0 %v10388_v32  ;;  %v10474_v32 = vld [vmem:[#allocation22 + $0x10] sm:$0xff] (!%p9512_p8)  }
 0xa52   : > { %9588 = vmatprep.subr.bf16.mxu0 (!%p9512_p8), %v10469_v53 }
 0xa54   : > { %8161 = vmatmul.mubr.bf16.vlgmr.msra.gmra.mrb[16].mxu0 %v13249_v13 }
 0xa55   : > { %9589 = vmatpush3.bf16.msra.mxu0 (!%p9512_p8), %v10470_v45 }
 0xa56   : > { %9590 = vmatprep.subr.bf16.mxu0 (!%p9512_p8), %v10471_v24 }
 0xa59   : > { %9591 = vmatpush3.bf16.msra.mxu0 (!%p9512_p8), %v10472_v61 }
 0xa5a   : > { %9592 = vmatprep.subr.bf16.mxu0 (!%p9512_p8), %v10473_v57 }
 0xa5d   : > { %9593 = vmatpush3.bf16.msra.mxu0 (!%p9512_p8), %v10474_v32 }
 0xa5e   : > { %9594 = vmatprep.subr.bf16.mxu0 (!%p9512_p8), %v10475_v23 }
 0xb27   : > { %v8162_v63 = vpop.f32.mrb[16].mxu0 }
 0xb28   : > { %v9642_v31 = vadd.f32 %v8162_v63, %v6540_v44  ;;  %v8164_v5 = vpop.f32.mrb[17].mxu0  ;;  %v10478_v63 = vld [vmem:[#allocation22 + $0x20] sm:$0xff] (!%p9512_p8)  }
 0xb29   : > { %v9643_v22 = vadd.f32 %v8164_v5, %v6544_v10  ;;  %v8166_v52 = vpop.f32.mrb[18].mxu0  ;;  %v10480_v5 = vld [vmem:[#allocation22 + $0x28] sm:$0xff] (!%p9512_p8)  }
 0xb2a   : > { %v8171_v50 = vadd.f32 %v9642_v31, %v12777_v42  ;;  %v9644_v58 = vadd.f32 %v8166_v52, %v6540_v44  ;;  %v8168_v59 = vpop.f32.mrb[19].mxu0  ;;  %v10476_v44 = vld [vmem:[#allocation22 + $0x18] sm:$0xff] (!%p9512_p8)   ;;  %v10479_v31 = vld [vmem:[#allocation22 + $0x68] sm:$0xff] (!%p9512_p8)   ;;  %v10482_v52 = vld [vmem:[#allocation22 + $0x30] sm:$0xff] (!%p9512_p8)  }
 0xb2b   : > { %v8172_v27 = vadd.f32 %v9643_v22, %v12779_v12  ;;  %v9645_v49 = vadd.f32 %v8168_v59, %v6544_v10  ;;  %v10477_v10 = vld [vmem:[#allocation22 + $0x60] sm:$0xff] (!%p9512_p8)   ;;  %9595 = vmatpush3.bf16.msra.mxu0 (!%p9512_p8), %v10476_v44  ;;  %v10481_v22 = vld [vmem:[#allocation22 + $0x70] sm:$0xff] (!%p9512_p8)  }
 0xb2c   : > { %v8173_v13 = vadd.f32 %v9644_v58, %v12781_v1  ;;  %9596 = vmatprep.subr.bf16.mxu0 (!%p9512_p8), %v10477_v10  ;;  %v10484_v58 = vld [vmem:[#allocation22 + $0x38] sm:$0xff] (!%p9512_p8)  }
 0xb2d   : > { %v8174_v18 = vadd.f32 %v9645_v49, %v12783_v17  ;;  %v8177_v39 = vadd.f32 %v8172_v27, %v8171_v50  ;;  %v9513_v49 = vld [vmem:[#allocation23] ss:$0 sm:$0xff] (!%p9512_p8) }
 0xb2f   : > { %8178 = vadd.xlane.f32.xlu0 %v8177_v39  ;;  %v8180_v51 = vadd.f32 %v8174_v18, %v8173_v13  ;;  %9597 = vmatpush3.bf16.msra.mxu0 (!%p9512_p8), %v10478_v63 }
 0xb30   : > { %9598 = vmatprep.subr.bf16.mxu0 (!%p9512_p8), %v10479_v31 }
 0xb31   : > { %8181 = vadd.xlane.f32.xlu1 %v8180_v51 }
 0xb33   : > { %9599 = vmatpush3.bf16.msra.mxu0 (!%p9512_p8), %v10480_v5 }
 0xb34   : > { %9600 = vmatprep.subr.bf16.mxu0 (!%p9512_p8), %v10481_v22 }
 0xb37   : > { %9601 = vmatpush3.bf16.msra.mxu0 (!%p9512_p8), %v10482_v52 }
 0xbbc   : > { %v8179_v0 = vpop.xlane.xlu0 %8178 }
 0xbbd   : > { %v8183_v62 = vmul.f32 0.00390625, %v8179_v0 }
 0xbbe   : > { %v8182_v36 = vpop.xlane.xlu1 %8181 }
 0xbbf   : > { %v8185_v15 = vsub.f32 %v8171_v50, %v8183_v62  ;;  %v8186_v47 = vsub.f32 %v8172_v27, %v8183_v62  ;;  %v8184_v43 = vmul.f32 0.00390625, %v8182_v36  ;;  %v10483_v50 = vld [vmem:[#allocation22 + $0x78] sm:$0xff] (!%p9512_p8)  }
 0xbc0   : > { %9602 = vmatprep.subr.bf16.mxu0 (!%p9512_p8), %v10483_v50 }
 0xbc1   : > { %v8187_v42 = vsub.f32 %v8173_v13, %v8184_v43  ;;  %v8188_v7 = vsub.f32 %v8174_v18, %v8184_v43  ;;  %v8189_v40 = vmul.f32 %v8185_v15, %v8185_v15  ;;  %v8190_v12 = vmul.f32 %v8186_v47, %v8186_v47  ;;  %9603 = vmatpush3.bf16.msra.mxu0 (!%p9512_p8), %v10484_v58 }
 0xbc3   : > { %v8193_v56 = vadd.f32 %v8190_v12, %v8189_v40  ;;  %v8191_v1 = vmul.f32 %v8187_v42, %v8187_v42  ;;  %v8192_v46 = vmul.f32 %v8188_v7, %v8188_v7 }
 0xbc5   : > { %8194 = vadd.xlane.f32.xlu0 %v8193_v56  ;;  %v8196_v17 = vadd.f32 %v8192_v46, %v8191_v1 }
 0xbc7   : > { %8197 = vadd.xlane.f32.xlu1 %v8196_v17 }
 0xc52   : > { %v8195_v41 = vpop.xlane.xlu0 %8194 }
 0xc53   : > { %v8199_v38 = vmul.f32 0.00390625, %v8195_v41 }
 0xc54   : > { %v8198_v4 = vpop.xlane.xlu1 %8197 }
 0xc55   : > { %v8201_v2 = vadd.f32 1e-05, %v8199_v38  ;;  %v8200_v35 = vmul.f32 0.00390625, %v8198_v4 }
 0xc57   : > { %10459 = vrsqrt.f32 %v8201_v2  ;;  %v8202_v60 = vadd.f32 1e-05, %v8200_v35 }
 0xc59   : > { %10461 = vrsqrt.f32 %v8202_v60 }
 0xc61   : > { %v10460_v28 = vpop.eup %10459 }
 0xc62   : > { %v8205_v19 = vmul.f32 %v10460_v28, %v8185_v15  ;;  %v8206_v48 = vmul.f32 %v10460_v28, %v8186_v47 }
 0xc63   : > { %v10462_v3 = vpop.eup %10461 }
 0xc64   : > { %v8220_v6 = vmul.f32 %v8213_v26, %v8205_v19  ;;  %v8221_v14 = vmul.f32 %v8217_v54, %v8206_v48  ;;  %v8207_v16 = vmul.f32 %v10462_v3, %v8187_v42  ;;  %v8208_v11 = vmul.f32 %v10462_v3, %v8188_v7  ;;  %8246 = sbr.rel (%p9512_p8) target bundleno = 3401 (0xd49), region = 144 }
 0xc66   : > { %v8235_v37 = vadd.f32 %v8228_v9, %v8220_v6  ;;  %v8236_v8 = vadd.f32 %v8232_v33, %v8221_v14  ;;  %v8222_v30 = vmul.f32 %v8213_v26, %v8207_v16  ;;  %v8223_v20 = vmul.f32 %v8217_v54, %v8208_v11 }
 0xc68   : > { %8239 = vst [vmem:[#allocation25] sm:$0xff] %v8235_v37  ;;  %8240 = vst [vmem:[#allocation25 + $0x8] sm:$0xff] %v8236_v8  ;;  %v8237_v21 = vadd.f32 %v8228_v9, %v8222_v30  ;;  %v8238_v29 = vadd.f32 %v8232_v33, %v8223_v20 }
 0xc6a   : > { %8241 = vst [vmem:[#allocation25 + $0x10] sm:$0xff] %v8237_v21  ;;  %8242 = vst [vmem:[#allocation25 + $0x18] sm:$0xff] %v8238_v29  ;;  %v8248_v55 = vpack.c.bf16 (!%p9512_p8), %v8238_v29, %v8236_v8  ;;  %v8247_v59 = vpack.c.bf16 (!%p9512_p8), %v8237_v21, %v8235_v37 }
 0xc6c   : > { %8416 = vmatprep.mubr.bf16.mxu0 %v8248_v55 }
 0xc6d   : > { %8417 = vmatmul.mubr.bf16.vlgmr.msra.gmra.mrb[0].mxu0 %v8247_v59 }
 0xd40   : > { %v9604_v27 = vpop.f32.mrb[0].mxu0 }
 0xd41   : > { %v9605_v13 = vpop.f32.mrb[1].mxu0 }
 0xd42   : > { %v9606_v18 = vadd.f32 %v9605_v13, %v9604_v27  ;;  %v9607_v39 = vpop.f32.mrb[2].mxu0 }
 0xd43   : > { %v9608_v51 = vpop.f32.mrb[3].mxu0 }
 0xd44   : > { %v8419_v0 = vadd.f32 %v9606_v18, %v9513_v49  ;;  %v9609_v62 = vadd.f32 %v9608_v51, %v9607_v39 }
 0xd46   : > { %8425 = vst [vmem:[%s13504_s2] sm:$0xff] %v8419_v0  ;;  %v8422_v36 = vadd.f32 %v9609_v62, %v9513_v49 }
 0xd48   : > { %8426 = vst [vmem:[%s13504_s2 + $0x8] sm:$0xff] %v8422_v36 }
 0xd49 PF: > { %s13505_s29 = sld [smem:[#allocation38_spill]]  ;;  %s11024_s30 = smov [#allocation25]  }
 0xd4a   : > { %s8433_s28 = sshll.u32 %s11024_s30, 4  ;;  %s8434_s28 = int_to_ptr.vmem [resolvable:$true] %s8433_s28 }
 0xd4b   : > { %s10901_s0 = scalar_lea.vmem %s8434_s28, 512  ;;  %p10908_p0 = scmp.lt.s32.totalorder %s8434_s28, %s8434_s28 }
 0xd4c   : > { %p10902_p2 = scmp.ne.s32.totalorder %s8434_s28, %s10901_s0  ;;  %p10909_p9 = scmp.lt.s32.totalorder %s10901_s0, %s10901_s0 }
 0xd4e   : > { %p10910_p12 = por %p10909_p9, %p10908_p0 }
 0xd4f   : > { %p9765_p1 = scmp.eq.s32.totalorder %s13505_s29, 3 }
 0xd51   : > { %p10903_p13 = pnand %p10902_p2, %p9765_p1 }
 0xd53   : > { %p10904_p5 = pneg %p10903_p13 }
 0xd55   : > { %p10911_p10 = pnand %p10910_p12, %p10904_p5 }
 0xd57   : > { %10914 = shalt.err (!%p10911_p10)
}
 0xd58   : > { %s13506_s21 = sld [smem:[#allocation47_spill]] }
 0xd5e   : > { %s13507_s16 = smov %s13506_s21  ;;  %s10915_s12 = scalar_lea.hbm %s13506_s21, 512 }
 0xd5f   : > { %p10916_p3 = scmp.ne.s32.totalorder %s13507_s16, %s10915_s12  ;;  %p10921_p6 = scmp.lt.u32.totalorder %s10915_s12, %s13507_s16 }
 0xd61   : > { %p10917_p11 = pnand %p10916_p3, %p9765_p1 }
 0xd63   : > { %p10918_p4 = pneg %p10917_p11 }
 0xd65   : > { %p10923_p7 = pnand %p10921_p6, %p10918_p4 }
 0xd67   : > { %10926 = shalt.err (!%p10923_p7)
}
 0xd68   : > { %s11025_s17 = smov 256   ;;  %s11026_s24 = smov 16  }
 0xd69   : > { %9713 = dma.vmem_to_hbm [thread:$0]  (%p9765_p1), %s8434_s28, 512, %s13507_s16, [#allocation4], %s11025_s17, %s11025_s17, %s11026_s24  }
 0xd6a   : > { %10980 = dma.done.wait (%p9765_p1), [#allocation4], 512  }
 0xd6b   : > { %10982 = vsyncadd (%p9765_p1), [#allocation4], 4294966784 }
 0xd6c PF: > { %s13508_s24 = sld [smem:[#allocation39_spill]]  ;;  %s13509_s21 = sld [smem:[#allocation36_spill]] }
 0xd6d   : > { %s13510_s22 = sld [smem:[#allocation37_spill]]  ;;  %s13511_s23 = sld [smem:[#allocation40_spill]] }
 0xd72   : > { %p47_p8 = scmp.ge.s32.totalorder %s13508_s24, 6  }
 0xd74   :  { %49 = sbr.rel (!%p47_p8) target bundleno = 24 (0x18), region = 274 }
 0xd7b   :  { %8455 = vsyncpa [#allocation3], 1 }
 0xd7c   :  { %8457 = vsyncpa [#allocation3 + $0x1], 1 }
 0xd7d   :  { %8458 = vsyncpa [#allocation6], 1 }
 0xd7e   :  { %8460 = vsyncpa [#allocation6 + $0x1], 1 }
 0xd7f   :  { %8461 = vsyncpa [#allocation9], 1 }
 0xd80   :  { %8463 = vsyncpa [#allocation9 + $0x1], 1 }
 0xd81   :  { %8464 = vsyncpa [#allocation12], 1 }
 0xd82   :  { %8466 = vsyncpa [#allocation12 + $0x1], 1 }
 0xd83   :  { %8467 = vsyncpa [#allocation15], 1 }
 0xd84   :  { %8469 = vsyncpa [#allocation15 + $0x1], 1 }
 0xd85   :  { %8470 = vsyncpa [#allocation18], 1 }
 0xd86   :  { %8472 = vsyncpa [#allocation18 + $0x1], 1 }
 0xd87   :  { %8473 = vsyncpa [#allocation21], 1 }
 0xd88   :  { %8475 = vsyncpa [#allocation21 + $0x1], 1 }
 0xd89   :  { %8476 = vsyncpa [#allocation24], 1 }
 0xd8a   :  { %8477 = vsyncpa [#allocation4], 1 }
 0xd8b   :  { %8479 = vsyncpa [#allocation4 + $0x1], 1 }

</bundles_post_ra>
